<compile_context>
chip_gen: v7x
topology: tpu7x:2x2x1
jax: 0.10.0
libtpu: 0.0.40
codegen_flags: <defaults>
</compile_context>

<pallas_src>
import numpy as np
import jax
import jax.numpy as jnp
from jax.experimental import pallas as pl
from jax.experimental.pallas import tpu as pltpu

_BN_EPS = 1e-5
_TAPS = ((-1, -1), (-1, 0), (-1, 1),
         (0, -1),  (0, 0),  (0, 1),
         (1, -1),  (1, 0),  (1, 1))


# ----------------------------------------------------------------------------
# In-kernel helpers (traced inside the Pallas kernel)
# ----------------------------------------------------------------------------
def _tap(pad_ref, hw, w, wpos, dy, dx):
    """One im2col tap (hw, C) read from a vertically zero-padded flat buffer.

    pad_ref layout: 1 guard row, W top-pad rows, H*W interior rows (row-major
    spatial), W bottom-pad rows, 1 guard row.  Horizontal out-of-range pixels
    (which alias neighbouring rows in the flat layout) are masked to zero.
    """
    start = 1 + (1 + dy) * w + dx
    t = pad_ref[start:start + hw, :]
    if dx == -1:
        t = jnp.where(wpos >= 1, t, 0.0)
    elif dx == 1:
        t = jnp.where(wpos <= w - 2, t, 0.0)
    return t


def _maxpool_into(src_ref, h, w, dst_ref, dst_row0):
    """2x2 stride-2 max-pool of src_ref (h*w, C) -> dst_ref rows [dst_row0, ...)."""
    hw = h * w
    wo, ho = w // 2, h // 2
    even = src_ref[pl.ds(0, hw // 2, stride=2), :]       # (h*wo, C): w even
    odd = src_ref[pl.ds(1, hw // 2, stride=2), :]        # (h*wo, C): w odd
    yw = jnp.maximum(even, odd)                          # row = h*wo + w0
    for h0 in range(ho):                                 # pair adjacent rows
        top = yw[(2 * h0) * wo:(2 * h0 + 1) * wo, :]
        bot = yw[(2 * h0 + 1) * wo:(2 * h0 + 2) * wo, :]
        dst_ref[dst_row0 + h0 * wo:dst_row0 + (h0 + 1) * wo, :] = (
            jnp.maximum(top, bot))


def _epilogue(acc, b_ref, s_ref, t_ref):
    """bias -> ReLU -> fused inference BatchNorm (per-channel scale/shift)."""
    acc = jnp.maximum(acc + b_ref[...], 0.0)
    return acc * s_ref[...] + t_ref[...]


def _deconv(q, wd_ref, sc_ref, cout, hwq):
    """2x2 stride-2 ConvTranspose: one matmul (N = 4*Cout) + scatter matmuls."""
    t = jnp.dot(q, wd_ref[...], preferred_element_type=jnp.float32)  # (hwq, 4*cout)
    pre = jnp.zeros((4 * hwq, cout), jnp.float32)
    for k in range(4):                                   # pixel-shuffle via 0/1 matmuls
        pre = pre + jnp.dot(sc_ref[k], t[:, k * cout:(k + 1) * cout],
                            preferred_element_type=jnp.float32)
    return pre                                            # row-major (2H*2W, cout)


# ----------------------------------------------------------------------------
# Fused kernel: whole AutoencoderConv3 forward for one batch element
# ----------------------------------------------------------------------------
def autoencoder_kernel(
    xcol_ref,
    w1_ref, b1_ref, s1_ref, t1_ref,
    w2_ref, b2_ref, s2_ref, t2_ref,
    w3_ref, b3_ref, s3_ref, t3_ref,
    wd1_ref, bd1_ref, sc1_ref,
    wd2_ref, bd2_ref, sc2_ref,
    wd3_ref, bd3_ref, sc3_ref,
    woc_ref, boc_ref,
    out_ref,
    act1_ref, pad2_ref, col2_ref, act2_ref, pad3_ref, act3_ref,
    p3_ref, padoc_ref,
):
    f32 = jnp.float32

    # ---------------- encoder 1: conv(1->128, K=9) + relu + bn1 + pool -------
    a1 = jnp.dot(xcol_ref[0], w1_ref[...], preferred_element_type=f32)  # (256,128)
    act1_ref[...] = _epilogue(a1, b1_ref, s1_ref, t1_ref)

    pad2_ref[0:9, :] = jnp.zeros((9, 128), f32)           # zero halo rows
    pad2_ref[73:82, :] = jnp.zeros((9, 128), f32)
    _maxpool_into(act1_ref, 16, 16, pad2_ref, 9)          # 8x8x128 interior

    # ---------------- encoder 2: conv(128->64, K=1152) + relu + bn2 + pool ----
    wpos2 = jax.lax.broadcasted_iota(jnp.int32, (64, 1), 0) & 7
    for k, (dy, dx) in enumerate(_TAPS):
        col2_ref[:, k * 128:(k + 1) * 128] = _tap(pad2_ref, 64, 8, wpos2, dy, dx)
    a2 = jnp.dot(col2_ref[...], w2_ref[...], preferred_element_type=f32)  # (64,64)
    act2_ref[...] = _epilogue(a2, b2_ref, s2_ref, t2_ref)

    pad3_ref[0:5, :] = jnp.zeros((5, 64), f32)
    pad3_ref[21:26, :] = jnp.zeros((5, 64), f32)
    _maxpool_into(act2_ref, 8, 8, pad3_ref, 5)            # 4x4x64 interior

    # ---------------- encoder 3: conv(64->32) + relu + bn3 + pool -------------
    wpos3 = jax.lax.broadcasted_iota(jnp.int32, (16, 1), 0) & 3
    a3 = jnp.zeros((16, 32), f32)
    for k, (dy, dx) in enumerate(_TAPS):                  # tiny layer: 9 taps, K=64
        a3 = a3 + jnp.dot(_tap(pad3_ref, 16, 4, wpos3, dy, dx), w3_ref[k],
                          preferred_element_type=f32)
    act3_ref[...] = _epilogue(a3, b3_ref, s3_ref, t3_ref)  # (16, 32)
    _maxpool_into(act3_ref, 4, 4, p3_ref, 0)               # (4, 32)  == 2x2x32

    # ---------------- decoder -------------------------------------------------
    d1 = _deconv(p3_ref[...], wd1_ref, sc1_ref, 64, 4)     # (16, 64)   4x4x64
    d1 = _epilogue(d1, bd1_ref, s2_ref, t2_ref)            # relu + batch2

    d2 = _deconv(d1, wd2_ref, sc2_ref, 128, 16)            # (64, 128)  8x8x128
    d2 = _epilogue(d2, bd2_ref, s1_ref, t1_ref)            # relu + batch1

    d3 = _deconv(d2, wd3_ref, sc3_ref, 256, 64)            # (256, 256) 16x16x256
    d3 = jnp.maximum(d3 + bd3_ref[...], 0.0)               # relu only

    padoc_ref[0:17, :] = jnp.zeros((17, 256), f32)
    padoc_ref[273:290, :] = jnp.zeros((17, 256), f32)
    padoc_ref[17:273, :] = d3

    # ---------------- out conv (256 -> 1) + sigmoid ---------------------------
    # Cout = 1: compute as 9 broadcast-multiplies + lane reductions on the VPU
    # (avoids an N=1 MXU matmul and a 2304-wide im2col buffer).
    wposo = jax.lax.broadcasted_iota(jnp.int32, (256, 1), 0) & 15
    acc = jnp.zeros((256, 1), f32)
    for k, (dy, dx) in enumerate(_TAPS):
        tp = _tap(padoc_ref, 256, 16, wposo, dy, dx)       # (256, 256)
        acc = acc + jnp.sum(tp * woc_ref[k:k + 1, :], axis=1, keepdims=True)
    out_ref[0] = jax.nn.sigmoid(acc + boc_ref[...])


# ----------------------------------------------------------------------------
# Wrapper: one fused pallas_call for the whole network
# ----------------------------------------------------------------------------
def _rep2(i):
    return (0, 0)


def _rep3(i):
    return (0, 0, 0)


def _input_im2col(x_nchw):
    """(N,1,16,16) NCHW input -> (N, 256, 9) im2col (tiny; done once in XLA)."""
    n = x_nchw.shape[0]
    img = x_nchw[:, 0, :, :]
    xp = jnp.pad(img, ((0, 0), (1, 1), (1, 1)))
    cols = [xp[:, ky:ky + 16, kx:kx + 16].reshape(n, 256)
            for ky in range(3) for kx in range(3)]
    return jnp.stack(cols, axis=-1)


def autoencoder_forward(x_nchw, P):
    n = x_nchw.shape[0]
    f32 = jnp.float32
    xcol = _input_im2col(x_nchw.astype(f32))               # (N, 256, 9)

    in_specs = [
        pl.BlockSpec((1, 256, 9), lambda i: (i, 0, 0)),    # xcol
        pl.BlockSpec((9, 128), _rep2),                     # enc1 w
        pl.BlockSpec((1, 128), _rep2),                     # enc1 b
        pl.BlockSpec((1, 128), _rep2),                     # bn1 s
        pl.BlockSpec((1, 128), _rep2),                     # bn1 t
        pl.BlockSpec((1152, 64), _rep2),                   # enc2 w
        pl.BlockSpec((1, 64), _rep2),                      # enc2 b
        pl.BlockSpec((1, 64), _rep2),                      # bn2 s
        pl.BlockSpec((1, 64), _rep2),                      # bn2 t
        pl.BlockSpec((9, 64, 32), _rep3),                  # enc3 w
        pl.BlockSpec((1, 32), _rep2),                      # enc3 b
        pl.BlockSpec((1, 32), _rep2),                      # bn3 s
        pl.BlockSpec((1, 32), _rep2),                      # bn3 t
        pl.BlockSpec((32, 256), _rep2),                    # dec1 w
        pl.BlockSpec((1, 64), _rep2),                      # dec1 b
        pl.BlockSpec((4, 16, 4), _rep3),                   # dec1 scatter
        pl.BlockSpec((64, 512), _rep2),                    # dec2 w
        pl.BlockSpec((1, 128), _rep2),                     # dec2 b
        pl.BlockSpec((4, 64, 16), _rep3),                  # dec2 scatter
        pl.BlockSpec((128, 1024), _rep2),                  # dec3 w
        pl.BlockSpec((1, 256), _rep2),                     # dec3 b
        pl.BlockSpec((4, 256, 64), _rep3),                 # dec3 scatter
        pl.BlockSpec((9, 256), _rep2),                     # outc w
        pl.BlockSpec((1, 1), _rep2),                       # outc b
    ]
    scratch_shapes = [
        pltpu.VMEM((256, 128), f32),   # act1 : enc1 output (pre-pool)
        pltpu.VMEM((82, 128), f32),    # pad2 : enc2 padded input (pool1 output)
        pltpu.VMEM((64, 1152), f32),   # col2 : enc2 im2col (K = 9*128)
        pltpu.VMEM((64, 64), f32),     # act2 : enc2 output (pre-pool)
        pltpu.VMEM((26, 64), f32),     # pad3 : enc3 padded input
        pltpu.VMEM((16, 32), f32),     # act3 : enc3 output (pre-pool)
        pltpu.VMEM((4, 32), f32),      # p3   : pooled bottleneck (dec1 input)
        pltpu.VMEM((290, 256), f32),   # padoc: out-conv padded input
    ]

    out = pl.pallas_call(
        autoencoder_kernel,
        out_shape=jax.ShapeDtypeStruct((n, 256, 1), f32),
        grid=(n,),
        in_specs=in_specs,
        out_specs=pl.BlockSpec((1, 256, 1), lambda i: (i, 0, 0)),
        scratch_shapes=scratch_shapes,
        compiler_params=pltpu.CompilerParams(
            dimension_semantics=("parallel",),
            vmem_limit_bytes=16 * 1024 * 1024),
    )(
        xcol,
        P["enc1_w"], P["enc1_b2d"], P["bn1_s2d"], P["bn1_t2d"],
        P["enc2_w"], P["enc2_b2d"], P["bn2_s2d"], P["bn2_t2d"],
        P["enc3_w"], P["enc3_b2d"], P["bn3_s2d"], P["bn3_t2d"],
        P["dec1_w"], P["dec1_b2d"], P["scat1"],
        P["dec2_w"], P["dec2_b2d"], P["scat2"],
        P["dec3_w"], P["dec3_b2d"], P["scat3"],
        P["outc_w"], P["outc_b2d"],
    )
    return out.reshape(n, 16, 16)[:, None, :, :]           # -> NCHW (N,1,16,16)


# ----------------------------------------------------------------------------
# Parameter packing (PyTorch layouts -> kernel layouts)
# ----------------------------------------------------------------------------
def _pack_conv_k(wt):       # (Cout, Cin, 3, 3) -> (9*Cin, Cout), row = (ky*3+kx)*Cin+ci
    co, ci = wt.shape[0], wt.shape[1]
    return jnp.transpose(wt, (2, 3, 1, 0)).reshape(9 * ci, co)


def _pack_conv_taps(wt):    # (Cout, Cin, 3, 3) -> (9, Cin, Cout)
    co, ci = wt.shape[0], wt.shape[1]
    return jnp.transpose(wt, (2, 3, 1, 0)).reshape(9, ci, co)


def _pack_outconv(wt):      # (1, Cin, 3, 3) -> (9, Cin)
    ci = wt.shape[1]
    return jnp.transpose(wt[0], (1, 2, 0)).reshape(9, ci)


def _pack_deconv(wt):       # (Cin, Cout, 2, 2) -> (Cin, 4*Cout), col = (dy*2+dx)*Cout+co
    ci, co = wt.shape[0], wt.shape[1]
    return jnp.transpose(wt, (0, 2, 3, 1)).reshape(ci, 4 * co)


def _make_scatter(hq, wq):
    """0/1 matrices scattering sub-pixel k of a (hq*wq) grid into row-major (2hq*2wq)."""
    s = np.zeros((4, 4 * hq * wq, hq * wq), np.float32)
    for dy in range(2):
        for dx in range(2):
            k = dy * 2 + dx
            for h in range(hq):
                for w in range(wq):
                    r = (2 * h + dy) * (2 * wq) + 2 * w + dx
                    s[k, r, h * wq + w] = 1.0
    return jnp.asarray(s)


def init_params(seed=0):
    key = jax.random.PRNGKey(seed)
    ks = iter(jax.random.split(key, 40))

    def rnd(shape, scale):
        return (scale * jax.random.normal(next(ks), shape)).astype(jnp.float32)

    def bn_params(c):
        gamma = (1.0 + 0.1 * jax.random.normal(next(ks), (c,))).astype(jnp.float32)
        beta = (0.1 * jax.random.normal(next(ks), (c,))).astype(jnp.float32)
        rm = (0.1 * jax.random.normal(next(ks), (c,))).astype(jnp.float32)
        rv = (0.5 + jax.random.uniform(next(ks), (c,))).astype(jnp.float32)
        return gamma, beta, rm, rv

    P = {}
    # PyTorch-layout weights (used by the pure-JAX reference).
    P["enc1_w_t"], P["enc1_b"] = rnd((128, 1, 3, 3), 0.10), rnd((128,), 0.05)
    P["enc2_w_t"], P["enc2_b"] = rnd((64, 128, 3, 3), 0.03), rnd((64,), 0.05)
    P["enc3_w_t"], P["enc3_b"] = rnd((32, 64, 3, 3), 0.05), rnd((32,), 0.05)
    P["outc_w_t"], P["outc_b"] = rnd((1, 256, 3, 3), 0.03), rnd((1,), 0.05)
    P["dec1_w_t"], P["dec1_b"] = rnd((32, 64, 2, 2), 0.08), rnd((64,), 0.05)
    P["dec2_w_t"], P["dec2_b"] = rnd((64, 128, 2, 2), 0.06), rnd((128,), 0.05)
    P["dec3_w_t"], P["dec3_b"] = rnd((128, 256, 2, 2), 0.04), rnd((256,), 0.05)
    P["bn1"], P["bn2"], P["bn3"] = bn_params(128), bn_params(64), bn_params(32)

    def fuse_bn(bn):
        g, b, rm, rv = bn
        s = g / jnp.sqrt(rv + _BN_EPS)
        return s, b - rm * s

    # Packed kernel-side parameters.
    P["enc1_w"] = _pack_conv_k(P["enc1_w_t"])              # (9, 128)
    P["enc2_w"] = _pack_conv_k(P["enc2_w_t"])              # (1152, 64)
    P["enc3_w"] = _pack_conv_taps(P["enc3_w_t"])           # (9, 64, 32)
    P["outc_w"] = _pack_outconv(P["outc_w_t"])             # (9, 256)
    P["dec1_w"] = _pack_deconv(P["dec1_w_t"])              # (32, 256)
    P["dec2_w"] = _pack_deconv(P["dec2_w_t"])              # (64, 512)
    P["dec3_w"] = _pack_deconv(P["dec3_w_t"])              # (128, 1024)
    for name, c in (("enc1", 128), ("enc2", 64), ("enc3", 32),
                    ("dec1", 64), ("dec2", 128), ("dec3", 256), ("outc", 1)):
        P[name + "_b2d"] = P[name + "_b"].reshape(1, c)
    for i, bn in ((1, P["bn1"]), (2, P["bn2"]), (3, P["bn3"])):
        s, t = fuse_bn(bn)
        P[f"bn{i}_s2d"] = s.reshape(1, -1)
        P[f"bn{i}_t2d"] = t.reshape(1, -1)
    P["scat1"] = _make_scatter(2, 2)                       # (4, 16, 4)
    P["scat2"] = _make_scatter(4, 4)                       # (4, 64, 16)
    P["scat3"] = _make_scatter(8, 8)                       # (4, 256, 64)
    return P


# ----------------------------------------------------------------------------
# Pure-JAX reference (NCHW, inference-mode BatchNorm) for correctness check
# ----------------------------------------------------------------------------
def _ref_forward(x_nchw, P):
    prec = jax.lax.Precision.HIGHEST

    def conv(x, w, b):
        y = jax.lax.conv_general_dilated(
            x, w, (1, 1), ((1, 1), (1, 1)),
            dimension_numbers=("NCHW", "OIHW", "NCHW"), precision=prec)
        return y + b[None, :, None, None]

    def bn(x, bnp):
        g, be, rm, rv = bnp
        s = g / jnp.sqrt(rv + _BN_EPS)
        return (x - rm[None, :, None, None]) * s[None, :, None, None] \
            + be[None, :, None, None]

    def pool(x):
        n, c, h, w = x.shape
        return x.reshape(n, c, h // 2, 2, w // 2, 2).max(axis=(3, 5))

    def deconv(x, w, b):  # w: (Cin, Cout, 2, 2), stride 2 => no overlap
        n, ci, h, ww = x.shape
        co = w.shape[1]
        y = jnp.einsum("nihw,iopq->nohpwq", x, w, precision=prec)
        return y.reshape(n, co, 2 * h, 2 * ww) + b[None, :, None, None]

    out = bn(jax.nn.relu(conv(x_nchw, P["enc1_w_t"], P["enc1_b"])), P["bn1"])
    out = pool(out)
    out = bn(jax.nn.relu(conv(out, P["enc2_w_t"], P["enc2_b"])), P["bn2"])
    out = pool(out)
    out = bn(jax.nn.relu(conv(out, P["enc3_w_t"], P["enc3_b"])), P["bn3"])
    out = pool(out)
    out = bn(jax.nn.relu(deconv(out, P["dec1_w_t"], P["dec1_b"])), P["bn2"])
    out = bn(jax.nn.relu(deconv(out, P["dec2_w_t"], P["dec2_b"])), P["bn1"])
    out = jax.nn.relu(deconv(out, P["dec3_w_t"], P["dec3_b"]))
    out = conv(out, P["outc_w_t"], P["outc_b"])
    return jax.nn.sigmoid(out)


if __name__ == "__main__":
    P = init_params(0)
    x = jax.random.normal(jax.random.PRNGKey(0), (2, 1, 16, 16), dtype=jnp.float32)

    fwd = jax.jit(autoencoder_forward)
    y = jax.block_until_ready(fwd(x, P))
    assert y.shape == (2, 1, 16, 16), y.shape

    y_ref = jax.block_until_ready(_ref_forward(x, P))
    max_err = float(jnp.max(jnp.abs(y - y_ref)))
    assert jnp.allclose(y, y_ref, atol=2e-4, rtol=2e-3), max_err

    print("KERNEL_OK")
</pallas_src>

<mosaic_0001>
module attributes {stable_mosaic.version = 11 : i64} {
  func.func @autoencoder_kernel(%arg0: i32, %arg1: memref<1x256x9xf32, #tpu.memory_space<vmem>>, %arg2: memref<9x128xf32, #tpu.memory_space<vmem>>, %arg3: memref<1x128xf32, #tpu.memory_space<vmem>>, %arg4: memref<1x128xf32, #tpu.memory_space<vmem>>, %arg5: memref<1x128xf32, #tpu.memory_space<vmem>>, %arg6: memref<1152x64xf32, #tpu.memory_space<vmem>>, %arg7: memref<1x64xf32, #tpu.memory_space<vmem>>, %arg8: memref<1x64xf32, #tpu.memory_space<vmem>>, %arg9: memref<1x64xf32, #tpu.memory_space<vmem>>, %arg10: memref<9x64x32xf32, #tpu.memory_space<vmem>>, %arg11: memref<1x32xf32, #tpu.memory_space<vmem>>, %arg12: memref<1x32xf32, #tpu.memory_space<vmem>>, %arg13: memref<1x32xf32, #tpu.memory_space<vmem>>, %arg14: memref<32x256xf32, #tpu.memory_space<vmem>>, %arg15: memref<1x64xf32, #tpu.memory_space<vmem>>, %arg16: memref<4x16x4xf32, #tpu.memory_space<vmem>>, %arg17: memref<64x512xf32, #tpu.memory_space<vmem>>, %arg18: memref<1x128xf32, #tpu.memory_space<vmem>>, %arg19: memref<4x64x16xf32, #tpu.memory_space<vmem>>, %arg20: memref<128x1024xf32, #tpu.memory_space<vmem>>, %arg21: memref<1x256xf32, #tpu.memory_space<vmem>>, %arg22: memref<4x256x64xf32, #tpu.memory_space<vmem>>, %arg23: memref<9x256xf32, #tpu.memory_space<vmem>>, %arg24: memref<1x1xf32, #tpu.memory_space<vmem>>, %arg25: memref<1x256x1xf32, #tpu.memory_space<vmem>>, %arg26: memref<256x128xf32, #tpu.memory_space<vmem>>, %arg27: memref<82x128xf32, #tpu.memory_space<vmem>>, %arg28: memref<64x1152xf32, #tpu.memory_space<vmem>>, %arg29: memref<64x64xf32, #tpu.memory_space<vmem>>, %arg30: memref<26x64xf32, #tpu.memory_space<vmem>>, %arg31: memref<16x32xf32, #tpu.memory_space<vmem>>, %arg32: memref<4x32xf32, #tpu.memory_space<vmem>>, %arg33: memref<290x256xf32, #tpu.memory_space<vmem>>) attributes {dimension_semantics = [#tpu.dimension_semantics<parallel>], iteration_bounds = array<i64: 2>, scalar_prefetch = 0 : i64, scratch_operands = 8 : i64, tpu.core_type = #tpu.core_type<tc>, window_params = [{transform_indices = @transform_0, window_bounds = array<i64: 1, 256, 9>}, {pipeline_mode = #tpu.pipeline_mode<synchronous>, transform_indices = @transform_1, window_bounds = array<i64: 9, 128>}, {pipeline_mode = #tpu.pipeline_mode<synchronous>, transform_indices = @transform_2, window_bounds = array<i64: 1, 128>}, {pipeline_mode = #tpu.pipeline_mode<synchronous>, transform_indices = @transform_3, window_bounds = array<i64: 1, 128>}, {pipeline_mode = #tpu.pipeline_mode<synchronous>, transform_indices = @transform_4, window_bounds = array<i64: 1, 128>}, {pipeline_mode = #tpu.pipeline_mode<synchronous>, transform_indices = @transform_5, window_bounds = array<i64: 1152, 64>}, {pipeline_mode = #tpu.pipeline_mode<synchronous>, transform_indices = @transform_6, window_bounds = array<i64: 1, 64>}, {pipeline_mode = #tpu.pipeline_mode<synchronous>, transform_indices = @transform_7, window_bounds = array<i64: 1, 64>}, {pipeline_mode = #tpu.pipeline_mode<synchronous>, transform_indices = @transform_8, window_bounds = array<i64: 1, 64>}, {pipeline_mode = #tpu.pipeline_mode<synchronous>, transform_indices = @transform_9, window_bounds = array<i64: 9, 64, 32>}, {pipeline_mode = #tpu.pipeline_mode<synchronous>, transform_indices = @transform_10, window_bounds = array<i64: 1, 32>}, {pipeline_mode = #tpu.pipeline_mode<synchronous>, transform_indices = @transform_11, window_bounds = array<i64: 1, 32>}, {pipeline_mode = #tpu.pipeline_mode<synchronous>, transform_indices = @transform_12, window_bounds = array<i64: 1, 32>}, {pipeline_mode = #tpu.pipeline_mode<synchronous>, transform_indices = @transform_13, window_bounds = array<i64: 32, 256>}, {pipeline_mode = #tpu.pipeline_mode<synchronous>, transform_indices = @transform_14, window_bounds = array<i64: 1, 64>}, {pipeline_mode = #tpu.pipeline_mode<synchronous>, transform_indices = @transform_15, window_bounds = array<i64: 4, 16, 4>}, {pipeline_mode = #tpu.pipeline_mode<synchronous>, transform_indices = @transform_16, window_bounds = array<i64: 64, 512>}, {pipeline_mode = #tpu.pipeline_mode<synchronous>, transform_indices = @transform_17, window_bounds = array<i64: 1, 128>}, {pipeline_mode = #tpu.pipeline_mode<synchronous>, transform_indices = @transform_18, window_bounds = array<i64: 4, 64, 16>}, {pipeline_mode = #tpu.pipeline_mode<synchronous>, transform_indices = @transform_19, window_bounds = array<i64: 128, 1024>}, {pipeline_mode = #tpu.pipeline_mode<synchronous>, transform_indices = @transform_20, window_bounds = array<i64: 1, 256>}, {pipeline_mode = #tpu.pipeline_mode<synchronous>, transform_indices = @transform_21, window_bounds = array<i64: 4, 256, 64>}, {pipeline_mode = #tpu.pipeline_mode<synchronous>, transform_indices = @transform_22, window_bounds = array<i64: 9, 256>}, {pipeline_mode = #tpu.pipeline_mode<synchronous>, transform_indices = @transform_23, window_bounds = array<i64: 1, 1>}, {transform_indices = @transform_24, window_bounds = array<i64: 1, 256, 1>}]} {
    %c0 = arith.constant 0 : index
    %c0_0 = arith.constant 0 : index
    %c0_1 = arith.constant 0 : index
    %0 = vector.load %arg1[%c0, %c0_0, %c0_1] : memref<1x256x9xf32, #tpu.memory_space<vmem>>, vector<1x256x9xf32>
    %1 = vector.shape_cast %0 : vector<1x256x9xf32> to vector<256x9xf32>
    %c0_2 = arith.constant 0 : index
    %c0_3 = arith.constant 0 : index
    %2 = vector.load %arg2[%c0_2, %c0_3] : memref<9x128xf32, #tpu.memory_space<vmem>>, vector<9x128xf32>
    %cst = arith.constant dense<0.000000e+00> : vector<256x128xf32>
    %3 = tpu.matmul %1, %2, %cst {dimension_numbers = #tpu.dot_dimension_numbers<[1], [0], [0], [1], [0, 0, 1, 1], [], []>} : vector<256x9xf32>, vector<9x128xf32>, vector<256x128xf32> -> vector<256x128xf32>
    %c0_4 = arith.constant 0 : index
    %c0_5 = arith.constant 0 : index
    %4 = vector.load %arg3[%c0_4, %c0_5] : memref<1x128xf32, #tpu.memory_space<vmem>>, vector<1x128xf32>
    %5 = vector.broadcast %4 : vector<1x128xf32> to vector<256x128xf32>
    %6 = arith.addf %3, %5 : vector<256x128xf32>
    %cst_6 = arith.constant 0.000000e+00 : f32
    %7 = vector.broadcast %cst_6 : f32 to vector<256x128xf32>
    %8 = arith.maximumf %6, %7 : vector<256x128xf32>
    %c0_7 = arith.constant 0 : index
    %c0_8 = arith.constant 0 : index
    %9 = vector.load %arg4[%c0_7, %c0_8] : memref<1x128xf32, #tpu.memory_space<vmem>>, vector<1x128xf32>
    %10 = vector.broadcast %9 : vector<1x128xf32> to vector<256x128xf32>
    %11 = arith.mulf %8, %10 : vector<256x128xf32>
    %c0_9 = arith.constant 0 : index
    %c0_10 = arith.constant 0 : index
    %12 = vector.load %arg5[%c0_9, %c0_10] : memref<1x128xf32, #tpu.memory_space<vmem>>, vector<1x128xf32>
    %13 = vector.broadcast %12 : vector<1x128xf32> to vector<256x128xf32>
    %14 = arith.addf %11, %13 : vector<256x128xf32>
    %c0_11 = arith.constant 0 : index
    %c0_12 = arith.constant 0 : index
    %15 = vector.load %arg26[%c0_11, %c0_12] : memref<256x128xf32, #tpu.memory_space<vmem>>, vector<256x128xf32>
    tpu.vector_store %arg26[%c0_11, %c0_12], %14 {strides = array<i32>} : memref<256x128xf32, #tpu.memory_space<vmem>>, vector<256x128xf32>,
    %cst_13 = arith.constant 0.000000e+00 : f32
    %16 = vector.broadcast %cst_13 : f32 to vector<9x128xf32>
    %c0_14 = arith.constant 0 : index
    %c0_15 = arith.constant 0 : index
    %17 = vector.load %arg27[%c0_14, %c0_15] : memref<82x128xf32, #tpu.memory_space<vmem>>, vector<9x128xf32>
    tpu.vector_store %arg27[%c0_14, %c0_15], %16 {strides = array<i32>} : memref<82x128xf32, #tpu.memory_space<vmem>>, vector<9x128xf32>,
    %cst_16 = arith.constant 0.000000e+00 : f32
    %18 = vector.broadcast %cst_16 : f32 to vector<9x128xf32>
    %c73 = arith.constant 73 : index
    %c0_17 = arith.constant 0 : index
    %19 = vector.load %arg27[%c73, %c0_17] : memref<82x128xf32, #tpu.memory_space<vmem>>, vector<9x128xf32>
    tpu.vector_store %arg27[%c73, %c0_17], %18 {strides = array<i32>} : memref<82x128xf32, #tpu.memory_space<vmem>>, vector<9x128xf32>,
    %c0_18 = arith.constant 0 : index
    %c0_19 = arith.constant 0 : index
    %20 = tpu.strided_load %arg26[%c0_18, %c0_19] {strides = array<i32: 2, 1>} : memref<256x128xf32, #tpu.memory_space<vmem>>, vector<128x128xf32>
    %c1 = arith.constant 1 : index
    %c0_20 = arith.constant 0 : index
    %21 = tpu.strided_load %arg26[%c1, %c0_20] {strides = array<i32: 2, 1>} : memref<256x128xf32, #tpu.memory_space<vmem>>, vector<128x128xf32>
    %22 = arith.maximumf %20, %21 : vector<128x128xf32>
    %23 = vector.extract_strided_slice %22 {offsets = [0, 0], sizes = [8, 128], strides = [1, 1]} : vector<128x128xf32> to vector<8x128xf32>
    %24 = vector.extract_strided_slice %22 {offsets = [8, 0], sizes = [8, 128], strides = [1, 1]} : vector<128x128xf32> to vector<8x128xf32>
    %25 = arith.maximumf %23, %24 : vector<8x128xf32>
    %c9 = arith.constant 9 : index
    %c0_21 = arith.constant 0 : index
    %26 = vector.load %arg27[%c9, %c0_21] : memref<82x128xf32, #tpu.memory_space<vmem>>, vector<8x128xf32>
    tpu.vector_store %arg27[%c9, %c0_21], %25 {strides = array<i32>} : memref<82x128xf32, #tpu.memory_space<vmem>>, vector<8x128xf32>,
    %27 = vector.extract_strided_slice %22 {offsets = [16, 0], sizes = [8, 128], strides = [1, 1]} : vector<128x128xf32> to vector<8x128xf32>
    %28 = vector.extract_strided_slice %22 {offsets = [24, 0], sizes = [8, 128], strides = [1, 1]} : vector<128x128xf32> to vector<8x128xf32>
    %29 = arith.maximumf %27, %28 : vector<8x128xf32>
    %c17 = arith.constant 17 : index
    %c0_22 = arith.constant 0 : index
    %30 = vector.load %arg27[%c17, %c0_22] : memref<82x128xf32, #tpu.memory_space<vmem>>, vector<8x128xf32>
    tpu.vector_store %arg27[%c17, %c0_22], %29 {strides = array<i32>} : memref<82x128xf32, #tpu.memory_space<vmem>>, vector<8x128xf32>,
    %31 = vector.extract_strided_slice %22 {offsets = [32, 0], sizes = [8, 128], strides = [1, 1]} : vector<128x128xf32> to vector<8x128xf32>
    %32 = vector.extract_strided_slice %22 {offsets = [40, 0], sizes = [8, 128], strides = [1, 1]} : vector<128x128xf32> to vector<8x128xf32>
    %33 = arith.maximumf %31, %32 : vector<8x128xf32>
    %c25 = arith.constant 25 : index
    %c0_23 = arith.constant 0 : index
    %34 = vector.load %arg27[%c25, %c0_23] : memref<82x128xf32, #tpu.memory_space<vmem>>, vector<8x128xf32>
    tpu.vector_store %arg27[%c25, %c0_23], %33 {strides = array<i32>} : memref<82x128xf32, #tpu.memory_space<vmem>>, vector<8x128xf32>,
    %35 = vector.extract_strided_slice %22 {offsets = [48, 0], sizes = [8, 128], strides = [1, 1]} : vector<128x128xf32> to vector<8x128xf32>
    %36 = vector.extract_strided_slice %22 {offsets = [56, 0], sizes = [8, 128], strides = [1, 1]} : vector<128x128xf32> to vector<8x128xf32>
    %37 = arith.maximumf %35, %36 : vector<8x128xf32>
    %c33 = arith.constant 33 : index
    %c0_24 = arith.constant 0 : index
    %38 = vector.load %arg27[%c33, %c0_24] : memref<82x128xf32, #tpu.memory_space<vmem>>, vector<8x128xf32>
    tpu.vector_store %arg27[%c33, %c0_24], %37 {strides = array<i32>} : memref<82x128xf32, #tpu.memory_space<vmem>>, vector<8x128xf32>,
    %39 = vector.extract_strided_slice %22 {offsets = [64, 0], sizes = [8, 128], strides = [1, 1]} : vector<128x128xf32> to vector<8x128xf32>
    %40 = vector.extract_strided_slice %22 {offsets = [72, 0], sizes = [8, 128], strides = [1, 1]} : vector<128x128xf32> to vector<8x128xf32>
    %41 = arith.maximumf %39, %40 : vector<8x128xf32>
    %c41 = arith.constant 41 : index
    %c0_25 = arith.constant 0 : index
    %42 = vector.load %arg27[%c41, %c0_25] : memref<82x128xf32, #tpu.memory_space<vmem>>, vector<8x128xf32>
    tpu.vector_store %arg27[%c41, %c0_25], %41 {strides = array<i32>} : memref<82x128xf32, #tpu.memory_space<vmem>>, vector<8x128xf32>,
    %43 = vector.extract_strided_slice %22 {offsets = [80, 0], sizes = [8, 128], strides = [1, 1]} : vector<128x128xf32> to vector<8x128xf32>
    %44 = vector.extract_strided_slice %22 {offsets = [88, 0], sizes = [8, 128], strides = [1, 1]} : vector<128x128xf32> to vector<8x128xf32>
    %45 = arith.maximumf %43, %44 : vector<8x128xf32>
    %c49 = arith.constant 49 : index
    %c0_26 = arith.constant 0 : index
    %46 = vector.load %arg27[%c49, %c0_26] : memref<82x128xf32, #tpu.memory_space<vmem>>, vector<8x128xf32>
    tpu.vector_store %arg27[%c49, %c0_26], %45 {strides = array<i32>} : memref<82x128xf32, #tpu.memory_space<vmem>>, vector<8x128xf32>,
    %47 = vector.extract_strided_slice %22 {offsets = [96, 0], sizes = [8, 128], strides = [1, 1]} : vector<128x128xf32> to vector<8x128xf32>
    %48 = vector.extract_strided_slice %22 {offsets = [104, 0], sizes = [8, 128], strides = [1, 1]} : vector<128x128xf32> to vector<8x128xf32>
    %49 = arith.maximumf %47, %48 : vector<8x128xf32>
    %c57 = arith.constant 57 : index
    %c0_27 = arith.constant 0 : index
    %50 = vector.load %arg27[%c57, %c0_27] : memref<82x128xf32, #tpu.memory_space<vmem>>, vector<8x128xf32>
    tpu.vector_store %arg27[%c57, %c0_27], %49 {strides = array<i32>} : memref<82x128xf32, #tpu.memory_space<vmem>>, vector<8x128xf32>,
    %51 = vector.extract_strided_slice %22 {offsets = [112, 0], sizes = [8, 128], strides = [1, 1]} : vector<128x128xf32> to vector<8x128xf32>
    %52 = vector.extract_strided_slice %22 {offsets = [120, 0], sizes = [8, 128], strides = [1, 1]} : vector<128x128xf32> to vector<8x128xf32>
    %53 = arith.maximumf %51, %52 : vector<8x128xf32>
    %c65 = arith.constant 65 : index
    %c0_28 = arith.constant 0 : index
    %54 = vector.load %arg27[%c65, %c0_28] : memref<82x128xf32, #tpu.memory_space<vmem>>, vector<8x128xf32>
    tpu.vector_store %arg27[%c65, %c0_28], %53 {strides = array<i32>} : memref<82x128xf32, #tpu.memory_space<vmem>>, vector<8x128xf32>,
    %55 = tpu.iota {dimensions = array<i32: 0>} : vector<64x1xi32>
    %c7_i32 = arith.constant 7 : i32
    %56 = vector.broadcast %c7_i32 : i32 to vector<64x1xi32>
    %57 = arith.andi %55, %56 : vector<64x1xi32>
    %c0_29 = arith.constant 0 : index
    %c0_30 = arith.constant 0 : index
    %58 = vector.load %arg27[%c0_29, %c0_30] : memref<82x128xf32, #tpu.memory_space<vmem>>, vector<64x128xf32>
    %c1_i32 = arith.constant 1 : i32
    %59 = vector.broadcast %c1_i32 : i32 to vector<64x1xi32>
    %60 = arith.cmpi sge, %57, %59 : vector<64x1xi32>
    %cst_31 = arith.constant 0.000000e+00 : f32
    %61 = vector.shape_cast %60 : vector<64x1xi1> to vector<64x1xi1>
    %62 = vector.broadcast %61 : vector<64x1xi1> to vector<64x128xi1>
    %63 = vector.broadcast %cst_31 : f32 to vector<64x128xf32>
    %64 = arith.select %62, %58, %63 : vector<64x128xi1>, vector<64x128xf32>
    %c0_32 = arith.constant 0 : index
    %c0_33 = arith.constant 0 : index
    %65 = vector.load %arg28[%c0_32, %c0_33] : memref<64x1152xf32, #tpu.memory_space<vmem>>, vector<64x128xf32>
    tpu.vector_store %arg28[%c0_32, %c0_33], %64 {strides = array<i32>} : memref<64x1152xf32, #tpu.memory_space<vmem>>, vector<64x128xf32>,
    %c1_34 = arith.constant 1 : index
    %c0_35 = arith.constant 0 : index
    %66 = vector.load %arg27[%c1_34, %c0_35] : memref<82x128xf32, #tpu.memory_space<vmem>>, vector<64x128xf32>
    %c0_36 = arith.constant 0 : index
    %c128 = arith.constant 128 : index
    %67 = vector.load %arg28[%c0_36, %c128] : memref<64x1152xf32, #tpu.memory_space<vmem>>, vector<64x128xf32>
    tpu.vector_store %arg28[%c0_36, %c128], %66 {strides = array<i32>} : memref<64x1152xf32, #tpu.memory_space<vmem>>, vector<64x128xf32>,
    %c2 = arith.constant 2 : index
    %c0_37 = arith.constant 0 : index
    %68 = vector.load %arg27[%c2, %c0_37] : memref<82x128xf32, #tpu.memory_space<vmem>>, vector<64x128xf32>
    %c6_i32 = arith.constant 6 : i32
    %69 = vector.broadcast %c6_i32 : i32 to vector<64x1xi32>
    %70 = arith.cmpi sle, %57, %69 : vector<64x1xi32>
    %cst_38 = arith.constant 0.000000e+00 : f32
    %71 = vector.shape_cast %70 : vector<64x1xi1> to vector<64x1xi1>
    %72 = vector.broadcast %71 : vector<64x1xi1> to vector<64x128xi1>
    %73 = vector.broadcast %cst_38 : f32 to vector<64x128xf32>
    %74 = arith.select %72, %68, %73 : vector<64x128xi1>, vector<64x128xf32>
    %c0_39 = arith.constant 0 : index
    %c256 = arith.constant 256 : index
    %75 = vector.load %arg28[%c0_39, %c256] : memref<64x1152xf32, #tpu.memory_space<vmem>>, vector<64x128xf32>
    tpu.vector_store %arg28[%c0_39, %c256], %74 {strides = array<i32>} : memref<64x1152xf32, #tpu.memory_space<vmem>>, vector<64x128xf32>,
    %c8 = arith.constant 8 : index
    %c0_40 = arith.constant 0 : index
    %76 = vector.load %arg27[%c8, %c0_40] : memref<82x128xf32, #tpu.memory_space<vmem>>, vector<64x128xf32>
    %c1_i32_41 = arith.constant 1 : i32
    %77 = vector.broadcast %c1_i32_41 : i32 to vector<64x1xi32>
    %78 = arith.cmpi sge, %57, %77 : vector<64x1xi32>
    %cst_42 = arith.constant 0.000000e+00 : f32
    %79 = vector.shape_cast %78 : vector<64x1xi1> to vector<64x1xi1>
    %80 = vector.broadcast %79 : vector<64x1xi1> to vector<64x128xi1>
    %81 = vector.broadcast %cst_42 : f32 to vector<64x128xf32>
    %82 = arith.select %80, %76, %81 : vector<64x128xi1>, vector<64x128xf32>
    %c0_43 = arith.constant 0 : index
    %c384 = arith.constant 384 : index
    %83 = vector.load %arg28[%c0_43, %c384] : memref<64x1152xf32, #tpu.memory_space<vmem>>, vector<64x128xf32>
    tpu.vector_store %arg28[%c0_43, %c384], %82 {strides = array<i32>} : memref<64x1152xf32, #tpu.memory_space<vmem>>, vector<64x128xf32>,
    %c9_44 = arith.constant 9 : index
    %c0_45 = arith.constant 0 : index
    %84 = vector.load %arg27[%c9_44, %c0_45] : memref<82x128xf32, #tpu.memory_space<vmem>>, vector<64x128xf32>
    %c0_46 = arith.constant 0 : index
    %c512 = arith.constant 512 : index
    %85 = vector.load %arg28[%c0_46, %c512] : memref<64x1152xf32, #tpu.memory_space<vmem>>, vector<64x128xf32>
    tpu.vector_store %arg28[%c0_46, %c512], %84 {strides = array<i32>} : memref<64x1152xf32, #tpu.memory_space<vmem>>, vector<64x128xf32>,
    %c10 = arith.constant 10 : index
    %c0_47 = arith.constant 0 : index
    %86 = vector.load %arg27[%c10, %c0_47] : memref<82x128xf32, #tpu.memory_space<vmem>>, vector<64x128xf32>
    %c6_i32_48 = arith.constant 6 : i32
    %87 = vector.broadcast %c6_i32_48 : i32 to vector<64x1xi32>
    %88 = arith.cmpi sle, %57, %87 : vector<64x1xi32>
    %cst_49 = arith.constant 0.000000e+00 : f32
    %89 = vector.shape_cast %88 : vector<64x1xi1> to vector<64x1xi1>
    %90 = vector.broadcast %89 : vector<64x1xi1> to vector<64x128xi1>
    %91 = vector.broadcast %cst_49 : f32 to vector<64x128xf32>
    %92 = arith.select %90, %86, %91 : vector<64x128xi1>, vector<64x128xf32>
    %c0_50 = arith.constant 0 : index
    %c640 = arith.constant 640 : index
    %93 = vector.load %arg28[%c0_50, %c640] : memref<64x1152xf32, #tpu.memory_space<vmem>>, vector<64x128xf32>
    tpu.vector_store %arg28[%c0_50, %c640], %92 {strides = array<i32>} : memref<64x1152xf32, #tpu.memory_space<vmem>>, vector<64x128xf32>,
    %c16 = arith.constant 16 : index
    %c0_51 = arith.constant 0 : index
    %94 = vector.load %arg27[%c16, %c0_51] : memref<82x128xf32, #tpu.memory_space<vmem>>, vector<64x128xf32>
    %c1_i32_52 = arith.constant 1 : i32
    %95 = vector.broadcast %c1_i32_52 : i32 to vector<64x1xi32>
    %96 = arith.cmpi sge, %57, %95 : vector<64x1xi32>
    %cst_53 = arith.constant 0.000000e+00 : f32
    %97 = vector.shape_cast %96 : vector<64x1xi1> to vector<64x1xi1>
    %98 = vector.broadcast %97 : vector<64x1xi1> to vector<64x128xi1>
    %99 = vector.broadcast %cst_53 : f32 to vector<64x128xf32>
    %100 = arith.select %98, %94, %99 : vector<64x128xi1>, vector<64x128xf32>
    %c0_54 = arith.constant 0 : index
    %c768 = arith.constant 768 : index
    %101 = vector.load %arg28[%c0_54, %c768] : memref<64x1152xf32, #tpu.memory_space<vmem>>, vector<64x128xf32>
    tpu.vector_store %arg28[%c0_54, %c768], %100 {strides = array<i32>} : memref<64x1152xf32, #tpu.memory_space<vmem>>, vector<64x128xf32>,
    %c17_55 = arith.constant 17 : index
    %c0_56 = arith.constant 0 : index
    %102 = vector.load %arg27[%c17_55, %c0_56] : memref<82x128xf32, #tpu.memory_space<vmem>>, vector<64x128xf32>
    %c0_57 = arith.constant 0 : index
    %c896 = arith.constant 896 : index
    %103 = vector.load %arg28[%c0_57, %c896] : memref<64x1152xf32, #tpu.memory_space<vmem>>, vector<64x128xf32>
    tpu.vector_store %arg28[%c0_57, %c896], %102 {strides = array<i32>} : memref<64x1152xf32, #tpu.memory_space<vmem>>, vector<64x128xf32>,
    %c18 = arith.constant 18 : index
    %c0_58 = arith.constant 0 : index
    %104 = vector.load %arg27[%c18, %c0_58] : memref<82x128xf32, #tpu.memory_space<vmem>>, vector<64x128xf32>
    %c6_i32_59 = arith.constant 6 : i32
    %105 = vector.broadcast %c6_i32_59 : i32 to vector<64x1xi32>
    %106 = arith.cmpi sle, %57, %105 : vector<64x1xi32>
    %cst_60 = arith.constant 0.000000e+00 : f32
    %107 = vector.shape_cast %106 : vector<64x1xi1> to vector<64x1xi1>
    %108 = vector.broadcast %107 : vector<64x1xi1> to vector<64x128xi1>
    %109 = vector.broadcast %cst_60 : f32 to vector<64x128xf32>
    %110 = arith.select %108, %104, %109 : vector<64x128xi1>, vector<64x128xf32>
    %c0_61 = arith.constant 0 : index
    %c1024 = arith.constant 1024 : index
    %111 = vector.load %arg28[%c0_61, %c1024] : memref<64x1152xf32, #tpu.memory_space<vmem>>, vector<64x128xf32>
    tpu.vector_store %arg28[%c0_61, %c1024], %110 {strides = array<i32>} : memref<64x1152xf32, #tpu.memory_space<vmem>>, vector<64x128xf32>,
    %c0_62 = arith.constant 0 : index
    %c0_63 = arith.constant 0 : index
    %112 = vector.load %arg28[%c0_62, %c0_63] : memref<64x1152xf32, #tpu.memory_space<vmem>>, vector<64x1152xf32>
    %c0_64 = arith.constant 0 : index
    %c0_65 = arith.constant 0 : index
    %113 = vector.load %arg6[%c0_64, %c0_65] : memref<1152x64xf32, #tpu.memory_space<vmem>>, vector<1152x64xf32>
    %cst_66 = arith.constant dense<0.000000e+00> : vector<64x64xf32>
    %114 = tpu.matmul %112, %113, %cst_66 {dimension_numbers = #tpu.dot_dimension_numbers<[1], [0], [0], [1], [0, 0, 1, 1], [], []>} : vector<64x1152xf32>, vector<1152x64xf32>, vector<64x64xf32> -> vector<64x64xf32>
    %c0_67 = arith.constant 0 : index
    %c0_68 = arith.constant 0 : index
    %115 = vector.load %arg7[%c0_67, %c0_68] : memref<1x64xf32, #tpu.memory_space<vmem>>, vector<1x64xf32>
    %116 = vector.broadcast %115 : vector<1x64xf32> to vector<64x64xf32>
    %117 = arith.addf %114, %116 : vector<64x64xf32>
    %cst_69 = arith.constant 0.000000e+00 : f32
    %118 = vector.broadcast %cst_69 : f32 to vector<64x64xf32>
    %119 = arith.maximumf %117, %118 : vector<64x64xf32>
    %c0_70 = arith.constant 0 : index
    %c0_71 = arith.constant 0 : index
    %120 = vector.load %arg8[%c0_70, %c0_71] : memref<1x64xf32, #tpu.memory_space<vmem>>, vector<1x64xf32>
    %121 = vector.broadcast %120 : vector<1x64xf32> to vector<64x64xf32>
    %122 = arith.mulf %119, %121 : vector<64x64xf32>
    %c0_72 = arith.constant 0 : index
    %c0_73 = arith.constant 0 : index
    %123 = vector.load %arg9[%c0_72, %c0_73] : memref<1x64xf32, #tpu.memory_space<vmem>>, vector<1x64xf32>
    %124 = vector.broadcast %123 : vector<1x64xf32> to vector<64x64xf32>
    %125 = arith.addf %122, %124 : vector<64x64xf32>
    %c0_74 = arith.constant 0 : index
    %c0_75 = arith.constant 0 : index
    %126 = vector.load %arg29[%c0_74, %c0_75] : memref<64x64xf32, #tpu.memory_space<vmem>>, vector<64x64xf32>
    tpu.vector_store %arg29[%c0_74, %c0_75], %125 {strides = array<i32>} : memref<64x64xf32, #tpu.memory_space<vmem>>, vector<64x64xf32>,
    %cst_76 = arith.constant 0.000000e+00 : f32
    %127 = vector.broadcast %cst_76 : f32 to vector<5x64xf32>
    %c0_77 = arith.constant 0 : index
    %c0_78 = arith.constant 0 : index
    %128 = vector.load %arg30[%c0_77, %c0_78] : memref<26x64xf32, #tpu.memory_space<vmem>>, vector<5x64xf32>
    tpu.vector_store %arg30[%c0_77, %c0_78], %127 {strides = array<i32>} : memref<26x64xf32, #tpu.memory_space<vmem>>, vector<5x64xf32>,
    %cst_79 = arith.constant 0.000000e+00 : f32
    %129 = vector.broadcast %cst_79 : f32 to vector<5x64xf32>
    %c21 = arith.constant 21 : index
    %c0_80 = arith.constant 0 : index
    %130 = vector.load %arg30[%c21, %c0_80] : memref<26x64xf32, #tpu.memory_space<vmem>>, vector<5x64xf32>
    tpu.vector_store %arg30[%c21, %c0_80], %129 {strides = array<i32>} : memref<26x64xf32, #tpu.memory_space<vmem>>, vector<5x64xf32>,
    %c0_81 = arith.constant 0 : index
    %c0_82 = arith.constant 0 : index
    %131 = tpu.strided_load %arg29[%c0_81, %c0_82] {strides = array<i32: 2, 1>} : memref<64x64xf32, #tpu.memory_space<vmem>>, vector<32x64xf32>
    %c1_83 = arith.constant 1 : index
    %c0_84 = arith.constant 0 : index
    %132 = tpu.strided_load %arg29[%c1_83, %c0_84] {strides = array<i32: 2, 1>} : memref<64x64xf32, #tpu.memory_space<vmem>>, vector<32x64xf32>
    %133 = arith.maximumf %131, %132 : vector<32x64xf32>
    %134 = vector.extract_strided_slice %133 {offsets = [0, 0], sizes = [4, 64], strides = [1, 1]} : vector<32x64xf32> to vector<4x64xf32>
    %135 = vector.extract_strided_slice %133 {offsets = [4, 0], sizes = [4, 64], strides = [1, 1]} : vector<32x64xf32> to vector<4x64xf32>
    %136 = arith.maximumf %134, %135 : vector<4x64xf32>
    %c5 = arith.constant 5 : index
    %c0_85 = arith.constant 0 : index
    %137 = vector.load %arg30[%c5, %c0_85] : memref<26x64xf32, #tpu.memory_space<vmem>>, vector<4x64xf32>
    tpu.vector_store %arg30[%c5, %c0_85], %136 {strides = array<i32>} : memref<26x64xf32, #tpu.memory_space<vmem>>, vector<4x64xf32>,
    %138 = vector.extract_strided_slice %133 {offsets = [8, 0], sizes = [4, 64], strides = [1, 1]} : vector<32x64xf32> to vector<4x64xf32>
    %139 = vector.extract_strided_slice %133 {offsets = [12, 0], sizes = [4, 64], strides = [1, 1]} : vector<32x64xf32> to vector<4x64xf32>
    %140 = arith.maximumf %138, %139 : vector<4x64xf32>
    %c9_86 = arith.constant 9 : index
    %c0_87 = arith.constant 0 : index
    %141 = vector.load %arg30[%c9_86, %c0_87] : memref<26x64xf32, #tpu.memory_space<vmem>>, vector<4x64xf32>
    tpu.vector_store %arg30[%c9_86, %c0_87], %140 {strides = array<i32>} : memref<26x64xf32, #tpu.memory_space<vmem>>, vector<4x64xf32>,
    %142 = vector.extract_strided_slice %133 {offsets = [16, 0], sizes = [4, 64], strides = [1, 1]} : vector<32x64xf32> to vector<4x64xf32>
    %143 = vector.extract_strided_slice %133 {offsets = [20, 0], sizes = [4, 64], strides = [1, 1]} : vector<32x64xf32> to vector<4x64xf32>
    %144 = arith.maximumf %142, %143 : vector<4x64xf32>
    %c13 = arith.constant 13 : index
    %c0_88 = arith.constant 0 : index
    %145 = vector.load %arg30[%c13, %c0_88] : memref<26x64xf32, #tpu.memory_space<vmem>>, vector<4x64xf32>
    tpu.vector_store %arg30[%c13, %c0_88], %144 {strides = array<i32>} : memref<26x64xf32, #tpu.memory_space<vmem>>, vector<4x64xf32>,
    %146 = vector.extract_strided_slice %133 {offsets = [24, 0], sizes = [4, 64], strides = [1, 1]} : vector<32x64xf32> to vector<4x64xf32>
    %147 = vector.extract_strided_slice %133 {offsets = [28, 0], sizes = [4, 64], strides = [1, 1]} : vector<32x64xf32> to vector<4x64xf32>
    %148 = arith.maximumf %146, %147 : vector<4x64xf32>
    %c17_89 = arith.constant 17 : index
    %c0_90 = arith.constant 0 : index
    %149 = vector.load %arg30[%c17_89, %c0_90] : memref<26x64xf32, #tpu.memory_space<vmem>>, vector<4x64xf32>
    tpu.vector_store %arg30[%c17_89, %c0_90], %148 {strides = array<i32>} : memref<26x64xf32, #tpu.memory_space<vmem>>, vector<4x64xf32>,
    %150 = tpu.iota {dimensions = array<i32: 0>} : vector<16x1xi32>
    %c3_i32 = arith.constant 3 : i32
    %151 = vector.broadcast %c3_i32 : i32 to vector<16x1xi32>
    %152 = arith.andi %150, %151 : vector<16x1xi32>
    %cst_91 = arith.constant 0.000000e+00 : f32
    %153 = vector.broadcast %cst_91 : f32 to vector<16x32xf32>
    %c0_92 = arith.constant 0 : index
    %c0_93 = arith.constant 0 : index
    %154 = vector.load %arg30[%c0_92, %c0_93] : memref<26x64xf32, #tpu.memory_space<vmem>>, vector<16x64xf32>
    %c1_i32_94 = arith.constant 1 : i32
    %155 = vector.broadcast %c1_i32_94 : i32 to vector<16x1xi32>
    %156 = arith.cmpi sge, %152, %155 : vector<16x1xi32>
    %cst_95 = arith.constant 0.000000e+00 : f32
    %157 = vector.shape_cast %156 : vector<16x1xi1> to vector<16x1xi1>
    %158 = vector.broadcast %157 : vector<16x1xi1> to vector<16x64xi1>
    %159 = vector.broadcast %cst_95 : f32 to vector<16x64xf32>
    %160 = arith.select %158, %154, %159 : vector<16x64xi1>, vector<16x64xf32>
    %c0_96 = arith.constant 0 : index
    %c0_97 = arith.constant 0 : index
    %c0_98 = arith.constant 0 : index
    %161 = vector.load %arg10[%c0_96, %c0_97, %c0_98] : memref<9x64x32xf32, #tpu.memory_space<vmem>>, vector<1x64x32xf32>
    %162 = vector.shape_cast %161 : vector<1x64x32xf32> to vector<64x32xf32>
    %cst_99 = arith.constant dense<0.000000e+00> : vector<16x32xf32>
    %163 = tpu.matmul %160, %162, %cst_99 {dimension_numbers = #tpu.dot_dimension_numbers<[1], [0], [0], [1], [0, 0, 1, 1], [], []>} : vector<16x64xf32>, vector<64x32xf32>, vector<16x32xf32> -> vector<16x32xf32>
    %164 = arith.addf %153, %163 : vector<16x32xf32>
    %c1_100 = arith.constant 1 : index
    %c0_101 = arith.constant 0 : index
    %165 = vector.load %arg30[%c1_100, %c0_101] : memref<26x64xf32, #tpu.memory_space<vmem>>, vector<16x64xf32>
    %c1_102 = arith.constant 1 : index
    %c0_103 = arith.constant 0 : index
    %c0_104 = arith.constant 0 : index
    %166 = vector.load %arg10[%c1_102, %c0_103, %c0_104] : memref<9x64x32xf32, #tpu.memory_space<vmem>>, vector<1x64x32xf32>
    %167 = vector.shape_cast %166 : vector<1x64x32xf32> to vector<64x32xf32>
    %cst_105 = arith.constant dense<0.000000e+00> : vector<16x32xf32>
    %168 = tpu.matmul %165, %167, %cst_105 {dimension_numbers = #tpu.dot_dimension_numbers<[1], [0], [0], [1], [0, 0, 1, 1], [], []>} : vector<16x64xf32>, vector<64x32xf32>, vector<16x32xf32> -> vector<16x32xf32>
    %169 = arith.addf %164, %168 : vector<16x32xf32>
    %c2_106 = arith.constant 2 : index
    %c0_107 = arith.constant 0 : index
    %170 = vector.load %arg30[%c2_106, %c0_107] : memref<26x64xf32, #tpu.memory_space<vmem>>, vector<16x64xf32>
    %c2_i32 = arith.constant 2 : i32
    %171 = vector.broadcast %c2_i32 : i32 to vector<16x1xi32>
    %172 = arith.cmpi sle, %152, %171 : vector<16x1xi32>
    %cst_108 = arith.constant 0.000000e+00 : f32
    %173 = vector.shape_cast %172 : vector<16x1xi1> to vector<16x1xi1>
    %174 = vector.broadcast %173 : vector<16x1xi1> to vector<16x64xi1>
    %175 = vector.broadcast %cst_108 : f32 to vector<16x64xf32>
    %176 = arith.select %174, %170, %175 : vector<16x64xi1>, vector<16x64xf32>
    %c2_109 = arith.constant 2 : index
    %c0_110 = arith.constant 0 : index
    %c0_111 = arith.constant 0 : index
    %177 = vector.load %arg10[%c2_109, %c0_110, %c0_111] : memref<9x64x32xf32, #tpu.memory_space<vmem>>, vector<1x64x32xf32>
    %178 = vector.shape_cast %177 : vector<1x64x32xf32> to vector<64x32xf32>
    %cst_112 = arith.constant dense<0.000000e+00> : vector<16x32xf32>
    %179 = tpu.matmul %176, %178, %cst_112 {dimension_numbers = #tpu.dot_dimension_numbers<[1], [0], [0], [1], [0, 0, 1, 1], [], []>} : vector<16x64xf32>, vector<64x32xf32>, vector<16x32xf32> -> vector<16x32xf32>
    %180 = arith.addf %169, %179 : vector<16x32xf32>
    %c4 = arith.constant 4 : index
    %c0_113 = arith.constant 0 : index
    %181 = vector.load %arg30[%c4, %c0_113] : memref<26x64xf32, #tpu.memory_space<vmem>>, vector<16x64xf32>
    %c1_i32_114 = arith.constant 1 : i32
    %182 = vector.broadcast %c1_i32_114 : i32 to vector<16x1xi32>
    %183 = arith.cmpi sge, %152, %182 : vector<16x1xi32>
    %cst_115 = arith.constant 0.000000e+00 : f32
    %184 = vector.shape_cast %183 : vector<16x1xi1> to vector<16x1xi1>
    %185 = vector.broadcast %184 : vector<16x1xi1> to vector<16x64xi1>
    %186 = vector.broadcast %cst_115 : f32 to vector<16x64xf32>
    %187 = arith.select %185, %181, %186 : vector<16x64xi1>, vector<16x64xf32>
    %c3 = arith.constant 3 : index
    %c0_116 = arith.constant 0 : index
    %c0_117 = arith.constant 0 : index
    %188 = vector.load %arg10[%c3, %c0_116, %c0_117] : memref<9x64x32xf32, #tpu.memory_space<vmem>>, vector<1x64x32xf32>
    %189 = vector.shape_cast %188 : vector<1x64x32xf32> to vector<64x32xf32>
    %cst_118 = arith.constant dense<0.000000e+00> : vector<16x32xf32>
    %190 = tpu.matmul %187, %189, %cst_118 {dimension_numbers = #tpu.dot_dimension_numbers<[1], [0], [0], [1], [0, 0, 1, 1], [], []>} : vector<16x64xf32>, vector<64x32xf32>, vector<16x32xf32> -> vector<16x32xf32>
    %191 = arith.addf %180, %190 : vector<16x32xf32>
    %c5_119 = arith.constant 5 : index
    %c0_120 = arith.constant 0 : index
    %192 = vector.load %arg30[%c5_119, %c0_120] : memref<26x64xf32, #tpu.memory_space<vmem>>, vector<16x64xf32>
    %c4_121 = arith.constant 4 : index
    %c0_122 = arith.constant 0 : index
    %c0_123 = arith.constant 0 : index
    %193 = vector.load %arg10[%c4_121, %c0_122, %c0_123] : memref<9x64x32xf32, #tpu.memory_space<vmem>>, vector<1x64x32xf32>
    %194 = vector.shape_cast %193 : vector<1x64x32xf32> to vector<64x32xf32>
    %cst_124 = arith.constant dense<0.000000e+00> : vector<16x32xf32>
    %195 = tpu.matmul %192, %194, %cst_124 {dimension_numbers = #tpu.dot_dimension_numbers<[1], [0], [0], [1], [0, 0, 1, 1], [], []>} : vector<16x64xf32>, vector<64x32xf32>, vector<16x32xf32> -> vector<16x32xf32>
    %196 = arith.addf %191, %195 : vector<16x32xf32>
    %c6 = arith.constant 6 : index
    %c0_125 = arith.constant 0 : index
    %197 = vector.load %arg30[%c6, %c0_125] : memref<26x64xf32, #tpu.memory_space<vmem>>, vector<16x64xf32>
    %c2_i32_126 = arith.constant 2 : i32
    %198 = vector.broadcast %c2_i32_126 : i32 to vector<16x1xi32>
    %199 = arith.cmpi sle, %152, %198 : vector<16x1xi32>
    %cst_127 = arith.constant 0.000000e+00 : f32
    %200 = vector.shape_cast %199 : vector<16x1xi1> to vector<16x1xi1>
    %201 = vector.broadcast %200 : vector<16x1xi1> to vector<16x64xi1>
    %202 = vector.broadcast %cst_127 : f32 to vector<16x64xf32>
    %203 = arith.select %201, %197, %202 : vector<16x64xi1>, vector<16x64xf32>
    %c5_128 = arith.constant 5 : index
    %c0_129 = arith.constant 0 : index
    %c0_130 = arith.constant 0 : index
    %204 = vector.load %arg10[%c5_128, %c0_129, %c0_130] : memref<9x64x32xf32, #tpu.memory_space<vmem>>, vector<1x64x32xf32>
    %205 = vector.shape_cast %204 : vector<1x64x32xf32> to vector<64x32xf32>
    %cst_131 = arith.constant dense<0.000000e+00> : vector<16x32xf32>
    %206 = tpu.matmul %203, %205, %cst_131 {dimension_numbers = #tpu.dot_dimension_numbers<[1], [0], [0], [1], [0, 0, 1, 1], [], []>} : vector<16x64xf32>, vector<64x32xf32>, vector<16x32xf32> -> vector<16x32xf32>
    %207 = arith.addf %196, %206 : vector<16x32xf32>
    %c8_132 = arith.constant 8 : index
    %c0_133 = arith.constant 0 : index
    %208 = vector.load %arg30[%c8_132, %c0_133] : memref<26x64xf32, #tpu.memory_space<vmem>>, vector<16x64xf32>
    %c1_i32_134 = arith.constant 1 : i32
    %209 = vector.broadcast %c1_i32_134 : i32 to vector<16x1xi32>
    %210 = arith.cmpi sge, %152, %209 : vector<16x1xi32>
    %cst_135 = arith.constant 0.000000e+00 : f32
    %211 = vector.shape_cast %210 : vector<16x1xi1> to vector<16x1xi1>
    %212 = vector.broadcast %211 : vector<16x1xi1> to vector<16x64xi1>
    %213 = vector.broadcast %cst_135 : f32 to vector<16x64xf32>
    %214 = arith.select %212, %208, %213 : vector<16x64xi1>, vector<16x64xf32>
    %c6_136 = arith.constant 6 : index
    %c0_137 = arith.constant 0 : index
    %c0_138 = arith.constant 0 : index
    %215 = vector.load %arg10[%c6_136, %c0_137, %c0_138] : memref<9x64x32xf32, #tpu.memory_space<vmem>>, vector<1x64x32xf32>
    %216 = vector.shape_cast %215 : vector<1x64x32xf32> to vector<64x32xf32>
    %cst_139 = arith.constant dense<0.000000e+00> : vector<16x32xf32>
    %217 = tpu.matmul %214, %216, %cst_139 {dimension_numbers = #tpu.dot_dimension_numbers<[1], [0], [0], [1], [0, 0, 1, 1], [], []>} : vector<16x64xf32>, vector<64x32xf32>, vector<16x32xf32> -> vector<16x32xf32>
    %218 = arith.addf %207, %217 : vector<16x32xf32>
    %c9_140 = arith.constant 9 : index
    %c0_141 = arith.constant 0 : index
    %219 = vector.load %arg30[%c9_140, %c0_141] : memref<26x64xf32, #tpu.memory_space<vmem>>, vector<16x64xf32>
    %c7 = arith.constant 7 : index
    %c0_142 = arith.constant 0 : index
    %c0_143 = arith.constant 0 : index
    %220 = vector.load %arg10[%c7, %c0_142, %c0_143] : memref<9x64x32xf32, #tpu.memory_space<vmem>>, vector<1x64x32xf32>
    %221 = vector.shape_cast %220 : vector<1x64x32xf32> to vector<64x32xf32>
    %cst_144 = arith.constant dense<0.000000e+00> : vector<16x32xf32>
    %222 = tpu.matmul %219, %221, %cst_144 {dimension_numbers = #tpu.dot_dimension_numbers<[1], [0], [0], [1], [0, 0, 1, 1], [], []>} : vector<16x64xf32>, vector<64x32xf32>, vector<16x32xf32> -> vector<16x32xf32>
    %223 = arith.addf %218, %222 : vector<16x32xf32>
    %c10_145 = arith.constant 10 : index
    %c0_146 = arith.constant 0 : index
    %224 = vector.load %arg30[%c10_145, %c0_146] : memref<26x64xf32, #tpu.memory_space<vmem>>, vector<16x64xf32>
    %c2_i32_147 = arith.constant 2 : i32
    %225 = vector.broadcast %c2_i32_147 : i32 to vector<16x1xi32>
    %226 = arith.cmpi sle, %152, %225 : vector<16x1xi32>
    %cst_148 = arith.constant 0.000000e+00 : f32
    %227 = vector.shape_cast %226 : vector<16x1xi1> to vector<16x1xi1>
    %228 = vector.broadcast %227 : vector<16x1xi1> to vector<16x64xi1>
    %229 = vector.broadcast %cst_148 : f32 to vector<16x64xf32>
    %230 = arith.select %228, %224, %229 : vector<16x64xi1>, vector<16x64xf32>
    %c8_149 = arith.constant 8 : index
    %c0_150 = arith.constant 0 : index
    %c0_151 = arith.constant 0 : index
    %231 = vector.load %arg10[%c8_149, %c0_150, %c0_151] : memref<9x64x32xf32, #tpu.memory_space<vmem>>, vector<1x64x32xf32>
    %232 = vector.shape_cast %231 : vector<1x64x32xf32> to vector<64x32xf32>
    %cst_152 = arith.constant dense<0.000000e+00> : vector<16x32xf32>
    %233 = tpu.matmul %230, %232, %cst_152 {dimension_numbers = #tpu.dot_dimension_numbers<[1], [0], [0], [1], [0, 0, 1, 1], [], []>} : vector<16x64xf32>, vector<64x32xf32>, vector<16x32xf32> -> vector<16x32xf32>
    %234 = arith.addf %223, %233 : vector<16x32xf32>
    %c0_153 = arith.constant 0 : index
    %c0_154 = arith.constant 0 : index
    %235 = vector.load %arg11[%c0_153, %c0_154] : memref<1x32xf32, #tpu.memory_space<vmem>>, vector<1x32xf32>
    %236 = vector.broadcast %235 : vector<1x32xf32> to vector<16x32xf32>
    %237 = arith.addf %234, %236 : vector<16x32xf32>
    %cst_155 = arith.constant 0.000000e+00 : f32
    %238 = vector.broadcast %cst_155 : f32 to vector<16x32xf32>
    %239 = arith.maximumf %237, %238 : vector<16x32xf32>
    %c0_156 = arith.constant 0 : index
    %c0_157 = arith.constant 0 : index
    %240 = vector.load %arg12[%c0_156, %c0_157] : memref<1x32xf32, #tpu.memory_space<vmem>>, vector<1x32xf32>
    %241 = vector.broadcast %240 : vector<1x32xf32> to vector<16x32xf32>
    %242 = arith.mulf %239, %241 : vector<16x32xf32>
    %c0_158 = arith.constant 0 : index
    %c0_159 = arith.constant 0 : index
    %243 = vector.load %arg13[%c0_158, %c0_159] : memref<1x32xf32, #tpu.memory_space<vmem>>, vector<1x32xf32>
    %244 = vector.broadcast %243 : vector<1x32xf32> to vector<16x32xf32>
    %245 = arith.addf %242, %244 : vector<16x32xf32>
    %c0_160 = arith.constant 0 : index
    %c0_161 = arith.constant 0 : index
    %246 = vector.load %arg31[%c0_160, %c0_161] : memref<16x32xf32, #tpu.memory_space<vmem>>, vector<16x32xf32>
    tpu.vector_store %arg31[%c0_160, %c0_161], %245 {strides = array<i32>} : memref<16x32xf32, #tpu.memory_space<vmem>>, vector<16x32xf32>,
    %c0_162 = arith.constant 0 : index
    %c0_163 = arith.constant 0 : index
    %247 = tpu.strided_load %arg31[%c0_162, %c0_163] {strides = array<i32: 2, 1>} : memref<16x32xf32, #tpu.memory_space<vmem>>, vector<8x32xf32>
    %c1_164 = arith.constant 1 : index
    %c0_165 = arith.constant 0 : index
    %248 = tpu.strided_load %arg31[%c1_164, %c0_165] {strides = array<i32: 2, 1>} : memref<16x32xf32, #tpu.memory_space<vmem>>, vector<8x32xf32>
    %249 = arith.maximumf %247, %248 : vector<8x32xf32>
    %250 = vector.extract_strided_slice %249 {offsets = [0, 0], sizes = [2, 32], strides = [1, 1]} : vector<8x32xf32> to vector<2x32xf32>
    %251 = vector.extract_strided_slice %249 {offsets = [2, 0], sizes = [2, 32], strides = [1, 1]} : vector<8x32xf32> to vector<2x32xf32>
    %252 = arith.maximumf %250, %251 : vector<2x32xf32>
    %c0_166 = arith.constant 0 : index
    %c0_167 = arith.constant 0 : index
    %253 = vector.load %arg32[%c0_166, %c0_167] : memref<4x32xf32, #tpu.memory_space<vmem>>, vector<2x32xf32>
    tpu.vector_store %arg32[%c0_166, %c0_167], %252 {strides = array<i32>} : memref<4x32xf32, #tpu.memory_space<vmem>>, vector<2x32xf32>,
    %254 = vector.extract_strided_slice %249 {offsets = [4, 0], sizes = [2, 32], strides = [1, 1]} : vector<8x32xf32> to vector<2x32xf32>
    %255 = vector.extract_strided_slice %249 {offsets = [6, 0], sizes = [2, 32], strides = [1, 1]} : vector<8x32xf32> to vector<2x32xf32>
    %256 = arith.maximumf %254, %255 : vector<2x32xf32>
    %c2_168 = arith.constant 2 : index
    %c0_169 = arith.constant 0 : index
    %257 = vector.load %arg32[%c2_168, %c0_169] : memref<4x32xf32, #tpu.memory_space<vmem>>, vector<2x32xf32>
    tpu.vector_store %arg32[%c2_168, %c0_169], %256 {strides = array<i32>} : memref<4x32xf32, #tpu.memory_space<vmem>>, vector<2x32xf32>,
    %c0_170 = arith.constant 0 : index
    %c0_171 = arith.constant 0 : index
    %258 = vector.load %arg32[%c0_170, %c0_171] : memref<4x32xf32, #tpu.memory_space<vmem>>, vector<4x32xf32>
    %c0_172 = arith.constant 0 : index
    %c0_173 = arith.constant 0 : index
    %259 = vector.load %arg14[%c0_172, %c0_173] : memref<32x256xf32, #tpu.memory_space<vmem>>, vector<32x256xf32>
    %cst_174 = arith.constant dense<0.000000e+00> : vector<4x256xf32>
    %260 = tpu.matmul %258, %259, %cst_174 {dimension_numbers = #tpu.dot_dimension_numbers<[1], [0], [0], [1], [0, 0, 1, 1], [], []>} : vector<4x32xf32>, vector<32x256xf32>, vector<4x256xf32> -> vector<4x256xf32>
    %cst_175 = arith.constant 0.000000e+00 : f32
    %261 = vector.broadcast %cst_175 : f32 to vector<16x64xf32>
    %c0_176 = arith.constant 0 : index
    %c0_177 = arith.constant 0 : index
    %c0_178 = arith.constant 0 : index
    %262 = vector.load %arg16[%c0_176, %c0_177, %c0_178] : memref<4x16x4xf32, #tpu.memory_space<vmem>>, vector<1x16x4xf32>
    %263 = vector.shape_cast %262 : vector<1x16x4xf32> to vector<16x4xf32>
    %264 = vector.extract_strided_slice %260 {offsets = [0, 0], sizes = [4, 64], strides = [1, 1]} : vector<4x256xf32> to vector<4x64xf32>
    %cst_179 = arith.constant dense<0.000000e+00> : vector<16x64xf32>
    %265 = tpu.matmul %263, %264, %cst_179 {dimension_numbers = #tpu.dot_dimension_numbers<[1], [0], [0], [1], [0, 0, 1, 1], [], []>} : vector<16x4xf32>, vector<4x64xf32>, vector<16x64xf32> -> vector<16x64xf32>
    %266 = arith.addf %261, %265 : vector<16x64xf32>
    %c1_180 = arith.constant 1 : index
    %c0_181 = arith.constant 0 : index
    %c0_182 = arith.constant 0 : index
    %267 = vector.load %arg16[%c1_180, %c0_181, %c0_182] : memref<4x16x4xf32, #tpu.memory_space<vmem>>, vector<1x16x4xf32>
    %268 = vector.shape_cast %267 : vector<1x16x4xf32> to vector<16x4xf32>
    %269 = vector.extract_strided_slice %260 {offsets = [0, 64], sizes = [4, 64], strides = [1, 1]} : vector<4x256xf32> to vector<4x64xf32>
    %cst_183 = arith.constant dense<0.000000e+00> : vector<16x64xf32>
    %270 = tpu.matmul %268, %269, %cst_183 {dimension_numbers = #tpu.dot_dimension_numbers<[1], [0], [0], [1], [0, 0, 1, 1], [], []>} : vector<16x4xf32>, vector<4x64xf32>, vector<16x64xf32> -> vector<16x64xf32>
    %271 = arith.addf %266, %270 : vector<16x64xf32>
    %c2_184 = arith.constant 2 : index
    %c0_185 = arith.constant 0 : index
    %c0_186 = arith.constant 0 : index
    %272 = vector.load %arg16[%c2_184, %c0_185, %c0_186] : memref<4x16x4xf32, #tpu.memory_space<vmem>>, vector<1x16x4xf32>
    %273 = vector.shape_cast %272 : vector<1x16x4xf32> to vector<16x4xf32>
    %274 = vector.extract_strided_slice %260 {offsets = [0, 128], sizes = [4, 64], strides = [1, 1]} : vector<4x256xf32> to vector<4x64xf32>
    %cst_187 = arith.constant dense<0.000000e+00> : vector<16x64xf32>
    %275 = tpu.matmul %273, %274, %cst_187 {dimension_numbers = #tpu.dot_dimension_numbers<[1], [0], [0], [1], [0, 0, 1, 1], [], []>} : vector<16x4xf32>, vector<4x64xf32>, vector<16x64xf32> -> vector<16x64xf32>
    %276 = arith.addf %271, %275 : vector<16x64xf32>
    %c3_188 = arith.constant 3 : index
    %c0_189 = arith.constant 0 : index
    %c0_190 = arith.constant 0 : index
    %277 = vector.load %arg16[%c3_188, %c0_189, %c0_190] : memref<4x16x4xf32, #tpu.memory_space<vmem>>, vector<1x16x4xf32>
    %278 = vector.shape_cast %277 : vector<1x16x4xf32> to vector<16x4xf32>
    %279 = vector.extract_strided_slice %260 {offsets = [0, 192], sizes = [4, 64], strides = [1, 1]} : vector<4x256xf32> to vector<4x64xf32>
    %cst_191 = arith.constant dense<0.000000e+00> : vector<16x64xf32>
    %280 = tpu.matmul %278, %279, %cst_191 {dimension_numbers = #tpu.dot_dimension_numbers<[1], [0], [0], [1], [0, 0, 1, 1], [], []>} : vector<16x4xf32>, vector<4x64xf32>, vector<16x64xf32> -> vector<16x64xf32>
    %281 = arith.addf %276, %280 : vector<16x64xf32>
    %c0_192 = arith.constant 0 : index
    %c0_193 = arith.constant 0 : index
    %282 = vector.load %arg15[%c0_192, %c0_193] : memref<1x64xf32, #tpu.memory_space<vmem>>, vector<1x64xf32>
    %283 = vector.broadcast %282 : vector<1x64xf32> to vector<16x64xf32>
    %284 = arith.addf %281, %283 : vector<16x64xf32>
    %cst_194 = arith.constant 0.000000e+00 : f32
    %285 = vector.broadcast %cst_194 : f32 to vector<16x64xf32>
    %286 = arith.maximumf %284, %285 : vector<16x64xf32>
    %c0_195 = arith.constant 0 : index
    %c0_196 = arith.constant 0 : index
    %287 = vector.load %arg8[%c0_195, %c0_196] : memref<1x64xf32, #tpu.memory_space<vmem>>, vector<1x64xf32>
    %288 = vector.broadcast %287 : vector<1x64xf32> to vector<16x64xf32>
    %289 = arith.mulf %286, %288 : vector<16x64xf32>
    %c0_197 = arith.constant 0 : index
    %c0_198 = arith.constant 0 : index
    %290 = vector.load %arg9[%c0_197, %c0_198] : memref<1x64xf32, #tpu.memory_space<vmem>>, vector<1x64xf32>
    %291 = vector.broadcast %290 : vector<1x64xf32> to vector<16x64xf32>
    %292 = arith.addf %289, %291 : vector<16x64xf32>
    %c0_199 = arith.constant 0 : index
    %c0_200 = arith.constant 0 : index
    %293 = vector.load %arg17[%c0_199, %c0_200] : memref<64x512xf32, #tpu.memory_space<vmem>>, vector<64x512xf32>
    %cst_201 = arith.constant dense<0.000000e+00> : vector<16x512xf32>
    %294 = tpu.matmul %292, %293, %cst_201 {dimension_numbers = #tpu.dot_dimension_numbers<[1], [0], [0], [1], [0, 0, 1, 1], [], []>} : vector<16x64xf32>, vector<64x512xf32>, vector<16x512xf32> -> vector<16x512xf32>
    %cst_202 = arith.constant 0.000000e+00 : f32
    %295 = vector.broadcast %cst_202 : f32 to vector<64x128xf32>
    %c0_203 = arith.constant 0 : index
    %c0_204 = arith.constant 0 : index
    %c0_205 = arith.constant 0 : index
    %296 = vector.load %arg19[%c0_203, %c0_204, %c0_205] : memref<4x64x16xf32, #tpu.memory_space<vmem>>, vector<1x64x16xf32>
    %297 = vector.shape_cast %296 : vector<1x64x16xf32> to vector<64x16xf32>
    %298 = vector.extract_strided_slice %294 {offsets = [0, 0], sizes = [16, 128], strides = [1, 1]} : vector<16x512xf32> to vector<16x128xf32>
    %cst_206 = arith.constant dense<0.000000e+00> : vector<64x128xf32>
    %299 = tpu.matmul %297, %298, %cst_206 {dimension_numbers = #tpu.dot_dimension_numbers<[1], [0], [0], [1], [0, 0, 1, 1], [], []>} : vector<64x16xf32>, vector<16x128xf32>, vector<64x128xf32> -> vector<64x128xf32>
    %300 = arith.addf %295, %299 : vector<64x128xf32>
    %c1_207 = arith.constant 1 : index
    %c0_208 = arith.constant 0 : index
    %c0_209 = arith.constant 0 : index
    %301 = vector.load %arg19[%c1_207, %c0_208, %c0_209] : memref<4x64x16xf32, #tpu.memory_space<vmem>>, vector<1x64x16xf32>
    %302 = vector.shape_cast %301 : vector<1x64x16xf32> to vector<64x16xf32>
    %303 = vector.extract_strided_slice %294 {offsets = [0, 128], sizes = [16, 128], strides = [1, 1]} : vector<16x512xf32> to vector<16x128xf32>
    %cst_210 = arith.constant dense<0.000000e+00> : vector<64x128xf32>
    %304 = tpu.matmul %302, %303, %cst_210 {dimension_numbers = #tpu.dot_dimension_numbers<[1], [0], [0], [1], [0, 0, 1, 1], [], []>} : vector<64x16xf32>, vector<16x128xf32>, vector<64x128xf32> -> vector<64x128xf32>
    %305 = arith.addf %300, %304 : vector<64x128xf32>
    %c2_211 = arith.constant 2 : index
    %c0_212 = arith.constant 0 : index
    %c0_213 = arith.constant 0 : index
    %306 = vector.load %arg19[%c2_211, %c0_212, %c0_213] : memref<4x64x16xf32, #tpu.memory_space<vmem>>, vector<1x64x16xf32>
    %307 = vector.shape_cast %306 : vector<1x64x16xf32> to vector<64x16xf32>
    %308 = vector.extract_strided_slice %294 {offsets = [0, 256], sizes = [16, 128], strides = [1, 1]} : vector<16x512xf32> to vector<16x128xf32>
    %cst_214 = arith.constant dense<0.000000e+00> : vector<64x128xf32>
    %309 = tpu.matmul %307, %308, %cst_214 {dimension_numbers = #tpu.dot_dimension_numbers<[1], [0], [0], [1], [0, 0, 1, 1], [], []>} : vector<64x16xf32>, vector<16x128xf32>, vector<64x128xf32> -> vector<64x128xf32>
    %310 = arith.addf %305, %309 : vector<64x128xf32>
    %c3_215 = arith.constant 3 : index
    %c0_216 = arith.constant 0 : index
    %c0_217 = arith.constant 0 : index
    %311 = vector.load %arg19[%c3_215, %c0_216, %c0_217] : memref<4x64x16xf32, #tpu.memory_space<vmem>>, vector<1x64x16xf32>
    %312 = vector.shape_cast %311 : vector<1x64x16xf32> to vector<64x16xf32>
    %313 = vector.extract_strided_slice %294 {offsets = [0, 384], sizes = [16, 128], strides = [1, 1]} : vector<16x512xf32> to vector<16x128xf32>
    %cst_218 = arith.constant dense<0.000000e+00> : vector<64x128xf32>
    %314 = tpu.matmul %312, %313, %cst_218 {dimension_numbers = #tpu.dot_dimension_numbers<[1], [0], [0], [1], [0, 0, 1, 1], [], []>} : vector<64x16xf32>, vector<16x128xf32>, vector<64x128xf32> -> vector<64x128xf32>
    %315 = arith.addf %310, %314 : vector<64x128xf32>
    %c0_219 = arith.constant 0 : index
    %c0_220 = arith.constant 0 : index
    %316 = vector.load %arg18[%c0_219, %c0_220] : memref<1x128xf32, #tpu.memory_space<vmem>>, vector<1x128xf32>
    %317 = vector.broadcast %316 : vector<1x128xf32> to vector<64x128xf32>
    %318 = arith.addf %315, %317 : vector<64x128xf32>
    %cst_221 = arith.constant 0.000000e+00 : f32
    %319 = vector.broadcast %cst_221 : f32 to vector<64x128xf32>
    %320 = arith.maximumf %318, %319 : vector<64x128xf32>
    %c0_222 = arith.constant 0 : index
    %c0_223 = arith.constant 0 : index
    %321 = vector.load %arg4[%c0_222, %c0_223] : memref<1x128xf32, #tpu.memory_space<vmem>>, vector<1x128xf32>
    %322 = vector.broadcast %321 : vector<1x128xf32> to vector<64x128xf32>
    %323 = arith.mulf %320, %322 : vector<64x128xf32>
    %c0_224 = arith.constant 0 : index
    %c0_225 = arith.constant 0 : index
    %324 = vector.load %arg5[%c0_224, %c0_225] : memref<1x128xf32, #tpu.memory_space<vmem>>, vector<1x128xf32>
    %325 = vector.broadcast %324 : vector<1x128xf32> to vector<64x128xf32>
    %326 = arith.addf %323, %325 : vector<64x128xf32>
    %c0_226 = arith.constant 0 : index
    %c0_227 = arith.constant 0 : index
    %327 = vector.load %arg20[%c0_226, %c0_227] : memref<128x1024xf32, #tpu.memory_space<vmem>>, vector<128x1024xf32>
    %cst_228 = arith.constant dense<0.000000e+00> : vector<64x1024xf32>
    %328 = tpu.matmul %326, %327, %cst_228 {dimension_numbers = #tpu.dot_dimension_numbers<[1], [0], [0], [1], [0, 0, 1, 1], [], []>} : vector<64x128xf32>, vector<128x1024xf32>, vector<64x1024xf32> -> vector<64x1024xf32>
    %cst_229 = arith.constant 0.000000e+00 : f32
    %329 = vector.broadcast %cst_229 : f32 to vector<256x256xf32>
    %c0_230 = arith.constant 0 : index
    %c0_231 = arith.constant 0 : index
    %c0_232 = arith.constant 0 : index
    %330 = vector.load %arg22[%c0_230, %c0_231, %c0_232] : memref<4x256x64xf32, #tpu.memory_space<vmem>>, vector<1x256x64xf32>
    %331 = vector.shape_cast %330 : vector<1x256x64xf32> to vector<256x64xf32>
    %332 = vector.extract_strided_slice %328 {offsets = [0, 0], sizes = [64, 256], strides = [1, 1]} : vector<64x1024xf32> to vector<64x256xf32>
    %cst_233 = arith.constant dense<0.000000e+00> : vector<256x256xf32>
    %333 = tpu.matmul %331, %332, %cst_233 {dimension_numbers = #tpu.dot_dimension_numbers<[1], [0], [0], [1], [0, 0, 1, 1], [], []>} : vector<256x64xf32>, vector<64x256xf32>, vector<256x256xf32> -> vector<256x256xf32>
    %334 = arith.addf %329, %333 : vector<256x256xf32>
    %c1_234 = arith.constant 1 : index
    %c0_235 = arith.constant 0 : index
    %c0_236 = arith.constant 0 : index
    %335 = vector.load %arg22[%c1_234, %c0_235, %c0_236] : memref<4x256x64xf32, #tpu.memory_space<vmem>>, vector<1x256x64xf32>
    %336 = vector.shape_cast %335 : vector<1x256x64xf32> to vector<256x64xf32>
    %337 = vector.extract_strided_slice %328 {offsets = [0, 256], sizes = [64, 256], strides = [1, 1]} : vector<64x1024xf32> to vector<64x256xf32>
    %cst_237 = arith.constant dense<0.000000e+00> : vector<256x256xf32>
    %338 = tpu.matmul %336, %337, %cst_237 {dimension_numbers = #tpu.dot_dimension_numbers<[1], [0], [0], [1], [0, 0, 1, 1], [], []>} : vector<256x64xf32>, vector<64x256xf32>, vector<256x256xf32> -> vector<256x256xf32>
    %339 = arith.addf %334, %338 : vector<256x256xf32>
    %c2_238 = arith.constant 2 : index
    %c0_239 = arith.constant 0 : index
    %c0_240 = arith.constant 0 : index
    %340 = vector.load %arg22[%c2_238, %c0_239, %c0_240] : memref<4x256x64xf32, #tpu.memory_space<vmem>>, vector<1x256x64xf32>
    %341 = vector.shape_cast %340 : vector<1x256x64xf32> to vector<256x64xf32>
    %342 = vector.extract_strided_slice %328 {offsets = [0, 512], sizes = [64, 256], strides = [1, 1]} : vector<64x1024xf32> to vector<64x256xf32>
    %cst_241 = arith.constant dense<0.000000e+00> : vector<256x256xf32>
    %343 = tpu.matmul %341, %342, %cst_241 {dimension_numbers = #tpu.dot_dimension_numbers<[1], [0], [0], [1], [0, 0, 1, 1], [], []>} : vector<256x64xf32>, vector<64x256xf32>, vector<256x256xf32> -> vector<256x256xf32>
    %344 = arith.addf %339, %343 : vector<256x256xf32>
    %c3_242 = arith.constant 3 : index
    %c0_243 = arith.constant 0 : index
    %c0_244 = arith.constant 0 : index
    %345 = vector.load %arg22[%c3_242, %c0_243, %c0_244] : memref<4x256x64xf32, #tpu.memory_space<vmem>>, vector<1x256x64xf32>
    %346 = vector.shape_cast %345 : vector<1x256x64xf32> to vector<256x64xf32>
    %347 = vector.extract_strided_slice %328 {offsets = [0, 768], sizes = [64, 256], strides = [1, 1]} : vector<64x1024xf32> to vector<64x256xf32>
    %cst_245 = arith.constant dense<0.000000e+00> : vector<256x256xf32>
    %348 = tpu.matmul %346, %347, %cst_245 {dimension_numbers = #tpu.dot_dimension_numbers<[1], [0], [0], [1], [0, 0, 1, 1], [], []>} : vector<256x64xf32>, vector<64x256xf32>, vector<256x256xf32> -> vector<256x256xf32>
    %349 = arith.addf %344, %348 : vector<256x256xf32>
    %c0_246 = arith.constant 0 : index
    %c0_247 = arith.constant 0 : index
    %350 = vector.load %arg21[%c0_246, %c0_247] : memref<1x256xf32, #tpu.memory_space<vmem>>, vector<1x256xf32>
    %351 = vector.broadcast %350 : vector<1x256xf32> to vector<256x256xf32>
    %352 = arith.addf %349, %351 : vector<256x256xf32>
    %cst_248 = arith.constant 0.000000e+00 : f32
    %353 = vector.broadcast %cst_248 : f32 to vector<256x256xf32>
    %354 = arith.maximumf %352, %353 : vector<256x256xf32>
    %cst_249 = arith.constant 0.000000e+00 : f32
    %355 = vector.broadcast %cst_249 : f32 to vector<17x256xf32>
    %c0_250 = arith.constant 0 : index
    %c0_251 = arith.constant 0 : index
    %356 = vector.load %arg33[%c0_250, %c0_251] : memref<290x256xf32, #tpu.memory_space<vmem>>, vector<17x256xf32>
    tpu.vector_store %arg33[%c0_250, %c0_251], %355 {strides = array<i32>} : memref<290x256xf32, #tpu.memory_space<vmem>>, vector<17x256xf32>,
    %cst_252 = arith.constant 0.000000e+00 : f32
    %357 = vector.broadcast %cst_252 : f32 to vector<17x256xf32>
    %c273 = arith.constant 273 : index
    %c0_253 = arith.constant 0 : index
    %358 = vector.load %arg33[%c273, %c0_253] : memref<290x256xf32, #tpu.memory_space<vmem>>, vector<17x256xf32>
    tpu.vector_store %arg33[%c273, %c0_253], %357 {strides = array<i32>} : memref<290x256xf32, #tpu.memory_space<vmem>>, vector<17x256xf32>,
    %c17_254 = arith.constant 17 : index
    %c0_255 = arith.constant 0 : index
    %359 = vector.load %arg33[%c17_254, %c0_255] : memref<290x256xf32, #tpu.memory_space<vmem>>, vector<256x256xf32>
    tpu.vector_store %arg33[%c17_254, %c0_255], %354 {strides = array<i32>} : memref<290x256xf32, #tpu.memory_space<vmem>>, vector<256x256xf32>,
    %360 = tpu.iota {dimensions = array<i32: 0>} : vector<256x1xi32>
    %c15_i32 = arith.constant 15 : i32
    %361 = vector.broadcast %c15_i32 : i32 to vector<256x1xi32>
    %362 = arith.andi %360, %361 : vector<256x1xi32>
    %cst_256 = arith.constant 0.000000e+00 : f32
    %363 = vector.broadcast %cst_256 : f32 to vector<256x1xf32>
    %c0_257 = arith.constant 0 : index
    %c0_258 = arith.constant 0 : index
    %364 = vector.load %arg33[%c0_257, %c0_258] : memref<290x256xf32, #tpu.memory_space<vmem>>, vector<256x256xf32>
    %c1_i32_259 = arith.constant 1 : i32
    %365 = vector.broadcast %c1_i32_259 : i32 to vector<256x1xi32>
    %366 = arith.cmpi sge, %362, %365 : vector<256x1xi32>
    %cst_260 = arith.constant 0.000000e+00 : f32
    %367 = vector.shape_cast %366 : vector<256x1xi1> to vector<256x1xi1>
    %368 = vector.broadcast %367 : vector<256x1xi1> to vector<256x256xi1>
    %369 = vector.broadcast %cst_260 : f32 to vector<256x256xf32>
    %370 = arith.select %368, %364, %369 : vector<256x256xi1>, vector<256x256xf32>
    %c0_261 = arith.constant 0 : index
    %c0_262 = arith.constant 0 : index
    %371 = vector.load %arg23[%c0_261, %c0_262] : memref<9x256xf32, #tpu.memory_space<vmem>>, vector<1x256xf32>
    %372 = vector.broadcast %371 : vector<1x256xf32> to vector<256x256xf32>
    %373 = arith.mulf %370, %372 : vector<256x256xf32>
    %cst_263 = arith.constant dense<0.000000e+00> : vector<256xf32>
    %374 = vector.multi_reduction <add>, %373, %cst_263 [1] : vector<256x256xf32> to vector<256xf32>
    %375 = vector.shape_cast %374 : vector<256xf32> to vector<256x1xf32>
    %376 = arith.addf %363, %375 : vector<256x1xf32>
    %c1_264 = arith.constant 1 : index
    %c0_265 = arith.constant 0 : index
    %377 = vector.load %arg33[%c1_264, %c0_265] : memref<290x256xf32, #tpu.memory_space<vmem>>, vector<256x256xf32>
    %c1_266 = arith.constant 1 : index
    %c0_267 = arith.constant 0 : index
    %378 = vector.load %arg23[%c1_266, %c0_267] : memref<9x256xf32, #tpu.memory_space<vmem>>, vector<1x256xf32>
    %379 = vector.broadcast %378 : vector<1x256xf32> to vector<256x256xf32>
    %380 = arith.mulf %377, %379 : vector<256x256xf32>
    %cst_268 = arith.constant dense<0.000000e+00> : vector<256xf32>
    %381 = vector.multi_reduction <add>, %380, %cst_268 [1] : vector<256x256xf32> to vector<256xf32>
    %382 = vector.shape_cast %381 : vector<256xf32> to vector<256x1xf32>
    %383 = arith.addf %376, %382 : vector<256x1xf32>
    %c2_269 = arith.constant 2 : index
    %c0_270 = arith.constant 0 : index
    %384 = vector.load %arg33[%c2_269, %c0_270] : memref<290x256xf32, #tpu.memory_space<vmem>>, vector<256x256xf32>
    %c14_i32 = arith.constant 14 : i32
    %385 = vector.broadcast %c14_i32 : i32 to vector<256x1xi32>
    %386 = arith.cmpi sle, %362, %385 : vector<256x1xi32>
    %cst_271 = arith.constant 0.000000e+00 : f32
    %387 = vector.shape_cast %386 : vector<256x1xi1> to vector<256x1xi1>
    %388 = vector.broadcast %387 : vector<256x1xi1> to vector<256x256xi1>
    %389 = vector.broadcast %cst_271 : f32 to vector<256x256xf32>
    %390 = arith.select %388, %384, %389 : vector<256x256xi1>, vector<256x256xf32>
    %c2_272 = arith.constant 2 : index
    %c0_273 = arith.constant 0 : index
    %391 = vector.load %arg23[%c2_272, %c0_273] : memref<9x256xf32, #tpu.memory_space<vmem>>, vector<1x256xf32>
    %392 = vector.broadcast %391 : vector<1x256xf32> to vector<256x256xf32>
    %393 = arith.mulf %390, %392 : vector<256x256xf32>
    %cst_274 = arith.constant dense<0.000000e+00> : vector<256xf32>
    %394 = vector.multi_reduction <add>, %393, %cst_274 [1] : vector<256x256xf32> to vector<256xf32>
    %395 = vector.shape_cast %394 : vector<256xf32> to vector<256x1xf32>
    %396 = arith.addf %383, %395 : vector<256x1xf32>
    %c16_275 = arith.constant 16 : index
    %c0_276 = arith.constant 0 : index
    %397 = vector.load %arg33[%c16_275, %c0_276] : memref<290x256xf32, #tpu.memory_space<vmem>>, vector<256x256xf32>
    %c1_i32_277 = arith.constant 1 : i32
    %398 = vector.broadcast %c1_i32_277 : i32 to vector<256x1xi32>
    %399 = arith.cmpi sge, %362, %398 : vector<256x1xi32>
    %cst_278 = arith.constant 0.000000e+00 : f32
    %400 = vector.shape_cast %399 : vector<256x1xi1> to vector<256x1xi1>
    %401 = vector.broadcast %400 : vector<256x1xi1> to vector<256x256xi1>
    %402 = vector.broadcast %cst_278 : f32 to vector<256x256xf32>
    %403 = arith.select %401, %397, %402 : vector<256x256xi1>, vector<256x256xf32>
    %c3_279 = arith.constant 3 : index
    %c0_280 = arith.constant 0 : index
    %404 = vector.load %arg23[%c3_279, %c0_280] : memref<9x256xf32, #tpu.memory_space<vmem>>, vector<1x256xf32>
    %405 = vector.broadcast %404 : vector<1x256xf32> to vector<256x256xf32>
    %406 = arith.mulf %403, %405 : vector<256x256xf32>
    %cst_281 = arith.constant dense<0.000000e+00> : vector<256xf32>
    %407 = vector.multi_reduction <add>, %406, %cst_281 [1] : vector<256x256xf32> to vector<256xf32>
    %408 = vector.shape_cast %407 : vector<256xf32> to vector<256x1xf32>
    %409 = arith.addf %396, %408 : vector<256x1xf32>
    %c17_282 = arith.constant 17 : index
    %c0_283 = arith.constant 0 : index
    %410 = vector.load %arg33[%c17_282, %c0_283] : memref<290x256xf32, #tpu.memory_space<vmem>>, vector<256x256xf32>
    %c4_284 = arith.constant 4 : index
    %c0_285 = arith.constant 0 : index
    %411 = vector.load %arg23[%c4_284, %c0_285] : memref<9x256xf32, #tpu.memory_space<vmem>>, vector<1x256xf32>
    %412 = vector.broadcast %411 : vector<1x256xf32> to vector<256x256xf32>
    %413 = arith.mulf %410, %412 : vector<256x256xf32>
    %cst_286 = arith.constant dense<0.000000e+00> : vector<256xf32>
    %414 = vector.multi_reduction <add>, %413, %cst_286 [1] : vector<256x256xf32> to vector<256xf32>
    %415 = vector.shape_cast %414 : vector<256xf32> to vector<256x1xf32>
    %416 = arith.addf %409, %415 : vector<256x1xf32>
    %c18_287 = arith.constant 18 : index
    %c0_288 = arith.constant 0 : index
    %417 = vector.load %arg33[%c18_287, %c0_288] : memref<290x256xf32, #tpu.memory_space<vmem>>, vector<256x256xf32>
    %c14_i32_289 = arith.constant 14 : i32
    %418 = vector.broadcast %c14_i32_289 : i32 to vector<256x1xi32>
    %419 = arith.cmpi sle, %362, %418 : vector<256x1xi32>
    %cst_290 = arith.constant 0.000000e+00 : f32
    %420 = vector.shape_cast %419 : vector<256x1xi1> to vector<256x1xi1>
    %421 = vector.broadcast %420 : vector<256x1xi1> to vector<256x256xi1>
    %422 = vector.broadcast %cst_290 : f32 to vector<256x256xf32>
    %423 = arith.select %421, %417, %422 : vector<256x256xi1>, vector<256x256xf32>
    %c5_291 = arith.constant 5 : index
    %c0_292 = arith.constant 0 : index
    %424 = vector.load %arg23[%c5_291, %c0_292] : memref<9x256xf32, #tpu.memory_space<vmem>>, vector<1x256xf32>
    %425 = vector.broadcast %424 : vector<1x256xf32> to vector<256x256xf32>
    %426 = arith.mulf %423, %425 : vector<256x256xf32>
    %cst_293 = arith.constant dense<0.000000e+00> : vector<256xf32>
    %427 = vector.multi_reduction <add>, %426, %cst_293 [1] : vector<256x256xf32> to vector<256xf32>
    %428 = vector.shape_cast %427 : vector<256xf32> to vector<256x1xf32>
    %429 = arith.addf %416, %428 : vector<256x1xf32>
    %c32 = arith.constant 32 : index
    %c0_294 = arith.constant 0 : index
    %430 = vector.load %arg33[%c32, %c0_294] : memref<290x256xf32, #tpu.memory_space<vmem>>, vector<256x256xf32>
    %c1_i32_295 = arith.constant 1 : i32
    %431 = vector.broadcast %c1_i32_295 : i32 to vector<256x1xi32>
    %432 = arith.cmpi sge, %362, %431 : vector<256x1xi32>
    %cst_296 = arith.constant 0.000000e+00 : f32
    %433 = vector.shape_cast %432 : vector<256x1xi1> to vector<256x1xi1>
    %434 = vector.broadcast %433 : vector<256x1xi1> to vector<256x256xi1>
    %435 = vector.broadcast %cst_296 : f32 to vector<256x256xf32>
    %436 = arith.select %434, %430, %435 : vector<256x256xi1>, vector<256x256xf32>
    %c6_297 = arith.constant 6 : index
    %c0_298 = arith.constant 0 : index
    %437 = vector.load %arg23[%c6_297, %c0_298] : memref<9x256xf32, #tpu.memory_space<vmem>>, vector<1x256xf32>
    %438 = vector.broadcast %437 : vector<1x256xf32> to vector<256x256xf32>
    %439 = arith.mulf %436, %438 : vector<256x256xf32>
    %cst_299 = arith.constant dense<0.000000e+00> : vector<256xf32>
    %440 = vector.multi_reduction <add>, %439, %cst_299 [1] : vector<256x256xf32> to vector<256xf32>
    %441 = vector.shape_cast %440 : vector<256xf32> to vector<256x1xf32>
    %442 = arith.addf %429, %441 : vector<256x1xf32>
    %c33_300 = arith.constant 33 : index
    %c0_301 = arith.constant 0 : index
    %443 = vector.load %arg33[%c33_300, %c0_301] : memref<290x256xf32, #tpu.memory_space<vmem>>, vector<256x256xf32>
    %c7_302 = arith.constant 7 : index
    %c0_303 = arith.constant 0 : index
    %444 = vector.load %arg23[%c7_302, %c0_303] : memref<9x256xf32, #tpu.memory_space<vmem>>, vector<1x256xf32>
    %445 = vector.broadcast %444 : vector<1x256xf32> to vector<256x256xf32>
    %446 = arith.mulf %443, %445 : vector<256x256xf32>
    %cst_304 = arith.constant dense<0.000000e+00> : vector<256xf32>
    %447 = vector.multi_reduction <add>, %446, %cst_304 [1] : vector<256x256xf32> to vector<256xf32>
    %448 = vector.shape_cast %447 : vector<256xf32> to vector<256x1xf32>
    %449 = arith.addf %442, %448 : vector<256x1xf32>
    %c34 = arith.constant 34 : index
    %c0_305 = arith.constant 0 : index
    %450 = vector.load %arg33[%c34, %c0_305] : memref<290x256xf32, #tpu.memory_space<vmem>>, vector<256x256xf32>
    %c14_i32_306 = arith.constant 14 : i32
    %451 = vector.broadcast %c14_i32_306 : i32 to vector<256x1xi32>
    %452 = arith.cmpi sle, %362, %451 : vector<256x1xi32>
    %cst_307 = arith.constant 0.000000e+00 : f32
    %453 = vector.shape_cast %452 : vector<256x1xi1> to vector<256x1xi1>
    %454 = vector.broadcast %453 : vector<256x1xi1> to vector<256x256xi1>
    %455 = vector.broadcast %cst_307 : f32 to vector<256x256xf32>
    %456 = arith.select %454, %450, %455 : vector<256x256xi1>, vector<256x256xf32>
    %c8_308 = arith.constant 8 : index
    %c0_309 = arith.constant 0 : index
    %457 = vector.load %arg23[%c8_308, %c0_309] : memref<9x256xf32, #tpu.memory_space<vmem>>, vector<1x256xf32>
    %458 = vector.broadcast %457 : vector<1x256xf32> to vector<256x256xf32>
    %459 = arith.mulf %456, %458 : vector<256x256xf32>
    %cst_310 = arith.constant dense<0.000000e+00> : vector<256xf32>
    %460 = vector.multi_reduction <add>, %459, %cst_310 [1] : vector<256x256xf32> to vector<256xf32>
    %461 = vector.shape_cast %460 : vector<256xf32> to vector<256x1xf32>
    %462 = arith.addf %449, %461 : vector<256x1xf32>
    %c0_311 = arith.constant 0 : index
    %c0_312 = arith.constant 0 : index
    %463 = vector.load %arg24[%c0_311, %c0_312] : memref<1x1xf32, #tpu.memory_space<vmem>>, vector<1x1xf32>
    %464 = vector.broadcast %463 : vector<1x1xf32> to vector<256x1xf32>
    %465 = arith.addf %462, %464 : vector<256x1xf32>
    %466 = arith.negf %465 : vector<256x1xf32>
    %467 = math.exp %466 : vector<256x1xf32>
    %cst_313 = arith.constant 1.000000e+00 : f32
    %468 = vector.broadcast %cst_313 : f32 to vector<256x1xf32>
    %469 = arith.addf %468, %467 : vector<256x1xf32>
    %470 = arith.divf %468, %469 : vector<256x1xf32>
    %c0_314 = arith.constant 0 : index
    %c0_315 = arith.constant 0 : index
    %c0_316 = arith.constant 0 : index
    %471 = vector.load %arg25[%c0_314, %c0_315, %c0_316] : memref<1x256x1xf32, #tpu.memory_space<vmem>>, vector<1x256x1xf32>
    %472 = vector.shape_cast %471 : vector<1x256x1xf32> to vector<256x1xf32>
    %473 = vector.shape_cast %470 : vector<256x1xf32> to vector<1x256x1xf32>
    tpu.vector_store %arg25[%c0_314, %c0_315, %c0_316], %473 {strides = array<i32>} : memref<1x256x1xf32, #tpu.memory_space<vmem>>, vector<1x256x1xf32>,
    return
  }
  func.func @transform_0(%arg0: i32) -> (i32, i32, i32) {
    %c0_i32 = arith.constant 0 : i32
    %c0_i32_0 = arith.constant 0 : i32
    %c0_i32_1 = arith.constant 0 : i32
    return %arg0, %c0_i32, %c0_i32_0 : i32, i32, i32
  }
  func.func @transform_1(%arg0: i32) -> (i32, i32) {
    %c0_i32 = arith.constant 0 : i32
    %c0_i32_0 = arith.constant 0 : i32
    %c0_i32_1 = arith.constant 0 : i32
    return %c0_i32, %c0_i32_0 : i32, i32
  }
  func.func @transform_2(%arg0: i32) -> (i32, i32) {
    %c0_i32 = arith.constant 0 : i32
    %c0_i32_0 = arith.constant 0 : i32
    %c0_i32_1 = arith.constant 0 : i32
    return %c0_i32, %c0_i32_0 : i32, i32
  }
  func.func @transform_3(%arg0: i32) -> (i32, i32) {
    %c0_i32 = arith.constant 0 : i32
    %c0_i32_0 = arith.constant 0 : i32
    %c0_i32_1 = arith.constant 0 : i32
    return %c0_i32, %c0_i32_0 : i32, i32
  }
  func.func @transform_4(%arg0: i32) -> (i32, i32) {
    %c0_i32 = arith.constant 0 : i32
    %c0_i32_0 = arith.constant 0 : i32
    %c0_i32_1 = arith.constant 0 : i32
    return %c0_i32, %c0_i32_0 : i32, i32
  }
  func.func @transform_5(%arg0: i32) -> (i32, i32) {
    %c0_i32 = arith.constant 0 : i32
    %c0_i32_0 = arith.constant 0 : i32
    %c0_i32_1 = arith.constant 0 : i32
    return %c0_i32, %c0_i32_0 : i32, i32
  }
  func.func @transform_6(%arg0: i32) -> (i32, i32) {
    %c0_i32 = arith.constant 0 : i32
    %c0_i32_0 = arith.constant 0 : i32
    %c0_i32_1 = arith.constant 0 : i32
    return %c0_i32, %c0_i32_0 : i32, i32
  }
  func.func @transform_7(%arg0: i32) -> (i32, i32) {
    %c0_i32 = arith.constant 0 : i32
    %c0_i32_0 = arith.constant 0 : i32
    %c0_i32_1 = arith.constant 0 : i32
    return %c0_i32, %c0_i32_0 : i32, i32
  }
  func.func @transform_8(%arg0: i32) -> (i32, i32) {
    %c0_i32 = arith.constant 0 : i32
    %c0_i32_0 = arith.constant 0 : i32
    %c0_i32_1 = arith.constant 0 : i32
    return %c0_i32, %c0_i32_0 : i32, i32
  }
  func.func @transform_9(%arg0: i32) -> (i32, i32, i32) {
    %c0_i32 = arith.constant 0 : i32
    %c0_i32_0 = arith.constant 0 : i32
    %c0_i32_1 = arith.constant 0 : i32
    %c0_i32_2 = arith.constant 0 : i32
    return %c0_i32, %c0_i32_0, %c0_i32_1 : i32, i32, i32
  }
  func.func @transform_10(%arg0: i32) -> (i32, i32) {
    %c0_i32 = arith.constant 0 : i32
    %c0_i32_0 = arith.constant 0 : i32
    %c0_i32_1 = arith.constant 0 : i32
    return %c0_i32, %c0_i32_0 : i32, i32
  }
  func.func @transform_11(%arg0: i32) -> (i32, i32) {
    %c0_i32 = arith.constant 0 : i32
    %c0_i32_0 = arith.constant 0 : i32
    %c0_i32_1 = arith.constant 0 : i32
    return %c0_i32, %c0_i32_0 : i32, i32
  }
  func.func @transform_12(%arg0: i32) -> (i32, i32) {
    %c0_i32 = arith.constant 0 : i32
    %c0_i32_0 = arith.constant 0 : i32
    %c0_i32_1 = arith.constant 0 : i32
    return %c0_i32, %c0_i32_0 : i32, i32
  }
  func.func @transform_13(%arg0: i32) -> (i32, i32) {
    %c0_i32 = arith.constant 0 : i32
    %c0_i32_0 = arith.constant 0 : i32
    %c0_i32_1 = arith.constant 0 : i32
    return %c0_i32, %c0_i32_0 : i32, i32
  }
  func.func @transform_14(%arg0: i32) -> (i32, i32) {
    %c0_i32 = arith.constant 0 : i32
    %c0_i32_0 = arith.constant 0 : i32
    %c0_i32_1 = arith.constant 0 : i32
    return %c0_i32, %c0_i32_0 : i32, i32
  }
  func.func @transform_15(%arg0: i32) -> (i32, i32, i32) {
    %c0_i32 = arith.constant 0 : i32
    %c0_i32_0 = arith.constant 0 : i32
    %c0_i32_1 = arith.constant 0 : i32
    %c0_i32_2 = arith.constant 0 : i32
    return %c0_i32, %c0_i32_0, %c0_i32_1 : i32, i32, i32
  }
  func.func @transform_16(%arg0: i32) -> (i32, i32) {
    %c0_i32 = arith.constant 0 : i32
    %c0_i32_0 = arith.constant 0 : i32
    %c0_i32_1 = arith.constant 0 : i32
    return %c0_i32, %c0_i32_0 : i32, i32
  }
  func.func @transform_17(%arg0: i32) -> (i32, i32) {
    %c0_i32 = arith.constant 0 : i32
    %c0_i32_0 = arith.constant 0 : i32
    %c0_i32_1 = arith.constant 0 : i32
    return %c0_i32, %c0_i32_0 : i32, i32
  }
  func.func @transform_18(%arg0: i32) -> (i32, i32, i32) {
    %c0_i32 = arith.constant 0 : i32
    %c0_i32_0 = arith.constant 0 : i32
    %c0_i32_1 = arith.constant 0 : i32
    %c0_i32_2 = arith.constant 0 : i32
    return %c0_i32, %c0_i32_0, %c0_i32_1 : i32, i32, i32
  }
  func.func @transform_19(%arg0: i32) -> (i32, i32) {
    %c0_i32 = arith.constant 0 : i32
    %c0_i32_0 = arith.constant 0 : i32
    %c0_i32_1 = arith.constant 0 : i32
    return %c0_i32, %c0_i32_0 : i32, i32
  }
  func.func @transform_20(%arg0: i32) -> (i32, i32) {
    %c0_i32 = arith.constant 0 : i32
    %c0_i32_0 = arith.constant 0 : i32
    %c0_i32_1 = arith.constant 0 : i32
    return %c0_i32, %c0_i32_0 : i32, i32
  }
  func.func @transform_21(%arg0: i32) -> (i32, i32, i32) {
    %c0_i32 = arith.constant 0 : i32
    %c0_i32_0 = arith.constant 0 : i32
    %c0_i32_1 = arith.constant 0 : i32
    %c0_i32_2 = arith.constant 0 : i32
    return %c0_i32, %c0_i32_0, %c0_i32_1 : i32, i32, i32
  }
  func.func @transform_22(%arg0: i32) -> (i32, i32) {
    %c0_i32 = arith.constant 0 : i32
    %c0_i32_0 = arith.constant 0 : i32
    %c0_i32_1 = arith.constant 0 : i32
    return %c0_i32, %c0_i32_0 : i32, i32
  }
  func.func @transform_23(%arg0: i32) -> (i32, i32) {
    %c0_i32 = arith.constant 0 : i32
    %c0_i32_0 = arith.constant 0 : i32
    %c0_i32_1 = arith.constant 0 : i32
    return %c0_i32, %c0_i32_0 : i32, i32
  }
  func.func @transform_24(%arg0: i32) -> (i32, i32, i32) {
    %c0_i32 = arith.constant 0 : i32
    %c0_i32_0 = arith.constant 0 : i32
    %c0_i32_1 = arith.constant 0 : i32
    return %arg0, %c0_i32, %c0_i32_0 : i32, i32, i32
  }
}

</mosaic_0001>

<bundles_post_ra>
// kernel: autoencoder_forward.1
= control target key start
LH: loop header
LB: loop body
LE: loop exit
PB: predicated region body
PF: predicated region fallthrough
CT: control target
= control target key end

     0   :  { %s13397_s27 = smov 0   ;;  %s20233_s0 = inlined_call_operand.vmem [shape: f32[2,256,9], index: 0, kind: input, shape index: {}]   ;;  %s20234_s1 = inlined_call_operand.vmem [shape: f32[9,128], index: 1, kind: input, shape index: {}]   ;;  %s20235_s2 = inlined_call_operand.vmem [shape: f32[1,128], index: 2, kind: input, shape index: {}]   ;;  %s20236_s3 = inlined_call_operand.vmem [shape: f32[1,128], index: 3, kind: input, shape index: {}]   ;;  %s20237_s4 = inlined_call_operand.vmem [shape: f32[1,128], index: 4, kind: input, shape index: {}]   ;;  %s20238_s5 = inlined_call_operand.vmem [shape: f32[1152,64], index: 5, kind: input, shape index: {}]   ;;  %s20239_s6 = inlined_call_operand.vmem [shape: f32[1,64], index: 6, kind: input, shape index: {}]   ;;  %s20240_s7 = inlined_call_operand.vmem [shape: f32[1,64], index: 7, kind: input, shape index: {}]   ;;  %s20241_s8 = inlined_call_operand.vmem [shape: f32[1,64], index: 8, kind: input, shape index: {}]   ;;  %s20242_s9 = inlined_call_operand.vmem [shape: f32[9,64,32], index: 9, kind: input, shape index: {}]   ;;  %s20243_s10 = inlined_call_operand.vmem [shape: f32[1,32], index: 10, kind: input, shape index: {}]   ;;  %s20244_s11 = inlined_call_operand.vmem [shape: f32[1,32], index: 11, kind: input, shape index: {}]   ;;  %s20245_s12 = inlined_call_operand.vmem [shape: f32[1,32], index: 12, kind: input, shape index: {}]   ;;  %s20246_s13 = inlined_call_operand.vmem [shape: f32[32,256], index: 13, kind: input, shape index: {}]   ;;  %s20247_s14 = inlined_call_operand.vmem [shape: f32[1,64], index: 14, kind: input, shape index: {}]   ;;  %s20248_s15 = inlined_call_operand.vmem [shape: f32[4,16,4], index: 15, kind: input, shape index: {}]   ;;  %s20249_s16 = inlined_call_operand.vmem [shape: f32[64,512], index: 16, kind: input, shape index: {}]   ;;  %s20250_s17 = inlined_call_operand.vmem [shape: f32[1,128], index: 17, kind: input, shape index: {}]   ;;  %s20251_s18 = inlined_call_operand.vmem [shape: f32[4,64,16], index: 18, kind: input, shape index: {}]   ;;  %s20252_s19 = inlined_call_operand.vmem [shape: f32[128,1024], index: 19, kind: input, shape index: {}]   ;;  %s20253_s20 = inlined_call_operand.vmem [shape: f32[1,256], index: 20, kind: input, shape index: {}]   ;;  %s20254_s21 = inlined_call_operand.vmem [shape: f32[4,256,64], index: 21, kind: input, shape index: {}]   ;;  %s20255_s22 = inlined_call_operand.vmem [shape: f32[9,256], index: 22, kind: input, shape index: {}]   ;;  %s20256_s23 = inlined_call_operand.<no memory space> [shape: f32[1,1], index: 23, kind: input, shape index: {}]   ;;  %s20257_s24 = inlined_call_operand.vmem [shape: f32[2,256,1], index: 24, kind: output, shape index: {}]  }
   0x1   :  { %20429 = sst [smem:[#allocation79_spill]] %s20233_s0  ;;  %v29_v0 = vstv %s20256_s23 }
   0x2   :  { %20430 = sst [smem:[#allocation80_spill]] %s20234_s1  ;;  %30 = vst [vmem:[#allocation10] sm:$0x1] %v29_v0 }
   0x3   :  { %20431 = sst [smem:[#allocation81_spill]] %s20235_s2 }
   0x4   :  { %20432 = sst [smem:[#allocation82_spill]] %s20236_s3 }
   0x5   :  { %20433 = sst [smem:[#allocation83_spill]] %s20237_s4 }
   0x6   :  { %20434 = sst [smem:[#allocation84_spill]] %s20238_s5 }
   0x7   :  { %20435 = sst [smem:[#allocation85_spill]] %s20239_s6 }
   0x8   :  { %20436 = sst [smem:[#allocation86_spill]] %s20240_s7 }
   0x9   :  { %20437 = sst [smem:[#allocation87_spill]] %s20241_s8 }
   0xa   :  { %20438 = sst [smem:[#allocation88_spill]] %s20242_s9 }
   0xb LB: > { %s10994_s28 = sadd.s32 4294967295, %s13264_s27   ;;  %p10998_p0 = scmp.ge.s32.totalorder %s13264_s27, 1  ;;  %s13264_s27 = sphi %s13397_s27, %s36_s27  }
   0xc   : > { %p664_p1 = scmp.lt.s32.totalorder %s13264_s27, 3 }
   0xe   : > { %p665_p2 = pnand %p10998_p0, %p664_p1 }
  0x10   : > { %668 = sbr.rel (%p665_p2) target bundleno = 3476 (0xd94), region = 116 }
  0x17   : > { %s20439_s29 = sld [smem:[#allocation80_spill]]  ;;  %vm20262_vm0 = vcmask 1040384   ;;  %p730_p3 = scmp.lt.s32.totalorder %s10994_s28, 1  ;;  %vm13266_vm1 = vmmov 1   ;;  %vm781_vm3 = vcmask 72704  }
  0x18   : > { %vm12305_vm2 = vmpackc.low %vm20262_vm0, %vm13266_vm1  ;;  %s20440_s3 = sld [smem:[#allocation84_spill]]  ;;  %s20441_s26 = sld [smem:[#allocation79_spill]] }
  0x19   : > { %s21036_s28 = smov (!%p730_p3, %s10994_s28), 1  ;;  %s20445_s2 = sld [smem:[#allocation81_spill]] }
  0x1a   : > { %s20263_s4 = sshll.u32 %s21036_s28, 8  ;;  %s20446_s7 = sld [smem:[#allocation82_spill]] }
  0x1b   : > { %s20447_s8 = sld [smem:[#allocation83_spill]]  ;;  %s20482_s9 = sld [smem:[#allocation88_spill]] }
  0x1c   : > { %s20484_s23 = sld [smem:[#allocation86_spill]]  ;;  %s20485_s25 = sld [smem:[#allocation87_spill]] }
  0x1d   : > { %v772_v1 = vld [vmem:[%s20439_s29] sm:$0xff]  ;;  %v773_v2 = vld [vmem:[%s20439_s29 + $0x8] sm:$0x1]  ;;  %s13268_s1 = smov 64  }
  0x1e   : > { %v12304_v3 = vpack.c.bf16 %v773_v2, %v772_v1  ;;  %v1693_v4 = vld [vmem:[%s20440_s3 + $0x80] sm:$0xff]  ;;  %v1694_v5 = vld [vmem:[%s20440_s3 + $0x88] sm:$0xff]  ;;  %s13426_s6 = scalar_lea.vmem %s20441_s26, %s20263_s4  ;;  %v1695_v42 = vld [vmem:[%s20440_s3 + $0x90] sm:$0xff]  ;;  %s20483_s26 = sld [smem:[#allocation85_spill]] }
  0x1f   : > { %v12310_v6 = vpack.c.bf16 %v1694_v5, %v1693_v4  ;;  %v740_v7 = vld [vmem:[%s13426_s6] sm:$0xff]  ;;  %v741_v8 = vld [vmem:[%s13426_s6 + $0x8] sm:$0xff]  ;;  %v742_v9 = vld [vmem:[%s13426_s6 + $0x10] sm:$0xff]  ;;  %s20760_s4 = sshll.u32 %s21036_s28, 8 }
  0x20   : > { %12306 = vmatprep.subr.msk.bf16.mxu0 %vm12305_vm2, %v12304_v3  ;;  %11957 = vmatprep.mubr.msk.f32.mxu0 %vm781_vm3, %v740_v7  ;;  %v743_v10 = vld [vmem:[%s13426_s6 + $0x18] sm:$0xff]  ;;  %v744_v11 = vld [vmem:[%s13426_s6 + $0x20] sm:$0xff]  ;;  %v745_v12 = vld [vmem:[%s13426_s6 + $0x28] sm:$0xff] }
  0x21   : > { %12309 = vmatpush3.bf16.msk.msra.mxu0 %vm12305_vm2, %v12304_v3  ;;  %12311 = vmatprep.subr.bf16.mxu1 %v12310_v6  ;;  %v746_v13 = vld [vmem:[%s13426_s6 + $0x30] sm:$0xff]  ;;  %v747_v14 = vld [vmem:[%s13426_s6 + $0x38] sm:$0xff]  ;;  %v748_v15 = vld [vmem:[%s13426_s6 + $0x40] sm:$0xff] }
  0x22   : > { %v749_v16 = vld [vmem:[%s13426_s6 + $0x48] sm:$0xff]  ;;  %v750_v17 = vld [vmem:[%s13426_s6 + $0x50] sm:$0xff]  ;;  %v751_v18 = vld [vmem:[%s13426_s6 + $0x58] sm:$0xff] }
  0x23   : > { %v752_v19 = vld [vmem:[%s13426_s6 + $0x60] sm:$0xff]  ;;  %v753_v20 = vld [vmem:[%s13426_s6 + $0x68] sm:$0xff]  ;;  %v754_v21 = vld [vmem:[%s13426_s6 + $0x70] sm:$0xff] }
  0x24   : > { %11958 = vmatmul.mubr.msk.f32.vlgmr.msra.gmra.mrb[0].mxu0 %vm781_vm3, %v741_v8  ;;  %v755_v22 = vld [vmem:[%s13426_s6 + $0x78] sm:$0xff]  ;;  %v756_v23 = vld [vmem:[%s13426_s6 + $0x80] sm:$0xff]  ;;  %v757_v24 = vld [vmem:[%s13426_s6 + $0x88] sm:$0xff] }
  0x25   : > { %11960 = vmatprep.mubr.msk.f32.mxu0 %vm781_vm3, %v742_v9  ;;  %v758_v25 = vld [vmem:[%s13426_s6 + $0x90] sm:$0xff]  ;;  %v759_v26 = vld [vmem:[%s13426_s6 + $0x98] sm:$0xff]  ;;  %v760_v27 = vld [vmem:[%s13426_s6 + $0xa0] sm:$0xff] }
  0x26   : > { %v761_v28 = vld [vmem:[%s13426_s6 + $0xa8] sm:$0xff]  ;;  %v762_v29 = vld [vmem:[%s13426_s6 + $0xb0] sm:$0xff]  ;;  %v763_v30 = vld [vmem:[%s13426_s6 + $0xb8] sm:$0xff] }
  0x27   : > { %v764_v31 = vld [vmem:[%s13426_s6 + $0xc0] sm:$0xff]  ;;  %v765_v32 = vld [vmem:[%s13426_s6 + $0xc8] sm:$0xff]  ;;  %v766_v33 = vld [vmem:[%s13426_s6 + $0xd0] sm:$0xff] }
  0x28   : > { %11961 = vmatmul.mubr.msk.f32.gmra.mrb[2].mxu0 %vm781_vm3, %v743_v10  ;;  %v767_v34 = vld [vmem:[%s13426_s6 + $0xd8] sm:$0xff]  ;;  %v768_v35 = vld [vmem:[%s13426_s6 + $0xe0] sm:$0xff]  ;;  %v769_v36 = vld [vmem:[%s13426_s6 + $0xe8] sm:$0xff] }
  0x29   : > { %11963 = vmatprep.mubr.msk.f32.mxu0 %vm781_vm3, %v744_v11  ;;  %v770_v37 = vld [vmem:[%s13426_s6 + $0xf0] sm:$0xff]  ;;  %v771_v38 = vld [vmem:[%s13426_s6 + $0xf8] sm:$0xff]  ;;  %v1677_v39 = vld [vmem:[%s20440_s3] sm:$0xff] }
  0x2a   : > { %v1678_v40 = vld [vmem:[%s20440_s3 + $0x8] sm:$0xff]  ;;  %v1696_v43 = vld [vmem:[%s20440_s3 + $0x98] sm:$0xff]  ;;  %v1679_v45 = vld [vmem:[%s20440_s3 + $0x10] sm:$0xff] }
  0x2b   : > { %v12312_v41 = vpack.c.bf16 %v1678_v40, %v1677_v39  ;;  %v12314_v44 = vpack.c.bf16 %v1696_v43, %v1695_v42  ;;  %v1680_v46 = vld [vmem:[%s20440_s3 + $0x18] sm:$0xff]  ;;  %v1697_v48 = vld [vmem:[%s20440_s3 + $0xa0] sm:$0xff]  ;;  %v1698_v49 = vld [vmem:[%s20440_s3 + $0xa8] sm:$0xff] }
  0x2c   : > { %11964 = vmatmul.mubr.msk.f32.gmra.mrb[4].mxu0 %vm781_vm3, %v745_v12  ;;  %v12316_v47 = vpack.c.bf16 %v1680_v46, %v1679_v45  ;;  %v12318_v50 = vpack.c.bf16 %v1698_v49, %v1697_v48  ;;  %v1681_v51 = vld [vmem:[%s20440_s3 + $0x20] sm:$0xff]  ;;  %v1682_v52 = vld [vmem:[%s20440_s3 + $0x28] sm:$0xff]  ;;  %v1699_v54 = vld [vmem:[%s20440_s3 + $0xb0] sm:$0xff] }
  0x2d   : > { %11966 = vmatprep.mubr.msk.f32.mxu0 %vm781_vm3, %v746_v13  ;;  %12313 = vmatpush3.bf16.msra.mxu1 %v12312_v41  ;;  %v12320_v53 = vpack.c.bf16 %v1682_v52, %v1681_v51  ;;  %v1700_v55 = vld [vmem:[%s20440_s3 + $0xb8] sm:$0xff]  ;;  %v1683_v57 = vld [vmem:[%s20440_s3 + $0x30] sm:$0xff]  ;;  %v1701_v60 = vld [vmem:[%s20440_s3 + $0xc0] sm:$0xff] }
  0x2e   : > { %12315 = vmatprep.subr.bf16.mxu1 %v12314_v44  ;;  %v12322_v56 = vpack.c.bf16 %v1700_v55, %v1699_v54  ;;  %v1684_v58 = vld [vmem:[%s20440_s3 + $0x38] sm:$0xff]  ;;  %v1702_v61 = vld [vmem:[%s20440_s3 + $0xc8] sm:$0xff]  ;;  %v1685_v63 = vld [vmem:[%s20440_s3 + $0x40] sm:$0xff] }
  0x2f   : > { %v12324_v59 = vpack.c.bf16 %v1684_v58, %v1683_v57  ;;  %v12326_v62 = vpack.c.bf16 %v1702_v61, %v1701_v60  ;;  %v1686_v0 = vld [vmem:[%s20440_s3 + $0x48] sm:$0xff]  ;;  %v1757_v1 = vld [vmem:[%s20440_s3 + $0x280] sm:$0xff]  ;;  %v1703_v8 = vld [vmem:[%s20440_s3 + $0xd0] sm:$0xff] }
  0x30   : > { %11967 = vmatmul.mubr.msk.f32.gmra.mrb[6].mxu0 %vm781_vm3, %v747_v14  ;;  %v1758_v2 = vld [vmem:[%s20440_s3 + $0x288] sm:$0xff]  ;;  %v12328_v3 = vpack.c.bf16 %v1686_v0, %v1685_v63  ;;  %v1741_v5 = vld [vmem:[%s20440_s3 + $0x200] sm:$0xff]  ;;  %v1704_v9 = vld [vmem:[%s20440_s3 + $0xd8] sm:$0xff] }
  0x31   : > { %11969 = vmatprep.mubr.msk.f32.mxu0 %vm781_vm3, %v748_v15  ;;  %12317 = vmatpush3.bf16.msra.mxu1 %v12316_v47  ;;  %v12374_v4 = vpack.c.bf16 %v1758_v2, %v1757_v1  ;;  %v1742_v6 = vld [vmem:[%s20440_s3 + $0x208] sm:$0xff]  ;;  %v12330_v10 = vpack.c.bf16 %v1704_v9, %v1703_v8  ;;  %v1687_v11 = vld [vmem:[%s20440_s3 + $0x50] sm:$0xff]  ;;  %v1688_v12 = vld [vmem:[%s20440_s3 + $0x58] sm:$0xff] }
  0x32   : > { %12319 = vmatprep.subr.bf16.mxu1 %v12318_v50  ;;  %v12376_v7 = vpack.c.bf16 %v1742_v6, %v1741_v5  ;;  %v1759_v13 = vld [vmem:[%s20440_s3 + $0x290] sm:$0xff]  ;;  %v1760_v14 = vld [vmem:[%s20440_s3 + $0x298] sm:$0xff]  ;;  %v12332_v15 = vpack.c.bf16 %v1688_v12, %v1687_v11  ;;  %v1765_v49 = vld [vmem:[%s20440_s3 + $0x2c0] sm:$0xff] }
  0x33   : > { %12375 = vmatprep.subr.bf16.mxu0 %v12374_v4  ;;  %v1763_v39 = vld [vmem:[%s20440_s3 + $0x2b0] sm:$0xff]  ;;  %v1764_v40 = vld [vmem:[%s20440_s3 + $0x2b8] sm:$0xff]  ;;  %v1766_v50 = vld [vmem:[%s20440_s3 + $0x2c8] sm:$0xff] }
  0x34   : > { %11970 = vmatmul.mubr.msk.f32.gmra.mrb[8].mxu0 %vm781_vm3, %v749_v16  ;;  %v12378_v16 = vpack.c.bf16 %v1760_v14, %v1759_v13  ;;  %v12386_v43 = vpack.c.bf16 %v1764_v40, %v1763_v39  ;;  %v1747_v44 = vld [vmem:[%s20440_s3 + $0x230] sm:$0xff]  ;;  %v1748_v45 = vld [vmem:[%s20440_s3 + $0x238] sm:$0xff]  ;;  %v12390_v52 = vpack.c.bf16 %v1766_v50, %v1765_v49  ;;  %v1750_v54 = vld [vmem:[%s20440_s3 + $0x248] sm:$0xff] }
  0x35   : > { %11972 = vmatprep.mubr.msk.f32.mxu0 %vm781_vm3, %v750_v17  ;;  %12321 = vmatpush3.bf16.msra.mxu1 %v12320_v53  ;;  %v1743_v17 = vld [vmem:[%s20440_s3 + $0x210] sm:$0xff]  ;;  %v12388_v46 = vpack.c.bf16 %v1748_v45, %v1747_v44  ;;  %v1749_v53 = vld [vmem:[%s20440_s3 + $0x240] sm:$0xff]  ;;  %v1768_v57 = vld [vmem:[%s20440_s3 + $0x2d8] sm:$0xff] }
  0x36   : > { %12323 = vmatprep.subr.bf16.mxu1 %v12322_v56  ;;  %12377 = vmatpush3.bf16.msra.mxu0 %v12376_v7  ;;  %v12392_v55 = vpack.c.bf16 %v1750_v54, %v1749_v53  ;;  %v1767_v56 = vld [vmem:[%s20440_s3 + $0x2d0] sm:$0xff]  ;;  %v1752_v60 = vld [vmem:[%s20440_s3 + $0x258] sm:$0xff]  ;;  %v1770_v63 = vld [vmem:[%s20440_s3 + $0x2e8] sm:$0xff] }
  0x37   : > { %12379 = vmatprep.subr.bf16.mxu0 %v12378_v16  ;;  %v12394_v58 = vpack.c.bf16 %v1768_v57, %v1767_v56  ;;  %v1753_v1 = vld [vmem:[%s20440_s3 + $0x260] sm:$0xff]  ;;  %v1754_v2 = vld [vmem:[%s20440_s3 + $0x268] sm:$0xff]  ;;  %v1771_v4 = vld [vmem:[%s20440_s3 + $0x2f0] sm:$0xff] }
  0x38   : > { %11973 = vmatmul.mubr.msk.f32.gmra.mrb[10].mxu0 %vm781_vm3, %v751_v18  ;;  %v1744_v18 = vld [vmem:[%s20440_s3 + $0x218] sm:$0xff]  ;;  %v1755_v7 = vld [vmem:[%s20440_s3 + $0x270] sm:$0xff]  ;;  %v1726_v11 = vld [vmem:[%s20440_s3 + $0x188] sm:$0xff] }
  0x39   : > { %11975 = vmatprep.mubr.msk.f32.mxu0 %vm781_vm3, %v752_v19  ;;  %12325 = vmatpush3.bf16.msra.mxu1 %v12324_v59  ;;  %v12380_v19 = vpack.c.bf16 %v1744_v18, %v1743_v17  ;;  %v1751_v59 = vld [vmem:[%s20440_s3 + $0x250] sm:$0xff]  ;;  %v1772_v5 = vld [vmem:[%s20440_s3 + $0x2f8] sm:$0xff]  ;;  %v1709_v13 = vld [vmem:[%s20440_s3 + $0x100] sm:$0xff] }
  0x3a   : > { %12327 = vmatprep.subr.bf16.mxu1 %v12326_v62  ;;  %v12396_v61 = vpack.c.bf16 %v1752_v60, %v1751_v59  ;;  %v1769_v62 = vld [vmem:[%s20440_s3 + $0x2e0] sm:$0xff]  ;;  %v12402_v6 = vpack.c.bf16 %v1772_v5, %v1771_v4  ;;  %v1756_v8 = vld [vmem:[%s20440_s3 + $0x278] sm:$0xff]  ;;  %v1710_v14 = vld [vmem:[%s20440_s3 + $0x108] sm:$0xff] }
  0x3b   : > { %12381 = vmatpush3.bf16.msra.mxu0 %v12380_v19  ;;  %v12398_v0 = vpack.c.bf16 %v1770_v63, %v1769_v62  ;;  %v12404_v9 = vpack.c.bf16 %v1756_v8, %v1755_v7  ;;  %v1727_v16 = vld [vmem:[%s20440_s3 + $0x190] sm:$0xff]  ;;  %v1728_v17 = vld [vmem:[%s20440_s3 + $0x198] sm:$0xff]  ;;  %v1717_v40 = vld [vmem:[%s20440_s3 + $0x140] sm:$0xff] }
  0x3c   : > { %11976 = vmatmul.mubr.msk.f32.gmra.mrb[12].mxu0 %vm781_vm3, %v753_v20  ;;  %v1705_v20 = vld [vmem:[%s20440_s3 + $0xe0] sm:$0xff]  ;;  %v12346_v18 = vpack.c.bf16 %v1728_v17, %v1727_v16  ;;  %v1711_v19 = vld [vmem:[%s20440_s3 + $0x110] sm:$0xff]  ;;  %v1736_v45 = vld [vmem:[%s20440_s3 + $0x1d8] sm:$0xff] }
  0x3d   : > { %11978 = vmatprep.mubr.msk.f32.mxu0 %vm781_vm3, %v754_v21  ;;  %12329 = vmatpush3.bf16.msra.mxu1 %v12328_v3  ;;  %v1706_v21 = vld [vmem:[%s20440_s3 + $0xe8] sm:$0xff]  ;;  %v12400_v3 = vpack.c.bf16 %v1754_v2, %v1753_v1  ;;  %v1735_v44 = vld [vmem:[%s20440_s3 + $0x1d0] sm:$0xff]  ;;  %v1720_v49 = vld [vmem:[%s20440_s3 + $0x158] sm:$0xff] }
  0x3e   : > { %12331 = vmatprep.subr.bf16.mxu1 %v12330_v10  ;;  %v1725_v10 = vld [vmem:[%s20440_s3 + $0x180] sm:$0xff]  ;;  %v1738_v53 = vld [vmem:[%s20440_s3 + $0x1e8] sm:$0xff]  ;;  %v1740_v59 = vld [vmem:[%s20440_s3 + $0x1f8] sm:$0xff] }
  0x3f   : > { %v12342_v12 = vpack.c.bf16 %v1726_v11, %v1725_v10  ;;  %v1722_v56 = vld [vmem:[%s20440_s3 + $0x168] sm:$0xff]  ;;  %v1724_v62 = vld [vmem:[%s20440_s3 + $0x178] sm:$0xff]  ;;  %v13809_v7 = vld [vmem:[%s20446_s7] ss:$0 sm:$0xff] }
  0x40   : > { %11979 = vmatmul.mubr.msk.f32.gmra.mrb[14].mxu0 %vm781_vm3, %v755_v22  ;;  %v12334_v22 = vpack.c.bf16 %v1706_v21, %v1705_v20  ;;  %v1712_v20 = vld [vmem:[%s20440_s3 + $0x118] sm:$0xff]  ;;  %v1790_v1 = vld [vmem:[%s20440_s3 + $0x388] sm:$0xff]  ;;  %v13815_v10 = vld [vmem:[%s20447_s8] ss:$0 sm:$0xff] }
  0x41   : > { %11981 = vmatprep.mubr.msk.f32.mxu0 %vm781_vm3, %v756_v23  ;;  %12333 = vmatpush3.bf16.msra.mxu1 %v12332_v15  ;;  %v1689_v23 = vld [vmem:[%s20440_s3 + $0x60] sm:$0xff]  ;;  %v12344_v15 = vpack.c.bf16 %v1710_v14, %v1709_v13  ;;  %v12348_v21 = vpack.c.bf16 %v1712_v20, %v1711_v19 }
  0x42   : > { %12335 = vmatprep.subr.bf16.mxu1 %v12334_v22  ;;  %v1729_v22 = vld [vmem:[%s20440_s3 + $0x1a0] sm:$0xff] }
  0x44   : > { %11982 = vmatmul.mubr.msk.f32.gmra.mrb[16].mxu0 %vm781_vm3, %v757_v24  ;;  %v1690_v24 = vld [vmem:[%s20440_s3 + $0x68] sm:$0xff] }
  0x45   : > { %11984 = vmatprep.mubr.msk.f32.mxu0 %vm781_vm3, %v758_v25  ;;  %v1761_v25 = vld [vmem:[%s20440_s3 + $0x2a0] sm:$0xff] }
  0x48   : > { %11985 = vmatmul.mubr.msk.f32.gmra.mrb[18].mxu0 %vm781_vm3, %v759_v26  ;;  %v1762_v26 = vld [vmem:[%s20440_s3 + $0x2a8] sm:$0xff] }
  0x49   : > { %11987 = vmatprep.mubr.msk.f32.mxu0 %vm781_vm3, %v760_v27  ;;  %v12336_v27 = vpack.c.bf16 %v1690_v24, %v1689_v23  ;;  %v1730_v23 = vld [vmem:[%s20440_s3 + $0x1a8] sm:$0xff] }
  0x4a   : > { %v12350_v24 = vpack.c.bf16 %v1730_v23, %v1729_v22 }
  0x4b   : > { %12337 = vmatpush3.bf16.msra.mxu1 %v12336_v27 }
  0x4c   : > { %11988 = vmatmul.mubr.msk.f32.gmra.mrb[20].mxu0 %vm781_vm3, %v761_v28  ;;  %v13267_v28 = vmov 0.0  }
  0x4d   : > { %11990 = vmatprep.mubr.msk.f32.mxu0 %vm781_vm3, %v762_v29  ;;  %1249 = vst [vmem:[#allocation3] sm:$0xff] %v13267_v28  ;;  %1250 = vst [vmem:[#allocation3 + $0x8] sm:$0x1] %v13267_v28  ;;  %v12382_v29 = vpack.c.bf16 %v1762_v26, %v1761_v25  ;;  %v1713_v25 = vld [vmem:[%s20440_s3 + $0x120] sm:$0xff]  ;;  %v1714_v26 = vld [vmem:[%s20440_s3 + $0x128] sm:$0xff] }
  0x4e   : > { %1251 = vst [vmem:[#allocation3 + $0x49] sm:$0xff] %v13267_v28  ;;  %1252 = vst [vmem:[#allocation3 + $0x51] sm:$0x1] %v13267_v28  ;;  %v12352_v27 = vpack.c.bf16 %v1714_v26, %v1713_v25 }
  0x4f   : > { %7025 = vst [vmem:[#allocation9] sm:$0xff] %v13267_v28  ;;  %7026 = vst [vmem:[#allocation9 + $0x8] sm:$0xff] %v13267_v28  ;;  %12383 = vmatprep.subr.bf16.mxu0 %v12382_v29  ;;  %v1732_v29 = vld [vmem:[%s20440_s3 + $0x1b8] sm:$0xff] }
  0x50   : > { %11991 = vmatmul.mubr.msk.f32.gmra.mrb[22].mxu0 %vm781_vm3, %v763_v30  ;;  %7029 = vst [vmem:[#allocation9 + $0x20] sm:$0x1] %v13267_v28  ;;  %7030 = vst [vmem:[#allocation9 + $0x28] sm:$0x1] %v13267_v28  ;;  %v1745_v30 = vld [vmem:[%s20440_s3 + $0x220] sm:$0xff] }
  0x51   : > { %11993 = vmatprep.mubr.msk.f32.mxu0 %vm781_vm3, %v764_v31  ;;  %7031 = vst [vmem:[#allocation9 + $0x220] sm:$0xfe] %v13267_v28  ;;  %7032 = vst [vmem:[#allocation9 + $0x228] sm:$0xfe] %v13267_v28  ;;  %v1746_v31 = vld [vmem:[%s20440_s3 + $0x228] sm:$0xff] }
  0x52   : > { %7035 = vst [vmem:[#allocation9 + $0x240] sm:$0x3] %v13267_v28  ;;  %7036 = vst [vmem:[#allocation9 + $0x248] sm:$0x3] %v13267_v28 }
  0x54   : > { %11994 = vmatmul.mubr.msk.f32.gmra.mrb[24].mxu0 %vm781_vm3, %v765_v32  ;;  %v12384_v32 = vpack.c.bf16 %v1746_v31, %v1745_v30  ;;  %v1413_v48 = vld [vmem:[#allocation3 + $0x1] sm:$0xff] }
  0x55   : > { %11996 = vmatprep.mubr.msk.f32.mxu0 %vm781_vm3, %v766_v33  ;;  %v1707_v33 = vld [vmem:[%s20440_s3 + $0xf0] sm:$0xff]  ;;  %1892 = vmatprep.mubr.f32.mxu1 %v1413_v48  ;;  %v1805_v31 = vld [vmem:[%s20440_s3 + $0x400] sm:$0xff] }
  0x56   : > { %12385 = vmatpush3.bf16.msra.mxu0 %v12384_v32  ;;  %v1806_v32 = vld [vmem:[%s20440_s3 + $0x408] sm:$0xff]  ;;  %v1719_v48 = vld [vmem:[%s20440_s3 + $0x150] sm:$0xff]  ;;  %v14362_v51 = vld [vmem:[#allocation3] sm:$0xff] }
  0x57   : > { %12387 = vmatprep.subr.bf16.mxu0 %v12386_v43  ;;  %v12364_v50 = vpack.c.bf16 %v1720_v49, %v1719_v48 }
  0x58   : > { %11997 = vmatmul.mubr.msk.f32.gmra.mrb[26].mxu0 %vm781_vm3, %v767_v34  ;;  %v1708_v34 = vld [vmem:[%s20440_s3 + $0xf8] sm:$0xff] }
  0x59   : > { %11999 = vmatprep.mubr.msk.f32.mxu0 %vm781_vm3, %v768_v35  ;;  %v1348_v35 = vlaneseq }
  0x5a   : > { %12389 = vmatpush3.bf16.msra.mxu0 %v12388_v46  ;;  %v12362_v46 = vpack.c.bf16 %v1736_v45, %v1735_v44 }
  0x5b   : > { %v13624_v42 = vshrl.u32 %v1348_v35, 7  ;;  %12391 = vmatprep.subr.bf16.mxu0 %v12390_v52  ;;  %v1716_v35 = vld [vmem:[%s20440_s3 + $0x138] sm:$0xff]  ;;  %v1737_v52 = vld [vmem:[%s20440_s3 + $0x1e0] sm:$0xff] }
  0x5c   : > { %12000 = vmatmul.mubr.msk.f32.gmra.mrb[28].mxu0 %vm781_vm3, %v769_v36  ;;  %v12338_v36 = vpack.c.bf16 %v1708_v34, %v1707_v33  ;;  %v1715_v33 = vld [vmem:[%s20440_s3 + $0x130] sm:$0xff]  ;;  %v13740_v34 = vpack.c.bf16 %v1806_v32, %v1805_v31  ;;  %v12366_v54 = vpack.c.bf16 %v1738_v53, %v1737_v52 }
  0x5d   : > { %12002 = vmatprep.mubr.msk.f32.mxu0 %vm781_vm3, %v770_v37  ;;  %v1691_v37 = vld [vmem:[%s20440_s3 + $0x70] sm:$0xff]  ;;  %20442 = vst [vmem:[#allocation11_spill] sm:$0xff] %v13624_v42  ;;  %v1357_v47 = vand.u32 7, %v13624_v42 }
  0x5e   : > { %12339 = vmatprep.subr.bf16.mxu1 %v12338_v36  ;;  %12393 = vmatpush3.bf16.msra.mxu0 %v12392_v55  ;;  %v12356_v36 = vpack.c.bf16 %v1716_v35, %v1715_v33  ;;  %v1721_v55 = vld [vmem:[%s20440_s3 + $0x160] sm:$0xff] }
  0x5f   : > { %vm13641_vm4 = vcmp.ge.s32.totalorder %v1357_v47, 1  ;;  %12395 = vmatprep.subr.bf16.mxu0 %v12394_v58  ;;  %v12368_v57 = vpack.c.bf16 %v1722_v56, %v1721_v55  ;;  %v1739_v58 = vld [vmem:[%s20440_s3 + $0x1f0] sm:$0xff]  ;;  %vm13896_vm6 = vcmp.le.s32.totalorder %v1357_v47, 6  ;;  %v1808_v47 = vld [vmem:[%s20440_s3 + $0x418] sm:$0xff] }
  0x60   : > { %12003 = vmatmul.mubr.msk.f32.gmra.mrb[30].mxu0 %vm781_vm3, %v771_v38  ;;  %v1692_v38 = vld [vmem:[%s20440_s3 + $0x78] sm:$0xff]  ;;  %v12370_v60 = vpack.c.bf16 %v1740_v59, %v1739_v58 }
  0x61   : > { %v12340_v41 = vpack.c.bf16 %v1692_v38, %v1691_v37  ;;  %v1733_v37 = vld [vmem:[%s20440_s3 + $0x1c0] sm:$0xff]  ;;  %v1734_v38 = vld [vmem:[%s20440_s3 + $0x1c8] sm:$0xff] }
  0x62   : > { %12397 = vmatpush3.bf16.msra.mxu0 %v12396_v61  ;;  %v12358_v39 = vpack.c.bf16 %v1734_v38, %v1733_v37  ;;  %v1723_v61 = vld [vmem:[%s20440_s3 + $0x170] sm:$0xff] }
  0x63   : > { %12341 = vmatpush3.bf16.msra.mxu1 %v12340_v41  ;;  %12399 = vmatprep.subr.bf16.mxu0 %v12398_v0  ;;  %v1718_v41 = vld [vmem:[%s20440_s3 + $0x148] sm:$0xff]  ;;  %v12372_v63 = vpack.c.bf16 %v1724_v62, %v1723_v61  ;;  %v1789_v0 = vld [vmem:[%s20440_s3 + $0x380] sm:$0xff] }
  0x64   : > { %12343 = vmatprep.subr.bf16.mxu1 %v12342_v12  ;;  %v12360_v43 = vpack.c.bf16 %v1718_v41, %v1717_v40  ;;  %v12406_v2 = vpack.c.bf16 %v1790_v1, %v1789_v0 }
  0x66   : > { %11481 = vmatmul.mubr.msk.f32.vlgmr.msra.gmra.mrb[0].mxu1 %vm13641_vm4, %v13267_v28  ;;  %12401 = vmatpush3.bf16.msra.mxu0 %v12400_v3  ;;  %v1731_v28 = vld [vmem:[%s20440_s3 + $0x1b0] sm:$0xff]  ;;  %v13803_v3 = vld [vmem:[%s20445_s2] ss:$0 sm:$0xff]  ;;  %s17901_s2 = scalar_lea.vmem %s20257_s24, %s20760_s4 }
  0x67   : > { %12403 = vmatprep.subr.bf16.mxu0 %v12402_v6  ;;  %12345 = vmatpush3.bf16.msra.mxu1 %v12344_v15  ;;  %v12354_v30 = vpack.c.bf16 %v1732_v29, %v1731_v28 }
  0x68   : > { %12347 = vmatprep.subr.bf16.mxu1 %v12346_v18 }
  0x6a   : > { %12405 = vmatpush3.bf16.msra.mxu0 %v12404_v9 }
  0x6b   : > { %12349 = vmatpush3.bf16.msra.mxu1 %v12348_v21  ;;  %12439 = vmatprep.subr.bf16.mxu0 %v13740_v34 }
  0x6c   : > { %12351 = vmatprep.subr.bf16.mxu1 %v12350_v24 }
  0x6f   : > { %12353 = vmatpush3.bf16.msra.mxu1 %v12352_v27 }
  0x70   : > { %12355 = vmatprep.subr.bf16.mxu1 %v12354_v30 }
  0x73   : > { %12357 = vmatpush3.bf16.msra.mxu1 %v12356_v36 }
  0x74   : > { %12359 = vmatprep.subr.bf16.mxu1 %v12358_v39 }
  0x77   : > { %12361 = vmatpush3.bf16.msra.mxu1 %v12360_v43 }
  0x78   : > { %12363 = vmatprep.subr.bf16.mxu1 %v12362_v46 }
  0x7b   : > { %12365 = vmatpush3.bf16.msra.mxu1 %v12364_v50 }
  0x7c   : > { %12367 = vmatprep.subr.bf16.mxu1 %v12366_v54 }
  0x7f   : > { %12369 = vmatpush3.bf16.msra.mxu1 %v12368_v57 }
  0x80   : > { %12371 = vmatprep.subr.bf16.mxu1 %v12370_v60 }
  0x83   : > { %12373 = vmatpush3.bf16.msra.mxu1 %v12372_v63 }
  0x84   : > { %12407 = vmatprep.subr.bf16.mxu1 %v12406_v2 }
  0xf7   : > { %v11959_v4 = vpop.f32.mrb[0].mxu0 }
  0xf8   : > { %v954_v5 = vadd.f32 %v11959_v4, %v13803_v3  ;;  %v948_v6 = vpop.f32.mrb[1].mxu0 }
  0xf9   : > { %v949_v8 = vadd.f32 %v13803_v3, %v948_v6 }
  0xfa   : > { %v1108_v9 = vmax.f32 %v954_v5, 0.0 }
  0xfb   : > { %v1107_v11 = vmax.f32 %v949_v8, 0.0  ;;  %v11962_v12 = vpop.f32.mrb[2].mxu0  ;;  %v13847_v8 = vadd.s32 8, %v13624_v42 }
  0xfc   : > { %v1147_v13 = vmul.f32 %v13809_v7, %v1108_v9  ;;  %v964_v14 = vadd.f32 %v11962_v12, %v13803_v3  ;;  %v958_v15 = vpop.f32.mrb[3].mxu0 }
  0xfd   : > { %v1146_v16 = vmul.f32 %v13809_v7, %v1107_v11  ;;  %v959_v17 = vadd.f32 %v13803_v3, %v958_v15 }
  0xfe   : > { %v1186_v18 = vadd.f32 %v13815_v10, %v1147_v13  ;;  %v1110_v19 = vmax.f32 %v964_v14, 0.0 }
  0xff   : > { %v1185_v20 = vadd.f32 %v13815_v10, %v1146_v16  ;;  %v1109_v21 = vmax.f32 %v959_v17, 0.0  ;;  %v11965_v22 = vpop.f32.mrb[4].mxu0 }
 0x100   : > { %1218 = vst [vmem:[#allocation2 + $0x8] sm:$0xff] %v1186_v18  ;;  %v1149_v23 = vmul.f32 %v13809_v7, %v1110_v19  ;;  %v974_v24 = vadd.f32 %v11965_v22, %v13803_v3  ;;  %v968_v25 = vpop.f32.mrb[5].mxu0 }
 0x101   : > { %1217 = vst [vmem:[#allocation2] sm:$0xff] %v1185_v20  ;;  %v1148_v26 = vmul.f32 %v13809_v7, %v1109_v21  ;;  %v969_v27 = vadd.f32 %v13803_v3, %v968_v25  ;;  %v1358_v21 = vand.u32 7, %v13847_v8 }
 0x102   : > { %v1188_v28 = vadd.f32 %v13815_v10, %v1149_v23  ;;  %v1112_v29 = vmax.f32 %v974_v24, 0.0 }
 0x103   : > { %v1187_v30 = vadd.f32 %v13815_v10, %v1148_v26  ;;  %v1111_v31 = vmax.f32 %v969_v27, 0.0  ;;  %v11968_v32 = vpop.f32.mrb[6].mxu0  ;;  %vm13868_vm5 = vcmp.ge.s32.totalorder %v1358_v21, 1  ;;  %vm13952_vm8 = vcmp.le.s32.totalorder %v1358_v21, 6  ;;  %v1812_v21 = vld [vmem:[%s20440_s3 + $0x438] sm:$0xff] }
 0x104   : > { %1220 = vst [vmem:[#allocation2 + $0x18] sm:$0xff] %v1188_v28  ;;  %v1151_v33 = vmul.f32 %v13809_v7, %v1112_v29  ;;  %v984_v35 = vadd.f32 %v11968_v32, %v13803_v3  ;;  %v978_v36 = vpop.f32.mrb[7].mxu0 }
 0x105   : > { %1219 = vst [vmem:[#allocation2 + $0x10] sm:$0xff] %v1187_v30  ;;  %v1150_v37 = vmul.f32 %v13809_v7, %v1111_v31  ;;  %v979_v38 = vadd.f32 %v13803_v3, %v978_v36 }
 0x106   : > { %v1190_v39 = vadd.f32 %v13815_v10, %v1151_v33  ;;  %v1114_v40 = vmax.f32 %v984_v35, 0.0 }
 0x107   : > { %v1189_v41 = vadd.f32 %v13815_v10, %v1150_v37  ;;  %v1113_v43 = vmax.f32 %v979_v38, 0.0  ;;  %v11971_v44 = vpop.f32.mrb[8].mxu0 }
 0x108   : > { %1222 = vst [vmem:[#allocation2 + $0x28] sm:$0xff] %v1190_v39  ;;  %v1153_v45 = vmul.f32 %v13809_v7, %v1114_v40  ;;  %v994_v46 = vadd.f32 %v11971_v44, %v13803_v3  ;;  %v988_v48 = vpop.f32.mrb[9].mxu0  ;;  %v1253_v54 = vld [vmem:[#allocation2] ss:$2 sm:$0xff]  ;;  %v1285_v55 = vld [vmem:[#allocation2 + $0x1] ss:$2 sm:$0xff] }
 0x109   : > { %1221 = vst [vmem:[#allocation2 + $0x20] sm:$0xff] %v1189_v41  ;;  %v1152_v49 = vmul.f32 %v13809_v7, %v1113_v43  ;;  %v989_v50 = vadd.f32 %v13803_v3, %v988_v48  ;;  %v1316_v2 = vmax.f32 %v1253_v54, %v1285_v55  ;;  %v13873_v40 = vadd.s32 16, %v13624_v42 }
 0x10a   : > { %v1192_v52 = vadd.f32 %v13815_v10, %v1153_v45  ;;  %v1116_v53 = vmax.f32 %v994_v46, 0.0 }
 0x10b   : > { %v1191_v56 = vadd.f32 %v13815_v10, %v1152_v49  ;;  %v1115_v57 = vmax.f32 %v989_v50, 0.0  ;;  %v11974_v58 = vpop.f32.mrb[10].mxu0 }
 0x10c   : > { %1224 = vst [vmem:[#allocation2 + $0x38] sm:$0xff] %v1192_v52  ;;  %v1155_v59 = vmul.f32 %v13809_v7, %v1116_v53  ;;  %v1004_v60 = vadd.f32 %v11974_v58, %v13803_v3  ;;  %v998_v61 = vpop.f32.mrb[11].mxu0  ;;  %v1255_v62 = vld [vmem:[#allocation2 + $0x10] ss:$2 sm:$0xff]  ;;  %v1287_v63 = vld [vmem:[#allocation2 + $0x11] ss:$2 sm:$0xff] }
 0x10d   : > { %1223 = vst [vmem:[#allocation2 + $0x30] sm:$0xff] %v1191_v56  ;;  %v1154_v0 = vmul.f32 %v13809_v7, %v1115_v57  ;;  %v999_v1 = vadd.f32 %v13803_v3, %v998_v61  ;;  %v1317_v4 = vmax.f32 %v1255_v62, %v1287_v63  ;;  %v1359_v56 = vand.u32 7, %v13873_v40 }
 0x10e   : > { %v1194_v5 = vadd.f32 %v13815_v10, %v1155_v59  ;;  %v1118_v6 = vmax.f32 %v1004_v60, 0.0 }
 0x10f   : > { %v1193_v9 = vadd.f32 %v13815_v10, %v1154_v0  ;;  %v1117_v11 = vmax.f32 %v999_v1, 0.0  ;;  %v11977_v12 = vpop.f32.mrb[12].mxu0  ;;  %v13850_v13 = vmax.f32 %v1316_v2, %v1317_v4  ;;  %vm13911_vm7 = vcmp.ge.s32.totalorder %v1359_v56, 1  ;;  %v1799_v1 = vld [vmem:[%s20440_s3 + $0x3d0] sm:$0xff] }
 0x110   : > { %1226 = vst [vmem:[#allocation2 + $0x48] sm:$0xff] %v1194_v5  ;;  %v1157_v14 = vmul.f32 %v13809_v7, %v1118_v6  ;;  %v1014_v15 = vadd.f32 %v11977_v12, %v13803_v3  ;;  %v1008_v16 = vpop.f32.mrb[13].mxu0  ;;  %v1257_v22 = vld [vmem:[#allocation2 + $0x20] ss:$2 sm:$0xff]  ;;  %v1289_v23 = vld [vmem:[#allocation2 + $0x21] ss:$2 sm:$0xff] }
 0x111   : > { %1225 = vst [vmem:[#allocation2 + $0x40] sm:$0xff] %v1193_v9  ;;  %v1156_v17 = vmul.f32 %v13809_v7, %v1117_v11  ;;  %v1009_v18 = vadd.f32 %v13803_v3, %v1008_v16  ;;  %1333 = vst [vmem:[#allocation3 + $0x9] sm:$0xff] %v13850_v13  ;;  %1897 = vmatprep.mubr.f32.mxu1 %v13850_v13  ;;  %v1318_v35 = vmax.f32 %v1257_v22, %v1289_v23  ;;  %v1807_v12 = vld [vmem:[%s20440_s3 + $0x410] sm:$0xff]  ;;  %v11043_v16 = vld [vmem:[%s20482_s9 + $0x48] sm:$0xff] }
 0x112   : > { %v1196_v19 = vadd.f32 %v13815_v10, %v1157_v14  ;;  %v1120_v20 = vmax.f32 %v1014_v15, 0.0  ;;  %vm14007_vm10 = vcmp.le.s32.totalorder %v1359_v56, 6  ;;  %v1816_v56 = vld [vmem:[%s20440_s3 + $0x458] sm:$0xff] }
 0x113   : > { %v1195_v24 = vadd.f32 %v13815_v10, %v1156_v17  ;;  %v1119_v25 = vmax.f32 %v1009_v18, 0.0  ;;  %v11980_v26 = vpop.f32.mrb[14].mxu0  ;;  %v13916_v17 = vadd.s32 24, %v13624_v42 }
 0x114   : > { %1228 = vst [vmem:[#allocation2 + $0x58] sm:$0xff] %v1196_v19  ;;  %v1159_v27 = vmul.f32 %v13809_v7, %v1120_v20  ;;  %v1024_v28 = vadd.f32 %v11980_v26, %v13803_v3  ;;  %v1018_v29 = vpop.f32.mrb[15].mxu0  ;;  %v1259_v30 = vld [vmem:[#allocation2 + $0x30] ss:$2 sm:$0xff]  ;;  %v1291_v31 = vld [vmem:[#allocation2 + $0x31] ss:$2 sm:$0xff] }
 0x115   : > { %1227 = vst [vmem:[#allocation2 + $0x50] sm:$0xff] %v1195_v24  ;;  %v1158_v32 = vmul.f32 %v13809_v7, %v1119_v25  ;;  %v1019_v33 = vadd.f32 %v13803_v3, %v1018_v29  ;;  %v1319_v36 = vmax.f32 %v1259_v30, %v1291_v31  ;;  %20454 = vst [vmem:[#allocation12_spill] sm:$0xff] %v13916_v17  ;;  %v1809_v31 = vld [vmem:[%s20440_s3 + $0x420] sm:$0xff] }
 0x116   : > { %v1198_v37 = vadd.f32 %v13815_v10, %v1159_v27  ;;  %v1122_v38 = vmax.f32 %v1024_v28, 0.0  ;;  %v12442_v28 = vpack.c.bf16 %v1808_v47, %v1807_v12 }
 0x117   : > { %v1197_v41 = vadd.f32 %v13815_v10, %v1158_v32  ;;  %v1121_v43 = vmax.f32 %v1019_v33, 0.0  ;;  %v11983_v44 = vpop.f32.mrb[16].mxu0  ;;  %v13876_v45 = vmax.f32 %v1318_v35, %v1319_v36  ;;  %v1810_v32 = vld [vmem:[%s20440_s3 + $0x428] sm:$0xff]  ;;  %v1360_v36 = vand.u32 7, %v13916_v17 }
 0x118   : > { %1230 = vst [vmem:[#allocation2 + $0x68] sm:$0xff] %v1198_v37  ;;  %v1161_v46 = vmul.f32 %v13809_v7, %v1122_v38  ;;  %v1034_v48 = vadd.f32 %v11983_v44, %v13803_v3  ;;  %v1028_v49 = vpop.f32.mrb[17].mxu0  ;;  %v13880_v50 = vld [vmem:[#allocation3 + $0x8] sm:$0xff] }
 0x119   : > { %1229 = vst [vmem:[#allocation2 + $0x60] sm:$0xff] %v1197_v41  ;;  %v1160_v52 = vmul.f32 %v13809_v7, %v1121_v43  ;;  %v1029_v53 = vadd.f32 %v13803_v3, %v1028_v49  ;;  %11482 = vmatmul.mubr.msk.f32.gmra.mrb[2].mxu1 %vm13868_vm5, %v13880_v50  ;;  %1335 = vst [vmem:[#allocation3 + $0x11] sm:$0xff] %v13876_v45  ;;  %v1261_v57 = vld [vmem:[#allocation2 + $0x40] ss:$2 sm:$0xff]  ;;  %v1293_v58 = vld [vmem:[#allocation2 + $0x41] ss:$2 sm:$0xff] }
 0x11a   : > { %v1200_v54 = vadd.f32 %v13815_v10, %v1161_v46  ;;  %v1124_v55 = vmax.f32 %v1034_v48, 0.0  ;;  %1902 = vmatprep.mubr.f32.mxu1 %v13876_v45  ;;  %v1320_v9 = vmax.f32 %v1261_v57, %v1293_v58  ;;  %vm13967_vm9 = vcmp.ge.s32.totalorder %v1360_v36, 1 }
 0x11b   : > { %v1199_v59 = vadd.f32 %v13815_v10, %v1160_v52  ;;  %v1123_v60 = vmax.f32 %v1029_v53, 0.0  ;;  %v11986_v61 = vpop.f32.mrb[18].mxu0  ;;  %vm14071_vm12 = vcmp.le.s32.totalorder %v1360_v36, 6 }
 0x11c   : > { %1232 = vst [vmem:[#allocation2 + $0x78] sm:$0xff] %v1200_v54  ;;  %v1163_v62 = vmul.f32 %v13809_v7, %v1124_v55  ;;  %v1044_v63 = vadd.f32 %v11986_v61, %v13803_v3  ;;  %v1038_v0 = vpop.f32.mrb[19].mxu0  ;;  %v1263_v2 = vld [vmem:[#allocation2 + $0x50] ss:$2 sm:$0xff]  ;;  %v1295_v4 = vld [vmem:[#allocation2 + $0x51] ss:$2 sm:$0xff]  ;;  %v12446_v54 = vpack.c.bf16 %v1810_v32, %v1809_v31 }
 0x11d   : > { %1231 = vst [vmem:[#allocation2 + $0x70] sm:$0xff] %v1199_v59  ;;  %v1162_v5 = vmul.f32 %v13809_v7, %v1123_v60  ;;  %v1039_v6 = vadd.f32 %v13803_v3, %v1038_v0  ;;  %v1321_v11 = vmax.f32 %v1263_v2, %v1295_v4  ;;  %v1811_v59 = vld [vmem:[%s20440_s3 + $0x430] sm:$0xff] }
 0x11e   : > { %v1202_v14 = vadd.f32 %v13815_v10, %v1163_v62  ;;  %v1126_v15 = vmax.f32 %v1044_v63, 0.0  ;;  %v13972_v63 = vadd.s32 32, %v13624_v42  ;;  %v11045_v62 = vld [vmem:[%s20482_s9 + $0x58] sm:$0xff] }
 0x11f   : > { %v1201_v18 = vadd.f32 %v13815_v10, %v1162_v5  ;;  %v1125_v19 = vmax.f32 %v1039_v6, 0.0  ;;  %v11989_v20 = vpop.f32.mrb[20].mxu0  ;;  %v13919_v22 = vmax.f32 %v1320_v9, %v1321_v11 }
 0x120   : > { %1234 = vst [vmem:[#allocation2 + $0x88] sm:$0xff] %v1202_v14  ;;  %v1165_v23 = vmul.f32 %v13809_v7, %v1126_v15  ;;  %v1054_v24 = vadd.f32 %v11989_v20, %v13803_v3  ;;  %v1048_v25 = vpop.f32.mrb[21].mxu0  ;;  %v13923_v26 = vld [vmem:[#allocation3 + $0xa] sm:$0xff]  ;;  %v12450_v14 = vpack.c.bf16 %v1812_v21, %v1811_v59 }
 0x121   : > { %v13925_v27 = vld [vmem:[#allocation3 + $0x10] sm:$0xff]  ;;  %1233 = vst [vmem:[#allocation2 + $0x80] sm:$0xff] %v1201_v18  ;;  %v1164_v29 = vmul.f32 %v13809_v7, %v1125_v19  ;;  %v1049_v30 = vadd.f32 %v13803_v3, %v1048_v25  ;;  %11505 = vmatprep.mubr.msk.f32.mxu0 %vm13896_vm6, %v13923_v26  ;;  %1337 = vst [vmem:[#allocation3 + $0x19] sm:$0xff] %v13919_v22  ;;  %v1265_v37 = vld [vmem:[#allocation2 + $0x60] ss:$2 sm:$0xff]  ;;  %v1361_v25 = vand.u32 7, %v13972_v63 }
 0x122   : > { %11483 = vmatmul.mubr.msk.f32.gmra.mrb[4].mxu1 %vm13911_vm7, %v13925_v27  ;;  %v1204_v33 = vadd.f32 %v13815_v10, %v1165_v23  ;;  %v1128_v35 = vmax.f32 %v1054_v24, 0.0  ;;  %2103 = vmatmul.mubr.f32.vlgmr.msra.gmra.mrb[32].mxu0 %v13850_v13  ;;  %v1297_v38 = vld [vmem:[#allocation2 + $0x61] ss:$2 sm:$0xff]  ;;  %v1784_v13 = vld [vmem:[%s20440_s3 + $0x358] sm:$0xff] }
 0x123   : > { %1907 = vmatprep.mubr.f32.mxu1 %v13919_v22  ;;  %v1203_v41 = vadd.f32 %v13815_v10, %v1164_v29  ;;  %v1127_v43 = vmax.f32 %v1049_v30, 0.0  ;;  %v11992_v44 = vpop.f32.mrb[22].mxu0  ;;  %12441 = vmatpush3.bf16.msra.mxu0 %v13740_v34  ;;  %v1322_v57 = vmax.f32 %v1265_v37, %v1297_v38  ;;  %v1813_v19 = vld [vmem:[%s20440_s3 + $0x440] sm:$0xff]  ;;  %v1814_v20 = vld [vmem:[%s20440_s3 + $0x448] sm:$0xff]  ;;  %vm14022_vm11 = vcmp.ge.s32.totalorder %v1361_v25, 1 }
 0x124   : > { %1236 = vst [vmem:[#allocation2 + $0x98] sm:$0xff] %v1204_v33  ;;  %v1167_v46 = vmul.f32 %v13809_v7, %v1128_v35  ;;  %v1064_v48 = vadd.f32 %v11992_v44, %v13803_v3  ;;  %v1058_v49 = vpop.f32.mrb[23].mxu0  ;;  %v1267_v52 = vld [vmem:[#allocation2 + $0x70] ss:$2 sm:$0xff]  ;;  %v1299_v53 = vld [vmem:[#allocation2 + $0x71] ss:$2 sm:$0xff]  ;;  %12443 = vmatprep.subr.bf16.mxu0 %v12442_v28  ;;  %v12454_v44 = vpack.c.bf16 %v1814_v20, %v1813_v19 }
 0x125   : > { %1235 = vst [vmem:[#allocation2 + $0x90] sm:$0xff] %v1203_v41  ;;  %v1166_v55 = vmul.f32 %v13809_v7, %v1127_v43  ;;  %v1059_v34 = vadd.f32 %v13803_v3, %v1058_v49  ;;  %v1323_v58 = vmax.f32 %v1267_v52, %v1299_v53  ;;  %v1815_v53 = vld [vmem:[%s20440_s3 + $0x450] sm:$0xff]  ;;  %vm14107_vm14 = vcmp.le.s32.totalorder %v1361_v25, 6  ;;  %v1801_v38 = vld [vmem:[%s20440_s3 + $0x3e0] sm:$0xff] }
 0x126   : > { %v1206_v60 = vadd.f32 %v13815_v10, %v1167_v46  ;;  %v1130_v61 = vmax.f32 %v1064_v48, 0.0 }
 0x127   : > { %v1205_v0 = vadd.f32 %v13815_v10, %v1166_v55  ;;  %v1129_v2 = vmax.f32 %v1059_v34, 0.0  ;;  %v11995_v4 = vpop.f32.mrb[24].mxu0  ;;  %v13975_v5 = vmax.f32 %v1322_v57, %v1323_v58  ;;  %12445 = vmatpush3.bf16.msra.mxu0 %v12442_v28  ;;  %v14027_v57 = vadd.s32 40, %v13624_v42 }
 0x128   : > { %1238 = vst [vmem:[#allocation2 + $0xa8] sm:$0xff] %v1206_v60  ;;  %v1169_v6 = vmul.f32 %v13809_v7, %v1130_v61  ;;  %v1074_v9 = vadd.f32 %v11995_v4, %v13803_v3  ;;  %v1068_v11 = vpop.f32.mrb[25].mxu0  ;;  %v13979_v12 = vld [vmem:[#allocation3 + $0x12] sm:$0xff]  ;;  %12447 = vmatprep.subr.bf16.mxu0 %v12446_v54  ;;  %v1269_v28 = vld [vmem:[#allocation2 + $0x80] ss:$2 sm:$0xff] }
 0x129   : > { %v13981_v47 = vld [vmem:[#allocation3 + $0x18] sm:$0xff]  ;;  %1237 = vst [vmem:[#allocation2 + $0xa0] sm:$0xff] %v1205_v0  ;;  %v1168_v15 = vmul.f32 %v13809_v7, %v1129_v2  ;;  %v1069_v18 = vadd.f32 %v13803_v3, %v1068_v11  ;;  %11506 = vmatprep.mubr.msk.f32.mxu0 %vm13952_vm8, %v13979_v12  ;;  %1339 = vst [vmem:[#allocation3 + $0x21] sm:$0xff] %v13975_v5  ;;  %v1301_v29 = vld [vmem:[#allocation2 + $0x81] ss:$2 sm:$0xff] }
 0x12a   : > { %11484 = vmatmul.mubr.msk.f32.gmra.mrb[6].mxu1 %vm13967_vm9, %v13981_v47  ;;  %v1208_v23 = vadd.f32 %v13815_v10, %v1169_v6  ;;  %v1132_v24 = vmax.f32 %v1074_v9, 0.0  ;;  %2108 = vmatmul.mubr.f32.gmra.mrb[34].mxu0 %v13876_v45  ;;  %v1324_v49 = vmax.f32 %v1269_v28, %v1301_v29  ;;  %20463 = vst [vmem:[#allocation13_spill] sm:$0xff] %v14027_v57 }
 0x12b   : > { %1912 = vmatprep.mubr.f32.mxu1 %v13975_v5  ;;  %v1207_v30 = vadd.f32 %v13815_v10, %v1168_v15  ;;  %v1131_v31 = vmax.f32 %v1069_v18, 0.0  ;;  %v11998_v32 = vpop.f32.mrb[26].mxu0  ;;  %12449 = vmatpush3.bf16.msra.mxu0 %v12446_v54  ;;  %v12458_v9 = vpack.c.bf16 %v1816_v56, %v1815_v53  ;;  %v1817_v15 = vld [vmem:[%s20440_s3 + $0x460] sm:$0xff]  ;;  %v1818_v18 = vld [vmem:[%s20440_s3 + $0x468] sm:$0xff]  ;;  %v1820_v53 = vld [vmem:[%s20440_s3 + $0x478] sm:$0xff] }
 0x12c   : > { %1240 = vst [vmem:[#allocation2 + $0xb8] sm:$0xff] %v1208_v23  ;;  %v1171_v33 = vmul.f32 %v13809_v7, %v1132_v24  ;;  %v1084_v35 = vadd.f32 %v11998_v32, %v13803_v3  ;;  %v1078_v37 = vpop.f32.mrb[27].mxu0  ;;  %v1271_v41 = vld [vmem:[#allocation2 + $0x90] ss:$2 sm:$0xff]  ;;  %v1303_v43 = vld [vmem:[#allocation2 + $0x91] ss:$2 sm:$0xff]  ;;  %12451 = vmatprep.subr.bf16.mxu0 %v12450_v14 }
 0x12d   : > { %1239 = vst [vmem:[#allocation2 + $0xb0] sm:$0xff] %v1207_v30  ;;  %v1170_v46 = vmul.f32 %v13809_v7, %v1131_v31  ;;  %v1079_v48 = vadd.f32 %v13803_v3, %v1078_v37  ;;  %v1325_v52 = vmax.f32 %v1271_v41, %v1303_v43  ;;  %v1362_v23 = vand.u32 7, %v14027_v57 }
 0x12e   : > { %v1210_v54 = vadd.f32 %v13815_v10, %v1171_v33  ;;  %v1134_v55 = vmax.f32 %v1084_v35, 0.0  ;;  %v12462_v43 = vpack.c.bf16 %v1818_v18, %v1817_v15 }
 0x12f   : > { %v1209_v58 = vadd.f32 %v13815_v10, %v1170_v46  ;;  %v1133_v59 = vmax.f32 %v1079_v48, 0.0  ;;  %v12001_v21 = vpop.f32.mrb[28].mxu0  ;;  %v14030_v60 = vmax.f32 %v1324_v49, %v1325_v52  ;;  %12453 = vmatpush3.bf16.msra.mxu0 %v12450_v14  ;;  %vm14077_vm13 = vcmp.ge.s32.totalorder %v1362_v23, 1 }
 0x130   : > { %1242 = vst [vmem:[#allocation2 + $0xc8] sm:$0xff] %v1210_v54  ;;  %v1173_v61 = vmul.f32 %v13809_v7, %v1134_v55  ;;  %v1094_v0 = vadd.f32 %v12001_v21, %v13803_v3  ;;  %v14034_v2 = vld [vmem:[#allocation3 + $0x1a] sm:$0xff]  ;;  %v1088_v4 = vpop.f32.mrb[29].mxu0  ;;  %12455 = vmatprep.subr.bf16.mxu0 %v12454_v44  ;;  %vm14136_vm1 = vcmp.le.s32.totalorder %v1362_v23, 6  ;;  %v1791_v23 = vld [vmem:[%s20440_s3 + $0x390] sm:$0xff]  ;;  %v1786_v55 = vld [vmem:[%s20440_s3 + $0x368] sm:$0xff] }
 0x131   : > { %v14036_v6 = vld [vmem:[#allocation3 + $0x20] sm:$0xff]  ;;  %1241 = vst [vmem:[#allocation2 + $0xc0] sm:$0xff] %v1209_v58  ;;  %v1172_v11 = vmul.f32 %v13809_v7, %v1133_v59  ;;  %11507 = vmatprep.mubr.msk.f32.mxu0 %vm14007_vm10, %v14034_v2  ;;  %v1089_v14 = vadd.f32 %v13803_v3, %v1088_v4  ;;  %1341 = vst [vmem:[#allocation3 + $0x29] sm:$0xff] %v14030_v60 }
 0x132   : > { %11485 = vmatmul.mubr.msk.f32.gmra.mrb[8].mxu1 %vm14022_vm11, %v14036_v6  ;;  %v1212_v19 = vadd.f32 %v13815_v10, %v1173_v61  ;;  %v1136_v20 = vmax.f32 %v1094_v0, 0.0  ;;  %2113 = vmatmul.mubr.f32.gmra.mrb[36].mxu0 %v13919_v22  ;;  %v1273_v24 = vld [vmem:[#allocation2 + $0xa0] ss:$2 sm:$0xff]  ;;  %v1305_v28 = vld [vmem:[#allocation2 + $0xa1] ss:$2 sm:$0xff]  ;;  %v14085_v61 = vadd.s32 48, %v13624_v42 }
 0x133   : > { %1917 = vmatprep.mubr.f32.mxu1 %v14030_v60  ;;  %v1211_v29 = vadd.f32 %v13815_v10, %v1172_v11  ;;  %v1135_v30 = vmax.f32 %v1089_v14, 0.0  ;;  %v12004_v31 = vpop.f32.mrb[30].mxu0  ;;  %12457 = vmatpush3.bf16.msra.mxu0 %v12454_v44  ;;  %v1326_v49 = vmax.f32 %v1273_v24, %v1305_v28  ;;  %v1819_v44 = vld [vmem:[%s20440_s3 + $0x470] sm:$0xff] }
 0x134   : > { %1244 = vst [vmem:[#allocation2 + $0xd8] sm:$0xff] %v1212_v19  ;;  %v1175_v32 = vmul.f32 %v13809_v7, %v1136_v20  ;;  %v1104_v33 = vadd.f32 %v12004_v31, %v13803_v3  ;;  %v1098_v35 = vpop.f32.mrb[31].mxu0  ;;  %v1275_v37 = vld [vmem:[#allocation2 + $0xb0] ss:$2 sm:$0xff]  ;;  %v1307_v41 = vld [vmem:[#allocation2 + $0xb1] ss:$2 sm:$0xff]  ;;  %12459 = vmatprep.subr.bf16.mxu0 %v12458_v9  ;;  %v12466_v11 = vpack.c.bf16 %v1820_v53, %v1819_v44 }
 0x135   : > { %1243 = vst [vmem:[#allocation2 + $0xd0] sm:$0xff] %v1211_v29  ;;  %v1174_v46 = vmul.f32 %v13809_v7, %v1135_v30  ;;  %v1099_v48 = vadd.f32 %v13803_v3, %v1098_v35  ;;  %v1327_v52 = vmax.f32 %v1275_v37, %v1307_v41  ;;  %20468 = vst [vmem:[#allocation14_spill] sm:$0xff] %v14085_v61  ;;  %v1363_v19 = vand.u32 7, %v14085_v61  ;;  %v1773_v53 = vld [vmem:[%s20440_s3 + $0x300] sm:$0xff]  ;;  %v1803_v30 = vld [vmem:[%s20440_s3 + $0x3f0] sm:$0xff] }
 0x136   : > { %v1214_v56 = vadd.f32 %v13815_v10, %v1175_v32  ;;  %v1138_v54 = vmax.f32 %v1104_v33, 0.0  ;;  %v14112_v31 = vadd.s32 56, %v13624_v42 }
 0x137   : > { %v1213_v58 = vadd.f32 %v13815_v10, %v1174_v46  ;;  %v1137_v59 = vmax.f32 %v1099_v48, 0.0  ;;  %v14082_v21 = vmax.f32 %v1326_v49, %v1327_v52  ;;  %12461 = vmatpush3.bf16.msra.mxu0 %v12458_v9  ;;  %vm14114_vm15 = vcmp.ge.s32.totalorder %v1363_v19, 1  ;;  %v1788_v52 = vld [vmem:[%s20440_s3 + $0x378] sm:$0xff] }
 0x138   : > { %1246 = vst [vmem:[#allocation2 + $0xe8] sm:$0xff] %v1214_v56  ;;  %v1177_v36 = vmul.f32 %v13809_v7, %v1138_v54  ;;  %v14088_v0 = vld [vmem:[#allocation3 + $0x22] sm:$0xff]  ;;  %12463 = vmatprep.subr.bf16.mxu0 %v12462_v43  ;;  %20471 = vst [vmem:[#allocation15_spill] sm:$0xff] %v14112_v31  ;;  %v1364_v41 = vand.u32 7, %v14112_v31  ;;  %vm14190_vm3 = vcmp.le.s32.totalorder %v1363_v19, 6 }
 0x139   : > { %v14090_v4 = vld [vmem:[#allocation3 + $0x28] sm:$0xff]  ;;  %1245 = vst [vmem:[#allocation2 + $0xe0] sm:$0xff] %v1213_v58  ;;  %v1176_v14 = vmul.f32 %v13809_v7, %v1137_v59  ;;  %11508 = vmatprep.mubr.msk.f32.mxu0 %vm14071_vm12, %v14088_v0  ;;  %1343 = vst [vmem:[#allocation3 + $0x31] sm:$0xff] %v14082_v21 }
 0x13a   : > { %11486 = vmatmul.mubr.msk.f32.gmra.mrb[10].mxu1 %vm14077_vm13, %v14090_v4  ;;  %v1216_v9 = vadd.f32 %v13815_v10, %v1177_v36  ;;  %2118 = vmatmul.mubr.f32.gmra.mrb[38].mxu0 %v13975_v5  ;;  %v1277_v15 = vld [vmem:[#allocation2 + $0xc0] ss:$2 sm:$0xff]  ;;  %v1309_v18 = vld [vmem:[#allocation2 + $0xc1] ss:$2 sm:$0xff]  ;;  %vm14140_vm2 = vcmp.ge.s32.totalorder %v1364_v41, 1  ;;  %v1792_v36 = vld [vmem:[%s20440_s3 + $0x398] sm:$0xff] }
 0x13b   : > { %1922 = vmatprep.mubr.f32.mxu1 %v14082_v21  ;;  %v1215_v7 = vadd.f32 %v13815_v10, %v1176_v14  ;;  %12465 = vmatpush3.bf16.msra.mxu0 %v12462_v43  ;;  %v1328_v28 = vmax.f32 %v1277_v15, %v1309_v18  ;;  %v1774_v56 = vld [vmem:[%s20440_s3 + $0x308] sm:$0xff]  ;;  %v12410_v14 = vpack.c.bf16 %v1792_v36, %v1791_v23  ;;  %v1775_v15 = vld [vmem:[%s20440_s3 + $0x310] sm:$0xff]  ;;  %v1776_v18 = vld [vmem:[%s20440_s3 + $0x318] sm:$0xff]  ;;  %vm14199_vm0 = vcmp.le.s32.totalorder %v1364_v41, 6 }
 0x13c   : > { %1248 = vst [vmem:[#allocation2 + $0xf8] sm:$0xff] %v1216_v9  ;;  %v1279_v20 = vld [vmem:[#allocation2 + $0xd0] ss:$2 sm:$0xff]  ;;  %v1311_v24 = vld [vmem:[#allocation2 + $0xd1] ss:$2 sm:$0xff]  ;;  %12467 = vmatprep.subr.bf16.mxu0 %v12466_v11  ;;  %v1429_v9 = vld [vmem:[#allocation3 + $0x2] sm:$0xff] }
 0x13d   : > { %1247 = vst [vmem:[#allocation2 + $0xf0] sm:$0xff] %v1215_v7  ;;  %v1329_v29 = vmax.f32 %v1279_v20, %v1311_v24  ;;  %v1793_v7 = vld [vmem:[%s20440_s3 + $0x3a0] sm:$0xff]  ;;  %v12412_v24 = vpack.c.bf16 %v1776_v18, %v1775_v15  ;;  %v1778_v19 = vld [vmem:[%s20440_s3 + $0x328] sm:$0xff]  ;;  %v1795_v41 = vld [vmem:[%s20440_s3 + $0x3b0] sm:$0xff] }
 0x13e   : > { %v1798_v23 = vld [vmem:[%s20440_s3 + $0x3c8] sm:$0xff]  ;;  %v11049_v10 = vld [vmem:[%s20482_s9 + $0x78] sm:$0xff] }
 0x13f   : > { %v14118_v32 = vmax.f32 %v1328_v28, %v1329_v29  ;;  %12469 = vmatpush3.bf16.msra.mxu0 %v12466_v11  ;;  %v12408_v11 = vpack.c.bf16 %v1774_v56, %v1773_v53  ;;  %v1777_v28 = vld [vmem:[%s20440_s3 + $0x320] sm:$0xff]  ;;  %v1780_v53 = vld [vmem:[%s20440_s3 + $0x338] sm:$0xff] }
 0x140   : > { %v1281_v33 = vld [vmem:[#allocation2 + $0xe0] ss:$2 sm:$0xff]  ;;  %v1313_v35 = vld [vmem:[#allocation2 + $0xe1] ss:$2 sm:$0xff]  ;;  %v14125_v25 = vld [vmem:[#allocation3 + $0x30] sm:$0xff] }
 0x141   : > { %v14120_v37 = vld [vmem:[#allocation3 + $0x2a] sm:$0xff]  ;;  %1345 = vst [vmem:[#allocation3 + $0x39] sm:$0xff] %v14118_v32  ;;  %11487 = vmatmul.mubr.msk.f32.gmra.mrb[12].mxu1 %vm14114_vm15, %v14125_v25  ;;  %v1330_v43 = vmax.f32 %v1281_v33, %v1313_v35  ;;  %v1797_v56 = vld [vmem:[%s20440_s3 + $0x3c0] sm:$0xff] }
 0x142   : > { %11509 = vmatprep.mubr.msk.f32.mxu0 %vm14107_vm14, %v14120_v37  ;;  %1927 = vmatprep.mubr.f32.mxu1 %v14118_v32 }
 0x143   : > { %2123 = vmatmul.mubr.f32.gmra.mrb[40].mxu0 %v14030_v60 }
 0x144   : > { %v1283_v46 = vld [vmem:[#allocation2 + $0xf0] ss:$2 sm:$0xff]  ;;  %v1315_v48 = vld [vmem:[#allocation2 + $0xf1] ss:$2 sm:$0xff] }
 0x145   : > { %v1331_v49 = vmax.f32 %v1283_v46, %v1315_v48  ;;  %v1796_v46 = vld [vmem:[%s20440_s3 + $0x3b8] sm:$0xff]  ;;  %v12416_v48 = vpack.c.bf16 %v1778_v19, %v1777_v28  ;;  %v11595_v19 = vpop.f32.mrb[0].mxu1 }
 0x146   : > { %v1804_v28 = vld [vmem:[%s20440_s3 + $0x3f8] sm:$0xff] }
 0x147   : > { %v14150_v54 = vmax.f32 %v1330_v43, %v1331_v49  ;;  %v1779_v49 = vld [vmem:[%s20440_s3 + $0x330] sm:$0xff] }
 0x148   : > { %v14155_v58 = vld [vmem:[#allocation3 + $0x32] sm:$0xff]  ;;  %v12420_v36 = vpack.c.bf16 %v1780_v53, %v1779_v49 }
 0x149   : > { %v14157_v59 = vld [vmem:[#allocation3 + $0x38] sm:$0xff]  ;;  %11510 = vmatprep.mubr.msk.f32.mxu0 %vm14136_vm1, %v14155_v58  ;;  %1347 = vst [vmem:[#allocation3 + $0x41] sm:$0xff] %v14150_v54 }
 0x14a   : > { %11488 = vmatmul.mubr.msk.f32.gmra.mrb[14].mxu1 %vm14140_vm2, %v14157_v59  ;;  %2128 = vmatmul.mubr.f32.gmra.mrb[42].mxu0 %v14082_v21 }
 0x14b   : > { %11489 = vmatprep.mubr.msk.f32.mxu1 %vm13641_vm4, %v13880_v50  ;;  %v1794_v50 = vld [vmem:[%s20440_s3 + $0x3a8] sm:$0xff] }
 0x14c   : > { %v12414_v43 = vpack.c.bf16 %v1794_v50, %v1793_v7  ;;  %v1783_v7 = vld [vmem:[%s20440_s3 + $0x350] sm:$0xff] }
 0x14e   : > { %11490 = vmatmul.mubr.msk.f32.vlgmr.msra.gmra.mrb[16].mxu1 %vm13896_vm6, %v1429_v9  ;;  %v1782_v9 = vld [vmem:[%s20440_s3 + $0x348] sm:$0xff] }
 0x14f   : > { %11491 = vmatprep.mubr.msk.f32.mxu1 %vm13868_vm5, %v13925_v27  ;;  %12409 = vmatpush3.bf16.msra.mxu1 %v12408_v11  ;;  %v12422_v11 = vpack.c.bf16 %v1798_v23, %v1797_v56 }
 0x150   : > { %12411 = vmatprep.subr.bf16.mxu1 %v12410_v14  ;;  %v14197_v29 = vld [vmem:[#allocation3 + $0x3a] sm:$0xff]  ;;  %v1524_v35 = vld [vmem:[#allocation3 + $0x42] sm:$0xff] }
 0x151   : > { %11511 = vmatprep.mubr.msk.f32.mxu0 %vm14190_vm3, %v14197_v29  ;;  %v1781_v14 = vld [vmem:[%s20440_s3 + $0x340] sm:$0xff]  ;;  %v1548_v39 = vld [vmem:[#allocation3 + $0x48] sm:$0xff] }
 0x152   : > { %11492 = vmatmul.mubr.msk.f32.gmra.mrb[18].mxu1 %vm13952_vm8, %v13923_v26  ;;  %2133 = vmatmul.mubr.f32.gmra.mrb[44].mxu0 %v14118_v32  ;;  %v12418_v26 = vpack.c.bf16 %v1796_v46, %v1795_v41  ;;  %v12424_v15 = vpack.c.bf16 %v1782_v9, %v1781_v14  ;;  %v12434_v41 = vpack.c.bf16 %v1804_v28, %v1803_v30  ;;  %v1787_v46 = vld [vmem:[%s20440_s3 + $0x370] sm:$0xff] }
 0x153   : > { %11493 = vmatprep.mubr.msk.f32.mxu1 %vm13911_vm7, %v13981_v47  ;;  %12413 = vmatpush3.bf16.msra.mxu1 %v12412_v24  ;;  %v1785_v24 = vld [vmem:[%s20440_s3 + $0x360] sm:$0xff]  ;;  %v12436_v49 = vpack.c.bf16 %v1788_v52, %v1787_v46 }
 0x154   : > { %11512 = vmatprep.mubr.msk.f32.mxu0 %vm14199_vm0, %v1524_v35  ;;  %12415 = vmatprep.subr.bf16.mxu1 %v12414_v43  ;;  %v1588_v43 = vld [vmem:[#allocation3 + $0x4a] sm:$0xff] }
 0x156   : > { %11494 = vmatmul.mubr.msk.f32.gmra.mrb[20].mxu1 %vm14007_vm10, %v13979_v12  ;;  %2138 = vmatmul.mubr.f32.gmra.mrb[46].mxu0 %v14150_v54 }
 0x157   : > { %11495 = vmatprep.mubr.msk.f32.mxu1 %vm13967_vm9, %v14036_v6  ;;  %12417 = vmatpush3.bf16.msra.mxu1 %v12416_v48  ;;  %v11596_v48 = vpop.f32.mrb[1].mxu1 }
 0x158   : > { %12037 = vmatprep.mubr.msk.f32.mxu0 %vm13896_vm6, %v13979_v12  ;;  %12419 = vmatprep.subr.bf16.mxu1 %v12418_v26  ;;  %v1800_v12 = vld [vmem:[%s20440_s3 + $0x3d8] sm:$0xff]  ;;  %v1484_v26 = vld [vmem:[#allocation3 + $0x40] sm:$0xff] }
 0x159   : > { %v12426_v18 = vpack.c.bf16 %v1800_v12, %v1799_v1 }
 0x15a   : > { %11496 = vmatmul.mubr.msk.f32.gmra.mrb[22].mxu1 %vm14071_vm12, %v14034_v2  ;;  %12038 = vmatmul.mubr.msk.f32.vlgmr.msra.gmra.mrb[48].mxu0 %vm13952_vm8, %v14034_v2  ;;  %v1802_v2 = vld [vmem:[%s20440_s3 + $0x3e8] sm:$0xff] }
 0x15b   : > { %11497 = vmatprep.mubr.msk.f32.mxu1 %vm14022_vm11, %v14090_v4  ;;  %12421 = vmatpush3.bf16.msra.mxu1 %v12420_v36  ;;  %v12430_v50 = vpack.c.bf16 %v1802_v2, %v1801_v38 }
 0x15c   : > { %12040 = vmatprep.mubr.msk.f32.mxu0 %vm14007_vm10, %v14088_v0  ;;  %12423 = vmatprep.subr.bf16.mxu1 %v12422_v11  ;;  %vm3339_vm10 = vcmask 261120  }
 0x15e   : > { %11498 = vmatmul.mubr.msk.f32.gmra.mrb[24].mxu1 %vm14107_vm14, %v14088_v0  ;;  %12041 = vmatmul.mubr.msk.f32.gmra.mrb[50].mxu0 %vm14071_vm12, %v14120_v37  ;;  %v12428_v0 = vpack.c.bf16 %v1784_v13, %v1783_v7  ;;  %vm3352_vm12 = vcmask 259076  }
 0x15f   : > { %11499 = vmatprep.mubr.msk.f32.mxu1 %vm14077_vm13, %v14125_v25  ;;  %12425 = vmatpush3.bf16.msra.mxu1 %v12424_v15 }
 0x160   : > { %12043 = vmatprep.mubr.msk.f32.mxu0 %vm14107_vm14, %v14155_v58  ;;  %12427 = vmatprep.subr.bf16.mxu1 %v12426_v18  ;;  %vm3452_vm14 = vcmask 1043456  }
 0x162   : > { %11500 = vmatmul.mubr.msk.f32.gmra.mrb[26].mxu1 %vm14136_vm1, %v14120_v37  ;;  %12044 = vmatmul.mubr.msk.f32.gmra.mrb[52].mxu0 %vm14136_vm1, %v14197_v29  ;;  %v12432_v37 = vpack.c.bf16 %v1786_v55, %v1785_v24 }
 0x163   : > { %11501 = vmatprep.mubr.msk.f32.mxu1 %vm14114_vm15, %v14157_v59  ;;  %12429 = vmatpush3.bf16.msra.mxu1 %v12428_v0 }
 0x164   : > { %12046 = vmatprep.mubr.msk.f32.mxu0 %vm14190_vm3, %v1524_v35  ;;  %12431 = vmatprep.subr.bf16.mxu1 %v12430_v50  ;;  %v14326_v35 = vadd.f32 %v11596_v48, %v11595_v19 }
 0x166   : > { %11502 = vmatmul.mubr.msk.f32.gmra.mrb[28].mxu1 %vm14190_vm3, %v14155_v58  ;;  %12047 = vmatmul.mubr.msk.f32.gmra.mrb[54].mxu0 %vm14199_vm0, %v1588_v43  ;;  %v2455_v58 = vld [vmem:[%s20482_s9] sm:$0xff]  ;;  %vm8359_vm3 = vcmask 1045504  }
 0x167   : > { %11503 = vmatprep.mubr.msk.f32.mxu1 %vm14140_vm2, %v1484_v26  ;;  %12433 = vmatpush3.bf16.msra.mxu1 %v12432_v37 }
 0x168   : > { %12435 = vmatprep.subr.bf16.mxu1 %v12434_v41 }
 0x16a   : > { %11504 = vmatmul.mubr.msk.f32.gmra.mrb[30].mxu1 %vm14199_vm0, %v14197_v29  ;;  %vm2400_vm0 = vcmask 520192  }
 0x16b   : > { %2207 = vmatprep.mubr.f32.mxu1 %v13876_v45  ;;  %12437 = vmatpush3.bf16.msra.mxu1 %v12436_v49  ;;  %2401 = vst.msk [vmem:[#allocation6] sm:$0x1f] %vm2400_vm0, %v14362_v51  ;;  %2402 = vst.msk [vmem:[#allocation6 + $0x15] sm:$0x1f] %vm2400_vm0, %v14362_v51  ;;  %v11042_v45 = vld [vmem:[%s20482_s9 + $0x40] sm:$0xff]  ;;  %vm20504_vm0 = vcmask 1040384  }
 0x16e   : > { %11513 = vmatmul.mubr.msk.f32.vlgmr.msra.gmra.mrb[32].mxu1 %vm13641_vm4, %v13925_v27  ;;  %v11044_v27 = vld [vmem:[%s20482_s9 + $0x50] sm:$0xff]  ;;  %vm2391_vm4 = vcmask 523264  }
 0x16f   : > { %2212 = vmatprep.mubr.f32.mxu1 %v13919_v22  ;;  %v12470_v22 = vpack.c.bf16 %v11043_v16, %v11042_v45  ;;  %v11039_v16 = vld [vmem:[%s20483_s26] ss:$0 sm:$0xff] }
 0x171   : > { %12471 = vmatprep.subr.bf16.mxu0 %v12470_v22 }
 0x172   : > { %11514 = vmatmul.mubr.msk.f32.gmra.mrb[34].mxu1 %vm13868_vm5, %v13981_v47  ;;  %12473 = vmatpush3.bf16.msra.mxu0 %v12470_v22  ;;  %vm2426_vm5 = vcmask 519168  }
 0x173   : > { %2217 = vmatprep.mubr.f32.mxu1 %v13975_v5  ;;  %v12474_v5 = vpack.c.bf16 %v11045_v62, %v11044_v27  ;;  %v1895_v27 = vadd.f32 %v14326_v35, %v11039_v16 }
 0x175   : > { %12475 = vmatprep.subr.bf16.mxu0 %v12474_v5 }
 0x176   : > { %11515 = vmatmul.mubr.msk.f32.gmra.mrb[36].mxu1 %vm13911_vm7, %v14036_v6  ;;  %12477 = vmatpush3.bf16.msra.mxu0 %v12474_v5  ;;  %v11047_v6 = vld [vmem:[%s20482_s9 + $0x68] sm:$0xff] }
 0x177   : > { %2222 = vmatprep.mubr.f32.mxu1 %v14030_v60  ;;  %v11046_v60 = vld [vmem:[%s20482_s9 + $0x60] sm:$0xff] }
 0x17a   : > { %11516 = vmatmul.mubr.msk.f32.gmra.mrb[38].mxu1 %vm13967_vm9, %v14090_v4  ;;  %v11048_v4 = vld [vmem:[%s20482_s9 + $0x70] sm:$0xff] }
 0x17b   : > { %2227 = vmatprep.mubr.f32.mxu1 %v14082_v21  ;;  %v12478_v21 = vpack.c.bf16 %v11047_v6, %v11046_v60 }
 0x17d   : > { %12479 = vmatprep.subr.bf16.mxu0 %v12478_v21 }
 0x17e   : > { %11517 = vmatmul.mubr.msk.f32.gmra.mrb[40].mxu1 %vm14022_vm11, %v14125_v25  ;;  %12481 = vmatpush3.bf16.msra.mxu0 %v12478_v21  ;;  %vm3350_vm11 = vcmask 254976  }
 0x17f   : > { %2232 = vmatprep.mubr.f32.mxu1 %v14118_v32  ;;  %v12482_v32 = vpack.c.bf16 %v11049_v10, %v11048_v4 }
 0x181   : > { %12483 = vmatprep.subr.bf16.mxu0 %v12482_v32 }
 0x182   : > { %11518 = vmatmul.mubr.msk.f32.gmra.mrb[42].mxu1 %vm14077_vm13, %v14157_v59  ;;  %12485 = vmatpush3.bf16.msra.mxu0 %v12482_v32  ;;  %v2456_v59 = vld [vmem:[%s20482_s9 + $0x8] sm:$0xff]  ;;  %vm3445_vm13 = vcmask 31744  }
 0x183   : > { %2237 = vmatprep.mubr.f32.mxu1 %v14150_v54  ;;  %v14400_v33 = vpack.c.bf16 %v2456_v59, %v2455_v58 }
 0x185   : > { %12487 = vmatprep.subr.bf16.mxu0 %v14400_v33 }
 0x186   : > { %11519 = vmatmul.mubr.msk.f32.gmra.mrb[44].mxu1 %vm14114_vm15, %v1484_v26  ;;  %vm4030_vm15 = vcmask 130048  }
 0x187   : > { %2242 = vmatprep.mubr.f32.mxu1 %v14362_v51 }
 0x18a   : > { %11520 = vmatmul.mubr.msk.f32.gmra.mrb[46].mxu1 %vm14140_vm2, %v1548_v39  ;;  %vm7926_vm2 = vcmask 1047553  }
 0x18b   : > { %3430 = vmatprep.mubr.f32.mxu1 %v14362_v51 }
 0x1ec   : > { %v11598_v47 = vpop.f32.mrb[2].mxu1 }
 0x1ed   : > { %v11599_v34 = vpop.f32.mrb[3].mxu1 }
 0x1ee   : > { %v11600_v3 = vadd.f32 %v11599_v34, %v11598_v47 }
 0x1f0   : > { %v1900_v6 = vadd.f32 %v11600_v3, %v11039_v16 }
 0x1f5   : > { %v11601_v25 = vpop.f32.mrb[4].mxu1  ;;  %v11707_v44 = vpop.f32.mrb[32].mxu0 }
 0x1f6   : > { %v11602_v54 = vpop.f32.mrb[5].mxu1  ;;  %v11708_v29 = vpop.f32.mrb[33].mxu0 }
 0x1f7   : > { %v11603_v20 = vadd.f32 %v11602_v54, %v11601_v25  ;;  %v11709_v53 = vadd.f32 %v11708_v29, %v11707_v44 }
 0x1f9   : > { %v1905_v59 = vadd.f32 %v11603_v20, %v11039_v16 }
 0x1fd   : > { %v11604_v56 = vpop.f32.mrb[6].mxu1  ;;  %v11710_v23 = vpop.f32.mrb[34].mxu0 }
 0x1fe   : > { %v11605_v36 = vpop.f32.mrb[7].mxu1  ;;  %v11711_v14 = vpop.f32.mrb[35].mxu0 }
 0x1ff   : > { %v11606_v11 = vadd.f32 %v11605_v36, %v11604_v56  ;;  %v11712_v9 = vadd.f32 %v11711_v14, %v11710_v23 }
 0x205   : > { %v11607_v1 = vpop.f32.mrb[8].mxu1  ;;  %v11713_v12 = vpop.f32.mrb[36].mxu0 }
 0x206   : > { %v11608_v15 = vpop.f32.mrb[9].mxu1  ;;  %v11714_v7 = vpop.f32.mrb[37].mxu0 }
 0x207   : > { %v11609_v18 = vadd.f32 %v11608_v15, %v11607_v1  ;;  %v11715_v13 = vadd.f32 %v11714_v7, %v11713_v12  ;;  %v1910_v15 = vadd.f32 %v11606_v11, %v11039_v16 }
 0x20d   : > { %v11610_v38 = vpop.f32.mrb[10].mxu1  ;;  %v11716_v2 = vpop.f32.mrb[38].mxu0 }
 0x20e   : > { %v11611_v0 = vpop.f32.mrb[11].mxu1  ;;  %v11717_v24 = vpop.f32.mrb[39].mxu0 }
 0x20f   : > { %v11612_v50 = vadd.f32 %v11611_v0, %v11610_v38  ;;  %v11718_v55 = vadd.f32 %v11717_v24, %v11716_v2 }
 0x214   : > { %v11613_v30 = vpop.f32.mrb[12].mxu1 }
 0x215   : > { %v11614_v37 = vpop.f32.mrb[13].mxu1 }
 0x216   : > { %v11719_v28 = vpop.f32.mrb[40].mxu0  ;;  %v11615_v19 = vadd.f32 %v11614_v37, %v11613_v30  ;;  %v1915_v30 = vadd.f32 %v11609_v18, %v11039_v16 }
 0x217   : > { %v11720_v43 = vpop.f32.mrb[41].mxu0 }
 0x218   : > { %v11721_v41 = vadd.f32 %v11720_v43, %v11719_v28 }
 0x21d   : > { %v11616_v46 = vpop.f32.mrb[14].mxu1  ;;  %v11722_v52 = vpop.f32.mrb[42].mxu0 }
 0x21e   : > { %v11617_v48 = vpop.f32.mrb[15].mxu1  ;;  %v11723_v49 = vpop.f32.mrb[43].mxu0 }
 0x21f   : > { %v11618_v26 = vadd.f32 %v11617_v48, %v11616_v46  ;;  %v11724_v39 = vadd.f32 %v11723_v49, %v11722_v52  ;;  %v1920_v48 = vadd.f32 %v11612_v50, %v11039_v16 }
 0x221   : > { %v11651_v45 = vpop.f32.mrb[16].mxu1 }
 0x222   : > { %v11652_v22 = vpop.f32.mrb[17].mxu1 }
 0x223   : > { %v11653_v62 = vadd.f32 %v11652_v22, %v11651_v45 }
 0x225   : > { %v2000_v5 = vadd.f32 %v11653_v62, %v1895_v27  ;;  %v11654_v47 = vpop.f32.mrb[18].mxu1  ;;  %v11725_v34 = vpop.f32.mrb[44].mxu0 }
 0x226   : > { %v11655_v60 = vpop.f32.mrb[19].mxu1  ;;  %v11726_v4 = vpop.f32.mrb[45].mxu0 }
 0x227   : > { %v11656_v21 = vadd.f32 %v11655_v60, %v11654_v47  ;;  %v2105_v10 = vadd.f32 %v11709_v53, %v2000_v5  ;;  %v11727_v32 = vadd.f32 %v11726_v4, %v11725_v34  ;;  %v1925_v5 = vadd.f32 %v11615_v19, %v11039_v16 }
 0x229   : > { %v2005_v25 = vadd.f32 %v11656_v21, %v1900_v6  ;;  %v11657_v44 = vpop.f32.mrb[20].mxu1  ;;  %v11728_v58 = vpop.f32.mrb[46].mxu0  ;;  %v1930_v21 = vadd.f32 %v11618_v26, %v11039_v16 }
 0x22a   : > { %v11658_v54 = vpop.f32.mrb[21].mxu1  ;;  %v11729_v56 = vpop.f32.mrb[47].mxu0 }
 0x22b   : > { %v11659_v29 = vadd.f32 %v11658_v54, %v11657_v44  ;;  %v2110_v23 = vadd.f32 %v11712_v9, %v2005_v25  ;;  %v11730_v36 = vadd.f32 %v11729_v56, %v11728_v58 }
 0x22d   : > { %v2010_v35 = vadd.f32 %v11659_v29, %v1905_v59  ;;  %v11660_v14 = vpop.f32.mrb[22].mxu1  ;;  %v12039_v1 = vpop.f32.mrb[48].mxu0 }
 0x22e   : > { %v11661_v12 = vpop.f32.mrb[23].mxu1  ;;  %v2314_v3 = vpop.f32.mrb[49].mxu0 }
 0x22f   : > { %v11662_v7 = vadd.f32 %v11661_v12, %v11660_v14  ;;  %v2115_v38 = vadd.f32 %v11715_v13, %v2010_v35  ;;  %v14422_v35 = vld [vmem:[%s20484_s23] ss:$0 sm:$0xff] }
 0x230   : > { %v14427_v14 = vld [vmem:[%s20485_s25] ss:$0 sm:$0xff] }
 0x231   : > { %v2015_v2 = vadd.f32 %v11662_v7, %v1910_v15  ;;  %v11663_v53 = vpop.f32.mrb[24].mxu1  ;;  %v14407_v0 = vpop.f32.mrb[50].mxu0 }
 0x232   : > { %v11664_v24 = vpop.f32.mrb[25].mxu1  ;;  %v2324_v20 = vpop.f32.mrb[51].mxu0 }
 0x233   : > { %v11665_v28 = vadd.f32 %v11664_v24, %v11663_v53  ;;  %v2120_v37 = vadd.f32 %v11718_v55, %v2015_v2 }
 0x235   : > { %v2020_v43 = vadd.f32 %v11665_v28, %v1915_v30  ;;  %v11666_v9 = vpop.f32.mrb[26].mxu1  ;;  %v14409_v46 = vpop.f32.mrb[52].mxu0 }
 0x236   : > { %v11667_v52 = vpop.f32.mrb[27].mxu1  ;;  %v2334_v11 = vpop.f32.mrb[53].mxu0 }
 0x237   : > { %v11668_v49 = vadd.f32 %v11667_v52, %v11666_v9  ;;  %v2125_v45 = vadd.f32 %v11721_v41, %v2020_v43 }
 0x239   : > { %v2025_v22 = vadd.f32 %v11668_v49, %v1920_v48  ;;  %v11669_v13 = vpop.f32.mrb[28].mxu1  ;;  %v14411_v62 = vpop.f32.mrb[54].mxu0 }
 0x23a   : > { %v11670_v27 = vpop.f32.mrb[29].mxu1  ;;  %v14413_v34 = vpop.f32.mrb[55].mxu0 }
 0x23b   : > { %v11671_v47 = vadd.f32 %v11670_v27, %v11669_v13  ;;  %v2130_v18 = vadd.f32 %v11724_v39, %v2025_v22 }
 0x23d   : > { %v2030_v55 = vadd.f32 %v11671_v47, %v1925_v5  ;;  %v11672_v60 = vpop.f32.mrb[30].mxu1 }
 0x23e   : > { %v11673_v6 = vpop.f32.mrb[31].mxu1 }
 0x23f   : > { %v11674_v4 = vadd.f32 %v11673_v6, %v11672_v60  ;;  %v14415_v25 = vadd.f32 %v11727_v32, %v2030_v55 }
 0x241   : > { %v2035_v50 = vadd.f32 %v11674_v4, %v1930_v21  ;;  %v11763_v44 = vpop.f32.mrb[32].mxu1 }
 0x242   : > { %v11764_v41 = vpop.f32.mrb[33].mxu1 }
 0x243   : > { %v14417_v54 = vadd.f32 %v11730_v36, %v2035_v50  ;;  %v11765_v58 = vadd.f32 %v11764_v41, %v11763_v44 }
 0x245   : > { %v2210_v59 = vadd.f32 %v11765_v58, %v2105_v10  ;;  %v11766_v29 = vpop.f32.mrb[34].mxu1 }
 0x246   : > { %v11767_v19 = vpop.f32.mrb[35].mxu1 }
 0x247   : > { %v2315_v56 = vadd.f32 %v2314_v3, %v2210_v59  ;;  %v11768_v39 = vadd.f32 %v11767_v19, %v11766_v29 }
 0x249   : > { %v2353_v26 = vmax.f32 %v2315_v56, 0.0  ;;  %v2215_v16 = vadd.f32 %v11768_v39, %v2110_v23  ;;  %v11769_v32 = vpop.f32.mrb[36].mxu1 }
 0x24a   : > { %v11770_v36 = vpop.f32.mrb[37].mxu1 }
 0x24b   : > { %v2368_v10 = vmul.f32 %v14422_v35, %v2353_v26  ;;  %v2320_v12 = vadd.f32 %v12039_v1, %v2215_v16  ;;  %v11771_v15 = vadd.f32 %v11770_v36, %v11769_v32 }
 0x24d   : > { %v2383_v7 = vadd.f32 %v14427_v14, %v2368_v10  ;;  %v2354_v3 = vmax.f32 %v2320_v12, 0.0  ;;  %v2220_v2 = vadd.f32 %v11771_v15, %v2115_v38  ;;  %v11772_v53 = vpop.f32.mrb[38].mxu1 }
 0x24e   : > { %v11773_v24 = vpop.f32.mrb[39].mxu1 }
 0x24f   : > { %2392 = vst.msk [vmem:[#allocation5] sm:$0xff] %vm2391_vm4, %v2383_v7  ;;  %v2369_v23 = vmul.f32 %v14422_v35, %v2354_v3  ;;  %v2325_v30 = vadd.f32 %v2324_v20, %v2220_v2  ;;  %v11774_v28 = vadd.f32 %v11773_v24, %v11772_v53 }
 0x251   : > { %v2384_v43 = vadd.f32 %v14427_v14, %v2369_v23  ;;  %v2355_v9 = vmax.f32 %v2325_v30, 0.0  ;;  %v2225_v52 = vadd.f32 %v11774_v28, %v2120_v37  ;;  %v11775_v48 = vpop.f32.mrb[40].mxu1 }
 0x252   : > { %v11776_v1 = vpop.f32.mrb[41].mxu1 }
 0x253   : > { %2393 = vst.msk [vmem:[#allocation5 + $0x8] sm:$0xff] %vm2391_vm4, %v2384_v43  ;;  %v2370_v49 = vmul.f32 %v14422_v35, %v2355_v9  ;;  %v2330_v38 = vadd.f32 %v14407_v0, %v2225_v52  ;;  %v11777_v22 = vadd.f32 %v11776_v1, %v11775_v48 }
 0x255   : > { %v2385_v13 = vadd.f32 %v14427_v14, %v2370_v49  ;;  %v2356_v27 = vmax.f32 %v2330_v38, 0.0  ;;  %v2230_v5 = vadd.f32 %v11777_v22, %v2125_v45  ;;  %v11778_v47 = vpop.f32.mrb[42].mxu1  ;;  %v2443_v22 = vand.u32 3, %v13624_v42 }
 0x256   : > { %v11779_v20 = vpop.f32.mrb[43].mxu1 }
 0x257   : > { %2394 = vst.msk [vmem:[#allocation5 + $0x10] sm:$0xff] %vm2391_vm4, %v2385_v13  ;;  %v2371_v55 = vmul.f32 %v14422_v35, %v2356_v27  ;;  %v2335_v37 = vadd.f32 %v2334_v11, %v2230_v5  ;;  %v11780_v60 = vadd.f32 %v11779_v20, %v11778_v47  ;;  %v2457_v27 = vld [vmem:[%s20482_s9 + $0x10] sm:$0xff]  ;;  %v2458_v5 = vld [vmem:[%s20482_s9 + $0x18] sm:$0xff]  ;;  %vm14470_vm6 = vcmp.ge.s32.totalorder %v2443_v22, 1 }
 0x258   : > { %vm14506_vm7 = vcmp.le.s32.totalorder %v2443_v22, 2  ;;  %v11071_v22 = vld [vmem:[%s20482_s9 + $0xf8] sm:$0xff] }
 0x259   : > { %v2386_v6 = vadd.f32 %v14427_v14, %v2371_v55  ;;  %v2357_v21 = vmax.f32 %v2335_v37, 0.0  ;;  %v2235_v4 = vadd.f32 %v11780_v60, %v2130_v18  ;;  %v11781_v50 = vpop.f32.mrb[44].mxu1  ;;  %v12490_v37 = vpack.c.bf16 %v2458_v5, %v2457_v27  ;;  %v2459_v60 = vld [vmem:[%s20482_s9 + $0x20] sm:$0xff]  ;;  %v11075_v5 = vld [vmem:[%s20482_s9 + $0x108] sm:$0xff] }
 0x25a   : > { %v11782_v44 = vpop.f32.mrb[45].mxu1  ;;  %v2403_v0 = vld [vmem:[#allocation5] ss:$2 sm:$0xff]  ;;  %v2411_v41 = vld [vmem:[#allocation5 + $0x1] ss:$2 sm:$0xff] }
 0x25b   : > { %2395 = vst.msk [vmem:[#allocation5 + $0x18] sm:$0xff] %vm2391_vm4, %v2386_v6  ;;  %v2372_v45 = vmul.f32 %v14422_v35, %v2357_v21  ;;  %v2340_v58 = vadd.f32 %v14409_v46, %v2235_v4  ;;  %v11783_v59 = vadd.f32 %v11782_v44, %v11781_v50  ;;  %v2418_v29 = vmax.f32 %v2403_v0, %v2411_v41  ;;  %v2460_v4 = vld [vmem:[%s20482_s9 + $0x28] sm:$0xff]  ;;  %v11074_v27 = vld [vmem:[%s20482_s9 + $0x100] sm:$0xff] }
 0x25c   : > { %v12494_v41 = vpack.c.bf16 %v2460_v4, %v2459_v60  ;;  %v11104_v55 = vld [vmem:[%s20482_s9 + $0x1c0] sm:$0xff] }
 0x25d   : > { %v2387_v19 = vadd.f32 %v14427_v14, %v2372_v45  ;;  %v2358_v11 = vmax.f32 %v2340_v58, 0.0  ;;  %v11784_v56 = vpop.f32.mrb[46].mxu1  ;;  %v2240_v39 = vadd.f32 %v11783_v59, %v14415_v25  ;;  %v2423_v26 = vrot.slane %v2418_v29, 4  ;;  %v2461_v45 = vld [vmem:[%s20482_s9 + $0x30] sm:$0xff]  ;;  %v2462_v58 = vld [vmem:[%s20482_s9 + $0x38] sm:$0xff] }
 0x25e   : > { %v11785_v18 = vpop.f32.mrb[47].mxu1  ;;  %v12498_v59 = vpack.c.bf16 %v2462_v58, %v2461_v45 }
 0x25f   : > { %2396 = vst.msk [vmem:[#allocation5 + $0x20] sm:$0xff] %vm2391_vm4, %v2387_v19  ;;  %v2373_v16 = vmul.f32 %v14422_v35, %v2358_v11  ;;  %v11786_v32 = vadd.f32 %v11785_v18, %v11784_v56  ;;  %v2345_v36 = vadd.f32 %v14413_v34, %v2240_v39  ;;  %v2425_v10 = vmax.f32 %v2418_v29, %v2423_v26  ;;  %v11054_v29 = vld [vmem:[%s20482_s9 + $0x80] sm:$0xff]  ;;  %v11056_v18 = vld [vmem:[%s20482_s9 + $0x90] sm:$0xff] }
 0x260   : > { %v2444_v56 = vand.u32 3, %v13847_v8 }
 0x261   : > { %v2388_v46 = vadd.f32 %v14427_v14, %v2373_v16  ;;  %v2245_v12 = vadd.f32 %v11786_v32, %v14417_v54  ;;  %v2359_v15 = vmax.f32 %v2345_v36, 0.0  ;;  %2427 = vst.msk [vmem:[#allocation6 + $0x5] sm:$0xf] %vm2426_vm5, %v2425_v10  ;;  %v11057_v16 = vld [vmem:[%s20482_s9 + $0x98] sm:$0xff]  ;;  %v11110_v32 = vld [vmem:[%s20482_s9 + $0x1f0] sm:$0xff] }
 0x262   : > { %v2405_v7 = vld [vmem:[#allocation5 + $0x10] ss:$2 sm:$0xff]  ;;  %v2413_v25 = vld [vmem:[#allocation5 + $0x11] ss:$2 sm:$0xff]  ;;  %vm14522_vm8 = vcmp.ge.s32.totalorder %v2444_v56, 1  ;;  %v12506_v10 = vpack.c.bf16 %v11057_v16, %v11056_v18  ;;  %vm14557_vm9 = vcmp.le.s32.totalorder %v2444_v56, 2 }
 0x263   : > { %v2419_v3 = vmax.f32 %v2405_v7, %v2413_v25  ;;  %2397 = vst.msk [vmem:[#allocation5 + $0x28] sm:$0xff] %vm2391_vm4, %v2388_v46  ;;  %v2350_v2 = vadd.f32 %v14411_v62, %v2245_v12  ;;  %v2374_v53 = vmul.f32 %v14422_v35, %v2359_v15  ;;  %v11058_v12 = vld [vmem:[%s20482_s9 + $0xa0] sm:$0xff]  ;;  %v11059_v15 = vld [vmem:[%s20482_s9 + $0xa8] sm:$0xff]  ;;  %v11086_v16 = vld [vmem:[%s20482_s9 + $0x150] sm:$0xff] }
 0x264   : > { %v12510_v25 = vpack.c.bf16 %v11059_v15, %v11058_v12  ;;  %v11084_v56 = vld [vmem:[%s20482_s9 + $0x140] sm:$0xff] }
 0x265   : > { %v2360_v24 = vmax.f32 %v2350_v2, 0.0  ;;  %v2389_v34 = vadd.f32 %v14427_v14, %v2374_v53  ;;  %v2429_v23 = vrot.slane %v2419_v3, 4  ;;  %v11061_v2 = vld [vmem:[%s20482_s9 + $0xb8] sm:$0xff]  ;;  %v11088_v15 = vld [vmem:[%s20482_s9 + $0x160] sm:$0xff] }
 0x267   : > { %v2375_v30 = vmul.f32 %v14422_v35, %v2360_v24  ;;  %2398 = vst.msk [vmem:[#allocation5 + $0x30] sm:$0xff] %vm2391_vm4, %v2389_v34  ;;  %v2431_v54 = vmax.f32 %v2419_v3, %v2429_v23  ;;  %v11060_v3 = vld [vmem:[%s20482_s9 + $0xb0] sm:$0xff]  ;;  %v11064_v24 = vld [vmem:[%s20482_s9 + $0xc0] sm:$0xff]  ;;  %v11065_v34 = vld [vmem:[%s20482_s9 + $0xc8] sm:$0xff] }
 0x268   : > { %v2463_v28 = vld [vmem:[#allocation6 + $0x1] sm:$0xff]  ;;  %v12514_v53 = vpack.c.bf16 %v11061_v2, %v11060_v3  ;;  %v12518_v23 = vpack.c.bf16 %v11065_v34, %v11064_v24  ;;  %v11090_v2 = vld [vmem:[%s20482_s9 + $0x170] sm:$0xff] }
 0x269   : > { %v2390_v43 = vadd.f32 %v14427_v14, %v2375_v30  ;;  %12065 = vmatprep.mubr.msk.f32.mxu0 %vm2391_vm4, %v2463_v28  ;;  %2432 = vst.msk [vmem:[#allocation6 + $0x9] sm:$0xf] %vm2426_vm5, %v2431_v54  ;;  %v2445_v20 = vld [vmem:[#allocation6] sm:$0xff]  ;;  %v11066_v30 = vld [vmem:[%s20482_s9 + $0xd0] sm:$0xff]  ;;  %v11094_v34 = vld [vmem:[%s20482_s9 + $0x180] sm:$0xff] }
 0x26a   : > { %v2407_v9 = vld [vmem:[#allocation5 + $0x20] ss:$2 sm:$0xff]  ;;  %v2415_v62 = vld [vmem:[#allocation5 + $0x21] ss:$2 sm:$0xff]  ;;  %v2453_v44 = vsel %vm14470_vm6, %v2445_v20, 0.0  ;;  %v11076_v20 = vld [vmem:[%s20482_s9 + $0x110] sm:$0xff] }
 0x26b   : > { %v2420_v52 = vmax.f32 %v2407_v9, %v2415_v62  ;;  %2399 = vst.msk [vmem:[#allocation5 + $0x38] sm:$0xff] %vm2391_vm4, %v2390_v43  ;;  %v11067_v54 = vld [vmem:[%s20482_s9 + $0xd8] sm:$0xff]  ;;  %v3357_v28 = vld [vmem:[%s20246_s13 + $0x10] sm:$0xff] }
 0x26c   : > { %v12522_v9 = vpack.c.bf16 %v11067_v54, %v11066_v30  ;;  %v11096_v54 = vld [vmem:[%s20482_s9 + $0x190] sm:$0xff] }
 0x26d   : > { %v2434_v48 = vrot.slane %v2420_v52, 4 }
 0x26f   : > { %v2436_v1 = vmax.f32 %v2420_v52, %v2434_v48  ;;  %v11068_v52 = vld [vmem:[%s20482_s9 + $0xe0] sm:$0xff]  ;;  %v11069_v48 = vld [vmem:[%s20482_s9 + $0xe8] sm:$0xff] }
 0x270   : > { %v2636_v36 = vld [vmem:[#allocation6 + $0x2] sm:$0xff] }
 0x271   : > { %2437 = vst.msk [vmem:[#allocation6 + $0xd] sm:$0xf] %vm2426_vm5, %v2436_v1  ;;  %v2644_v7 = vsel %vm14506_vm7, %v2636_v36, 0.0  ;;  %v2738_v43 = vld [vmem:[#allocation6 + $0x4] sm:$0xff] }
 0x272   : > { %v2409_v49 = vld [vmem:[#allocation5 + $0x30] ss:$2 sm:$0xff]  ;;  %v2417_v38 = vld [vmem:[#allocation5 + $0x31] ss:$2 sm:$0xff]  ;;  %v2740_v1 = vsel %vm14470_vm6, %v2738_v43, 0.0  ;;  %v2834_v45 = vld [vmem:[#allocation6 + $0x5] sm:$0xff] }
 0x273   : > { %v2421_v13 = vmax.f32 %v2409_v49, %v2417_v38  ;;  %v12526_v49 = vpack.c.bf16 %v11069_v48, %v11068_v52  ;;  %v11070_v38 = vld [vmem:[%s20482_s9 + $0xf0] sm:$0xff]  ;;  %v11087_v36 = vld [vmem:[%s20482_s9 + $0x158] sm:$0xff]  ;;  %v11098_v48 = vld [vmem:[%s20482_s9 + $0x1a0] sm:$0xff] }
 0x274   : > { %v11097_v43 = vld [vmem:[%s20482_s9 + $0x198] sm:$0xff] }
 0x275   : > { %v2439_v47 = vrot.slane %v2421_v13, 4 }
 0x277   : > { %v2441_v6 = vmax.f32 %v2421_v13, %v2439_v47  ;;  %v12530_v13 = vpack.c.bf16 %v11071_v22, %v11070_v38  ;;  %v12534_v47 = vpack.c.bf16 %v11075_v5, %v11074_v27  ;;  %v11100_v38 = vld [vmem:[%s20482_s9 + $0x1b0] sm:$0xff]  ;;  %v11101_v22 = vld [vmem:[%s20482_s9 + $0x1b8] sm:$0xff] }
 0x278   : > { %v14477_v21 = vld [vmem:[#allocation6 + $0x9] sm:$0xff]  ;;  %v11106_v27 = vld [vmem:[%s20482_s9 + $0x1d0] sm:$0xff]  ;;  %v11107_v5 = vld [vmem:[%s20482_s9 + $0x1d8] sm:$0xff] }
 0x279   : > { %v14482_v50 = vld [vmem:[#allocation6 + $0x8] sm:$0xff]  ;;  %12066 = vmatmul.mubr.msk.f32.vlgmr.msra.gmra.mrb[56].mxu0 %vm2391_vm4, %v14477_v21  ;;  %2442 = vst.msk [vmem:[#allocation6 + $0x11] sm:$0xf] %vm2426_vm5, %v2441_v6  ;;  %vm20505_vm5 = vmmov %vm20504_vm0 }
 0x27a   : > { %v3026_v0 = vsel %vm14470_vm6, %v14482_v50, 0.0  ;;  %12489 = vmatpush3.bf16.msra.mxu0 %v14400_v33  ;;  %12084 = vmatprep.mubr.msk.f32.mxu0 %vm2391_vm4, %v2453_v44  ;;  %v11055_v33 = vld [vmem:[%s20482_s9 + $0x88] sm:$0xff]  ;;  %v2454_v46 = vsel %vm14522_vm8, %v14482_v50, 0.0  ;;  %v11078_v44 = vld [vmem:[%s20482_s9 + $0x120] sm:$0xff]  ;;  %vm20555_vm6 = vmmov %vm20504_vm0 }
 0x27b   : > { %12491 = vmatprep.subr.bf16.mxu0 %v12490_v37  ;;  %v12502_v26 = vpack.c.bf16 %v11055_v33, %v11054_v29  ;;  %v11081_v29 = vld [vmem:[%s20482_s9 + $0x138] sm:$0xff]  ;;  %v11105_v50 = vld [vmem:[%s20482_s9 + $0x1c8] sm:$0xff] }
 0x27e   : > { %12493 = vmatpush3.bf16.msra.mxu0 %v12490_v37  ;;  %v11077_v37 = vld [vmem:[%s20482_s9 + $0x118] sm:$0xff] }
 0x27f   : > { %12495 = vmatprep.subr.bf16.mxu0 %v12494_v41  ;;  %v12538_v6 = vpack.c.bf16 %v11077_v37, %v11076_v20  ;;  %v12586_v20 = vpack.c.bf16 %v11107_v5, %v11106_v27 }
 0x280   : > { %v14510_v11 = vld [vmem:[#allocation6 + $0xa] sm:$0xff]  ;;  %v3215_v19 = vld [vmem:[#allocation6 + $0x12] sm:$0xff] }
 0x281   : > { %v3216_v39 = vsel %vm14506_vm7, %v14510_v11, 0.0  ;;  %v2645_v62 = vsel %vm14557_vm9, %v14510_v11, 0.0  ;;  %v2739_v60 = vld [vmem:[#allocation6 + $0xc] sm:$0xff]  ;;  %v3217_v11 = vsel %vm14557_vm9, %v3215_v19, 0.0 }
 0x282   : > { %12497 = vmatpush3.bf16.msra.mxu0 %v12494_v41  ;;  %v2741_v4 = vsel %vm14522_vm8, %v2739_v60, 0.0  ;;  %v11079_v41 = vld [vmem:[%s20482_s9 + $0x128] sm:$0xff]  ;;  %v11108_v60 = vld [vmem:[%s20482_s9 + $0x1e0] sm:$0xff] }
 0x283   : > { %12499 = vmatprep.subr.bf16.mxu0 %v12498_v59  ;;  %v12542_v58 = vpack.c.bf16 %v11079_v41, %v11078_v44  ;;  %v2835_v12 = vld [vmem:[#allocation6 + $0xd] sm:$0xff]  ;;  %v11111_v44 = vld [vmem:[%s20482_s9 + $0x1f8] sm:$0xff] }
 0x284   : > { %v12594_v41 = vpack.c.bf16 %v11111_v44, %v11110_v32  ;;  %v3437_v32 = vld [vmem:[%s20248_s15] sm:$0xff]  ;;  %v3438_v44 = vld [vmem:[%s20248_s15 + $0x8] sm:$0xff] }
 0x285   : > { %v3829_v19 = vld [vmem:[%s20249_s16 + $0x40] sm:$0xff] }
 0x286   : > { %12501 = vmatpush3.bf16.msra.mxu0 %v12498_v59  ;;  %v11080_v59 = vld [vmem:[%s20482_s9 + $0x130] sm:$0xff] }
 0x287   : > { %12503 = vmatprep.subr.bf16.mxu0 %v12502_v26  ;;  %v12546_v33 = vpack.c.bf16 %v11081_v29, %v11080_v59  ;;  %v11116_v59 = vld [vmem:[%s20482_s9 + $0x210] sm:$0xff]  ;;  %v11117_v29 = vld [vmem:[%s20482_s9 + $0x218] sm:$0xff] }
 0x289   : > { %12085 = vmatmul.mubr.msk.f32.vlgmr.msra.gmra.mrb[56].mxu0 %vm2391_vm4, %v2454_v46  ;;  %v12554_v46 = vpack.c.bf16 %v11087_v36, %v11086_v16  ;;  %v11120_v36 = vld [vmem:[%s20482_s9 + $0x230] sm:$0xff] }
 0x28a   : > { %12505 = vmatpush3.bf16.msra.mxu0 %v12502_v26  ;;  %12103 = vmatprep.mubr.msk.f32.mxu0 %vm2391_vm4, %v2644_v7  ;;  %v11085_v26 = vld [vmem:[%s20482_s9 + $0x148] sm:$0xff] }
 0x28b   : > { %12507 = vmatprep.subr.bf16.mxu0 %v12506_v10  ;;  %v12550_v18 = vpack.c.bf16 %v11085_v26, %v11084_v56  ;;  %v11089_v7 = vld [vmem:[%s20482_s9 + $0x168] sm:$0xff]  ;;  %v11118_v26 = vld [vmem:[%s20482_s9 + $0x220] sm:$0xff] }
 0x28c   : > { %v12558_v3 = vpack.c.bf16 %v11089_v7, %v11088_v15  ;;  %v3121_v56 = vld [vmem:[#allocation6 + $0x11] sm:$0xff]  ;;  %v3355_v15 = vld [vmem:[%s20246_s13] sm:$0xff] }
 0x28e   : > { %12509 = vmatpush3.bf16.msra.mxu0 %v12506_v10  ;;  %v2928_v10 = vld [vmem:[#allocation6 + $0x6] sm:$0xff] }
 0x28f   : > { %12511 = vmatprep.subr.bf16.mxu0 %v12510_v25 }
 0x292   : > { %12513 = vmatpush3.bf16.msra.mxu0 %v12510_v25  ;;  %v2930_v25 = vsel %vm14506_vm7, %v2928_v10, 0.0  ;;  %v11121_v10 = vld [vmem:[%s20482_s9 + $0x238] sm:$0xff]  ;;  %vm20557_vm7 = vmmov %vm20504_vm0 }
 0x293   : > { %12515 = vmatprep.subr.bf16.mxu0 %v12514_v53 }
 0x296   : > { %12517 = vmatpush3.bf16.msra.mxu0 %v12514_v53  ;;  %v11091_v53 = vld [vmem:[%s20482_s9 + $0x178] sm:$0xff] }
 0x297   : > { %12519 = vmatprep.subr.bf16.mxu0 %v12518_v23  ;;  %v12562_v24 = vpack.c.bf16 %v11091_v53, %v11090_v2  ;;  %v3359_v53 = vld [vmem:[%s20246_s13 + $0x20] sm:$0xff] }
 0x299   : > { %12104 = vmatmul.mubr.msk.f32.vlgmr.msra.gmra.mrb[56].mxu0 %vm2391_vm4, %v2645_v62  ;;  %v12570_v62 = vpack.c.bf16 %v11097_v43, %v11096_v54 }
 0x29a   : > { %12521 = vmatpush3.bf16.msra.mxu0 %v12518_v23  ;;  %12122 = vmatprep.mubr.msk.f32.mxu0 %vm2391_vm4, %v2740_v1  ;;  %v11095_v23 = vld [vmem:[%s20482_s9 + $0x188] sm:$0xff] }
 0x29b   : > { %12523 = vmatprep.subr.bf16.mxu0 %v12522_v9  ;;  %v12566_v30 = vpack.c.bf16 %v11095_v23, %v11094_v34  ;;  %v11099_v1 = vld [vmem:[%s20482_s9 + $0x1a8] sm:$0xff]  ;;  %v11124_v23 = vld [vmem:[%s20243_s10] ss:$0 sm:$0xff] }
 0x29e   : > { %12525 = vmatpush3.bf16.msra.mxu0 %v12522_v9  ;;  %v2929_v9 = vld [vmem:[#allocation6 + $0xe] sm:$0xff] }
 0x29f   : > { %12527 = vmatprep.subr.bf16.mxu0 %v12526_v49  ;;  %v2931_v52 = vsel %vm14557_vm9, %v2929_v9, 0.0  ;;  %v11125_v9 = vld [vmem:[%s20244_s11] ss:$0 sm:$0xff]  ;;  %vm20561_vm9 = vmmov %vm20504_vm0 }
 0x2a2   : > { %12529 = vmatpush3.bf16.msra.mxu0 %v12526_v49  ;;  %v12574_v49 = vpack.c.bf16 %v11099_v1, %v11098_v48  ;;  %v11126_v48 = vld [vmem:[%s20245_s12] ss:$0 sm:$0xff] }
 0x2a3   : > { %12531 = vmatprep.subr.bf16.mxu0 %v12530_v13 }
 0x2a6   : > { %12533 = vmatpush3.bf16.msra.mxu0 %v12530_v13  ;;  %v12578_v13 = vpack.c.bf16 %v11101_v22, %v11100_v38 }
 0x2a7   : > { %12535 = vmatprep.subr.bf16.mxu0 %v12534_v47 }
 0x2a9   : > { %12123 = vmatmul.mubr.msk.f32.vlgmr.msra.gmra.mrb[56].mxu0 %vm2391_vm4, %v2741_v4 }
 0x2aa   : > { %12537 = vmatpush3.bf16.msra.mxu0 %v12534_v47  ;;  %12141 = vmatprep.mubr.msk.f32.mxu0 %vm2391_vm4, %v2834_v45  ;;  %v3025_v47 = vld [vmem:[#allocation6 + $0x10] sm:$0xff]  ;;  %v11114_v45 = vld [vmem:[%s20482_s9 + $0x200] sm:$0xff] }
 0x2ab   : > { %12539 = vmatprep.subr.bf16.mxu0 %v12538_v6  ;;  %v3027_v37 = vsel %vm14522_vm8, %v3025_v47, 0.0 }
 0x2ae   : > { %12541 = vmatpush3.bf16.msra.mxu0 %v12538_v6  ;;  %v11109_v6 = vld [vmem:[%s20482_s9 + $0x1e8] sm:$0xff] }
 0x2af   : > { %12543 = vmatprep.subr.bf16.mxu0 %v12542_v58  ;;  %v12590_v4 = vpack.c.bf16 %v11109_v6, %v11108_v60 }
 0x2b2   : > { %12545 = vmatpush3.bf16.msra.mxu0 %v12542_v58 }
 0x2b3   : > { %12547 = vmatprep.subr.bf16.mxu0 %v12546_v33 }
 0x2b6   : > { %12549 = vmatpush3.bf16.msra.mxu0 %v12546_v33  ;;  %v12602_v33 = vpack.c.bf16 %v11117_v29, %v11116_v59  ;;  %v11137_v59 = vld [vmem:[%s20248_s15 + $0x28] sm:$0xff]  ;;  %v11141_v29 = vld [vmem:[%s20248_s15 + $0x30] sm:$0xff] }
 0x2b7   : > { %12551 = vmatprep.subr.bf16.mxu0 %v12550_v18 }
 0x2b9   : > { %12142 = vmatmul.mubr.msk.f32.vlgmr.msra.gmra.mrb[56].mxu0 %vm2391_vm4, %v2835_v12  ;;  %v3358_v12 = vld [vmem:[%s20246_s13 + $0x18] sm:$0xff] }
 0x2ba   : > { %12553 = vmatpush3.bf16.msra.mxu0 %v12550_v18  ;;  %12160 = vmatprep.mubr.msk.f32.mxu0 %vm2391_vm4, %v2930_v25  ;;  %v11119_v18 = vld [vmem:[%s20482_s9 + $0x228] sm:$0xff]  ;;  %v3362_v25 = vld [vmem:[%s20246_s13 + $0x38] sm:$0xff] }
 0x2bb   : > { %12555 = vmatprep.subr.bf16.mxu0 %v12554_v46  ;;  %v12606_v16 = vpack.c.bf16 %v11119_v18, %v11118_v26  ;;  %v3825_v26 = vld [vmem:[%s20249_s16 + $0x20] sm:$0xff]  ;;  %v3830_v18 = vld [vmem:[%s20249_s16 + $0x48] sm:$0xff] }
 0x2be   : > { %12557 = vmatpush3.bf16.msra.mxu0 %v12554_v46  ;;  %v12610_v46 = vpack.c.bf16 %v11121_v10, %v11120_v36  ;;  %v11142_v36 = vld [vmem:[%s20248_s15 + $0x38] sm:$0xff] }
 0x2bf   : > { %12559 = vmatprep.subr.bf16.mxu0 %v12558_v3 }
 0x2c2   : > { %12561 = vmatpush3.bf16.msra.mxu0 %v12558_v3  ;;  %v12616_v3 = vpack.c.bf16 %v3357_v28, %v3355_v15  ;;  %v3838_v15 = vld [vmem:[%s20249_s16 + $0x88] sm:$0xff] }
 0x2c3   : > { %12563 = vmatprep.subr.bf16.mxu0 %v12562_v24 }
 0x2c6   : > { %12565 = vmatpush3.bf16.msra.mxu0 %v12562_v24  ;;  %v3361_v24 = vld [vmem:[%s20246_s13 + $0x30] sm:$0xff] }
 0x2c7   : > { %12567 = vmatprep.subr.bf16.mxu0 %v12566_v30  ;;  %v12620_v34 = vpack.c.bf16 %v3361_v24, %v3359_v53  ;;  %v3850_v53 = vld [vmem:[%s20249_s16 + $0xe8] sm:$0xff] }
 0x2c9   : > { %12161 = vmatmul.mubr.msk.f32.vlgmr.msra.gmra.mrb[56].mxu0 %vm2391_vm4, %v2931_v52 }
 0x2ca   : > { %12569 = vmatpush3.bf16.msra.mxu0 %v12566_v30  ;;  %12179 = vmatprep.mubr.msk.f32.mxu0 %vm2391_vm4, %v3026_v0  ;;  %v12582_v0 = vpack.c.bf16 %v11105_v50, %v11104_v55 }
 0x2cb   : > { %12571 = vmatprep.subr.bf16.mxu0 %v12570_v62 }
 0x2ce   : > { %12573 = vmatpush3.bf16.msra.mxu0 %v12570_v62 }
 0x2cf   : > { %12575 = vmatprep.subr.bf16.mxu0 %v12574_v49 }
 0x2d2   : > { %12577 = vmatpush3.bf16.msra.mxu0 %v12574_v49 }
 0x2d3   : > { %12579 = vmatprep.subr.bf16.mxu0 %v12578_v13 }
 0x2d6   : > { %12581 = vmatpush3.bf16.msra.mxu0 %v12578_v13 }
 0x2d7   : > { %12583 = vmatprep.subr.bf16.mxu0 %v12582_v0 }
 0x2d9   : > { %12180 = vmatmul.mubr.msk.f32.vlgmr.msra.gmra.mrb[56].mxu0 %vm2391_vm4, %v3027_v37 }
 0x2da   : > { %12585 = vmatpush3.bf16.msra.mxu0 %v12582_v0  ;;  %12198 = vmatprep.mubr.msk.f32.mxu0 %vm2391_vm4, %v14477_v21  ;;  %v11115_v21 = vld [vmem:[%s20482_s9 + $0x208] sm:$0xff] }
 0x2db   : > { %12587 = vmatprep.subr.bf16.mxu0 %v12586_v20  ;;  %v12598_v58 = vpack.c.bf16 %v11115_v21, %v11114_v45  ;;  %v3822_v21 = vld [vmem:[%s20249_s16 + $0x8] sm:$0xff] }
 0x2de   : > { %12589 = vmatpush3.bf16.msra.mxu0 %v12586_v20  ;;  %v11128_v20 = vld [vmem:[%s20248_s15 + $0x10] sm:$0xff] }
 0x2df   : > { %12591 = vmatprep.subr.bf16.mxu0 %v12590_v4 }
 0x2e2   : > { %12593 = vmatpush3.bf16.msra.mxu0 %v12590_v4  ;;  %v11129_v4 = vld [vmem:[%s20248_s15 + $0x18] sm:$0xff] }
 0x2e3   : > { %12595 = vmatprep.subr.bf16.mxu0 %v12594_v41 }
 0x2e6   : > { %12597 = vmatpush3.bf16.msra.mxu0 %v12594_v41  ;;  %v11136_v41 = vld [vmem:[%s20248_s15 + $0x20] sm:$0xff] }
 0x2e7   : > { %12599 = vmatprep.subr.bf16.mxu0 %v12598_v58 }
 0x2e9   : > { %12199 = vmatmul.mubr.msk.f32.vlgmr.msra.gmra.mrb[56].mxu0 %vm2391_vm4, %v3121_v56  ;;  %v3821_v56 = vld [vmem:[%s20249_s16] sm:$0xff] }
 0x2ea   : > { %12601 = vmatpush3.bf16.msra.mxu0 %v12598_v58  ;;  %12217 = vmatprep.mubr.msk.f32.mxu0 %vm2391_vm4, %v3216_v39  ;;  %v3356_v39 = vld [vmem:[%s20246_s13 + $0x8] sm:$0xff]  ;;  %v12624_v10 = vpack.c.bf16 %v3825_v26, %v3821_v56  ;;  %v3851_v56 = vld [vmem:[%s20249_s16 + $0xf0] sm:$0xff] }
 0x2eb   : > { %12603 = vmatprep.subr.bf16.mxu0 %v12602_v33  ;;  %v12614_v7 = vpack.c.bf16 %v3358_v12, %v3356_v39  ;;  %v3826_v58 = vld [vmem:[%s20249_s16 + $0x28] sm:$0xff]  ;;  %v14831_v12 = vld [vmem:[#allocation3] sm:$0xff] }
 0x2ed   : > { %12615 = vmatprep.subr.bf16.mxu1 %v12614_v7  ;;  %v3842_v7 = vld [vmem:[%s20249_s16 + $0xa8] sm:$0xff] }
 0x2ee   : > { %12605 = vmatpush3.bf16.msra.mxu0 %v12602_v33  ;;  %12617 = vmatpush1.bf16.msra.mxu1 %v12616_v3  ;;  %v12622_v33 = vpack.c.bf16 %v3826_v58, %v3822_v21  ;;  %v12630_v28 = vpack.c.bf16 %v3842_v7, %v3838_v15  ;;  %v3843_v21 = vld [vmem:[%s20249_s16 + $0xb0] sm:$0xff]  ;;  %v3848_v58 = vld [vmem:[%s20249_s16 + $0xd8] sm:$0xff] }
 0x2ef   : > { %12607 = vmatprep.subr.bf16.mxu0 %v12606_v16  ;;  %v4661_v15 = vld [vmem:[%s20252_s19 + $0xd8] sm:$0xff] }
 0x2f2   : > { %12609 = vmatpush3.bf16.msra.mxu0 %v12606_v16  ;;  %v3834_v16 = vld [vmem:[%s20249_s16 + $0x68] sm:$0xff] }
 0x2f3   : > { %12611 = vmatprep.subr.bf16.mxu0 %v12610_v46 }
 0x2f6   : > { %12613 = vmatpush3.bf16.msra.mxu0 %v12610_v46  ;;  %v12626_v46 = vpack.c.bf16 %v3834_v16, %v3830_v18  ;;  %v11153_v18 = vld [vmem:[%s20251_s18 + $0x40] sm:$0xff]  ;;  %v4637_v16 = vld [vmem:[%s20252_s19 + $0x18] sm:$0xff] }
 0x2f9   : > { %12218 = vmatmul.mubr.msk.f32.vlgmr.msra.gmra.mrb[56].mxu0 %vm2391_vm4, %v3217_v11  ;;  %v3833_v11 = vld [vmem:[%s20249_s16 + $0x60] sm:$0xff] }
 0x2fa   : > { %4939 = vmatprep.mubr.f32.mxu0 %v14362_v51  ;;  %v3360_v51 = vld [vmem:[%s20246_s13 + $0x28] sm:$0xff]  ;;  %v12628_v39 = vpack.c.bf16 %v3833_v11, %v3829_v19  ;;  %v4644_v19 = vld [vmem:[%s20252_s19 + $0x50] sm:$0xff] }
 0x2fb   : > { %v12618_v2 = vpack.c.bf16 %v3362_v25, %v3360_v51  ;;  %v3837_v51 = vld [vmem:[%s20249_s16 + $0x80] sm:$0xff] }
 0x2fc   : > { %v3841_v25 = vld [vmem:[%s20249_s16 + $0xa0] sm:$0xff] }
 0x2fd   : > { %12619 = vmatprep.subr.bf16.mxu1 %v12618_v2  ;;  %v12632_v3 = vpack.c.bf16 %v3841_v25, %v3837_v51  ;;  %v3846_v2 = vld [vmem:[%s20249_s16 + $0xc8] sm:$0xff]  ;;  %v4660_v51 = vld [vmem:[%s20252_s19 + $0xd0] sm:$0xff] }
 0x2fe   : > { %12621 = vmatpush1.bf16.msra.mxu1 %v12620_v34  ;;  %v12634_v24 = vpack.c.bf16 %v3850_v53, %v3846_v2  ;;  %v3845_v34 = vld [vmem:[%s20249_s16 + $0xc0] sm:$0xff]  ;;  %v4677_v2 = vld [vmem:[%s20252_s19 + $0x158] sm:$0xff] }
 0x3cc   : > { %v12219_v30 = vpop.f32.mrb[56].mxu0 }
 0x3cd   : > { %v3318_v54 = vadd.f32 %v12219_v30, %v11124_v23  ;;  %v3299_v43 = vpop.f32.mrb[57].mxu0 }
 0x3ce   : > { %v3317_v62 = vadd.f32 %v11124_v23, %v3299_v43  ;;  %v3849_v23 = vld [vmem:[%s20249_s16 + $0xe0] sm:$0xff]  ;;  %v3828_v43 = vld [vmem:[%s20249_s16 + $0x38] sm:$0xff] }
 0x3cf   : > { %v3320_v52 = vmax.f32 %v3318_v54, 0.0  ;;  %v12636_v30 = vpack.c.bf16 %v3849_v23, %v3845_v34  ;;  %v3824_v54 = vld [vmem:[%s20249_s16 + $0x18] sm:$0xff]  ;;  %v4676_v34 = vld [vmem:[%s20252_s19 + $0x150] sm:$0xff] }
 0x3d0   : > { %v3319_v1 = vmax.f32 %v3317_v62, 0.0  ;;  %v11146_v62 = vld [vmem:[%s20247_s14] ss:$0 sm:$0xff]  ;;  %v4685_v23 = vld [vmem:[%s20252_s19 + $0x198] sm:$0xff] }
 0x3d1   : > { %v3329_v49 = vmul.f32 %v11125_v9, %v3320_v52 }
 0x3d2   : > { %v3328_v38 = vmul.f32 %v11125_v9, %v3319_v1  ;;  %v12638_v9 = vpack.c.bf16 %v3828_v43, %v3824_v54  ;;  %v4693_v54 = vld [vmem:[%s20252_s19 + $0x1d8] sm:$0xff] }
 0x3d3   : > { %v3338_v22 = vadd.f32 %v11126_v48, %v3329_v49  ;;  %v12714_v43 = vpack.c.bf16 %v4693_v54, %v4685_v23  ;;  %v11183_v23 = vld [vmem:[%s20251_s18 + $0xb0] sm:$0xff]  ;;  %v11193_v54 = vld [vmem:[%s20251_s18 + $0xc0] sm:$0xff] }
 0x3d4   : > { %v3337_v13 = vadd.f32 %v11126_v48, %v3328_v38 }
 0x3d5   : > { %3341 = vst.msk [vmem:[#allocation7 + $0x8] sm:$0xff] %vm3339_vm10, %v3338_v22 }
 0x3d6   : > { %3340 = vst.msk [vmem:[#allocation7] sm:$0xff] %vm3339_vm10, %v3337_v13  ;;  %v3823_v13 = vld [vmem:[%s20249_s16 + $0x10] sm:$0xff] }
 0x3dd   : > { %v3342_v55 = vld [vmem:[#allocation7] ss:$2 sm:$0xff]  ;;  %v3344_v50 = vld [vmem:[#allocation7 + $0x1] ss:$2 sm:$0xff] }
 0x3de   : > { %v3345_v0 = vmax.f32 %v3342_v55, %v3344_v50  ;;  %v3827_v55 = vld [vmem:[%s20249_s16 + $0x30] sm:$0xff]  ;;  %v3832_v50 = vld [vmem:[%s20249_s16 + $0x58] sm:$0xff] }
 0x3e0   : > { %v3347_v27 = vrot.slane %v3345_v0, 2 }
 0x3e2   : > { %v3349_v5 = vmax.f32 %v3345_v0, %v3347_v27  ;;  %v3836_v0 = vld [vmem:[%s20249_s16 + $0x78] sm:$0xff] }
 0x3e4   : > { %3351 = vst.msk [vmem:[#allocation8] sm:$0x3] %vm3350_vm11, %v3349_v5  ;;  %vm20563_vm11 = vmmov %vm20504_vm0 }
 0x3e5   : > { %3353 = vst.msk [vmem:[#allocation8 - $0x2] sm:$0x30] %vm3352_vm12, %v3349_v5  ;;  %v12640_v5 = vpack.c.bf16 %v3827_v55, %v3823_v13  ;;  %v4717_v13 = vld [vmem:[%s20252_s19 + $0x298] sm:$0xff]  ;;  %vm20564_vm12 = vmmov %vm20504_vm0 }
 0x3e6   : > { %v4725_v55 = vld [vmem:[%s20252_s19 + $0x2d8] sm:$0xff] }
 0x3ec   : > { %v3354_v47 = vld [vmem:[#allocation8] sm:$0xf] }
 0x3ed   : > { %11127 = vmatmul.mubr.msk.f32.vlgmr.msra.gmra.mrb[48].mxu1 %vm3339_vm10, %v3354_v47  ;;  %vm20562_vm10 = vmmov %vm20504_vm0 }
 0x3ee   : > { %12222 = vmatprep.mubr.msk.f32.mxu1 %vm3445_vm13, %v11128_v20 }
 0x4c0   : > { %v3432_v37 = vpop.f32.mrb[48].mxu1 }
 0x4c1   : > { %3443 = vrot.lane.b32.xlu0 %v3432_v37, %s13268_s1  ;;  %v3434_v60 = vpop.f32.mrb[49].mxu1 }
 0x4c5   : > { %3705 = vrot.lane.b32.xlu0 %v3434_v60, %s13268_s1 }
 0x533   : > { %v3444_v6 = vpop.permute.xlu0 %3443 }
 0x534   : > { %12220 = vmatprep.subr.msk.mxu1 %vm3452_vm14, %v3444_v6 }
 0x535   : > { %12221 = vmatpush3.msk.msra.mxu1 %vm3452_vm14, %v3444_v6  ;;  %v3835_v6 = vld [vmem:[%s20249_s16 + $0x70] sm:$0xff] }
 0x536   : > { %12223 = vmatmul.mubr.msk.f32.vlgmr.msra.gmra.mrb[50].mxu1 %vm3445_vm13, %v11129_v4  ;;  %12225 = vmatprep.subr.msk.mxu1 %vm3452_vm14, %v3432_v37  ;;  %v3840_v4 = vld [vmem:[%s20249_s16 + $0x98] sm:$0xff] }
 0x537   : > { %12226 = vmatpush3.msk.msra.mxu1 %vm3452_vm14, %v3432_v37  ;;  %12227 = vmatprep.mubr.msk.f32.mxu1 %vm3445_vm13, %v3437_v32  ;;  %v3706_v45 = vpop.permute.xlu0 %3705  ;;  %v12642_v37 = vpack.c.bf16 %v3836_v0, %v3832_v50  ;;  %v3844_v32 = vld [vmem:[%s20249_s16 + $0xb8] sm:$0xff]  ;;  %v12722_v0 = vpack.c.bf16 %v4725_v55, %v4717_v13  ;;  %v4658_v13 = vld [vmem:[%s20252_s19 + $0xc0] sm:$0xff]  ;;  %v4667_v55 = vld [vmem:[%s20252_s19 + $0x108] sm:$0xff] }
 0x538   : > { %12230 = vmatprep.subr.msk.mxu1 %vm3452_vm14, %v3434_v60 }
 0x53e   : > { %12228 = vmatmul.mubr.msk.f32.vlgmr.msra.gmra.mrb[50].mxu1 %vm3445_vm13, %v3438_v44 }
 0x53f   : > { %12231 = vmatpush3.msk.msra.mxu1 %vm3452_vm14, %v3434_v60  ;;  %12232 = vmatprep.mubr.msk.f32.mxu1 %vm3445_vm13, %v11136_v41  ;;  %v3831_v60 = vld [vmem:[%s20249_s16 + $0x50] sm:$0xff]  ;;  %v12646_v41 = vpack.c.bf16 %v3844_v32, %v3840_v4 }
 0x540   : > { %12235 = vmatprep.subr.msk.mxu1 %vm3452_vm14, %v3706_v45 }
 0x546   : > { %12233 = vmatmul.mubr.msk.f32.vlgmr.msra.gmra.mrb[50].mxu1 %vm3445_vm13, %v11137_v59  ;;  %v3852_v59 = vld [vmem:[%s20249_s16 + $0xf8] sm:$0xff] }
 0x547   : > { %12236 = vmatpush3.msk.msra.mxu1 %vm3452_vm14, %v3706_v45  ;;  %12237 = vmatprep.mubr.msk.f32.mxu1 %vm3445_vm13, %v11141_v29  ;;  %v3839_v45 = vld [vmem:[%s20249_s16 + $0x90] sm:$0xff]  ;;  %v12650_v29 = vpack.c.bf16 %v3852_v59, %v3848_v58  ;;  %v11158_v59 = vld [vmem:[%s20251_s18 + $0x68] sm:$0xff]  ;;  %vm20568_vm14 = vmmov %vm20504_vm0 }
 0x548   : > { %12623 = vmatprep.subr.bf16.mxu1 %v12622_v33  ;;  %v3847_v33 = vld [vmem:[%s20249_s16 + $0xd0] sm:$0xff] }
 0x549   : > { %v12652_v26 = vpack.c.bf16 %v3851_v56, %v3847_v33 }
 0x54e   : > { %12238 = vmatmul.mubr.msk.f32.vlgmr.msra.gmra.mrb[50].mxu1 %vm3445_vm13, %v11142_v36  ;;  %v4645_v36 = vld [vmem:[%s20252_s19 + $0x58] sm:$0xff]  ;;  %vm20566_vm13 = vmmov %vm20504_vm0 }
 0x54f   : > { %12625 = vmatpush1.bf16.msra.mxu1 %v12624_v10  ;;  %3923 = vmatprep.mubr.f32.mxu1 %v14831_v12  ;;  %v12702_v10 = vpack.c.bf16 %v4645_v36, %v4637_v16  ;;  %v4013_v16 = vld [vmem:[%s20251_s18] sm:$0xff]  ;;  %v4014_v36 = vld [vmem:[%s20251_s18 + $0x8] sm:$0xff] }
 0x550   : > { %12627 = vmatprep.subr.bf16.mxu1 %v12626_v46  ;;  %v4636_v46 = vld [vmem:[%s20252_s19 + $0x10] sm:$0xff] }
 0x551   : > { %v12704_v11 = vpack.c.bf16 %v4644_v19, %v4636_v46  ;;  %12703 = vmatprep.subr.bf16.mxu0 %v12702_v10  ;;  %v4015_v10 = vld [vmem:[%s20251_s18 + $0x10] sm:$0xff]  ;;  %v4016_v46 = vld [vmem:[%s20251_s18 + $0x18] sm:$0xff]  ;;  %v4017_v19 = vld [vmem:[%s20251_s18 + $0x20] sm:$0xff] }
 0x553   : > { %12629 = vmatpush1.bf16.msra.mxu1 %v12628_v39  ;;  %v4653_v39 = vld [vmem:[%s20252_s19 + $0x98] sm:$0xff]  ;;  %12705 = vmatpush1.bf16.msra.mxu0 %v12704_v11  ;;  %v4018_v11 = vld [vmem:[%s20251_s18 + $0x28] sm:$0xff] }
 0x554   : > { %12631 = vmatprep.subr.bf16.mxu1 %v12630_v28  ;;  %v12706_v7 = vpack.c.bf16 %v4661_v15, %v4653_v39  ;;  %v4652_v28 = vld [vmem:[%s20252_s19 + $0x90] sm:$0xff]  ;;  %v4020_v15 = vld [vmem:[%s20251_s18 + $0x38] sm:$0xff] }
 0x555   : > { %v12708_v25 = vpack.c.bf16 %v4660_v51, %v4652_v28  ;;  %v4019_v39 = vld [vmem:[%s20251_s18 + $0x30] sm:$0xff]  ;;  %v4635_v28 = vld [vmem:[%s20252_s19 + $0x8] sm:$0xff] }
 0x556   : > { %12707 = vmatprep.subr.bf16.mxu0 %v12706_v7  ;;  %v11177_v7 = vld [vmem:[%s20251_s18 + $0x80] sm:$0xff]  ;;  %v4643_v51 = vld [vmem:[%s20252_s19 + $0x48] sm:$0xff] }
 0x557   : > { %12633 = vmatpush1.bf16.msra.mxu1 %v12632_v3  ;;  %v4669_v3 = vld [vmem:[%s20252_s19 + $0x118] sm:$0xff]  ;;  %12709 = vmatpush1.bf16.msra.mxu0 %v12708_v25  ;;  %v11178_v25 = vld [vmem:[%s20251_s18 + $0x88] sm:$0xff] }
 0x558   : > { %12635 = vmatprep.subr.bf16.mxu1 %v12634_v24  ;;  %v12710_v53 = vpack.c.bf16 %v4677_v2, %v4669_v3  ;;  %v4668_v24 = vld [vmem:[%s20252_s19 + $0x110] sm:$0xff]  ;;  %v12670_v2 = vpack.c.bf16 %v4643_v51, %v4635_v28  ;;  %v4741_v28 = vld [vmem:[%s20252_s19 + $0x358] sm:$0xff]  ;;  %v4730_v51 = vld [vmem:[%s20252_s19 + $0x300] sm:$0xff] }
 0x559   : > { %v11179_v3 = vld [vmem:[%s20251_s18 + $0x90] sm:$0xff] }
 0x55a   : > { %12711 = vmatprep.subr.bf16.mxu0 %v12710_v53  ;;  %v11180_v53 = vld [vmem:[%s20251_s18 + $0x98] sm:$0xff] }
 0x55b   : > { %12637 = vmatpush1.bf16.msra.mxu1 %v12636_v30  ;;  %v12712_v30 = vpack.c.bf16 %v4676_v34, %v4668_v24  ;;  %v11181_v24 = vld [vmem:[%s20251_s18 + $0xa0] sm:$0xff]  ;;  %v11182_v34 = vld [vmem:[%s20251_s18 + $0xa8] sm:$0xff] }
 0x55c   : > { %12639 = vmatprep.subr.bf16.mxu1 %v12638_v9  ;;  %v4684_v9 = vld [vmem:[%s20252_s19 + $0x190] sm:$0xff] }
 0x55d   : > { %12713 = vmatpush1.bf16.msra.mxu0 %v12712_v30  ;;  %v11184_v30 = vld [vmem:[%s20251_s18 + $0xb8] sm:$0xff] }
 0x55e   : > { %12715 = vmatprep.subr.bf16.mxu0 %v12714_v43  ;;  %v4634_v43 = vld [vmem:[%s20252_s19] sm:$0xff] }
 0x621   : > { %v12239_v52 = vpop.f32.mrb[50].mxu1 }
 0x622   : > { %v3800_v48 = vadd.f32 %v12239_v52, %v11146_v62  ;;  %v3781_v1 = vpop.f32.mrb[51].mxu1  ;;  %v4701_v52 = vld [vmem:[%s20252_s19 + $0x218] sm:$0xff] }
 0x623   : > { %v3799_v49 = vadd.f32 %v11146_v62, %v3781_v1  ;;  %v4692_v62 = vld [vmem:[%s20252_s19 + $0x1d0] sm:$0xff] }
 0x624   : > { %v3802_v38 = vmax.f32 %v3800_v48, 0.0  ;;  %v4709_v48 = vld [vmem:[%s20252_s19 + $0x258] sm:$0xff]  ;;  %v12716_v1 = vpack.c.bf16 %v4692_v62, %v4684_v9  ;;  %v4642_v9 = vld [vmem:[%s20252_s19 + $0x40] sm:$0xff]  ;;  %v4651_v62 = vld [vmem:[%s20252_s19 + $0x88] sm:$0xff] }
 0x625   : > { %v3801_v22 = vmax.f32 %v3799_v49, 0.0  ;;  %v12718_v49 = vpack.c.bf16 %v4709_v48, %v4701_v52  ;;  %v4659_v52 = vld [vmem:[%s20252_s19 + $0xc8] sm:$0xff] }
 0x626   : > { %v3811_v47 = vmul.f32 %v14422_v35, %v3802_v38  ;;  %v4700_v38 = vld [vmem:[%s20252_s19 + $0x210] sm:$0xff]  ;;  %12717 = vmatpush1.bf16.msra.mxu0 %v12716_v1  ;;  %v11194_v48 = vld [vmem:[%s20251_s18 + $0xc8] sm:$0xff]  ;;  %v12672_v1 = vpack.c.bf16 %v4642_v9, %v4634_v43  ;;  %v4757_v9 = vld [vmem:[%s20252_s19 + $0x3d8] sm:$0xff] }
 0x627   : > { %v3810_v27 = vmul.f32 %v14422_v35, %v3801_v22  ;;  %v12644_v35 = vpack.c.bf16 %v3835_v6, %v3831_v60  ;;  %v4708_v22 = vld [vmem:[%s20252_s19 + $0x250] sm:$0xff]  ;;  %12719 = vmatprep.subr.bf16.mxu0 %v12718_v49 }
 0x628   : > { %v3820_v44 = vadd.f32 %v14427_v14, %v3811_v47  ;;  %v12720_v50 = vpack.c.bf16 %v4708_v22, %v4700_v38  ;;  %v11195_v49 = vld [vmem:[%s20251_s18 + $0xd0] sm:$0xff]  ;;  %v12674_v38 = vpack.c.bf16 %v4659_v52, %v4651_v62  ;;  %v4650_v22 = vld [vmem:[%s20252_s19 + $0x80] sm:$0xff] }
 0x629   : > { %v3819_v20 = vadd.f32 %v14427_v14, %v3810_v27  ;;  %v12648_v14 = vpack.c.bf16 %v3843_v21, %v3839_v45  ;;  %v4716_v27 = vld [vmem:[%s20252_s19 + $0x290] sm:$0xff]  ;;  %v11157_v45 = vld [vmem:[%s20251_s18 + $0x60] sm:$0xff] }
 0x62a   : > { %12721 = vmatpush1.bf16.msra.mxu0 %v12720_v50  ;;  %v4675_v50 = vld [vmem:[%s20252_s19 + $0x148] sm:$0xff]  ;;  %v4746_v62 = vld [vmem:[%s20252_s19 + $0x380] sm:$0xff] }
 0x62b   : > { %11149 = vmatmul.mubr.msk.f32.vlgmr.msra.gmra.mrb[52].mxu1 %vm2391_vm4, %v3819_v20  ;;  %12723 = vmatprep.subr.bf16.mxu0 %v12722_v0  ;;  %v11196_v0 = vld [vmem:[%s20251_s18 + $0xd8] sm:$0xff] }
 0x62c   : > { %12641 = vmatpush1.bf16.msra.mxu1 %v12640_v5  ;;  %3929 = vmatprep.mubr.f32.mxu1 %v14831_v12  ;;  %v4724_v5 = vld [vmem:[%s20252_s19 + $0x2d0] sm:$0xff] }
 0x62d   : > { %12643 = vmatprep.subr.bf16.mxu1 %v12642_v37  ;;  %v12724_v47 = vpack.c.bf16 %v4724_v5, %v4716_v27  ;;  %v12676_v27 = vpack.c.bf16 %v4658_v13, %v4650_v22  ;;  %v11197_v5 = vld [vmem:[%s20251_s18 + $0xe0] sm:$0xff]  ;;  %v4639_v13 = vld [vmem:[%s20252_s19 + $0x28] sm:$0xff] }
 0x62f   : > { %11150 = vmatmul.mubr.msk.f32.gmra.mrb[54].mxu1 %vm2391_vm4, %v3820_v44  ;;  %12725 = vmatpush1.bf16.msra.mxu0 %v12724_v47  ;;  %v12678_v47 = vpack.c.bf16 %v4675_v50, %v4667_v55  ;;  %v4647_v55 = vld [vmem:[%s20252_s19 + $0x68] sm:$0xff]  ;;  %v4641_v50 = vld [vmem:[%s20252_s19 + $0x38] sm:$0xff] }
 0x630   : > { %12645 = vmatpush1.bf16.msra.mxu1 %v12644_v35  ;;  %4000 = vmatprep.mubr.f32.mxu1 %v14831_v12  ;;  %v11154_v35 = vld [vmem:[%s20251_s18 + $0x48] sm:$0xff] }
 0x631   : > { %12647 = vmatprep.subr.bf16.mxu1 %v12646_v41  ;;  %v11156_v41 = vld [vmem:[%s20251_s18 + $0x58] sm:$0xff] }
 0x634   : > { %12649 = vmatpush1.bf16.msra.mxu1 %v12648_v14  ;;  %v11159_v14 = vld [vmem:[%s20251_s18 + $0x70] sm:$0xff] }
 0x635   : > { %12651 = vmatprep.subr.bf16.mxu1 %v12650_v29 }
 0x638   : > { %12653 = vmatpush1.bf16.msra.mxu1 %v12652_v26  ;;  %v11160_v26 = vld [vmem:[%s20251_s18 + $0x78] sm:$0xff] }
 0x63b   : > { %11151 = vmatmul.mubr.msk.f32.vlgmr.msra.gmra.mrb[56].mxu1 %vm2391_vm4, %v3819_v20 }
 0x63c   : > { %4006 = vmatprep.mubr.f32.mxu1 %v14831_v12 }
 0x63f   : > { %11152 = vmatmul.mubr.msk.f32.gmra.mrb[58].mxu1 %vm2391_vm4, %v3820_v44  ;;  %v11155_v44 = vld [vmem:[%s20251_s18 + $0x50] sm:$0xff] }
 0x640   : > { %12244 = vmatprep.mubr.msk.f32.mxu1 %vm4030_vm15, %v11153_v18 }
 0x6fe   : > { %v3925_v20 = vpop.f32.mrb[52].mxu1 }
 0x6ff   : > { %v3927_v37 = vpop.f32.mrb[53].mxu1 }
 0x702   : > { %v3931_v60 = vpop.f32.mrb[54].mxu1 }
 0x703   : > { %v12658_v6 = vpack.c.bf16 %v3931_v60, %v3925_v20  ;;  %v3933_v4 = vpop.f32.mrb[55].mxu1  ;;  %v4666_v20 = vld [vmem:[%s20252_s19 + $0x100] sm:$0xff]  ;;  %v4683_v60 = vld [vmem:[%s20252_s19 + $0x188] sm:$0xff] }
 0x704   : > { %v12654_v32 = vpack.c.bf16 %v3933_v4, %v3927_v37  ;;  %v4674_v37 = vld [vmem:[%s20252_s19 + $0x140] sm:$0xff]  ;;  %v11198_v4 = vld [vmem:[%s20251_s18 + $0xe8] sm:$0xff] }
 0x706   : > { %12655 = vmatprep.subr.bf16.mxu1 %v12654_v32 }
 0x707   : > { %12657 = vmatpush3.bf16.msra.mxu1 %v12654_v32  ;;  %v12680_v32 = vpack.c.bf16 %v4674_v37, %v4666_v20 }
 0x708   : > { %12659 = vmatprep.subr.bf16.mxu1 %v12658_v6 }
 0x70a   : > { %12245 = vmatmul.mubr.msk.f32.vlgmr.msra.gmra.mrb[60].mxu1 %vm4030_vm15, %v11154_v35  ;;  %v11199_v35 = vld [vmem:[%s20251_s18 + $0xf0] sm:$0xff] }
 0x70b   : > { %12661 = vmatpush3.bf16.msra.mxu1 %v12658_v6  ;;  %12247 = vmatprep.mubr.msk.f32.mxu1 %vm4030_vm15, %v11155_v44  ;;  %v4691_v6 = vld [vmem:[%s20252_s19 + $0x1c8] sm:$0xff] }
 0x70c   : > { %v12682_v44 = vpack.c.bf16 %v4691_v6, %v4683_v60 }
 0x70e   : > { %v4002_v21 = vpop.f32.mrb[56].mxu1  ;;  %12248 = vmatmul.mubr.msk.f32.gmra.mrb[62].mxu1 %vm4030_vm15, %v11156_v41  ;;  %v4682_v41 = vld [vmem:[%s20252_s19 + $0x180] sm:$0xff] }
 0x70f   : > { %v4004_v58 = vpop.f32.mrb[57].mxu1  ;;  %12250 = vmatprep.mubr.msk.f32.mxu1 %vm4030_vm15, %v11157_v45  ;;  %v4690_v45 = vld [vmem:[%s20252_s19 + $0x1c0] sm:$0xff] }
 0x712   : > { %v4008_v29 = vpop.f32.mrb[58].mxu1  ;;  %12251 = vmatmul.mubr.msk.f32.gmra.mrb[64].mxu1 %vm4030_vm15, %v11158_v59  ;;  %v11200_v59 = vld [vmem:[%s20251_s18 + $0xf8] sm:$0xff] }
 0x713   : > { %v12662_v33 = vpack.c.bf16 %v4008_v29, %v4002_v21  ;;  %v4010_v56 = vpop.f32.mrb[59].mxu1  ;;  %12253 = vmatprep.mubr.msk.f32.mxu1 %vm4030_vm15, %v11159_v14  ;;  %v4699_v21 = vld [vmem:[%s20252_s19 + $0x208] sm:$0xff]  ;;  %v12684_v14 = vpack.c.bf16 %v4690_v45, %v4682_v41  ;;  %v4646_v45 = vld [vmem:[%s20252_s19 + $0x60] sm:$0xff] }
 0x714   : > { %v12666_v18 = vpack.c.bf16 %v4010_v56, %v4004_v58  ;;  %v4707_v58 = vld [vmem:[%s20252_s19 + $0x248] sm:$0xff]  ;;  %v4706_v56 = vld [vmem:[%s20252_s19 + $0x240] sm:$0xff] }
 0x715   : > { %12663 = vmatprep.subr.bf16.mxu1 %v12662_v33  ;;  %v12686_v29 = vpack.c.bf16 %v4707_v58, %v4699_v21  ;;  %v4640_v21 = vld [vmem:[%s20252_s19 + $0x30] sm:$0xff] }
 0x716   : > { %12254 = vmatmul.mubr.msk.f32.gmra.mrb[66].mxu1 %vm4030_vm15, %v11160_v26  ;;  %v4715_v26 = vld [vmem:[%s20252_s19 + $0x288] sm:$0xff]  ;;  %v4648_v58 = vld [vmem:[%s20252_s19 + $0x70] sm:$0xff] }
 0x717   : > { %12260 = vmatprep.mubr.msk.f32.mxu1 %vm4030_vm15, %v4013_v16 }
 0x71a   : > { %12261 = vmatmul.mubr.msk.f32.vlgmr.msra.gmra.mrb[60].mxu1 %vm4030_vm15, %v4014_v36 }
 0x71b   : > { %12665 = vmatpush3.bf16.msra.mxu1 %v12662_v33  ;;  %12263 = vmatprep.mubr.msk.f32.mxu1 %vm4030_vm15, %v4015_v10  ;;  %v4698_v33 = vld [vmem:[%s20252_s19 + $0x200] sm:$0xff] }
 0x71c   : > { %12667 = vmatprep.subr.bf16.mxu1 %v12666_v18  ;;  %v12688_v16 = vpack.c.bf16 %v4706_v56, %v4698_v33  ;;  %v4714_v10 = vld [vmem:[%s20252_s19 + $0x280] sm:$0xff] }
 0x71e   : > { %12264 = vmatmul.mubr.msk.f32.gmra.mrb[62].mxu1 %vm4030_vm15, %v4016_v46  ;;  %v4722_v46 = vld [vmem:[%s20252_s19 + $0x2c0] sm:$0xff] }
 0x71f   : > { %12266 = vmatprep.mubr.msk.f32.mxu1 %vm4030_vm15, %v4017_v19  ;;  %v12692_v19 = vpack.c.bf16 %v4722_v46, %v4714_v10  ;;  %v12768_v10 = vpack.c.bf16 %v4648_v58, %v4640_v21  ;;  %v4654_v46 = vld [vmem:[%s20252_s19 + $0xa0] sm:$0xff]  ;;  %v4688_v58 = vld [vmem:[%s20252_s19 + $0x1b0] sm:$0xff] }
 0x720   : > { %v4694_v21 = vld [vmem:[%s20252_s19 + $0x1e0] sm:$0xff] }
 0x722   : > { %12267 = vmatmul.mubr.msk.f32.gmra.mrb[64].mxu1 %vm4030_vm15, %v4018_v11  ;;  %v4731_v11 = vld [vmem:[%s20252_s19 + $0x308] sm:$0xff] }
 0x723   : > { %12269 = vmatprep.mubr.msk.f32.mxu1 %vm4030_vm15, %v4019_v39  ;;  %v4739_v39 = vld [vmem:[%s20252_s19 + $0x348] sm:$0xff] }
 0x726   : > { %12270 = vmatmul.mubr.msk.f32.gmra.mrb[66].mxu1 %vm4030_vm15, %v4020_v15  ;;  %v12694_v15 = vpack.c.bf16 %v4739_v39, %v4731_v11 }
 0x727   : > { %12276 = vmatprep.mubr.msk.f32.mxu1 %vm4030_vm15, %v11177_v7  ;;  %v4733_v7 = vld [vmem:[%s20252_s19 + $0x318] sm:$0xff] }
 0x72a   : > { %12277 = vmatmul.mubr.msk.f32.vlgmr.msra.gmra.mrb[60].mxu1 %vm4030_vm15, %v11178_v25  ;;  %v12726_v25 = vpack.c.bf16 %v4741_v28, %v4733_v7  ;;  %v4662_v28 = vld [vmem:[%s20252_s19 + $0xe0] sm:$0xff] }
 0x72b   : > { %12669 = vmatpush3.bf16.msra.mxu1 %v12666_v18  ;;  %12279 = vmatprep.mubr.msk.f32.mxu1 %vm4030_vm15, %v11179_v3  ;;  %v4723_v18 = vld [vmem:[%s20252_s19 + $0x2c8] sm:$0xff]  ;;  %v4738_v3 = vld [vmem:[%s20252_s19 + $0x340] sm:$0xff] }
 0x72c   : > { %12671 = vmatprep.subr.bf16.mxu1 %v12670_v2  ;;  %v12690_v36 = vpack.c.bf16 %v4723_v18, %v4715_v26  ;;  %v4732_v2 = vld [vmem:[%s20252_s19 + $0x310] sm:$0xff]  ;;  %12727 = vmatprep.subr.bf16.mxu0 %v12726_v25  ;;  %v4663_v26 = vld [vmem:[%s20252_s19 + $0xe8] sm:$0xff]  ;;  %v4657_v18 = vld [vmem:[%s20252_s19 + $0xb8] sm:$0xff] }
 0x72d   : > { %v4664_v25 = vld [vmem:[%s20252_s19 + $0xf0] sm:$0xff] }
 0x72e   : > { %12280 = vmatmul.mubr.msk.f32.gmra.mrb[62].mxu1 %vm4030_vm15, %v11180_v53  ;;  %v4740_v53 = vld [vmem:[%s20252_s19 + $0x350] sm:$0xff] }
 0x72f   : > { %12282 = vmatprep.mubr.msk.f32.mxu1 %vm4030_vm15, %v11181_v24  ;;  %v12696_v24 = vpack.c.bf16 %v4738_v3, %v4730_v51  ;;  %v4656_v51 = vld [vmem:[%s20252_s19 + $0xb0] sm:$0xff] }
 0x732   : > { %12283 = vmatmul.mubr.msk.f32.gmra.mrb[64].mxu1 %vm4030_vm15, %v11182_v34  ;;  %v12728_v34 = vpack.c.bf16 %v4740_v53, %v4732_v2 }
 0x733   : > { %12285 = vmatprep.mubr.msk.f32.mxu1 %vm4030_vm15, %v11183_v23  ;;  %v4747_v23 = vld [vmem:[%s20252_s19 + $0x388] sm:$0xff] }
 0x734   : > { %12729 = vmatpush1.bf16.msra.mxu0 %v12728_v34  ;;  %v4679_v34 = vld [vmem:[%s20252_s19 + $0x168] sm:$0xff] }
 0x736   : > { %12286 = vmatmul.mubr.msk.f32.gmra.mrb[66].mxu1 %vm4030_vm15, %v11184_v30  ;;  %v4755_v30 = vld [vmem:[%s20252_s19 + $0x3c8] sm:$0xff] }
 0x737   : > { %12292 = vmatprep.mubr.msk.f32.mxu1 %vm4030_vm15, %v11193_v54  ;;  %v4749_v54 = vld [vmem:[%s20252_s19 + $0x398] sm:$0xff]  ;;  %v12698_v43 = vpack.c.bf16 %v4755_v30, %v4747_v23 }
 0x738   : > { %v12730_v52 = vpack.c.bf16 %v4757_v9, %v4749_v54  ;;  %v4673_v23 = vld [vmem:[%s20252_s19 + $0x138] sm:$0xff]  ;;  %v12740_v54 = vpack.c.bf16 %v4662_v28, %v4654_v46  ;;  %v4670_v9 = vld [vmem:[%s20252_s19 + $0x120] sm:$0xff] }
 0x739   : > { %v4681_v30 = vld [vmem:[%s20252_s19 + $0x178] sm:$0xff]  ;;  %v4702_v46 = vld [vmem:[%s20252_s19 + $0x220] sm:$0xff] }
 0x73a   : > { %12293 = vmatmul.mubr.msk.f32.vlgmr.msra.gmra.mrb[60].mxu1 %vm4030_vm15, %v11194_v48  ;;  %v4754_v48 = vld [vmem:[%s20252_s19 + $0x3c0] sm:$0xff]  ;;  %12731 = vmatprep.subr.bf16.mxu0 %v12730_v52 }
 0x73b   : > { %12295 = vmatprep.mubr.msk.f32.mxu1 %vm4030_vm15, %v11195_v49  ;;  %12673 = vmatpush1.bf16.msra.mxu1 %v12672_v1  ;;  %v4748_v1 = vld [vmem:[%s20252_s19 + $0x390] sm:$0xff]  ;;  %v4710_v28 = vld [vmem:[%s20252_s19 + $0x260] sm:$0xff] }
 0x73c   : > { %12675 = vmatprep.subr.bf16.mxu1 %v12674_v38  ;;  %v4756_v49 = vld [vmem:[%s20252_s19 + $0x3d0] sm:$0xff]  ;;  %v12700_v38 = vpack.c.bf16 %v4754_v48, %v4746_v62 }
 0x73d   : > { %v12732_v22 = vpack.c.bf16 %v4756_v49, %v4748_v1 }
 0x73e   : > { %12296 = vmatmul.mubr.msk.f32.gmra.mrb[62].mxu1 %vm4030_vm15, %v11196_v0  ;;  %v12734_v0 = vpack.c.bf16 %v4647_v55, %v4639_v13  ;;  %v4680_v13 = vld [vmem:[%s20252_s19 + $0x170] sm:$0xff] }
 0x73f   : > { %12298 = vmatprep.mubr.msk.f32.mxu1 %vm4030_vm15, %v11197_v5  ;;  %12677 = vmatpush1.bf16.msra.mxu1 %v12676_v27  ;;  %v4649_v27 = vld [vmem:[%s20252_s19 + $0x78] sm:$0xff] }
 0x740   : > { %12679 = vmatprep.subr.bf16.mxu1 %v12678_v47  ;;  %12733 = vmatpush1.bf16.msra.mxu0 %v12732_v22  ;;  %v12766_v5 = vpack.c.bf16 %v4649_v27, %v4641_v50  ;;  %v15256_v47 = vld [vmem:[%s20250_s17] ss:$0 sm:$0xff]  ;;  %v4672_v22 = vld [vmem:[%s20252_s19 + $0x130] sm:$0xff]  ;;  %v4687_v27 = vld [vmem:[%s20252_s19 + $0x1a8] sm:$0xff] }
 0x742   : > { %12299 = vmatmul.mubr.msk.f32.gmra.mrb[64].mxu1 %vm4030_vm15, %v11198_v4  ;;  %12767 = vmatprep.subr.bf16.mxu0 %v12766_v5  ;;  %v15263_v4 = vld [vmem:[%s20446_s7] ss:$0 sm:$0xff]  ;;  %v4695_v5 = vld [vmem:[%s20252_s19 + $0x1e8] sm:$0xff] }
 0x743   : > { %12301 = vmatprep.mubr.msk.f32.mxu1 %vm4030_vm15, %v11199_v35  ;;  %12681 = vmatpush1.bf16.msra.mxu1 %v12680_v32  ;;  %v4638_v32 = vld [vmem:[%s20252_s19 + $0x20] sm:$0xff] }
 0x744   : > { %12683 = vmatprep.subr.bf16.mxu1 %v12682_v44 }
 0x746   : > { %12302 = vmatmul.mubr.msk.f32.gmra.mrb[66].mxu1 %vm4030_vm15, %v11200_v59  ;;  %v15280_v59 = vld [vmem:[%s20447_s8] ss:$0 sm:$0xff]  ;;  %vm20570_vm15 = vmmov %vm20504_vm0 }
 0x747   : > { %12685 = vmatpush1.bf16.msra.mxu1 %v12684_v14  ;;  %4826 = vmatprep.mubr.f32.mxu1 %v14831_v12 }
 0x748   : > { %12687 = vmatprep.subr.bf16.mxu1 %v12686_v29  ;;  %v4655_v29 = vld [vmem:[%s20252_s19 + $0xa8] sm:$0xff] }
 0x749   : > { %v12738_v2 = vpack.c.bf16 %v4663_v26, %v4655_v29  ;;  %v12746_v29 = vpack.c.bf16 %v4695_v5, %v4687_v27  ;;  %v4711_v26 = vld [vmem:[%s20252_s19 + $0x268] sm:$0xff]  ;;  %v4745_v27 = vld [vmem:[%s20252_s19 + $0x378] sm:$0xff] }
 0x74b   : > { %12689 = vmatpush1.bf16.msra.mxu1 %v12688_v16  ;;  %v4665_v16 = vld [vmem:[%s20252_s19 + $0xf8] sm:$0xff] }
 0x74c   : > { %12691 = vmatprep.subr.bf16.mxu1 %v12690_v36  ;;  %v12736_v36 = vpack.c.bf16 %v4646_v45, %v4638_v32  ;;  %v12770_v53 = vpack.c.bf16 %v4665_v16, %v4657_v18  ;;  %v4686_v32 = vld [vmem:[%s20252_s19 + $0x1a0] sm:$0xff]  ;;  %v4705_v18 = vld [vmem:[%s20252_s19 + $0x238] sm:$0xff] }
 0x74d   : > { %v4713_v16 = vld [vmem:[%s20252_s19 + $0x278] sm:$0xff] }
 0x74f   : > { %12693 = vmatpush1.bf16.msra.mxu1 %v12692_v19 }
 0x750   : > { %12695 = vmatprep.subr.bf16.mxu1 %v12694_v15 }
 0x753   : > { %12697 = vmatpush1.bf16.msra.mxu1 %v12696_v24  ;;  %v4671_v24 = vld [vmem:[%s20252_s19 + $0x128] sm:$0xff] }
 0x754   : > { %12699 = vmatprep.subr.bf16.mxu1 %v12698_v43  ;;  %v12772_v43 = vpack.c.bf16 %v4664_v25, %v4656_v51  ;;  %v12742_v50 = vpack.c.bf16 %v4679_v34, %v4671_v24  ;;  %v4704_v51 = vld [vmem:[%s20252_s19 + $0x230] sm:$0xff]  ;;  %v4727_v24 = vld [vmem:[%s20252_s19 + $0x2e8] sm:$0xff]  ;;  %v4721_v34 = vld [vmem:[%s20252_s19 + $0x2b8] sm:$0xff] }
 0x755   : > { %v4712_v25 = vld [vmem:[%s20252_s19 + $0x270] sm:$0xff] }
 0x757   : > { %12701 = vmatpush1.bf16.msra.mxu1 %v12700_v38  ;;  %v4678_v38 = vld [vmem:[%s20252_s19 + $0x160] sm:$0xff] }
 0x758   : > { %12735 = vmatprep.subr.bf16.mxu1 %v12734_v0  ;;  %v12774_v0 = vpack.c.bf16 %v4681_v30, %v4673_v23  ;;  %v4729_v23 = vld [vmem:[%s20252_s19 + $0x2f8] sm:$0xff]  ;;  %v12752_v30 = vpack.c.bf16 %v4710_v28, %v4702_v46  ;;  %v4758_v46 = vld [vmem:[%s20252_s19 + $0x3e0] sm:$0xff] }
 0x80d   : > { %v12294_v20 = vpop.f32.mrb[60].mxu1 }
 0x80e   : > { %v4589_v37 = vadd.f32 %v12294_v20, %v15256_v47  ;;  %v4534_v60 = vpop.f32.mrb[61].mxu1  ;;  %v4689_v20 = vld [vmem:[%s20252_s19 + $0x1b8] sm:$0xff] }
 0x80f   : > { %v4588_v6 = vadd.f32 %v15256_v47, %v4534_v60  ;;  %v12744_v60 = vpack.c.bf16 %v4678_v38, %v4670_v9  ;;  %v4726_v38 = vld [vmem:[%s20252_s19 + $0x2e0] sm:$0xff] }
 0x810   : > { %v4597_v35 = vmax.f32 %v4589_v37, 0.0  ;;  %v4697_v37 = vld [vmem:[%s20252_s19 + $0x1f8] sm:$0xff] }
 0x811   : > { %v4596_v44 = vmax.f32 %v4588_v6, 0.0  ;;  %v12297_v41 = vpop.f32.mrb[62].mxu1  ;;  %v12776_v6 = vpack.c.bf16 %v4680_v13, %v4672_v22  ;;  %v4720_v22 = vld [vmem:[%s20252_s19 + $0x2b0] sm:$0xff] }
 0x812   : > { %v4544_v14 = vpop.f32.mrb[63].mxu1  ;;  %v4612_v19 = vmul.f32 %v15263_v4, %v4597_v35  ;;  %v4591_v39 = vadd.f32 %v12297_v41, %v15256_v47  ;;  %v4728_v13 = vld [vmem:[%s20252_s19 + $0x2f0] sm:$0xff] }
 0x813   : > { %v4611_v33 = vmul.f32 %v15263_v4, %v4596_v44  ;;  %v4590_v56 = vadd.f32 %v15256_v47, %v4544_v14  ;;  %v4696_v14 = vld [vmem:[%s20252_s19 + $0x1f0] sm:$0xff] }
 0x814   : > { %v15331_v62 = vadd.f32 %v15280_v59, %v4612_v19  ;;  %v4599_v52 = vmax.f32 %v4591_v39, 0.0 }
 0x815   : > { %v15301_v11 = vadd.f32 %v15280_v59, %v4611_v33  ;;  %v4598_v15 = vmax.f32 %v4590_v56, 0.0  ;;  %v12300_v7 = vpop.f32.mrb[64].mxu1  ;;  %v12778_v33 = vpack.c.bf16 %v4697_v37, %v4689_v20  ;;  %v4703_v56 = vld [vmem:[%s20252_s19 + $0x228] sm:$0xff]  ;;  %v12788_v20 = vpack.c.bf16 %v4728_v13, %v4720_v22  ;;  %v4734_v37 = vld [vmem:[%s20252_s19 + $0x320] sm:$0xff] }
 0x816   : > { %v4554_v3 = vpop.f32.mrb[65].mxu1  ;;  %v4614_v35 = vmul.f32 %v15263_v4, %v4599_v52  ;;  %v4593_v41 = vadd.f32 %v12300_v7, %v15256_v47 }
 0x817   : > { %4827 = vmatmul.mubr.f32.vlgmr.msra.gmra.mrb[68].mxu1 %v15301_v11  ;;  %4940 = vmatmul.mubr.f32.vlgmr.msra.gmra.mrb[58].mxu0 %v15301_v11  ;;  %v4613_v48 = vmul.f32 %v15263_v4, %v4598_v15  ;;  %v4592_v1 = vadd.f32 %v15256_v47, %v4554_v3  ;;  %v12750_v3 = vpack.c.bf16 %v4711_v26, %v4703_v56  ;;  %v4761_v56 = vld [vmem:[%s20252_s19 + $0x3f8] sm:$0xff] }
 0x818   : > { %12737 = vmatpush1.bf16.msra.mxu1 %v12736_v36  ;;  %12769 = vmatpush1.bf16.msra.mxu0 %v12768_v10  ;;  %v12748_v36 = vpack.c.bf16 %v4694_v21, %v4686_v32  ;;  %v12780_v10 = vpack.c.bf16 %v4696_v14, %v4688_v58  ;;  %v15399_v19 = vadd.f32 %v15280_v59, %v4614_v35  ;;  %v4601_v39 = vmax.f32 %v4593_v41, 0.0  ;;  %v4742_v35 = vld [vmem:[%s20252_s19 + $0x360] sm:$0xff]  ;;  %v4736_v41 = vld [vmem:[%s20252_s19 + $0x330] sm:$0xff]  ;;  %v4751_v14 = vld [vmem:[%s20252_s19 + $0x3a8] sm:$0xff] }
 0x819   : > { %v15335_v49 = vpop.f32.mrb[66].mxu1  ;;  %4832 = vmatprep.mubr.f32.mxu1 %v14831_v12  ;;  %4945 = vmatprep.mubr.f32.mxu0 %v14831_v12  ;;  %v15367_v44 = vadd.f32 %v15280_v59, %v4613_v48  ;;  %v4600_v45 = vmax.f32 %v4592_v1, 0.0  ;;  %v12760_v26 = vpack.c.bf16 %v4742_v35, %v4734_v37 }
 0x81a   : > { %v4564_v55 = vpop.f32.mrb[67].mxu1  ;;  %12739 = vmatprep.subr.bf16.mxu1 %v12738_v2  ;;  %12771 = vmatprep.subr.bf16.mxu0 %v12770_v53  ;;  %v12782_v2 = vpack.c.bf16 %v4713_v16, %v4705_v18  ;;  %v4719_v53 = vld [vmem:[%s20252_s19 + $0x2a8] sm:$0xff]  ;;  %v4616_v9 = vmul.f32 %v15263_v4, %v4601_v39  ;;  %v4595_v48 = vadd.f32 %v15335_v49, %v15256_v47  ;;  %v4750_v16 = vld [vmem:[%s20252_s19 + $0x3a0] sm:$0xff]  ;;  %v4752_v39 = vld [vmem:[%s20252_s19 + $0x3b0] sm:$0xff] }
 0x81b   : > { %4833 = vmatmul.mubr.f32.gmra.mrb[70].mxu1 %v15331_v62  ;;  %4946 = vmatmul.mubr.f32.gmra.mrb[60].mxu0 %v15331_v62  ;;  %v4615_v15 = vmul.f32 %v15263_v4, %v4600_v45  ;;  %v4594_v7 = vadd.f32 %v15256_v47, %v4564_v55  ;;  %v12754_v47 = vpack.c.bf16 %v4727_v24, %v4719_v53  ;;  %v4735_v55 = vld [vmem:[%s20252_s19 + $0x328] sm:$0xff]  ;;  %v4744_v45 = vld [vmem:[%s20252_s19 + $0x370] sm:$0xff] }
 0x81c   : > { %12741 = vmatpush1.bf16.msra.mxu1 %v12740_v54  ;;  %12773 = vmatpush1.bf16.msra.mxu0 %v12772_v43  ;;  %v12784_v54 = vpack.c.bf16 %v4712_v25, %v4704_v51  ;;  %v4718_v43 = vld [vmem:[%s20252_s19 + $0x2a0] sm:$0xff]  ;;  %v12786_v49 = vpack.c.bf16 %v4729_v23, %v4721_v34  ;;  %v12792_v18 = vpack.c.bf16 %v4744_v45, %v4736_v41 }
 0x81d   : > { %4838 = vmatprep.mubr.f32.mxu1 %v14831_v12  ;;  %4951 = vmatprep.mubr.f32.mxu0 %v14831_v12  ;;  %v15433_v52 = vadd.f32 %v15280_v59, %v4615_v15  ;;  %v4602_v1 = vmax.f32 %v4594_v7, 0.0  ;;  %v12756_v5 = vpack.c.bf16 %v4726_v38, %v4718_v43  ;;  %v4760_v15 = vld [vmem:[%s20252_s19 + $0x3f0] sm:$0xff]  ;;  %v12764_v28 = vpack.c.bf16 %v4758_v46, %v4750_v16 }
 0x81e   : > { %12743 = vmatprep.subr.bf16.mxu1 %v12742_v50  ;;  %12775 = vmatprep.subr.bf16.mxu0 %v12774_v0  ;;  %v4743_v50 = vld [vmem:[%s20252_s19 + $0x368] sm:$0xff]  ;;  %v4737_v0 = vld [vmem:[%s20252_s19 + $0x338] sm:$0xff]  ;;  %v12796_v51 = vpack.c.bf16 %v4760_v15, %v4752_v39 }
 0x81f   : > { %4839 = vmatmul.mubr.f32.gmra.mrb[72].mxu1 %v15367_v44  ;;  %4952 = vmatmul.mubr.f32.gmra.mrb[62].mxu0 %v15367_v44  ;;  %v4617_v32 = vmul.f32 %v15263_v4, %v4602_v1  ;;  %v12758_v21 = vpack.c.bf16 %v4743_v50, %v4735_v55  ;;  %v12790_v58 = vpack.c.bf16 %v4745_v27, %v4737_v0 }
 0x820   : > { %12745 = vmatpush1.bf16.msra.mxu1 %v12744_v60  ;;  %12777 = vmatpush1.bf16.msra.mxu0 %v12776_v6  ;;  %v15466_v60 = vadd.f32 %v15280_v59, %v4616_v9  ;;  %v4603_v6 = vmax.f32 %v4595_v48, 0.0 }
 0x821   : > { %4844 = vmatprep.mubr.f32.mxu1 %v14831_v12  ;;  %4957 = vmatprep.mubr.f32.mxu0 %v14831_v12 }
 0x822   : > { %12747 = vmatprep.subr.bf16.mxu1 %v12746_v29  ;;  %12779 = vmatprep.subr.bf16.mxu0 %v12778_v33  ;;  %v4759_v29 = vld [vmem:[%s20252_s19 + $0x3e8] sm:$0xff]  ;;  %v4753_v33 = vld [vmem:[%s20252_s19 + $0x3b8] sm:$0xff] }
 0x823   : > { %4845 = vmatmul.mubr.f32.gmra.mrb[74].mxu1 %v15399_v19  ;;  %4958 = vmatmul.mubr.f32.gmra.mrb[64].mxu0 %v15399_v19  ;;  %v12794_v7 = vpack.c.bf16 %v4761_v56, %v4753_v33 }
 0x824   : > { %12749 = vmatpush1.bf16.msra.mxu1 %v12748_v36  ;;  %12781 = vmatpush1.bf16.msra.mxu0 %v12780_v10  ;;  %v4618_v36 = vmul.f32 %v15263_v4, %v4603_v6  ;;  %v4632_v10 = vadd.f32 %v15280_v59, %v4617_v32  ;;  %v12762_v4 = vpack.c.bf16 %v4759_v29, %v4751_v14 }
 0x825   : > { %4850 = vmatprep.mubr.f32.mxu1 %v14831_v12  ;;  %4963 = vmatprep.mubr.f32.mxu0 %v14831_v12 }
 0x826   : > { %12751 = vmatprep.subr.bf16.mxu1 %v12750_v3  ;;  %12783 = vmatprep.subr.bf16.mxu0 %v12782_v2  ;;  %v4633_v25 = vadd.f32 %v15280_v59, %v4618_v36  ;;  %v15539_v59 = vld [vmem:[#allocation3] sm:$0xff] }
 0x827   : > { %4851 = vmatmul.mubr.f32.gmra.mrb[76].mxu1 %v15433_v52  ;;  %4964 = vmatmul.mubr.f32.gmra.mrb[66].mxu0 %v15433_v52 }
 0x828   : > { %12753 = vmatpush1.bf16.msra.mxu1 %v12752_v30  ;;  %12785 = vmatpush1.bf16.msra.mxu0 %v12784_v54 }
 0x829   : > { %4856 = vmatprep.mubr.f32.mxu1 %v14831_v12  ;;  %4969 = vmatprep.mubr.f32.mxu0 %v14831_v12 }
 0x82a   : > { %12755 = vmatprep.subr.bf16.mxu1 %v12754_v47  ;;  %12787 = vmatprep.subr.bf16.mxu0 %v12786_v49 }
 0x82b   : > { %4857 = vmatmul.mubr.f32.gmra.mrb[78].mxu1 %v15466_v60  ;;  %4970 = vmatmul.mubr.f32.gmra.mrb[68].mxu0 %v15466_v60 }
 0x82c   : > { %12757 = vmatpush1.bf16.msra.mxu1 %v12756_v5  ;;  %12789 = vmatpush1.bf16.msra.mxu0 %v12788_v20 }
 0x82d   : > { %4862 = vmatprep.mubr.f32.mxu1 %v14831_v12  ;;  %4975 = vmatprep.mubr.f32.mxu0 %v14831_v12 }
 0x82e   : > { %12759 = vmatprep.subr.bf16.mxu1 %v12758_v21  ;;  %12791 = vmatprep.subr.bf16.mxu0 %v12790_v58 }
 0x82f   : > { %4863 = vmatmul.mubr.f32.gmra.mrb[80].mxu1 %v4632_v10  ;;  %4976 = vmatmul.mubr.f32.gmra.mrb[70].mxu0 %v4632_v10 }
 0x830   : > { %12761 = vmatpush1.bf16.msra.mxu1 %v12760_v26  ;;  %12793 = vmatpush1.bf16.msra.mxu0 %v12792_v18 }
 0x831   : > { %4868 = vmatprep.mubr.f32.mxu1 %v14831_v12  ;;  %4981 = vmatprep.mubr.f32.mxu0 %v14831_v12 }
 0x832   : > { %12763 = vmatprep.subr.bf16.mxu1 %v12762_v4  ;;  %12795 = vmatprep.subr.bf16.mxu0 %v12794_v7 }
 0x833   : > { %4869 = vmatmul.mubr.f32.gmra.mrb[82].mxu1 %v4633_v25  ;;  %4982 = vmatmul.mubr.f32.gmra.mrb[72].mxu0 %v4633_v25 }
 0x834   : > { %12765 = vmatpush1.bf16.msra.mxu1 %v12764_v28  ;;  %12797 = vmatpush1.bf16.msra.mxu0 %v12796_v51  ;;  %v5214_v28 = vld [vmem:[%s20254_s21] sm:$0xff] }
 0x835   : > { %5052 = vmatprep.mubr.f32.mxu1 %v14831_v12  ;;  %5165 = vmatprep.mubr.f32.mxu0 %v14831_v12  ;;  %v11212_v51 = vld [vmem:[%s20254_s21 + $0x100] sm:$0xff] }
 0x837   : > { %5053 = vmatmul.mubr.f32.vlgmr.msra.gmra.mrb[84].mxu1 %v15301_v11  ;;  %5166 = vmatmul.mubr.f32.vlgmr.msra.gmra.mrb[74].mxu0 %v15301_v11 }
 0x838   : > { %5058 = vmatprep.mubr.f32.mxu1 %v14831_v12  ;;  %5171 = vmatprep.mubr.f32.mxu0 %v14831_v12 }
 0x83b   : > { %5059 = vmatmul.mubr.f32.gmra.mrb[86].mxu1 %v15331_v62  ;;  %5172 = vmatmul.mubr.f32.gmra.mrb[76].mxu0 %v15331_v62 }
 0x83c   : > { %5064 = vmatprep.mubr.f32.mxu1 %v14831_v12  ;;  %5177 = vmatprep.mubr.f32.mxu0 %v14831_v12 }
 0x83f   : > { %5065 = vmatmul.mubr.f32.gmra.mrb[88].mxu1 %v15367_v44  ;;  %5178 = vmatmul.mubr.f32.gmra.mrb[78].mxu0 %v15367_v44 }
 0x840   : > { %5070 = vmatprep.mubr.f32.mxu1 %v14831_v12  ;;  %5183 = vmatprep.mubr.f32.mxu0 %v14831_v12 }
 0x843   : > { %5071 = vmatmul.mubr.f32.gmra.mrb[90].mxu1 %v15399_v19  ;;  %5184 = vmatmul.mubr.f32.gmra.mrb[80].mxu0 %v15399_v19 }
 0x844   : > { %5076 = vmatprep.mubr.f32.mxu1 %v14831_v12  ;;  %5189 = vmatprep.mubr.f32.mxu0 %v14831_v12 }
 0x847   : > { %5077 = vmatmul.mubr.f32.gmra.mrb[92].mxu1 %v15433_v52  ;;  %5190 = vmatmul.mubr.f32.gmra.mrb[82].mxu0 %v15433_v52 }
 0x848   : > { %5082 = vmatprep.mubr.f32.mxu1 %v14831_v12  ;;  %5195 = vmatprep.mubr.f32.mxu0 %v14831_v12 }
 0x84b   : > { %5083 = vmatmul.mubr.f32.gmra.mrb[94].mxu1 %v15466_v60  ;;  %5196 = vmatmul.mubr.f32.gmra.mrb[84].mxu0 %v15466_v60 }
 0x84c   : > { %5088 = vmatprep.mubr.f32.mxu1 %v14831_v12  ;;  %5201 = vmatprep.mubr.f32.mxu0 %v14831_v12 }
 0x84f   : > { %5089 = vmatmul.mubr.f32.gmra.mrb[96].mxu1 %v4632_v10  ;;  %5202 = vmatmul.mubr.f32.gmra.mrb[86].mxu0 %v4632_v10 }
 0x850   : > { %5094 = vmatprep.mubr.f32.mxu1 %v15539_v59  ;;  %5207 = vmatprep.mubr.f32.mxu0 %v15539_v59 }
 0x853   : > { %5095 = vmatmul.mubr.f32.gmra.mrb[98].mxu1 %v4633_v25  ;;  %5208 = vmatmul.mubr.f32.gmra.mrb[88].mxu0 %v4633_v25 }
 0x854   : > { %5792 = vmatprep.mubr.f32.mxu1 %v15539_v59  ;;  %5439 = vmatprep.mubr.f32.mxu0 %v15539_v59 }
 0x8ea   : > { %v4828_v11 = vpop.f32.mrb[68].mxu1  ;;  %v4941_v62 = vpop.f32.mrb[58].mxu0 }
 0x8eb   : > { %v4830_v44 = vpop.f32.mrb[69].mxu1  ;;  %v4943_v19 = vpop.f32.mrb[59].mxu0 }
 0x8ee   : > { %v4834_v3 = vpop.f32.mrb[70].mxu1  ;;  %v4947_v12 = vpop.f32.mrb[60].mxu0 }
 0x8ef   : > { %v12816_v2 = vpack.c.bf16 %v4834_v3, %v4828_v11  ;;  %v12800_v53 = vpack.c.bf16 %v4947_v12, %v4941_v62  ;;  %v4836_v24 = vpop.f32.mrb[71].mxu1  ;;  %v4949_v34 = vpop.f32.mrb[61].mxu0  ;;  %v5215_v12 = vld [vmem:[%s20254_s21 + $0x8] sm:$0xff] }
 0x8f0   : > { %v12814_v23 = vpack.c.bf16 %v4836_v24, %v4830_v44  ;;  %v12798_v30 = vpack.c.bf16 %v4949_v34, %v4943_v19 }
 0x8f2   : > { %v4840_v54 = vpop.f32.mrb[72].mxu1  ;;  %v4953_v43 = vpop.f32.mrb[62].mxu0  ;;  %12799 = vmatprep.subr.bf16.mxu0 %v12798_v30  ;;  %12815 = vmatprep.subr.bf16.mxu1 %v12814_v23  ;;  %v11213_v23 = vld [vmem:[%s20254_s21 + $0x108] sm:$0xff] }
 0x8f3   : > { %v4842_v9 = vpop.f32.mrb[73].mxu1  ;;  %v4955_v52 = vpop.f32.mrb[63].mxu0  ;;  %12801 = vmatpush1.bf16.msra.mxu0 %v12800_v53  ;;  %12817 = vmatpush1.bf16.msra.mxu1 %v12816_v2 }
 0x8f6   : > { %v4846_v48 = vpop.f32.mrb[74].mxu1  ;;  %v4959_v1 = vpop.f32.mrb[64].mxu0 }
 0x8f7   : > { %v12820_v38 = vpack.c.bf16 %v4846_v48, %v4840_v54  ;;  %v12804_v22 = vpack.c.bf16 %v4959_v1, %v4953_v43  ;;  %v4848_v13 = vpop.f32.mrb[75].mxu1  ;;  %v4961_v47 = vpop.f32.mrb[65].mxu0  ;;  %v5216_v43 = vld [vmem:[%s20254_s21 + $0x10] sm:$0xff] }
 0x8f8   : > { %v12818_v49 = vpack.c.bf16 %v4848_v13, %v4842_v9  ;;  %v12802_v55 = vpack.c.bf16 %v4961_v47, %v4955_v52  ;;  %v11214_v48 = vld [vmem:[%s20254_s21 + $0x110] sm:$0xff]  ;;  %v5217_v47 = vld [vmem:[%s20254_s21 + $0x18] sm:$0xff] }
 0x8fa   : > { %v4852_v50 = vpop.f32.mrb[76].mxu1  ;;  %v4965_v0 = vpop.f32.mrb[66].mxu0  ;;  %12803 = vmatprep.subr.bf16.mxu0 %v12802_v55  ;;  %12819 = vmatprep.subr.bf16.mxu1 %v12818_v49 }
 0x8fb   : > { %v4854_v27 = vpop.f32.mrb[77].mxu1  ;;  %v4967_v5 = vpop.f32.mrb[67].mxu0  ;;  %12805 = vmatpush1.bf16.msra.mxu0 %v12804_v22  ;;  %12821 = vmatpush1.bf16.msra.mxu1 %v12820_v38 }
 0x8fe   : > { %v4858_v20 = vpop.f32.mrb[78].mxu1  ;;  %v4971_v37 = vpop.f32.mrb[68].mxu0 }
 0x8ff   : > { %v12824_v60 = vpack.c.bf16 %v4858_v20, %v4852_v50  ;;  %v12808_v6 = vpack.c.bf16 %v4971_v37, %v4965_v0  ;;  %v4860_v32 = vpop.f32.mrb[79].mxu1  ;;  %v4973_v35 = vpop.f32.mrb[69].mxu0  ;;  %v5218_v37 = vld [vmem:[%s20254_s21 + $0x20] sm:$0xff] }
 0x900   : > { %v12822_v41 = vpack.c.bf16 %v4860_v32, %v4854_v27  ;;  %v12806_v45 = vpack.c.bf16 %v4973_v35, %v4967_v5  ;;  %v11215_v27 = vld [vmem:[%s20254_s21 + $0x118] sm:$0xff]  ;;  %v11216_v32 = vld [vmem:[%s20254_s21 + $0x120] sm:$0xff] }
 0x902   : > { %v4864_v21 = vpop.f32.mrb[80].mxu1  ;;  %v4977_v58 = vpop.f32.mrb[70].mxu0  ;;  %12807 = vmatprep.subr.bf16.mxu0 %v12806_v45  ;;  %12823 = vmatprep.subr.bf16.mxu1 %v12822_v41 }
 0x903   : > { %v4866_v14 = vpop.f32.mrb[81].mxu1  ;;  %v4979_v29 = vpop.f32.mrb[71].mxu0  ;;  %12809 = vmatpush1.bf16.msra.mxu0 %v12808_v6  ;;  %12825 = vmatpush1.bf16.msra.mxu1 %v12824_v60 }
 0x906   : > { %v4870_v33 = vpop.f32.mrb[82].mxu1  ;;  %v4983_v56 = vpop.f32.mrb[72].mxu0 }
 0x907   : > { %v12828_v26 = vpack.c.bf16 %v4870_v33, %v4864_v21  ;;  %v12812_v18 = vpack.c.bf16 %v4983_v56, %v4977_v58  ;;  %v4872_v16 = vpop.f32.mrb[83].mxu1  ;;  %v4985_v36 = vpop.f32.mrb[73].mxu0  ;;  %v5219_v58 = vld [vmem:[%s20254_s21 + $0x28] sm:$0xff] }
 0x908   : > { %v12826_v10 = vpack.c.bf16 %v4872_v16, %v4866_v14  ;;  %v12810_v46 = vpack.c.bf16 %v4985_v36, %v4979_v29  ;;  %v5220_v36 = vld [vmem:[%s20254_s21 + $0x30] sm:$0xff] }
 0x90a   : > { %v5054_v39 = vpop.f32.mrb[84].mxu1  ;;  %v5167_v15 = vpop.f32.mrb[74].mxu0  ;;  %12811 = vmatprep.subr.bf16.mxu0 %v12810_v46  ;;  %12827 = vmatprep.subr.bf16.mxu1 %v12826_v10 }
 0x90b   : > { %v5056_v4 = vpop.f32.mrb[85].mxu1  ;;  %v5169_v7 = vpop.f32.mrb[75].mxu0  ;;  %12813 = vmatpush1.bf16.msra.mxu0 %v12812_v18  ;;  %12829 = vmatpush1.bf16.msra.mxu1 %v12828_v26  ;;  %v11217_v26 = vld [vmem:[%s20254_s21 + $0x128] sm:$0xff] }
 0x90e   : > { %v5060_v25 = vpop.f32.mrb[86].mxu1  ;;  %v5173_v11 = vpop.f32.mrb[76].mxu0  ;;  %11276 = vmatmul.mubr.msk.f32.vlgmr.msra.gmra.mrb[100].mxu1 %vm2391_vm4, %v5214_v28  ;;  %11244 = vmatmul.mubr.msk.f32.vlgmr.msra.gmra.mrb[90].mxu0 %vm2391_vm4, %v11212_v51  ;;  %v5221_v51 = vld [vmem:[%s20254_s21 + $0x38] sm:$0xff] }
 0x90f   : > { %v12832_v62 = vpack.c.bf16 %v5060_v25, %v5054_v39  ;;  %v15553_v44 = vpack.c.bf16 %v5173_v11, %v5167_v15  ;;  %v5062_v19 = vpop.f32.mrb[87].mxu1  ;;  %v5175_v3 = vpop.f32.mrb[77].mxu0  ;;  %5798 = vmatprep.mubr.f32.mxu1 %v15539_v59  ;;  %5445 = vmatprep.mubr.f32.mxu0 %v15539_v59  ;;  %v11218_v39 = vld [vmem:[%s20254_s21 + $0x130] sm:$0xff] }
 0x910   : > { %v12830_v2 = vpack.c.bf16 %v5062_v19, %v5056_v4  ;;  %v15560_v53 = vpack.c.bf16 %v5175_v3, %v5169_v7  ;;  %v5222_v19 = vld [vmem:[%s20254_s21 + $0x40] sm:$0xff] }
 0x911   : > { %v11220_v3 = vld [vmem:[%s20254_s21 + $0x140] sm:$0xff] }
 0x912   : > { %v5066_v24 = vpop.f32.mrb[88].mxu1  ;;  %v5179_v34 = vpop.f32.mrb[78].mxu0  ;;  %11277 = vmatmul.mubr.msk.f32.gmra.mrb[102].mxu1 %vm2391_vm4, %v5215_v12  ;;  %12831 = vmatprep.subr.bf16.mxu1 %v12830_v2  ;;  %v5223_v12 = vld [vmem:[%s20254_s21 + $0x48] sm:$0xff] }
 0x913   : > { %12847 = vmatprep.subr.bf16.mxu0 %v15560_v53  ;;  %v5068_v30 = vpop.f32.mrb[89].mxu1  ;;  %v5181_v54 = vpop.f32.mrb[79].mxu0  ;;  %12833 = vmatpush1.bf16.msra.mxu1 %v12832_v62  ;;  %v11219_v62 = vld [vmem:[%s20254_s21 + $0x138] sm:$0xff]  ;;  %v11221_v2 = vld [vmem:[%s20254_s21 + $0x148] sm:$0xff] }
 0x914   : > { %12849 = vmatpush1.bf16.msra.mxu0 %v15553_v44  ;;  %5804 = vmatprep.mubr.f32.mxu1 %v15539_v59 }
 0x915   : > { %11245 = vmatmul.mubr.msk.f32.gmra.mrb[92].mxu0 %vm2391_vm4, %v11213_v23  ;;  %v11223_v23 = vld [vmem:[%s20254_s21 + $0x158] sm:$0xff] }
 0x916   : > { %v5072_v9 = vpop.f32.mrb[90].mxu1  ;;  %v5185_v52 = vpop.f32.mrb[80].mxu0  ;;  %11278 = vmatmul.mubr.msk.f32.gmra.mrb[104].mxu1 %vm2391_vm4, %v5216_v43  ;;  %5451 = vmatprep.mubr.f32.mxu0 %v15539_v59  ;;  %v5227_v43 = vld [vmem:[%s20254_s21 + $0x68] sm:$0xff] }
 0x917   : > { %v12836_v1 = vpack.c.bf16 %v5072_v9, %v5066_v24  ;;  %v15578_v38 = vpack.c.bf16 %v5185_v52, %v5179_v34  ;;  %v5074_v22 = vpop.f32.mrb[91].mxu1  ;;  %v5187_v13 = vpop.f32.mrb[81].mxu0  ;;  %5810 = vmatprep.mubr.f32.mxu1 %v15539_v59  ;;  %v11222_v24 = vld [vmem:[%s20254_s21 + $0x150] sm:$0xff]  ;;  %v5225_v34 = vld [vmem:[%s20254_s21 + $0x58] sm:$0xff]  ;;  %v11225_v9 = vld [vmem:[%s20254_s21 + $0x168] sm:$0xff] }
 0x918   : > { %v12834_v49 = vpack.c.bf16 %v5074_v22, %v5068_v30  ;;  %v15584_v55 = vpack.c.bf16 %v5187_v13, %v5181_v54  ;;  %v5226_v30 = vld [vmem:[%s20254_s21 + $0x60] sm:$0xff]  ;;  %v5228_v52 = vld [vmem:[%s20254_s21 + $0x70] sm:$0xff]  ;;  %v11227_v22 = vld [vmem:[%s20254_s21 + $0x178] sm:$0xff] }
 0x919   : > { %11246 = vmatmul.mubr.msk.f32.gmra.mrb[94].mxu0 %vm2391_vm4, %v11214_v48  ;;  %v11224_v54 = vld [vmem:[%s20254_s21 + $0x160] sm:$0xff]  ;;  %v11226_v48 = vld [vmem:[%s20254_s21 + $0x170] sm:$0xff] }
 0x91a   : > { %v5078_v50 = vpop.f32.mrb[92].mxu1  ;;  %v5191_v0 = vpop.f32.mrb[82].mxu0  ;;  %11279 = vmatmul.mubr.msk.f32.gmra.mrb[106].mxu1 %vm2391_vm4, %v5217_v47  ;;  %12835 = vmatprep.subr.bf16.mxu1 %v12834_v49  ;;  %v5230_v13 = vld [vmem:[%s20254_s21 + $0x80] sm:$0xff]  ;;  %v5231_v49 = vld [vmem:[%s20254_s21 + $0x88] sm:$0xff] }
 0x91b   : > { %12851 = vmatprep.subr.bf16.mxu0 %v15584_v55  ;;  %v5080_v5 = vpop.f32.mrb[93].mxu1  ;;  %v5193_v20 = vpop.f32.mrb[83].mxu0  ;;  %5457 = vmatprep.mubr.f32.mxu0 %v15539_v59  ;;  %v11228_v47 = vld [vmem:[%s20254_s21 + $0x180] sm:$0xff] }
 0x91c   : > { %12837 = vmatpush1.bf16.msra.mxu1 %v12836_v1  ;;  %12853 = vmatpush1.bf16.msra.mxu0 %v15578_v38  ;;  %v5229_v1 = vld [vmem:[%s20254_s21 + $0x78] sm:$0xff] }
 0x91d   : > { %11247 = vmatmul.mubr.msk.f32.gmra.mrb[96].mxu0 %vm2391_vm4, %v11215_v27  ;;  %5816 = vmatprep.mubr.f32.mxu1 %v15539_v59  ;;  %v11230_v27 = vld [vmem:[%s20254_s21 + $0x190] sm:$0xff] }
 0x91e   : > { %v5084_v60 = vpop.f32.mrb[94].mxu1  ;;  %v5197_v6 = vpop.f32.mrb[84].mxu0  ;;  %11280 = vmatmul.mubr.msk.f32.gmra.mrb[108].mxu1 %vm2391_vm4, %v5218_v37  ;;  %5463 = vmatprep.mubr.f32.mxu0 %v15539_v59  ;;  %v5234_v37 = vld [vmem:[%s20254_s21 + $0xa0] sm:$0xff] }
 0x91f   : > { %v12840_v35 = vpack.c.bf16 %v5084_v60, %v5078_v50  ;;  %v15604_v41 = vpack.c.bf16 %v5197_v6, %v5191_v0  ;;  %v5086_v45 = vpop.f32.mrb[95].mxu1  ;;  %v5199_v21 = vpop.f32.mrb[85].mxu0  ;;  %5822 = vmatprep.mubr.f32.mxu1 %v15539_v59  ;;  %v11229_v50 = vld [vmem:[%s20254_s21 + $0x188] sm:$0xff]  ;;  %v5232_v0 = vld [vmem:[%s20254_s21 + $0x90] sm:$0xff]  ;;  %v11232_v60 = vld [vmem:[%s20254_s21 + $0x1a0] sm:$0xff] }
 0x920   : > { %v12838_v14 = vpack.c.bf16 %v5086_v45, %v5080_v5  ;;  %v15610_v29 = vpack.c.bf16 %v5199_v21, %v5193_v20  ;;  %v5233_v5 = vld [vmem:[%s20254_s21 + $0x98] sm:$0xff]  ;;  %v5235_v6 = vld [vmem:[%s20254_s21 + $0xa8] sm:$0xff]  ;;  %v11234_v45 = vld [vmem:[%s20254_s21 + $0x1b0] sm:$0xff] }
 0x921   : > { %11248 = vmatmul.mubr.msk.f32.gmra.mrb[98].mxu0 %vm2391_vm4, %v11216_v32  ;;  %v11231_v20 = vld [vmem:[%s20254_s21 + $0x198] sm:$0xff]  ;;  %v11233_v32 = vld [vmem:[%s20254_s21 + $0x1a8] sm:$0xff] }
 0x922   : > { %v5090_v33 = vpop.f32.mrb[96].mxu1  ;;  %v5203_v56 = vpop.f32.mrb[86].mxu0  ;;  %11281 = vmatmul.mubr.msk.f32.gmra.mrb[110].mxu1 %vm2391_vm4, %v5219_v58  ;;  %12839 = vmatprep.subr.bf16.mxu1 %v12838_v14  ;;  %v5237_v21 = vld [vmem:[%s20254_s21 + $0xb8] sm:$0xff]  ;;  %v5238_v14 = vld [vmem:[%s20254_s21 + $0xc0] sm:$0xff] }
 0x923   : > { %12855 = vmatprep.subr.bf16.mxu0 %v15610_v29  ;;  %v5092_v18 = vpop.f32.mrb[97].mxu1  ;;  %v5205_v16 = vpop.f32.mrb[87].mxu0  ;;  %5469 = vmatprep.mubr.f32.mxu0 %v15539_v59  ;;  %v11235_v58 = vld [vmem:[%s20254_s21 + $0x1b8] sm:$0xff] }
 0x924   : > { %12841 = vmatpush1.bf16.msra.mxu1 %v12840_v35  ;;  %12857 = vmatpush1.bf16.msra.mxu0 %v15604_v41  ;;  %v5236_v35 = vld [vmem:[%s20254_s21 + $0xb0] sm:$0xff] }
 0x925   : > { %11249 = vmatmul.mubr.msk.f32.gmra.mrb[100].mxu0 %vm2391_vm4, %v11217_v26  ;;  %5828 = vmatprep.mubr.f32.mxu1 %v15539_v59  ;;  %v11237_v26 = vld [vmem:[%s20254_s21 + $0x1c8] sm:$0xff] }
 0x926   : > { %v5096_v10 = vpop.f32.mrb[98].mxu1  ;;  %v5209_v46 = vpop.f32.mrb[88].mxu0  ;;  %11282 = vmatmul.mubr.msk.f32.gmra.mrb[112].mxu1 %vm2391_vm4, %v5220_v36  ;;  %5475 = vmatprep.mubr.f32.mxu0 %v15539_v59  ;;  %v5241_v36 = vld [vmem:[%s20254_s21 + $0xd8] sm:$0xff] }
 0x927   : > { %v12844_v15 = vpack.c.bf16 %v5096_v10, %v5090_v33  ;;  %v15630_v4 = vpack.c.bf16 %v5209_v46, %v5203_v56  ;;  %v5098_v7 = vpop.f32.mrb[99].mxu1  ;;  %v5211_v28 = vpop.f32.mrb[89].mxu0  ;;  %5834 = vmatprep.mubr.f32.mxu1 %v15539_v59  ;;  %v11236_v33 = vld [vmem:[%s20254_s21 + $0x1c0] sm:$0xff]  ;;  %v5239_v56 = vld [vmem:[%s20254_s21 + $0xc8] sm:$0xff]  ;;  %v11239_v10 = vld [vmem:[%s20254_s21 + $0x1d8] sm:$0xff] }
 0x928   : > { %v12842_v25 = vpack.c.bf16 %v5098_v7, %v5092_v18  ;;  %v15636_v11 = vpack.c.bf16 %v5211_v28, %v5205_v16  ;;  %v5240_v18 = vld [vmem:[%s20254_s21 + $0xd0] sm:$0xff]  ;;  %v5242_v46 = vld [vmem:[%s20254_s21 + $0xe0] sm:$0xff]  ;;  %v11241_v7 = vld [vmem:[%s20254_s21 + $0x1e8] sm:$0xff] }
 0x929   : > { %11250 = vmatmul.mubr.msk.f32.gmra.mrb[102].mxu0 %vm2391_vm4, %v11218_v39  ;;  %v11238_v16 = vld [vmem:[%s20254_s21 + $0x1d0] sm:$0xff]  ;;  %v11240_v39 = vld [vmem:[%s20254_s21 + $0x1e0] sm:$0xff] }
 0x92a   : > { %11283 = vmatmul.mubr.msk.f32.gmra.mrb[114].mxu1 %vm2391_vm4, %v5221_v51  ;;  %12843 = vmatprep.subr.bf16.mxu1 %v12842_v25  ;;  %v5244_v28 = vld [vmem:[%s20254_s21 + $0xf0] sm:$0xff]  ;;  %v5245_v25 = vld [vmem:[%s20254_s21 + $0xf8] sm:$0xff] }
 0x92b   : > { %12859 = vmatprep.subr.bf16.mxu0 %v15636_v11  ;;  %5481 = vmatprep.mubr.f32.mxu0 %v15539_v59  ;;  %v11242_v51 = vld [vmem:[%s20254_s21 + $0x1f0] sm:$0xff] }
 0x92c   : > { %12845 = vmatpush1.bf16.msra.mxu1 %v12844_v15  ;;  %12861 = vmatpush1.bf16.msra.mxu0 %v15630_v4  ;;  %v5243_v15 = vld [vmem:[%s20254_s21 + $0xe8] sm:$0xff] }
 0x92d   : > { %11251 = vmatmul.mubr.msk.f32.gmra.mrb[104].mxu0 %vm2391_vm4, %v11219_v62  ;;  %12862 = vmatprep.subr.bf16.mxu1 %v15560_v53  ;;  %v5224_v53 = vld [vmem:[%s20254_s21 + $0x50] sm:$0xff]  ;;  %v11243_v62 = vld [vmem:[%s20254_s21 + $0x1f8] sm:$0xff] }
 0x92e   : > { %5840 = vmatprep.mubr.f32.mxu1 %v15539_v59  ;;  %5487 = vmatprep.mubr.f32.mxu0 %v15539_v59 }
 0x92f   : > { %11284 = vmatmul.mubr.msk.f32.gmra.mrb[116].mxu1 %vm2391_vm4, %v5222_v19  ;;  %v11308_v19 = vld [vmem:[%s20254_s21 + $0x200] sm:$0xff] }
 0x930   : > { %5846 = vmatprep.mubr.f32.mxu1 %v15539_v59 }
 0x931   : > { %11252 = vmatmul.mubr.msk.f32.gmra.mrb[106].mxu0 %vm2391_vm4, %v11220_v3  ;;  %v11372_v3 = vld [vmem:[%s20254_s21 + $0x300] sm:$0xff] }
 0x932   : > { %5493 = vmatprep.mubr.f32.mxu0 %v15539_v59 }
 0x933   : > { %11285 = vmatmul.mubr.msk.f32.gmra.mrb[118].mxu1 %vm2391_vm4, %v5223_v12  ;;  %v11309_v12 = vld [vmem:[%s20254_s21 + $0x208] sm:$0xff] }
 0x934   : > { %5852 = vmatprep.mubr.f32.mxu1 %v15539_v59 }
 0x935   : > { %11253 = vmatmul.mubr.msk.f32.gmra.mrb[108].mxu0 %vm2391_vm4, %v11221_v2  ;;  %v11373_v2 = vld [vmem:[%s20254_s21 + $0x308] sm:$0xff] }
 0x936   : > { %5499 = vmatprep.mubr.f32.mxu0 %v15539_v59 }
 0x937   : > { %11286 = vmatmul.mubr.msk.f32.gmra.mrb[120].mxu1 %vm2391_vm4, %v5224_v53  ;;  %v11377_v53 = vld [vmem:[%s20254_s21 + $0x328] sm:$0xff] }
 0x938   : > { %5858 = vmatprep.mubr.f32.mxu1 %v15539_v59 }
 0x939   : > { %11254 = vmatmul.mubr.msk.f32.gmra.mrb[110].mxu0 %vm2391_vm4, %v11222_v24  ;;  %v11314_v24 = vld [vmem:[%s20254_s21 + $0x230] sm:$0xff] }
 0x93a   : > { %5505 = vmatprep.mubr.f32.mxu0 %v15539_v59 }
 0x93b   : > { %11287 = vmatmul.mubr.msk.f32.gmra.mrb[122].mxu1 %vm2391_vm4, %v5225_v34  ;;  %v11378_v34 = vld [vmem:[%s20254_s21 + $0x330] sm:$0xff] }
 0x93c   : > { %5864 = vmatprep.mubr.f32.mxu1 %v15539_v59 }
 0x93d   : > { %11255 = vmatmul.mubr.msk.f32.gmra.mrb[112].mxu0 %vm2391_vm4, %v11223_v23  ;;  %v11315_v23 = vld [vmem:[%s20254_s21 + $0x238] sm:$0xff] }
 0x93e   : > { %5511 = vmatprep.mubr.f32.mxu0 %v15539_v59 }
 0x93f   : > { %11288 = vmatmul.mubr.msk.f32.gmra.mrb[124].mxu1 %vm2391_vm4, %v5226_v30  ;;  %v11379_v30 = vld [vmem:[%s20254_s21 + $0x338] sm:$0xff] }
 0x940   : > { %5870 = vmatprep.mubr.f32.mxu1 %v15539_v59 }
 0x941   : > { %11256 = vmatmul.mubr.msk.f32.gmra.mrb[114].mxu0 %vm2391_vm4, %v11224_v54  ;;  %v11316_v54 = vld [vmem:[%s20254_s21 + $0x240] sm:$0xff] }
 0x942   : > { %5517 = vmatprep.mubr.f32.mxu0 %v15539_v59 }
 0x943   : > { %11289 = vmatmul.mubr.msk.f32.gmra.mrb[126].mxu1 %vm2391_vm4, %v5227_v43  ;;  %v11380_v43 = vld [vmem:[%s20254_s21 + $0x340] sm:$0xff] }
 0x944   : > { %5876 = vmatprep.mubr.f32.mxu1 %v15539_v59 }
 0x945   : > { %11257 = vmatmul.mubr.msk.f32.gmra.mrb[116].mxu0 %vm2391_vm4, %v11225_v9  ;;  %v11317_v9 = vld [vmem:[%s20254_s21 + $0x248] sm:$0xff] }
 0x946   : > { %5523 = vmatprep.mubr.f32.mxu0 %v15539_v59 }
 0x947   : > { %11290 = vmatmul.mubr.msk.f32.gmra.mrb[128].mxu1 %vm2391_vm4, %v5228_v52  ;;  %v11381_v52 = vld [vmem:[%s20254_s21 + $0x348] sm:$0xff] }
 0x948   : > { %5882 = vmatprep.mubr.f32.mxu1 %v15539_v59 }
 0x949   : > { %11258 = vmatmul.mubr.msk.f32.gmra.mrb[118].mxu0 %vm2391_vm4, %v11226_v48  ;;  %v11318_v48 = vld [vmem:[%s20254_s21 + $0x250] sm:$0xff] }
 0x94a   : > { %5529 = vmatprep.mubr.f32.mxu0 %v15539_v59 }
 0x94b   : > { %11291 = vmatmul.mubr.msk.f32.gmra.mrb[130].mxu1 %vm2391_vm4, %v5229_v1  ;;  %v11382_v1 = vld [vmem:[%s20254_s21 + $0x350] sm:$0xff] }
 0x94c   : > { %5888 = vmatprep.mubr.f32.mxu1 %v15539_v59 }
 0x94d   : > { %11259 = vmatmul.mubr.msk.f32.gmra.mrb[120].mxu0 %vm2391_vm4, %v11227_v22  ;;  %v11319_v22 = vld [vmem:[%s20254_s21 + $0x258] sm:$0xff] }
 0x94e   : > { %5535 = vmatprep.mubr.f32.mxu0 %v15539_v59 }
 0x94f   : > { %11292 = vmatmul.mubr.msk.f32.gmra.mrb[132].mxu1 %vm2391_vm4, %v5230_v13  ;;  %v11383_v13 = vld [vmem:[%s20254_s21 + $0x358] sm:$0xff] }
 0x950   : > { %5894 = vmatprep.mubr.f32.mxu1 %v15539_v59 }
 0x951   : > { %11260 = vmatmul.mubr.msk.f32.gmra.mrb[122].mxu0 %vm2391_vm4, %v11228_v47  ;;  %v11320_v47 = vld [vmem:[%s20254_s21 + $0x260] sm:$0xff] }
 0x952   : > { %5541 = vmatprep.mubr.f32.mxu0 %v15539_v59 }
 0x953   : > { %11293 = vmatmul.mubr.msk.f32.gmra.mrb[134].mxu1 %vm2391_vm4, %v5231_v49  ;;  %v11384_v49 = vld [vmem:[%s20254_s21 + $0x360] sm:$0xff] }
 0x954   : > { %5900 = vmatprep.mubr.f32.mxu1 %v15539_v59 }
 0x955   : > { %11261 = vmatmul.mubr.msk.f32.gmra.mrb[124].mxu0 %vm2391_vm4, %v11229_v50  ;;  %v11321_v50 = vld [vmem:[%s20254_s21 + $0x268] sm:$0xff] }
 0x956   : > { %5547 = vmatprep.mubr.f32.mxu0 %v15539_v59 }
 0x957   : > { %11294 = vmatmul.mubr.msk.f32.gmra.mrb[136].mxu1 %vm2391_vm4, %v5232_v0  ;;  %v11385_v0 = vld [vmem:[%s20254_s21 + $0x368] sm:$0xff] }
 0x958   : > { %5906 = vmatprep.mubr.f32.mxu1 %v15539_v59 }
 0x959   : > { %11262 = vmatmul.mubr.msk.f32.gmra.mrb[126].mxu0 %vm2391_vm4, %v11230_v27  ;;  %v11322_v27 = vld [vmem:[%s20254_s21 + $0x270] sm:$0xff] }
 0x95a   : > { %5553 = vmatprep.mubr.f32.mxu0 %v15539_v59 }
 0x95b   : > { %11295 = vmatmul.mubr.msk.f32.gmra.mrb[138].mxu1 %vm2391_vm4, %v5233_v5  ;;  %v11386_v5 = vld [vmem:[%s20254_s21 + $0x370] sm:$0xff] }
 0x95c   : > { %5912 = vmatprep.mubr.f32.mxu1 %v15539_v59 }
 0x95d   : > { %11263 = vmatmul.mubr.msk.f32.gmra.mrb[128].mxu0 %vm2391_vm4, %v11231_v20  ;;  %v11323_v20 = vld [vmem:[%s20254_s21 + $0x278] sm:$0xff] }
 0x95e   : > { %5559 = vmatprep.mubr.f32.mxu0 %v15539_v59 }
 0x95f   : > { %11296 = vmatmul.mubr.msk.f32.gmra.mrb[140].mxu1 %vm2391_vm4, %v5234_v37  ;;  %v11387_v37 = vld [vmem:[%s20254_s21 + $0x378] sm:$0xff] }
 0x960   : > { %5918 = vmatprep.mubr.f32.mxu1 %v15539_v59 }
 0x961   : > { %11264 = vmatmul.mubr.msk.f32.gmra.mrb[130].mxu0 %vm2391_vm4, %v11232_v60  ;;  %v11324_v60 = vld [vmem:[%s20254_s21 + $0x280] sm:$0xff] }
 0x962   : > { %5565 = vmatprep.mubr.f32.mxu0 %v15539_v59 }
 0x963   : > { %11297 = vmatmul.mubr.msk.f32.gmra.mrb[142].mxu1 %vm2391_vm4, %v5235_v6  ;;  %v11388_v6 = vld [vmem:[%s20254_s21 + $0x380] sm:$0xff] }
 0x964   : > { %5924 = vmatprep.mubr.f32.mxu1 %v15539_v59 }
 0x965   : > { %11265 = vmatmul.mubr.msk.f32.gmra.mrb[132].mxu0 %vm2391_vm4, %v11233_v32  ;;  %v11325_v32 = vld [vmem:[%s20254_s21 + $0x288] sm:$0xff] }
 0x966   : > { %5571 = vmatprep.mubr.f32.mxu0 %v15539_v59 }
 0x967   : > { %11298 = vmatmul.mubr.msk.f32.gmra.mrb[144].mxu1 %vm2391_vm4, %v5236_v35  ;;  %v11389_v35 = vld [vmem:[%s20254_s21 + $0x388] sm:$0xff] }
 0x968   : > { %5930 = vmatprep.mubr.f32.mxu1 %v15539_v59 }
 0x969   : > { %11266 = vmatmul.mubr.msk.f32.gmra.mrb[134].mxu0 %vm2391_vm4, %v11234_v45  ;;  %v11326_v45 = vld [vmem:[%s20254_s21 + $0x290] sm:$0xff] }
 0x96a   : > { %5577 = vmatprep.mubr.f32.mxu0 %v15539_v59 }
 0x96b   : > { %11299 = vmatmul.mubr.msk.f32.gmra.mrb[146].mxu1 %vm2391_vm4, %v5237_v21  ;;  %v11390_v21 = vld [vmem:[%s20254_s21 + $0x390] sm:$0xff] }
 0x96c   : > { %5936 = vmatprep.mubr.f32.mxu1 %v15539_v59 }
 0x96d   : > { %11267 = vmatmul.mubr.msk.f32.gmra.mrb[136].mxu0 %vm2391_vm4, %v11235_v58  ;;  %v11327_v58 = vld [vmem:[%s20254_s21 + $0x298] sm:$0xff] }
 0x96e   : > { %5583 = vmatprep.mubr.f32.mxu0 %v15539_v59 }
 0x96f   : > { %11300 = vmatmul.mubr.msk.f32.gmra.mrb[148].mxu1 %vm2391_vm4, %v5238_v14  ;;  %v16089_v14 = vsub.s32 0, %v13624_v42 }
 0x970   : > { %5942 = vmatprep.mubr.f32.mxu1 %v15539_v59 }
 0x971   : > { %11268 = vmatmul.mubr.msk.f32.gmra.mrb[138].mxu0 %vm2391_vm4, %v11236_v33  ;;  %v16092_v33 = vsub.s32 1, %v13624_v42 }
 0x972   : > { %5589 = vmatprep.mubr.f32.mxu0 %v15539_v59 }
 0x973   : > { %11301 = vmatmul.mubr.msk.f32.gmra.mrb[150].mxu1 %vm2391_vm4, %v5239_v56  ;;  %v7383_v56 = vand.u32 15, %v13624_v42 }
 0x974   : > { %5948 = vmatprep.mubr.f32.mxu1 %v15539_v59 }
 0x975   : > { %11269 = vmatmul.mubr.msk.f32.gmra.mrb[140].mxu0 %vm2391_vm4, %v11237_v26  ;;  %v7639_v26 = vld [vmem:[%s20255_s22] ss:$8 sm:$0x3]  ;;  %vm16103_vm1 = vcmp.ge.s32.totalorder %v7383_v56, 1 }
 0x976   : > { %5595 = vmatprep.mubr.f32.mxu0 %v15539_v59  ;;  %v11441_v56 = vld [vmem:[%s20255_s22 + $0x6] ss:$8 sm:$0x3] }
 0x977   : > { %11302 = vmatmul.mubr.msk.f32.gmra.mrb[152].mxu1 %vm2391_vm4, %v5240_v18  ;;  %v11391_v18 = vld [vmem:[%s20254_s21 + $0x398] sm:$0xff] }
 0x978   : > { %5954 = vmatprep.mubr.f32.mxu1 %v15539_v59 }
 0x979   : > { %11270 = vmatmul.mubr.msk.f32.gmra.mrb[142].mxu0 %vm2391_vm4, %v11238_v16 }
 0x97a   : > { %5601 = vmatprep.mubr.f32.mxu0 %v15539_v59 }
 0x97b   : > { %11303 = vmatmul.mubr.msk.f32.gmra.mrb[154].mxu1 %vm2391_vm4, %v5241_v36  ;;  %v16108_v36 = vrot.slane %v7639_v26, %v16089_v14 }
 0x97c   : > { %5960 = vmatprep.mubr.f32.mxu1 %v15539_v59 }
 0x97d   : > { %11271 = vmatmul.mubr.msk.f32.gmra.mrb[144].mxu0 %vm2391_vm4, %v11239_v10  ;;  %v16111_v10 = vrot.slane %v7639_v26, %v16092_v33 }
 0x97e   : > { %5607 = vmatprep.mubr.f32.mxu0 %v15539_v59 }
 0x97f   : > { %11304 = vmatmul.mubr.msk.f32.gmra.mrb[156].mxu1 %vm2391_vm4, %v5242_v46  ;;  %v7575_v46 = vsel %vm16103_vm1, %v15539_v59, 0.0 }
 0x980   : > { %5966 = vmatprep.mubr.f32.mxu1 %v15539_v59 }
 0x981   : > { %11272 = vmatmul.mubr.msk.f32.gmra.mrb[146].mxu0 %vm2391_vm4, %v11240_v39  ;;  %v11328_v39 = vld [vmem:[%s20254_s21 + $0x2a0] sm:$0xff] }
 0x982   : > { %5613 = vmatprep.mubr.f32.mxu0 %v15539_v59 }
 0x983   : > { %11305 = vmatmul.mubr.msk.f32.gmra.mrb[158].mxu1 %vm2391_vm4, %v5243_v15  ;;  %v7651_v15 = vmul.f32 %v16108_v36, %v7575_v46 }
 0x984   : > { %5972 = vmatprep.mubr.f32.mxu1 %v15539_v59 }
 0x985   : > { %11273 = vmatmul.mubr.msk.f32.gmra.mrb[148].mxu0 %vm2391_vm4, %v11241_v7  ;;  %v7652_v7 = vmul.f32 %v16111_v10, %v7575_v46  ;;  %v16224_v46 = vrot.slane %v11441_v56, %v16092_v33 }
 0x986   : > { %5619 = vmatprep.mubr.f32.mxu0 %v15539_v59 }
 0x987   : > { %11306 = vmatmul.mubr.msk.f32.gmra.mrb[160].mxu1 %vm2391_vm4, %v5244_v28  ;;  %v11392_v28 = vld [vmem:[%s20254_s21 + $0x3a0] sm:$0xff]  ;;  %20501 = vst [vmem:[#allocation21_spill] sm:$0xff] %v16224_v46 }
 0x988   : > { %5978 = vmatprep.mubr.f32.mxu1 %v15539_v59 }
 0x989   : > { %11274 = vmatmul.mubr.msk.f32.gmra.mrb[150].mxu0 %vm2391_vm4, %v11242_v51  ;;  %v7715_v51 = vadd.f32 %v7652_v7, %v7651_v15 }
 0x98a   : > { %5625 = vmatprep.mubr.f32.mxu0 %v15539_v59 }
 0x98b   : > { %11307 = vmatmul.mubr.msk.f32.gmra.mrb[162].mxu1 %vm2391_vm4, %v5245_v25  ;;  %v11329_v25 = vld [vmem:[%s20254_s21 + $0x2a8] sm:$0xff]  ;;  %7716 = vadd.xlane.f32.xlu1 %v7715_v51 }
 0x98c   : > { %6178 = vmatprep.mubr.f32.mxu1 %v15539_v59  ;;  %v11333_v51 = vld [vmem:[%s20254_s21 + $0x2c8] sm:$0xff] }
 0x98d   : > { %11275 = vmatmul.mubr.msk.f32.gmra.mrb[152].mxu0 %vm2391_vm4, %v11243_v62  ;;  %v7653_v62 = vmul.f32 %v15539_v59, %v16108_v36 }
 0x98e   : > { %6628 = vmatprep.mubr.f32.mxu0 %v15539_v59 }
 0x98f   : > { %11340 = vmatmul.mubr.msk.f32.vlgmr.msra.gmra.mrb[100].mxu1 %vm2391_vm4, %v11308_v19  ;;  %v7654_v19 = vmul.f32 %v15539_v59, %v16111_v10 }
 0x990   : > { %12866 = vmatpush1.bf16.msra.mxu1 %v15553_v44  ;;  %6184 = vmatprep.mubr.f32.mxu1 %v15539_v59  ;;  %v11310_v44 = vld [vmem:[%s20254_s21 + $0x210] sm:$0xff] }
 0x991   : > { %12863 = vmatprep.subr.bf16.mxu1 %v15584_v55  ;;  %11404 = vmatmul.mubr.msk.f32.vlgmr.msra.gmra.mrb[154].mxu0 %vm2391_vm4, %v11372_v3  ;;  %v11374_v55 = vld [vmem:[%s20254_s21 + $0x310] sm:$0xff]  ;;  %v11436_v3 = vld [vmem:[%s20255_s22 + $0x1] ss:$8 sm:$0x3] }
 0x992   : > { %6634 = vmatprep.mubr.f32.mxu0 %v15539_v59 }
 0x993   : > { %11341 = vmatmul.mubr.msk.f32.gmra.mrb[102].mxu1 %vm2391_vm4, %v11309_v12 }
 0x994   : > { %12867 = vmatpush1.bf16.msra.mxu1 %v15578_v38  ;;  %6190 = vmatprep.mubr.f32.mxu1 %v15539_v59  ;;  %v11311_v38 = vld [vmem:[%s20254_s21 + $0x218] sm:$0xff] }
 0x995   : > { %12864 = vmatprep.subr.bf16.mxu1 %v15610_v29  ;;  %11405 = vmatmul.mubr.msk.f32.gmra.mrb[156].mxu0 %vm2391_vm4, %v11373_v2  ;;  %v11375_v29 = vld [vmem:[%s20254_s21 + $0x318] sm:$0xff]  ;;  %v16144_v2 = vrot.slane %v11436_v3, %v16089_v14 }
 0x996   : > { %6640 = vmatprep.mubr.f32.mxu0 %v15539_v59 }
 0x997   : > { %11342 = vmatmul.mubr.msk.f32.gmra.mrb[104].mxu1 %vm2391_vm4, %v11310_v44  ;;  %v16147_v44 = vrot.slane %v11436_v3, %v16092_v33 }
 0x998   : > { %12868 = vmatpush1.bf16.msra.mxu1 %v15604_v41  ;;  %6196 = vmatprep.mubr.f32.mxu1 %v15539_v59  ;;  %v11312_v41 = vld [vmem:[%s20254_s21 + $0x220] sm:$0xff] }
 0x999   : > { %12865 = vmatprep.subr.bf16.mxu1 %v15636_v11  ;;  %11406 = vmatmul.mubr.msk.f32.gmra.mrb[158].mxu0 %vm2391_vm4, %v11374_v55  ;;  %v11376_v11 = vld [vmem:[%s20254_s21 + $0x320] sm:$0xff]  ;;  %20496 = vst [vmem:[#allocation16_spill] sm:$0xff] %v16147_v44  ;;  %v11393_v55 = vld [vmem:[%s20254_s21 + $0x3a8] sm:$0xff] }
 0x99a   : > { %6646 = vmatprep.mubr.f32.mxu0 %v15539_v59 }
 0x99b   : > { %11343 = vmatmul.mubr.msk.f32.gmra.mrb[106].mxu1 %vm2391_vm4, %v11311_v38 }
 0x99c   : > { %12869 = vmatpush1.bf16.msra.mxu1 %v15630_v4  ;;  %6202 = vmatprep.mubr.f32.mxu1 %v15539_v59  ;;  %v11313_v4 = vld [vmem:[%s20254_s21 + $0x228] sm:$0xff] }
 0x99d   : > { %11407 = vmatmul.mubr.msk.f32.gmra.mrb[160].mxu0 %vm2391_vm4, %v11375_v29  ;;  %v7718_v29 = vadd.f32 %v7654_v19, %v7653_v62 }
 0x99e   : > { %6652 = vmatprep.mubr.f32.mxu0 %v15539_v59 }
 0x99f   : > { %11344 = vmatmul.mubr.msk.f32.gmra.mrb[108].mxu1 %vm2391_vm4, %v11312_v41  ;;  %v7843_v41 = vld [vmem:[#allocation9] sm:$0xfe]  ;;  %7719 = vadd.xlane.f32.xlu1 %v7718_v29  ;;  %v10024_v29 = vld [vmem:[#allocation9 + $0x240] sm:$0x1] }
 0x9a0   : > { %6208 = vmatprep.mubr.f32.mxu1 %v15539_v59 }
 0x9a1   : > { %11408 = vmatmul.mubr.msk.f32.gmra.mrb[162].mxu0 %vm2391_vm4, %v11376_v11  ;;  %v7844_v11 = vld [vmem:[#allocation9 + $0x8] sm:$0xfe] }
 0x9a2   : > { %6658 = vmatprep.mubr.f32.mxu0 %v15539_v59 }
 0x9a3   : > { %11345 = vmatmul.mubr.msk.f32.gmra.mrb[110].mxu1 %vm2391_vm4, %v11313_v4  ;;  %v7860_v4 = vmul.f32 %v16144_v2, %v7843_v41  ;;  %v10025_v41 = vld [vmem:[#allocation9 + $0x248] sm:$0x1] }
 0x9a4   : > { %6214 = vmatprep.mubr.f32.mxu1 %v15539_v59 }
 0x9a5   : > { %11409 = vmatmul.mubr.msk.f32.gmra.mrb[164].mxu0 %vm2391_vm4, %v11377_v53  ;;  %v7861_v53 = vmul.f32 %v16147_v44, %v7844_v11  ;;  %v11397_v11 = vld [vmem:[%s20254_s21 + $0x3c8] sm:$0xff] }
 0x9a6   : > { %6664 = vmatprep.mubr.f32.mxu0 %v15539_v59 }
 0x9a7   : > { %11346 = vmatmul.mubr.msk.f32.gmra.mrb[112].mxu1 %vm2391_vm4, %v11314_v24  ;;  %v11330_v24 = vld [vmem:[%s20254_s21 + $0x2b0] sm:$0xff] }
 0x9a8   : > { %6220 = vmatprep.mubr.f32.mxu1 %v15539_v59 }
 0x9a9   : > { %11410 = vmatmul.mubr.msk.f32.gmra.mrb[166].mxu0 %vm2391_vm4, %v11378_v34  ;;  %v7862_v34 = vmul.f32 %v15539_v59, %v16144_v2 }
 0x9aa   : > { %6670 = vmatprep.mubr.f32.mxu0 %v15539_v59 }
 0x9ab   : > { %11347 = vmatmul.mubr.msk.f32.gmra.mrb[114].mxu1 %vm2391_vm4, %v11315_v23  ;;  %v7863_v23 = vmul.f32 %v15539_v59, %v16147_v44 }
 0x9ac   : > { %6226 = vmatprep.mubr.f32.mxu1 %v15539_v59 }
 0x9ad   : > { %11411 = vmatmul.mubr.msk.f32.gmra.mrb[168].mxu0 %vm2391_vm4, %v11379_v30  ;;  %v11394_v30 = vld [vmem:[%s20254_s21 + $0x3b0] sm:$0xff] }
 0x9ae   : > { %6676 = vmatprep.mubr.f32.mxu0 %v15539_v59 }
 0x9af   : > { %11348 = vmatmul.mubr.msk.f32.gmra.mrb[116].mxu1 %vm2391_vm4, %v11316_v54  ;;  %v7927_v54 = vsel %vm7926_vm2, %v7860_v4, 0.0 }
 0x9b0   : > { %6232 = vmatprep.mubr.f32.mxu1 %v15539_v59 }
 0x9b1   : > { %11412 = vmatmul.mubr.msk.f32.gmra.mrb[170].mxu0 %vm2391_vm4, %v11380_v43  ;;  %v7928_v43 = vsel %vm7926_vm2, %v7861_v53, 0.0 }
 0x9b2   : > { %6682 = vmatprep.mubr.f32.mxu0 %v15539_v59 }
 0x9b3   : > { %11349 = vmatmul.mubr.msk.f32.gmra.mrb[118].mxu1 %vm2391_vm4, %v11317_v9  ;;  %v8193_v9 = vld [vmem:[#allocation9] sm:$0xfc] }
 0x9b4   : > { %6238 = vmatprep.mubr.f32.mxu1 %v15539_v59 }
 0x9b5   : > { %11413 = vmatmul.mubr.msk.f32.gmra.mrb[172].mxu0 %vm2391_vm4, %v11381_v52  ;;  %v16174_v52 = vrot.slane %v15539_v59, 2 }
 0x9b6   : > { %6688 = vmatprep.mubr.f32.mxu0 %v15539_v59 }
 0x9b7   : > { %11350 = vmatmul.mubr.msk.f32.gmra.mrb[120].mxu1 %vm2391_vm4, %v11318_v48  ;;  %20497 = vst [vmem:[#allocation17_spill] sm:$0xff] %v16174_v52  ;;  %v7932_v48 = vadd.f32 %v7863_v23, %v7862_v34  ;;  %v11334_v23 = vld [vmem:[%s20254_s21 + $0x2d0] sm:$0xff] }
 0x9b8   : > { %6244 = vmatprep.mubr.f32.mxu1 %v15539_v59 }
 0x9b9   : > { %11414 = vmatmul.mubr.msk.f32.gmra.mrb[174].mxu0 %vm2391_vm4, %v11382_v1  ;;  %v7929_v1 = vadd.f32 %v7928_v43, %v7927_v54  ;;  %7933 = vadd.xlane.f32.xlu0 %v7932_v48 }
 0x9ba   : > { %6694 = vmatprep.mubr.f32.mxu0 %v15539_v59 }
 0x9bb   : > { %11351 = vmatmul.mubr.msk.f32.gmra.mrb[122].mxu1 %vm2391_vm4, %v11319_v22  ;;  %v8194_v22 = vld [vmem:[#allocation9 + $0x8] sm:$0xfc]  ;;  %7930 = vadd.xlane.f32.xlu1 %v7929_v1 }
 0x9bc   : > { %6250 = vmatprep.mubr.f32.mxu1 %v15539_v59 }
 0x9bd   : > { %11415 = vmatmul.mubr.msk.f32.gmra.mrb[176].mxu0 %vm2391_vm4, %v11383_v13  ;;  %v11437_v13 = vld [vmem:[%s20255_s22 + $0x2] ss:$8 sm:$0x3] }
 0x9be   : > { %6700 = vmatprep.mubr.f32.mxu0 %v15539_v59 }
 0x9bf   : > { %11352 = vmatmul.mubr.msk.f32.gmra.mrb[124].mxu1 %vm2391_vm4, %v11320_v47  ;;  %v8360_v47 = vrot.slane %v8193_v9, 2 }
 0x9c0   : > { %6256 = vmatprep.mubr.f32.mxu1 %v15539_v59 }
 0x9c1   : > { %11416 = vmatmul.mubr.msk.f32.gmra.mrb[178].mxu0 %vm2391_vm4, %v11384_v49  ;;  %v8363_v49 = vrot.slane %v8194_v22, 2  ;;  %v11398_v22 = vld [vmem:[%s20254_s21 + $0x3d0] sm:$0xff] }
 0x9c2   : > { %6706 = vmatprep.mubr.f32.mxu0 %v15539_v59 }
 0x9c3   : > { %11353 = vmatmul.mubr.msk.f32.gmra.mrb[126].mxu1 %vm2391_vm4, %v11321_v50  ;;  %v11331_v50 = vld [vmem:[%s20254_s21 + $0x2b8] sm:$0xff] }
 0x9c4   : > { %6262 = vmatprep.mubr.f32.mxu1 %v15539_v59 }
 0x9c5   : > { %11417 = vmatmul.mubr.msk.f32.gmra.mrb[180].mxu0 %vm2391_vm4, %v11385_v0 }
 0x9c6   : > { %6712 = vmatprep.mubr.f32.mxu0 %v15539_v59 }
 0x9c7   : > { %11354 = vmatmul.mubr.msk.f32.gmra.mrb[128].mxu1 %vm2391_vm4, %v11322_v27  ;;  %v16187_v27 = vrot.slane %v11437_v13, %v16089_v14 }
 0x9c8   : > { %6268 = vmatprep.mubr.f32.mxu1 %v15539_v59 }
 0x9c9   : > { %11418 = vmatmul.mubr.msk.f32.gmra.mrb[182].mxu0 %vm2391_vm4, %v11386_v5  ;;  %20498 = vst [vmem:[#allocation18_spill] sm:$0xff] %v16187_v27  ;;  %v16190_v5 = vrot.slane %v11437_v13, %v16092_v33  ;;  %v11335_v13 = vld [vmem:[%s20254_s21 + $0x2d8] sm:$0xff] }
 0x9ca   : > { %6718 = vmatprep.mubr.f32.mxu0 %v15539_v59 }
 0x9cb   : > { %11355 = vmatmul.mubr.msk.f32.gmra.mrb[130].mxu1 %vm2391_vm4, %v11323_v20  ;;  %20499 = vst [vmem:[#allocation19_spill] sm:$0xff] %v16190_v5 }
 0x9cc   : > { %6274 = vmatprep.mubr.f32.mxu1 %v15539_v59 }
 0x9cd   : > { %11419 = vmatmul.mubr.msk.f32.gmra.mrb[184].mxu0 %vm2391_vm4, %v11387_v37  ;;  %v8365_v37 = vsel %vm8359_vm3, %v8363_v49, %v16174_v52 }
 0x9ce   : > { %6724 = vmatprep.mubr.f32.mxu0 %v15539_v59 }
 0x9cf   : > { %11356 = vmatmul.mubr.msk.f32.gmra.mrb[132].mxu1 %vm2391_vm4, %v11324_v60  ;;  %v16199_v60 = vld [vmem:[#allocation3] sm:$0xff] }
 0x9d0   : > { %6280 = vmatprep.mubr.f32.mxu1 %v15539_v59  ;;  %v9893_v7 = vmul.f32 %v16199_v60, %v16224_v46 }
 0x9d1   : > { %11420 = vmatmul.mubr.msk.f32.gmra.mrb[186].mxu0 %vm2391_vm4, %v11388_v6  ;;  %v11395_v6 = vld [vmem:[%s20254_s21 + $0x3b8] sm:$0xff] }
 0x9d2   : > { %6730 = vmatprep.mubr.f32.mxu0 %v15539_v59 }
 0x9d3   : > { %11357 = vmatmul.mubr.msk.f32.gmra.mrb[134].mxu1 %vm2391_vm4, %v11325_v32 }
 0x9d4   : > { %6286 = vmatprep.mubr.f32.mxu1 %v15539_v59 }
 0x9d5   : > { %11421 = vmatmul.mubr.msk.f32.gmra.mrb[188].mxu0 %vm2391_vm4, %v11389_v35  ;;  %v8632_v35 = vmul.f32 %v16190_v5, %v8365_v37 }
 0x9d6   : > { %6736 = vmatprep.mubr.f32.mxu0 %v15539_v59 }
 0x9d7   : > { %11358 = vmatmul.mubr.msk.f32.gmra.mrb[136].mxu1 %vm2391_vm4, %v11326_v45  ;;  %v11332_v45 = vld [vmem:[%s20254_s21 + $0x2c0] sm:$0xff] }
 0x9d8   : > { %6292 = vmatprep.mubr.f32.mxu1 %v15539_v59 }
 0x9d9   : > { %11422 = vmatmul.mubr.msk.f32.gmra.mrb[190].mxu0 %vm2391_vm4, %v11390_v21 }
 0x9da   : > { %6742 = vmatprep.mubr.f32.mxu0 %v15539_v59 }
 0x9db   : > { %11359 = vmatmul.mubr.msk.f32.gmra.mrb[138].mxu1 %vm2391_vm4, %v11327_v58 }
 0x9dc   : > { %6298 = vmatprep.mubr.f32.mxu1 %v15539_v59 }
 0x9dd   : > { %11423 = vmatmul.mubr.msk.f32.gmra.mrb[192].mxu0 %vm2391_vm4, %v11391_v18  ;;  %v16221_v18 = vrot.slane %v11441_v56, %v16089_v14  ;;  %v11401_v56 = vld [vmem:[%s20254_s21 + $0x3e8] sm:$0xff] }
 0x9de   : > { %6748 = vmatprep.mubr.f32.mxu0 %v15539_v59 }
 0x9df   : > { %11360 = vmatmul.mubr.msk.f32.gmra.mrb[140].mxu1 %vm2391_vm4, %v11328_v39  ;;  %20500 = vst [vmem:[#allocation20_spill] sm:$0xff] %v16221_v18  ;;  %v11396_v39 = vld [vmem:[%s20254_s21 + $0x3c0] sm:$0xff]  ;;  %v9892_v15 = vmul.f32 %v16199_v60, %v16221_v18 }
 0x9e0   : > { %6304 = vmatprep.mubr.f32.mxu1 %v15539_v59 }
 0x9e1   : > { %11424 = vmatmul.mubr.msk.f32.gmra.mrb[194].mxu0 %vm2391_vm4, %v11392_v28  ;;  %v16141_v12 = vpop.f32.mrb[90].mxu0  ;;  %v11442_v28 = vld [vmem:[%s20255_s22 + $0x7] ss:$8 sm:$0x3] }
 0x9e2   : > { %6754 = vmatprep.mubr.f32.mxu0 %v15539_v59  ;;  %v16153_v38 = vpop.f32.mrb[91].mxu0  ;;  %v16245_v62 = vrot.slane %v11442_v28, %v16089_v14  ;;  %v16248_v19 = vrot.slane %v11442_v28, %v16092_v33  ;;  %v11402_v28 = vld [vmem:[%s20254_s21 + $0x3f0] sm:$0xff] }
 0x9e3   : > { %11361 = vmatmul.mubr.msk.f32.gmra.mrb[142].mxu1 %vm2391_vm4, %v11329_v25 }
 0x9e4   : > { %6310 = vmatprep.mubr.f32.mxu1 %v15539_v59  ;;  %20502 = vst [vmem:[#allocation22_spill] sm:$0xff] %v16245_v62  ;;  %20503 = vst [vmem:[#allocation23_spill] sm:$0xff] %v16248_v19  ;;  %v10103_v4 = vmul.f32 %v16245_v62, %v10024_v29  ;;  %v10104_v53 = vmul.f32 %v16248_v19, %v10025_v41  ;;  %v10102_v34 = vmul.f32 %v16199_v60, %v16248_v19 }
 0x9e5   : > { %11425 = vmatmul.mubr.msk.f32.gmra.mrb[196].mxu0 %vm2391_vm4, %v11393_v55  ;;  %v9987_v55 = vadd.f32 %v9893_v7, %v9892_v15 }
 0x9e6   : > { %6760 = vmatprep.mubr.f32.mxu0 %v15539_v59  ;;  %v10203_v54 = vsel %vm20504_vm0, %v10103_v4, 0.0  ;;  %v10204_v43 = vsel %vm20505_vm5, %v10104_v53, 0.0  ;;  %v11403_v4 = vld [vmem:[%s20254_s21 + $0x3f8] sm:$0xff]  ;;  %vm20573_vm5 = vmmov %vm20504_vm0 }
 0x9e7   : > { %11362 = vmatmul.mubr.msk.f32.gmra.mrb[144].mxu1 %vm2391_vm4, %v11330_v24  ;;  %v10101_v24 = vmul.f32 %v16199_v60, %v16245_v62  ;;  %v10205_v48 = vadd.f32 %v10204_v43, %v10203_v54 }
 0x9e8   : > { %6316 = vmatprep.mubr.f32.mxu1 %v15539_v59  ;;  %v16184_v0 = vpop.f32.mrb[92].mxu0  ;;  %v8362_v59 = vsel %vm8359_vm3, %v8360_v47, %v16174_v52 }
 0x9e9   : > { %11426 = vmatmul.mubr.msk.f32.gmra.mrb[198].mxu0 %vm2391_vm4, %v11394_v30  ;;  %v16193_v20 = vpop.f32.mrb[93].mxu0  ;;  %v8631_v32 = vmul.f32 %v16187_v27, %v8362_v59  ;;  %v10200_v1 = vadd.f32 %v10102_v34, %v10101_v24  ;;  %10206 = vadd.xlane.f32.xlu1 %v10205_v48  ;;  %v11336_v59 = vld [vmem:[%s20254_s21 + $0x2e0] sm:$0xff] }
 0x9ea   : > { %6766 = vmatprep.mubr.f32.mxu0 %v16199_v60 }
 0x9eb   : > { %11363 = vmatmul.mubr.msk.f32.gmra.mrb[146].mxu1 %vm2391_vm4, %v11331_v50  ;;  %v8695_v58 = vadd.f32 %v8632_v35, %v8631_v32  ;;  %v11399_v50 = vld [vmem:[%s20254_s21 + $0x3d8] sm:$0xff]  ;;  %v11400_v32 = vld [vmem:[%s20254_s21 + $0x3e0] sm:$0xff]  ;;  %v11337_v35 = vld [vmem:[%s20254_s21 + $0x2e8] sm:$0xff] }
 0x9ec   : > { %6322 = vmatprep.mubr.f32.mxu1 %v16199_v60  ;;  %v16212_v21 = vpop.f32.mrb[94].mxu0 }
 0x9ed   : > { %11427 = vmatmul.mubr.msk.f32.gmra.mrb[200].mxu0 %vm2391_vm4, %v11395_v6  ;;  %v16218_v26 = vpop.f32.mrb[95].mxu0  ;;  %8696 = vadd.xlane.f32.xlu0 %v8695_v58 }
 0x9ee   : > { %6772 = vmatprep.mubr.f32.mxu0 %v16199_v60 }
 0x9ef   : > { %11364 = vmatmul.mubr.msk.f32.gmra.mrb[148].mxu1 %vm2391_vm4, %v11332_v45 }
 0x9f0   : > { %6328 = vmatprep.mubr.f32.mxu1 %v16199_v60  ;;  %v16242_v25 = vpop.f32.mrb[96].mxu0 }
 0x9f1   : > { %11428 = vmatmul.mubr.msk.f32.gmra.mrb[202].mxu0 %vm2391_vm4, %v11396_v39  ;;  %v16251_v3 = vpop.f32.mrb[97].mxu0  ;;  %9988 = vadd.xlane.f32.xlu0 %v9987_v55  ;;  %v11338_v39 = vld [vmem:[%s20254_s21 + $0x2f0] sm:$0xff] }
 0x9f2   : > { %6778 = vmatprep.mubr.f32.mxu0 %v16199_v60 }
 0x9f3   : > { %11365 = vmatmul.mubr.msk.f32.gmra.mrb[150].mxu1 %vm2391_vm4, %v11333_v51  ;;  %v11339_v51 = vld [vmem:[%s20254_s21 + $0x2f8] sm:$0xff] }
 0x9f4   : > { %6334 = vmatprep.mubr.f32.mxu1 %v16199_v60  ;;  %v16268_v30 = vpop.f32.mrb[98].mxu0 }
 0x9f5   : > { %11429 = vmatmul.mubr.msk.f32.gmra.mrb[204].mxu0 %vm2391_vm4, %v11397_v11  ;;  %v16273_v9 = vpop.f32.mrb[99].mxu0  ;;  %10201 = vadd.xlane.f32.xlu0 %v10200_v1 }
 0x9f6   : > { %6784 = vmatprep.mubr.f32.mxu0 %v16199_v60 }
 0x9f7   : > { %11366 = vmatmul.mubr.msk.f32.gmra.mrb[152].mxu1 %vm2391_vm4, %v11334_v23 }
 0x9f8   : > { %6340 = vmatprep.mubr.f32.mxu1 %v16199_v60  ;;  %v16284_v47 = vpop.f32.mrb[100].mxu0 }
 0x9f9   : > { %11430 = vmatmul.mubr.msk.f32.gmra.mrb[206].mxu0 %vm2391_vm4, %v11398_v22  ;;  %v16287_v49 = vpop.f32.mrb[101].mxu0 }
 0x9fa   : > { %6790 = vmatprep.mubr.f32.mxu0 %v16199_v60 }
 0x9fb   : > { %11367 = vmatmul.mubr.msk.f32.gmra.mrb[154].mxu1 %vm2391_vm4, %v11335_v13 }
 0x9fc   : > { %6346 = vmatprep.mubr.f32.mxu1 %v16199_v60  ;;  %v16298_v37 = vpop.f32.mrb[102].mxu0 }
 0x9fd   : > { %11431 = vmatmul.mubr.msk.f32.gmra.mrb[208].mxu0 %vm2391_vm4, %v11399_v50  ;;  %v16301_v6 = vpop.f32.mrb[103].mxu0 }
 0x9fe   : > { %6796 = vmatprep.mubr.f32.mxu0 %v16199_v60 }
 0x9ff   : > { %11368 = vmatmul.mubr.msk.f32.gmra.mrb[156].mxu1 %vm2391_vm4, %v11336_v59 }
 0xa00   : > { %6352 = vmatprep.mubr.f32.mxu1 %v16199_v60  ;;  %v16312_v45 = vpop.f32.mrb[104].mxu0 }
 0xa01   : > { %11432 = vmatmul.mubr.msk.f32.gmra.mrb[210].mxu0 %vm2391_vm4, %v11400_v32  ;;  %v16315_v58 = vpop.f32.mrb[105].mxu0 }
 0xa02   : > { %6802 = vmatprep.mubr.f32.mxu0 %v16199_v60 }
 0xa03   : > { %11369 = vmatmul.mubr.msk.f32.gmra.mrb[158].mxu1 %vm2391_vm4, %v11337_v35 }
 0xa04   : > { %6358 = vmatprep.mubr.f32.mxu1 %v16199_v60  ;;  %v16326_v15 = vpop.f32.mrb[106].mxu0 }
 0xa05   : > { %11433 = vmatmul.mubr.msk.f32.gmra.mrb[212].mxu0 %vm2391_vm4, %v11401_v56  ;;  %v16329_v7 = vpop.f32.mrb[107].mxu0 }
 0xa06   : > { %6808 = vmatprep.mubr.f32.mxu0 %v16199_v60 }
 0xa07   : > { %11370 = vmatmul.mubr.msk.f32.gmra.mrb[160].mxu1 %vm2391_vm4, %v11338_v39 }
 0xa08   : > { %6364 = vmatprep.mubr.f32.mxu1 %v16199_v60  ;;  %v16340_v55 = vpop.f32.mrb[108].mxu0 }
 0xa09   : > { %11434 = vmatmul.mubr.msk.f32.gmra.mrb[214].mxu0 %vm2391_vm4, %v11402_v28  ;;  %v16343_v29 = vpop.f32.mrb[109].mxu0 }
 0xa0b   : > { %11371 = vmatmul.mubr.msk.f32.gmra.mrb[162].mxu1 %vm2391_vm4, %v11339_v51 }
 0xa0c   : > { %v16346_v41 = vpop.f32.mrb[110].mxu0  ;;  %6814 = vmatprep.mubr.f32.mxu1 %v16199_v60 }
 0xa0d   : > { %v16349_v11 = vpop.f32.mrb[111].mxu0 }
 0xa10   : > { %v16354_v53 = vpop.f32.mrb[112].mxu0 }
 0xa11   : > { %v16356_v24 = vpop.f32.mrb[113].mxu0 }
 0xa13   : > { %11435 = vmatmul.mubr.msk.f32.vlgmr.msra.gmra.mrb[162].mxu1 %vm2391_vm4, %v11403_v4 }
 0xa14   : > { %v16359_v34 = vpop.f32.mrb[114].mxu0 }
 0xa15   : > { %20506 = vst [vmem:[#allocation24_spill] sm:$0xff] %v16359_v34  ;;  %v16361_v23 = vpop.f32.mrb[115].mxu0 }
 0xa16   : > { %20507 = vst [vmem:[#allocation25_spill] sm:$0xff] %v16361_v23 }
 0xa18   : > { %v16363_v54 = vpop.f32.mrb[116].mxu0 }
 0xa19   : > { %20508 = vst [vmem:[#allocation26_spill] sm:$0xff] %v16363_v54  ;;  %v16365_v43 = vpop.f32.mrb[117].mxu0 }
 0xa1a   : > { %20509 = vst [vmem:[#allocation27_spill] sm:$0xff] %v16365_v43 }
 0xa1c   : > { %v16367_v60 = vpop.f32.mrb[118].mxu0 }
 0xa1d   : > { %20510 = vst [vmem:[#allocation28_spill] sm:$0xff] %v16367_v60  ;;  %v16369_v48 = vpop.f32.mrb[119].mxu0 }
 0xa1e   : > { %20511 = vst [vmem:[#allocation29_spill] sm:$0xff] %v16369_v48 }
 0xa20   : > { %v16371_v1 = vpop.f32.mrb[120].mxu0 }
 0xa21   : > { %20512 = vst [vmem:[#allocation30_spill] sm:$0xff] %v16371_v1  ;;  %v16373_v22 = vpop.f32.mrb[121].mxu0  ;;  %v7385_v1 = vand.u32 15, %v13873_v40  ;;  %v11438_v40 = vld [vmem:[%s20255_s22 + $0x3] ss:$8 sm:$0x3] }
 0xa22   : > { %20513 = vst [vmem:[#allocation31_spill] sm:$0xff] %v16373_v22  ;;  %v16481_v62 = vrot.slane %v11438_v40, %v16092_v33 }
 0xa23   : > { %vm16471_vm4 = vcmp.ge.s32.totalorder %v7385_v1, 1 }
 0xa24   : > { %v16375_v13 = vpop.f32.mrb[122].mxu0  ;;  %20549 = vst [vmem:[#allocation65_spill] sm:$0xff] %v16481_v62 }
 0xa25   : > { %20514 = vst [vmem:[#allocation32_spill] sm:$0xff] %v16375_v13  ;;  %v16377_v50 = vpop.f32.mrb[123].mxu0 }
 0xa26   : > { %20515 = vst [vmem:[#allocation33_spill] sm:$0xff] %v16377_v50 }
 0xa28   : > { %v16379_v59 = vpop.f32.mrb[124].mxu0 }
 0xa29   : > { %20516 = vst [vmem:[#allocation34_spill] sm:$0xff] %v16379_v59  ;;  %v16381_v32 = vpop.f32.mrb[125].mxu0 }
 0xa2a   : > { %20517 = vst [vmem:[#allocation35_spill] sm:$0xff] %v16381_v32 }
 0xa2c   : > { %v16383_v35 = vpop.f32.mrb[126].mxu0 }
 0xa2d   : > { %20518 = vst [vmem:[#allocation36_spill] sm:$0xff] %v16383_v35  ;;  %v16385_v56 = vpop.f32.mrb[127].mxu0 }
 0xa2e   : > { %20519 = vst [vmem:[#allocation37_spill] sm:$0xff] %v16385_v56 }
 0xa30   : > { %v16387_v39 = vpop.f32.mrb[128].mxu0 }
 0xa31   : > { %20520 = vst [vmem:[#allocation38_spill] sm:$0xff] %v16387_v39  ;;  %v16389_v28 = vpop.f32.mrb[129].mxu0 }
 0xa32   : > { %20521 = vst [vmem:[#allocation39_spill] sm:$0xff] %v16389_v28 }
 0xa34   : > { %v16391_v51 = vpop.f32.mrb[130].mxu0 }
 0xa35   : > { %20522 = vst [vmem:[#allocation40_spill] sm:$0xff] %v16391_v51  ;;  %v16393_v4 = vpop.f32.mrb[131].mxu0 }
 0xa36   : > { %20523 = vst [vmem:[#allocation41_spill] sm:$0xff] %v16393_v4 }
 0xa38   : > { %v16395_v31 = vpop.f32.mrb[132].mxu0 }
 0xa39   : > { %20524 = vst [vmem:[#allocation42_spill] sm:$0xff] %v16395_v31  ;;  %v16397_v42 = vpop.f32.mrb[133].mxu0 }
 0xa3a   : > { %20525 = vst [vmem:[#allocation43_spill] sm:$0xff] %v16397_v42 }
 0xa3c   : > { %v16399_v50 = vpop.f32.mrb[134].mxu0 }
 0xa3d   : > { %20526 = vst [vmem:[#allocation44_spill] sm:$0xff] %v16399_v50  ;;  %v16401_v59 = vpop.f32.mrb[135].mxu0 }
 0xa3e   : > { %20527 = vst [vmem:[#allocation45_spill] sm:$0xff] %v16401_v59 }
 0xa40   : > { %v16403_v32 = vpop.f32.mrb[136].mxu0 }
 0xa41   : > { %20528 = vst [vmem:[#allocation46_spill] sm:$0xff] %v16403_v32  ;;  %v16405_v35 = vpop.f32.mrb[137].mxu0 }
 0xa42   : > { %20529 = vst [vmem:[#allocation47_spill] sm:$0xff] %v16405_v35 }
 0xa44   : > { %v16407_v56 = vpop.f32.mrb[138].mxu0 }
 0xa45   : > { %20530 = vst [vmem:[#allocation48_spill] sm:$0xff] %v16407_v56  ;;  %v16409_v39 = vpop.f32.mrb[139].mxu0 }
 0xa46   : > { %20531 = vst [vmem:[#allocation49_spill] sm:$0xff] %v16409_v39 }
 0xa48   : > { %v16411_v28 = vpop.f32.mrb[140].mxu0 }
 0xa49   : > { %20532 = vst [vmem:[#allocation50_spill] sm:$0xff] %v16411_v28  ;;  %v16413_v51 = vpop.f32.mrb[141].mxu0 }
 0xa4a   : > { %20533 = vst [vmem:[#allocation51_spill] sm:$0xff] %v16413_v51 }
 0xa4c   : > { %v16415_v4 = vpop.f32.mrb[142].mxu0 }
 0xa4d   : > { %20534 = vst [vmem:[#allocation52_spill] sm:$0xff] %v16415_v4  ;;  %v16417_v31 = vpop.f32.mrb[143].mxu0 }
 0xa4e   : > { %20535 = vst [vmem:[#allocation53_spill] sm:$0xff] %v16417_v31 }
 0xa50   : > { %v16419_v42 = vpop.f32.mrb[144].mxu0 }
 0xa51   : > { %20536 = vst [vmem:[#allocation54_spill] sm:$0xff] %v16419_v42  ;;  %v16421_v50 = vpop.f32.mrb[145].mxu0  ;;  %v6885_v42 = vld [vmem:[%s20253_s20] sm:$0x3] }
 0xa52   : > { %20537 = vst [vmem:[#allocation55_spill] sm:$0xff] %v16421_v50 }
 0xa54   : > { %v16423_v59 = vpop.f32.mrb[146].mxu0 }
 0xa55   : > { %20538 = vst [vmem:[#allocation56_spill] sm:$0xff] %v16423_v59  ;;  %v16425_v32 = vpop.f32.mrb[147].mxu0 }
 0xa56   : > { %20539 = vst [vmem:[#allocation57_spill] sm:$0xff] %v16425_v32 }
 0xa58   : > { %v16427_v35 = vpop.f32.mrb[148].mxu0 }
 0xa59   : > { %20540 = vst [vmem:[#allocation58_spill] sm:$0xff] %v16427_v35  ;;  %v16429_v56 = vpop.f32.mrb[149].mxu0  ;;  %v16444_v35 = vrot.slane %v6885_v42, %v16089_v14 }
 0xa5a   : > { %20541 = vst [vmem:[#allocation59_spill] sm:$0xff] %v16429_v56 }
 0xa5c   : > { %v16431_v39 = vpop.f32.mrb[150].mxu0 }
 0xa5d   : > { %20542 = vst [vmem:[#allocation60_spill] sm:$0xff] %v16431_v39  ;;  %v16433_v28 = vpop.f32.mrb[151].mxu0 }
 0xa5e   : > { %20543 = vst [vmem:[#allocation61_spill] sm:$0xff] %v16433_v28  ;;  %v16448_v28 = vrot.slane %v6885_v42, %v16092_v33 }
 0xa60   : > { %v16435_v51 = vpop.f32.mrb[152].mxu0 }
 0xa61   : > { %20544 = vst [vmem:[#allocation62_spill] sm:$0xff] %v16435_v51  ;;  %v16440_v31 = vpop.f32.mrb[153].mxu0 }
 0xa62   : > { %20545 = vst [vmem:[#allocation63_spill] sm:$0xff] %v16440_v31  ;;  %v6180_v50 = vpop.f32.mrb[100].mxu1 }
 0xa63   : > { %v12870_v59 = vadd.f32 %v6180_v50, %v16141_v12  ;;  %v6182_v32 = vpop.f32.mrb[101].mxu1 }
 0xa64   : > { %v12872_v56 = vadd.f32 %v6182_v32, %v16153_v38  ;;  %v6630_v39 = vpop.f32.mrb[154].mxu0 }
 0xa65   : > { %v12871_v51 = vadd.f32 %v12870_v59, %v6630_v39  ;;  %v6632_v4 = vpop.f32.mrb[155].mxu0  ;;  %v11440_v59 = vld [vmem:[%s20255_s22 + $0x5] ss:$8 sm:$0x3] }
 0xa66   : > { %v12873_v13 = vadd.f32 %v12872_v56, %v6632_v4  ;;  %v6186_v22 = vpop.f32.mrb[102].mxu1  ;;  %v16498_v17 = vrot.slane %v11440_v59, %v16092_v33 }
 0xa67   : > { %v6897_v31 = vadd.f32 %v12871_v51, %v16444_v35  ;;  %v12874_v12 = vadd.f32 %v6186_v22, %v16184_v0  ;;  %v6188_v50 = vpop.f32.mrb[103].mxu1 }
 0xa68   : > { %v6898_v38 = vadd.f32 %v12873_v13, %v16448_v28  ;;  %v12876_v42 = vadd.f32 %v6188_v50, %v16193_v20  ;;  %v6636_v32 = vpop.f32.mrb[156].mxu0  ;;  %v11439_v13 = vld [vmem:[%s20255_s22 + $0x4] ss:$8 sm:$0x3]  ;;  %20553 = vst [vmem:[#allocation69_spill] sm:$0xff] %v16498_v17 }
 0xa69   : > { %v6961_v56 = vmax.f32 %v6897_v31, 0.0  ;;  %v12875_v39 = vadd.f32 %v12874_v12, %v6636_v32  ;;  %v6638_v4 = vpop.f32.mrb[157].mxu0  ;;  %v7384_v32 = vand.u32 15, %v13847_v8  ;;  %v16484_v1 = vrot.slane %v11439_v13, %v16089_v14 }
 0xa6a   : > { %v6962_v22 = vmax.f32 %v6898_v38, 0.0  ;;  %v12877_v51 = vadd.f32 %v12876_v42, %v6638_v4  ;;  %v6192_v19 = vpop.f32.mrb[104].mxu1  ;;  %v20546_v38 = vmov 0  ;;  %v16490_v57 = vrot.slane %v11439_v13, %v16092_v33 }
 0xa6b   : > { %v7101_v20 = vrot.slane %v6961_v56, 7  ;;  %v6899_v50 = vadd.f32 %v12875_v39, %v16444_v35  ;;  %v12878_v31 = vadd.f32 %v6192_v19, %v16212_v21  ;;  %v6194_v12 = vpop.f32.mrb[105].mxu1  ;;  %v20547_v38 = vsel %vm16471_vm4, 4294967295, %v20546_v38  ;;  %20550 = vst [vmem:[#allocation66_spill] sm:$0xff] %v16484_v1 }
 0xa6c   : > { %20548 = vst [vmem:[#allocation64_spill] sm:$0xff] %v20547_v38  ;;  %v7102_v42 = vrot.slane %v6962_v22, 7  ;;  %v6900_v4 = vadd.f32 %v12877_v51, %v16448_v28  ;;  %v12880_v56 = vadd.f32 %v6194_v12, %v16218_v26  ;;  %v6642_v0 = vpop.f32.mrb[158].mxu0  ;;  %v16478_v39 = vrot.slane %v11438_v40, %v16089_v14  ;;  %v11443_v22 = vld [vmem:[%s20255_s22 + $0x10] ss:$8 sm:$0x3] }
 0xa6d   : > { %7293 = vst [vmem:[#allocation9 + $0x20] sm:$0xfe] %v7101_v20  ;;  %v6963_v21 = vmax.f32 %v6899_v50, 0.0  ;;  %v12879_v8 = vadd.f32 %v12878_v31, %v6642_v0  ;;  %v6644_v19 = vpop.f32.mrb[159].mxu0  ;;  %20551 = vst [vmem:[#allocation67_spill] sm:$0xff] %v16490_v57  ;;  %v16493_v0 = vrot.slane %v11440_v59, %v16089_v14  ;;  %v16503_v13 = vrot.slane %v11443_v22, %v16089_v14 }
 0xa6e   : > { %7294 = vst [vmem:[#allocation9 + $0x28] sm:$0xfe] %v7102_v42  ;;  %v6964_v26 = vmax.f32 %v6900_v4, 0.0  ;;  %v12881_v51 = vadd.f32 %v12880_v56, %v6644_v19  ;;  %v6198_v12 = vpop.f32.mrb[106].mxu1  ;;  %vm16528_vm8 = vcmp.le.s32.totalorder %v7384_v32, 14 }
 0xa6f   : > { %20552 = vst [vmem:[#allocation68_spill] sm:$0xff] %v16493_v0  ;;  %v7103_v50 = vrot.slane %v6963_v21, 7  ;;  %v6901_v40 = vadd.f32 %v12879_v8, %v16444_v35  ;;  %v12882_v31 = vadd.f32 %v6198_v12, %v16242_v25  ;;  %v6200_v61 = vpop.f32.mrb[107].mxu1  ;;  %20554 = vst [vmem:[#allocation70_spill] sm:$0xff] %v16503_v13  ;;  %v16509_v25 = vrot.slane %v11443_v22, %v16092_v33 }
 0xa70   : > { %v7105_v48 = vrot.slane %v6964_v26, 7  ;;  %v6902_v4 = vadd.f32 %v12881_v51, %v16448_v28  ;;  %v12884_v56 = vadd.f32 %v6200_v61, %v16251_v3  ;;  %v6648_v19 = vpop.f32.mrb[160].mxu0 }
 0xa71   : > { %v16506_v60 = vsel %vm20555_vm6, %v7101_v20, %v7103_v50  ;;  %v6965_v21 = vmax.f32 %v6901_v40, 0.0  ;;  %v12883_v8 = vadd.f32 %v12882_v31, %v6648_v19  ;;  %v6650_v46 = vpop.f32.mrb[161].mxu0  ;;  %20556 = vst [vmem:[#allocation71_spill] sm:$0xff] %v16509_v25  ;;  %vm20574_vm6 = vmmov %vm20504_vm0 }
 0xa72   : > { %v16512_v59 = vsel %vm20557_vm7, %v7102_v42, %v7105_v48  ;;  %v6966_v26 = vmax.f32 %v6902_v4, 0.0  ;;  %v12885_v51 = vadd.f32 %v12884_v56, %v6650_v46  ;;  %v6204_v12 = vpop.f32.mrb[108].mxu1  ;;  %v16516_v61 = vmul.f32 %v16108_v36, %v16506_v60  ;;  %vm20575_vm7 = vmmov %vm20504_vm0 }
 0xa73   : > { %v7107_v14 = vrot.slane %v6965_v21, 7  ;;  %v6903_v3 = vadd.f32 %v12883_v8, %v16444_v35  ;;  %v12886_v20 = vadd.f32 %v6204_v12, %v16268_v30  ;;  %v6206_v40 = vpop.f32.mrb[109].mxu1  ;;  %v16522_v33 = vmul.f32 %v16111_v10, %v16512_v59 }
 0xa74   : > { %v7109_v22 = vrot.slane %v6966_v26, 7  ;;  %v6904_v42 = vadd.f32 %v12885_v51, %v16448_v28  ;;  %v12888_v46 = vadd.f32 %v6206_v40, %v16273_v9  ;;  %v6654_v31 = vpop.f32.mrb[162].mxu0  ;;  %v16526_v4 = vld [vmem:[#allocation9 + $0x20] sm:$0xff]  ;;  %v20558_v56 = vmov 0 }
 0xa75   : > { %v20559_v56 = vsel %vm16528_vm8, 4294967295, %v20558_v56  ;;  %v16534_v30 = vmul.f32 %v16478_v39, %v16506_v60  ;;  %v16537_v19 = vsel %vm20561_vm9, %v7103_v50, %v7107_v14  ;;  %v6967_v21 = vmax.f32 %v6903_v3, 0.0  ;;  %v6656_v26 = vpop.f32.mrb[163].mxu0  ;;  %v16539_v51 = vld [vmem:[#allocation9 + $0x28] sm:$0xff]  ;;  %vm20576_vm9 = vmmov %vm20504_vm0 }
 0xa76   : > { %20560 = vst [vmem:[#allocation72_spill] sm:$0xff] %v20559_v56  ;;  %v12887_v8 = vadd.f32 %v12886_v20, %v6654_v31  ;;  %v7864_v9 = vmul.f32 %v16144_v2, %v16526_v4  ;;  %7297 = vst [vmem:[#allocation9 + $0x40] sm:$0xff] %v16537_v19  ;;  %v16545_v32 = vsel %vm20562_vm10, %v7105_v48, %v7109_v22  ;;  %v6968_v12 = vmax.f32 %v6904_v42, 0.0  ;;  %v6210_v25 = vpop.f32.mrb[110].mxu1 }
 0xa77   : > { %v12889_v40 = vadd.f32 %v12888_v46, %v6656_v26  ;;  %v7865_v50 = vmul.f32 %v16147_v44, %v16539_v51  ;;  %7298 = vst [vmem:[#allocation9 + $0x48] sm:$0xff] %v16545_v32  ;;  %v7111_v3 = vrot.slane %v6967_v21, 7  ;;  %v12890_v31 = vadd.f32 %v6210_v25, %v16284_v47  ;;  %v6212_v13 = vpop.f32.mrb[111].mxu1  ;;  %vm20577_vm10 = vmmov %vm20504_vm0 }
 0xa78   : > { %v6905_v20 = vadd.f32 %v12887_v8, %v16444_v35  ;;  %v7579_v18 = vsel %vm16471_vm4, %v16526_v4, 0.0  ;;  %v7113_v48 = vrot.slane %v6968_v12, 7  ;;  %v12892_v46 = vadd.f32 %v6212_v13, %v16287_v49  ;;  %v6660_v26 = vpop.f32.mrb[164].mxu0 }
 0xa79   : > { %v6906_v42 = vadd.f32 %v12889_v40, %v16448_v28  ;;  %v7935_v43 = vadd.f32 %v7865_v50, %v7864_v9  ;;  %v16558_v54 = vsel %vm20563_vm11, %v7107_v14, %v7111_v3  ;;  %v12891_v23 = vadd.f32 %v12890_v31, %v6660_v26  ;;  %v6662_v8 = vpop.f32.mrb[165].mxu0  ;;  %vm20579_vm11 = vmmov %vm20504_vm0 }
 0xa7a   : > { %v6969_v21 = vmax.f32 %v6905_v20, 0.0  ;;  %v7580_v47 = vsel %vm16471_vm4, %v16539_v51, 0.0  ;;  %v16564_v25 = vsel %vm20564_vm12, %v7109_v22, %v7113_v48  ;;  %v12893_v34 = vadd.f32 %v12892_v46, %v6662_v8  ;;  %v6216_v40 = vpop.f32.mrb[112].mxu1 }
 0xa7b   : > { %20565 = vst [vmem:[#allocation73_spill] sm:$0xff] %v16564_v25  ;;  %v6970_v12 = vmax.f32 %v6906_v42, 0.0  ;;  %7936 = vadd.xlane.f32.xlu1 %v7935_v43  ;;  %v7655_v49 = vmul.f32 %v16108_v36, %v7579_v18  ;;  %v6907_v14 = vadd.f32 %v12891_v23, %v16444_v35  ;;  %v12894_v9 = vadd.f32 %v6216_v40, %v16298_v37  ;;  %v6218_v20 = vpop.f32.mrb[113].mxu1 }
 0xa7c   : > { %v7115_v13 = vrot.slane %v6969_v21, 7  ;;  %v7656_v50 = vmul.f32 %v16111_v10, %v7580_v47  ;;  %v6908_v26 = vadd.f32 %v12893_v34, %v16448_v28  ;;  %v12896_v22 = vadd.f32 %v6218_v20, %v16301_v6  ;;  %v6666_v25 = vpop.f32.mrb[166].mxu0 }
 0xa7d   : > { %v7117_v31 = vrot.slane %v6970_v12, 7  ;;  %v20283_v42 = vrot.slane %v16526_v4, 2  ;;  %v6971_v18 = vmax.f32 %v6907_v14, 0.0  ;;  %v12895_v21 = vadd.f32 %v12894_v9, %v6666_v25  ;;  %v6668_v23 = vpop.f32.mrb[167].mxu0 }
 0xa7e   : > { %v16574_v43 = vsel %vm20566_vm13, %v7111_v3, %v7115_v13  ;;  %v7721_v46 = vadd.f32 %v7656_v50, %v7655_v49  ;;  %v6972_v8 = vmax.f32 %v6908_v26, 0.0  ;;  %v12897_v47 = vadd.f32 %v12896_v22, %v6668_v23  ;;  %v6222_v34 = vpop.f32.mrb[114].mxu1  ;;  %vm20585_vm13 = vmmov %vm20504_vm0 }
 0xa7f   : > { %20567 = vst [vmem:[#allocation74_spill] sm:$0xff] %v16574_v43  ;;  %7301 = vst [vmem:[#allocation9 + $0x60] sm:$0xff] %v16574_v43  ;;  %v16578_v37 = vsel %vm20568_vm14, %v7113_v48, %v7117_v31  ;;  %v8367_v6 = vsel %vm8359_vm3, %v16174_v52, %v20283_v42  ;;  %v7119_v3 = vrot.slane %v6971_v18, 7  ;;  %v6909_v25 = vadd.f32 %v12895_v21, %v16444_v35  ;;  %v6224_v40 = vpop.f32.mrb[115].mxu1 }
 0xa80   : > { %20569 = vst [vmem:[#allocation75_spill] sm:$0xff] %v16578_v37  ;;  %7302 = vst [vmem:[#allocation9 + $0x68] sm:$0xff] %v16578_v37  ;;  %7722 = vadd.xlane.f32.xlu0 %v7721_v46  ;;  %v20282_v12 = vrot.slane %v16539_v51, 2  ;;  %v8556_v48 = vsel %vm16528_vm8, %v8367_v6, 0.0  ;;  %v7121_v49 = vrot.slane %v6972_v8, 7  ;;  %v6910_v14 = vadd.f32 %v12897_v47, %v16448_v28  ;;  %v6672_v20 = vpop.f32.mrb[168].mxu0 }
 0xa81   : > { %v8633_v9 = vmul.f32 %v16187_v27, %v8556_v48  ;;  %v12898_v50 = vadd.f32 %v6222_v34, %v16312_v45  ;;  %v16593_v26 = vsel %vm20570_vm15, %v7115_v13, %v7119_v3  ;;  %v6973_v22 = vmax.f32 %v6909_v25, 0.0  ;;  %v6674_v21 = vpop.f32.mrb[169].mxu0  ;;  %vm20586_vm14 = vmmov %vm20504_vm0 }
 0xa82   : > { %20571 = vst [vmem:[#allocation76_spill] sm:$0xff] %v16593_v26  ;;  %v8369_v18 = vsel %vm8359_vm3, %v16174_v52, %v20282_v12  ;;  %v8827_v46 = vsel %vm16103_vm1, %v16526_v4, 0.0  ;;  %7303 = vst [vmem:[#allocation9 + $0x70] sm:$0xff] %v16593_v26  ;;  %v16604_v23 = vsel %vm20504_vm0, %v7117_v31, %v7121_v49  ;;  %v6974_v45 = vmax.f32 %v6910_v14, 0.0  ;;  %v6228_v47 = vpop.f32.mrb[116].mxu1 }
 0xa83   : > { %20572 = vst [vmem:[#allocation77_spill] sm:$0xff] %v16604_v23  ;;  %v8557_v13 = vsel %vm16528_vm8, %v8369_v18, 0.0  ;;  %v8828_v8 = vsel %vm16103_vm1, %v16539_v51, 0.0  ;;  %7304 = vst [vmem:[#allocation9 + $0x78] sm:$0xff] %v16604_v23  ;;  %v7123_v6 = vrot.slane %v6973_v22, 7  ;;  %v8904_v25 = vmul.f32 %v16478_v39, %v8827_v46  ;;  %v6230_v12 = vpop.f32.mrb[117].mxu1 }
 0xa84   : > { %v8634_v34 = vmul.f32 %v16190_v5, %v8557_v13  ;;  %v8905_v48 = vmul.f32 %v16481_v62, %v8828_v8  ;;  %v9096_v31 = vld [vmem:[#allocation9 + $0x20] sm:$0xfe]  ;;  %v7125_v14 = vrot.slane %v6974_v45, 7  ;;  %v12900_v42 = vadd.f32 %v6224_v40, %v16315_v58  ;;  %v9097_v26 = vld [vmem:[#allocation9 + $0x28] sm:$0xfe]  ;;  %v6678_v37 = vpop.f32.mrb[170].mxu0  ;;  %vm20587_vm15 = vmmov %vm20504_vm0 }
 0xa85   : > { %v12899_v18 = vadd.f32 %v12898_v50, %v6672_v20  ;;  %v7724_v52 = vadd.f32 %v16522_v33, %v16516_v61  ;;  %v7124_v23 = vsel %vm20573_vm5, %v7119_v3, %v7123_v6  ;;  %v12902_v13 = vadd.f32 %v6228_v47, %v16326_v15  ;;  %v6680_v46 = vpop.f32.mrb[171].mxu0  ;;  %vm20591_vm5 = vmmov %vm20504_vm0 }
 0xa86   : > { %v8698_v22 = vadd.f32 %v8634_v34, %v8633_v9  ;;  %v8968_v43 = vadd.f32 %v8905_v48, %v8904_v25  ;;  %7305 = vst [vmem:[#allocation9 + $0x80] sm:$0xff] %v7124_v23  ;;  %v7126_v8 = vsel %vm20574_vm6, %v7121_v49, %v7125_v14  ;;  %v12901_v56 = vadd.f32 %v12900_v42, %v6674_v21  ;;  %v6234_v40 = vpop.f32.mrb[118].mxu1  ;;  %vm20593_vm6 = vmmov %vm20504_vm0 }
 0xa87   : > { %v6911_v45 = vadd.f32 %v12899_v18, %v16444_v35  ;;  %v9113_v58 = vmul.f32 %v16484_v1, %v9096_v31  ;;  %7306 = vst [vmem:[#allocation9 + $0x88] sm:$0xff] %v7126_v8  ;;  %v9114_v61 = vmul.f32 %v16490_v57, %v9097_v26  ;;  %v12904_v33 = vadd.f32 %v6230_v12, %v16329_v7  ;;  %v6236_v9 = vpop.f32.mrb[119].mxu1 }
 0xa88   : > { %8699 = vadd.xlane.f32.xlu1 %v8698_v22  ;;  %8969 = vadd.xlane.f32.xlu0 %v8968_v43  ;;  %v12903_v3 = vadd.f32 %v12902_v13, %v6678_v37  ;;  %v16626_v15 = vrot.slane %v16506_v60, 2  ;;  %v6912_v49 = vadd.f32 %v12901_v56, %v16448_v28  ;;  %v8907_v20 = vmul.f32 %v16481_v62, %v16512_v59  ;;  %v6684_v21 = vpop.f32.mrb[172].mxu0 }
 0xa89   : > { %v6975_v50 = vmax.f32 %v6911_v45, 0.0  ;;  %v9179_v42 = vsel %vm7926_vm2, %v9113_v58, 0.0  ;;  %v9180_v43 = vsel %vm7926_vm2, %v9114_v61, 0.0  ;;  %v12905_v23 = vadd.f32 %v12904_v33, %v6680_v46  ;;  %v6686_v37 = vpop.f32.mrb[173].mxu0 }
 0xa8a   : > { %v6913_v26 = vadd.f32 %v12903_v3, %v16444_v35  ;;  %v12906_v7 = vadd.f32 %v6234_v40, %v16340_v55  ;;  %v6976_v47 = vmax.f32 %v6912_v49, 0.0  ;;  %v9181_v34 = vadd.f32 %v9180_v43, %v9179_v42  ;;  %v6240_v56 = vpop.f32.mrb[120].mxu1 }
 0xa8b   : > { %v7127_v12 = vrot.slane %v6975_v50, 7  ;;  %v8971_v25 = vadd.f32 %v8907_v20, %v16534_v30  ;;  %v6914_v31 = vadd.f32 %v12905_v23, %v16448_v28  ;;  %v7866_v18 = vmul.f32 %v16144_v2, %v16506_v60  ;;  %v6242_v13 = vpop.f32.mrb[121].mxu1 }
 0xa8c   : > { %7725 = vadd.xlane.f32.xlu1 %v7724_v52  ;;  %v6977_v48 = vmax.f32 %v6913_v26, 0.0  ;;  %v7867_v22 = vmul.f32 %v16147_v44, %v16512_v59  ;;  %v7129_v46 = vrot.slane %v6976_v47, 7  ;;  %9182 = vadd.xlane.f32.xlu0 %v9181_v34  ;;  %v12908_v8 = vadd.f32 %v6236_v9, %v16343_v29  ;;  %v6690_v30 = vpop.f32.mrb[174].mxu0 }
 0xa8d   : > { %v7128_v55 = vsel %vm20575_vm7, %v7123_v6, %v7127_v12  ;;  %v12907_v45 = vadd.f32 %v12906_v7, %v6684_v21  ;;  %v6978_v58 = vmax.f32 %v6914_v31, 0.0  ;;  %v9115_v61 = vmul.f32 %v16484_v1, %v16506_v60  ;;  %v6692_v33 = vpop.f32.mrb[175].mxu0  ;;  %vm20596_vm7 = vmmov %vm20504_vm0 }
 0xa8e   : > { %7307 = vst [vmem:[#allocation9 + $0x90] sm:$0xff] %v7128_v55  ;;  %v7131_v52 = vrot.slane %v6977_v48, 7  ;;  %v7938_v40 = vadd.f32 %v7867_v22, %v7866_v18  ;;  %v7130_v3 = vsel %vm20576_vm9, %v7125_v14, %v7129_v46  ;;  %v12909_v49 = vadd.f32 %v12908_v8, %v6686_v37  ;;  %v6246_v42 = vpop.f32.mrb[122].mxu1  ;;  %v9444_v14 = vld [vmem:[#allocation9 + $0x20] sm:$0xfc] }
 0xa8f   : > { %v6915_v50 = vadd.f32 %v12907_v45, %v16444_v35  ;;  %v9116_v6 = vmul.f32 %v16490_v57, %v16512_v59  ;;  %7308 = vst [vmem:[#allocation9 + $0x98] sm:$0xff] %v7130_v3  ;;  %v7133_v9 = vrot.slane %v6978_v58, 7  ;;  %v12910_v20 = vadd.f32 %v6240_v56, %v16346_v41  ;;  %v6248_v43 = vpop.f32.mrb[123].mxu1 }
 0xa90   : > { %v7132_v29 = vsel %vm20577_vm10, %v7127_v12, %v7131_v52  ;;  %8972 = vadd.xlane.f32.xlu1 %v8971_v25  ;;  %v20578_v60 = vrot.slane %v16526_v4, 2  ;;  %7939 = vadd.xlane.f32.xlu0 %v7938_v40  ;;  %v6916_v23 = vadd.f32 %v12909_v49, %v16448_v28  ;;  %v16657_v37 = vrot.slane %v16512_v59, 2  ;;  %v9445_v12 = vld [vmem:[#allocation9 + $0x28] sm:$0xfc]  ;;  %v6696_v47 = vpop.f32.mrb[176].mxu0  ;;  %vm20607_vm10 = vmmov %vm20504_vm0 }
 0xa91   : > { %7309 = vst [vmem:[#allocation9 + $0xa0] sm:$0xff] %v7132_v29  ;;  %v6979_v26 = vmax.f32 %v6915_v50, 0.0  ;;  %v9184_v7 = vadd.f32 %v9116_v6, %v9115_v61  ;;  %v7134_v41 = vsel %vm20579_vm11, %v7129_v46, %v7133_v9  ;;  %v12912_v4 = vadd.f32 %v6242_v13, %v16349_v11  ;;  %v6698_v56 = vpop.f32.mrb[177].mxu0  ;;  %vm20610_vm11 = vmmov %vm20504_vm0 }
 0xa92   : > { %v8371_v21 = vsel %vm8359_vm3, %v20578_v60, %v16626_v15  ;;  %v12911_v25 = vadd.f32 %v12910_v20, %v6690_v30  ;;  %v20580_v48 = vand.u32 15, %v13972_v63  ;;  %v20581_v31 = vmov 0  ;;  %7310 = vst [vmem:[#allocation9 + $0xa8] sm:$0xff] %v7134_v41  ;;  %v6252_v8 = vpop.f32.mrb[124].mxu1 }
 0xa93   : > { %v8635_v34 = vmul.f32 %v16187_v27, %v8371_v21  ;;  %v7135_v18 = vrot.slane %v6979_v26, 7  ;;  %v6980_v59 = vmax.f32 %v6916_v23, 0.0  ;;  %v20584_v22 = vrot.slane %v16539_v51, 2  ;;  %v6254_v30 = vpop.f32.mrb[125].mxu1 }
 0xa94   : > { %vm16664_vm12 = vcmp.ge.s32.totalorder %v20580_v48, 1  ;;  %v9456_v46 = vrot.slane %v9444_v14, 2  ;;  %9185 = vadd.xlane.f32.xlu1 %v9184_v7  ;;  %v6917_v13 = vadd.f32 %v12911_v25, %v16444_v35  ;;  %v12913_v63 = vadd.f32 %v12912_v4, %v6692_v33  ;;  %v6702_v3 = vpop.f32.mrb[178].mxu0 }
 0xa95   : > { %v20582_v31 = vsel %vm16664_vm12, 4294967295, %v20581_v31  ;;  %v8373_v55 = vsel %vm8359_vm3, %v20584_v22, %v16657_v37  ;;  %v9458_v45 = vrot.slane %v9445_v12, 2  ;;  %v7136_v58 = vsel %vm20585_vm13, %v7131_v52, %v7135_v18  ;;  %v6704_v33 = vpop.f32.mrb[179].mxu0  ;;  %vm20613_vm13 = vmmov %vm20504_vm0 }
 0xa96   : > { %20583 = vst [vmem:[#allocation78_spill] sm:$0xff] %v20582_v31  ;;  %v8636_v11 = vmul.f32 %v16190_v5, %v8373_v55  ;;  %v7137_v40 = vrot.slane %v6980_v59, 7  ;;  %v9457_v61 = vsel %vm8359_vm3, %v9456_v46, %v16626_v15  ;;  %v12914_v51 = vadd.f32 %v6246_v42, %v16354_v53  ;;  %7311 = vst [vmem:[#allocation9 + $0xb0] sm:$0xff] %v7136_v58  ;;  %v6258_v53 = vpop.f32.mrb[126].mxu1  ;;  %v20588_v46 = vld [vmem:[#allocation24_spill] sm:$0xff] }
 0xa97   : > { %v6981_v49 = vmax.f32 %v6917_v13, 0.0  ;;  %v6918_v6 = vadd.f32 %v12913_v63, %v16448_v28  ;;  %v9459_v29 = vsel %vm8359_vm3, %v9458_v45, %v16657_v37  ;;  %v9557_v52 = vmul.f32 %v16493_v0, %v9457_v61  ;;  %v6260_v7 = vpop.f32.mrb[127].mxu1 }
 0xa98   : > { %v8701_v50 = vadd.f32 %v8636_v11, %v8635_v34  ;;  %v7138_v20 = vsel %vm20586_vm14, %v7133_v9, %v7137_v40  ;;  %v9558_v60 = vmul.f32 %v16498_v17, %v9459_v29  ;;  %v9117_v21 = vmul.f32 %v16484_v1, %v16537_v19  ;;  %v6708_v4 = vpop.f32.mrb[180].mxu0  ;;  %vm20618_vm14 = vmmov %vm20504_vm0 }
 0xa99   : > { %7312 = vst [vmem:[#allocation9 + $0xb8] sm:$0xff] %v7138_v20  ;;  %v7139_v42 = vrot.slane %v6981_v49, 7  ;;  %v6982_v14 = vmax.f32 %v6918_v6, 0.0  ;;  %v9118_v26 = vmul.f32 %v16490_v57, %v16545_v32  ;;  %v12916_v23 = vadd.f32 %v6248_v43, %v16356_v24  ;;  %v6710_v55 = vpop.f32.mrb[181].mxu0 }
 0xa9a   : > { %8702 = vadd.xlane.f32.xlu0 %v8701_v50  ;;  %v9621_v12 = vadd.f32 %v9558_v60, %v9557_v52  ;;  %v12915_v9 = vadd.f32 %v12914_v51, %v6696_v47  ;;  %v7868_v41 = vmul.f32 %v16144_v2, %v16537_v19  ;;  %v7869_v34 = vmul.f32 %v16147_v44, %v16545_v32  ;;  %v6264_v13 = vpop.f32.mrb[128].mxu1  ;;  %v20589_v51 = vld [vmem:[#allocation25_spill] sm:$0xff]  ;;  %v20590_v52 = vld [vmem:[#allocation26_spill] sm:$0xff] }
 0xa9b   : > { %v7140_v25 = vsel %vm20587_vm15, %v7135_v18, %v7139_v42  ;;  %v7141_v48 = vrot.slane %v6982_v14, 7  ;;  %v9187_v59 = vadd.f32 %v9118_v26, %v9117_v21  ;;  %v12917_v22 = vadd.f32 %v12916_v23, %v6698_v56  ;;  %v6266_v58 = vpop.f32.mrb[129].mxu1  ;;  %vm20620_vm15 = vmmov %vm20504_vm0 }
 0xa9c   : > { %7313 = vst [vmem:[#allocation9 + $0xc0] sm:$0xff] %v7140_v25  ;;  %9622 = vadd.xlane.f32.xlu1 %v9621_v12  ;;  %v6919_v24 = vadd.f32 %v12915_v9, %v16444_v35  ;;  %v7941_v43 = vadd.f32 %v7869_v34, %v7868_v41  ;;  %v12918_v47 = vadd.f32 %v6252_v8, %v20588_v46  ;;  %v8831_v11 = vsel %vm16471_vm4, %v16537_v19, 0.0  ;;  %v6714_v6 = vpop.f32.mrb[182].mxu0 }
 0xa9d   : > { %v7142_v63 = vsel %vm20504_vm0, %v7137_v40, %v7141_v48  ;;  %v6920_v18 = vadd.f32 %v12917_v22, %v16448_v28  ;;  %v8832_v56 = vsel %vm16471_vm4, %v16545_v32, 0.0  ;;  %v8908_v45 = vmul.f32 %v16478_v39, %v8831_v11  ;;  %v16714_v21 = vpop.f32.mrb[183].mxu0  ;;  %v20594_v11 = vld [vmem:[#allocation27_spill] sm:$0xff] }
 0xa9e   : > { %9188 = vadd.xlane.f32.xlu0 %v9187_v59  ;;  %7314 = vst [vmem:[#allocation9 + $0xc8] sm:$0xff] %v7142_v63  ;;  %v6983_v61 = vmax.f32 %v6919_v24, 0.0  ;;  %v8909_v8 = vmul.f32 %v16481_v62, %v8832_v56  ;;  %v12920_v50 = vadd.f32 %v6254_v30, %v20589_v51  ;;  %v12919_v49 = vadd.f32 %v12918_v47, %v6702_v3  ;;  %v16717_v23 = vpop.f32.mrb[130].mxu1  ;;  %v20592_v24 = vld [vmem:[#allocation73_spill] sm:$0xff] }
 0xa9f   : > { %v6984_v29 = vmax.f32 %v6920_v18, 0.0  ;;  %v7583_v40 = vsel %vm16664_vm12, %v16537_v19, 0.0  ;;  %v7584_v20 = vsel %vm16664_vm12, %v16545_v32, 0.0  ;;  %v12922_v60 = vadd.f32 %v6258_v53, %v20590_v52  ;;  %v16723_v25 = vpop.f32.mrb[131].mxu1  ;;  %v20597_v52 = vld [vmem:[#allocation21_spill] sm:$0xff] }
 0xaa0   : > { %v7143_v14 = vrot.slane %v6983_v61, 7  ;;  %7942 = vadd.xlane.f32.xlu1 %v7941_v43  ;;  %v8974_v26 = vadd.f32 %v8909_v8, %v8908_v45  ;;  %v6921_v30 = vadd.f32 %v12919_v49, %v16444_v35  ;;  %v12921_v3 = vadd.f32 %v12920_v50, %v6704_v33  ;;  %v16729_v43 = vpop.f32.mrb[184].mxu0 }
 0xaa1   : > { %v7145_v12 = vrot.slane %v6984_v29, 7  ;;  %v7659_v9 = vmul.f32 %v16108_v36, %v7583_v40  ;;  %v7660_v41 = vmul.f32 %v16111_v10, %v7584_v20  ;;  %v7870_v34 = vmul.f32 %v16144_v2, %v16558_v54  ;;  %v16733_v56 = vpop.f32.mrb[185].mxu0 }
 0xaa2   : > { %v7144_v53 = vsel %vm20591_vm5, %v7139_v42, %v7143_v14  ;;  %8975 = vadd.xlane.f32.xlu0 %v8974_v26  ;;  %v6985_v59 = vmax.f32 %v6921_v30, 0.0  ;;  %v6922_v22 = vadd.f32 %v12921_v3, %v16448_v28  ;;  %v7871_v33 = vmul.f32 %v16147_v44, %v20592_v24  ;;  %v16738_v51 = vpop.f32.mrb[132].mxu1  ;;  %v20598_v26 = vld [vmem:[#allocation28_spill] sm:$0xff]  ;;  %vm20622_vm5 = vmmov %vm20504_vm0 }
 0xaa3   : > { %7315 = vst [vmem:[#allocation9 + $0xd0] sm:$0xff] %v7144_v53  ;;  %v7146_v46 = vsel %vm20593_vm6, %v7141_v48, %v7145_v12  ;;  %v7727_v47 = vadd.f32 %v7660_v41, %v7659_v9  ;;  %v12924_v63 = vadd.f32 %v6260_v7, %v20594_v11  ;;  %v12923_v18 = vadd.f32 %v12922_v60, %v6708_v4  ;;  %v20595_v4 = vld [vmem:[#allocation20_spill] sm:$0xff]  ;;  %v16745_v29 = vpop.f32.mrb[133].mxu1  ;;  %vm20628_vm6 = vmmov %vm20504_vm0 }
 0xaa4   : > { %7316 = vst [vmem:[#allocation9 + $0xd8] sm:$0xff] %v7146_v46  ;;  %v7147_v42 = vrot.slane %v6985_v59, 7  ;;  %v6986_v45 = vmax.f32 %v6922_v22, 0.0  ;;  %v7944_v61 = vadd.f32 %v7871_v33, %v7870_v34  ;;  %v9753_v8 = vsel %vm16103_vm1, %v16537_v19, 0.0  ;;  %v16750_v3 = vpop.f32.mrb[186].mxu0  ;;  %v20600_v59 = vld [vmem:[#allocation29_spill] sm:$0xff] }
 0xaa5   : > { %7728 = vadd.xlane.f32.xlu1 %v7727_v47  ;;  %v6923_v50 = vadd.f32 %v12923_v18, %v16444_v35  ;;  %v12925_v48 = vadd.f32 %v12924_v63, %v6710_v55  ;;  %v9754_v7 = vsel %vm16103_vm1, %v16545_v32, 0.0  ;;  %v9830_v49 = vmul.f32 %v20595_v4, %v9753_v8  ;;  %v16755_v34 = vpop.f32.mrb[187].mxu0  ;;  %vm20599_vm1 = vmmov %vm20504_vm0  ;;  %v10022_v46 = vld [vmem:[#allocation9 + $0x40] sm:$0xfe]  ;;  %v20601_v47 = vld [vmem:[#allocation12_spill] sm:$0xff] }
 0xaa6   : > { %v7148_v40 = vsel %vm20596_vm7, %v7143_v14, %v7147_v42  ;;  %v7149_v20 = vrot.slane %v6986_v45, 7  ;;  %7945 = vadd.xlane.f32.xlu0 %v7944_v61  ;;  %v9831_v60 = vmul.f32 %v20597_v52, %v9754_v7  ;;  %v12926_v30 = vadd.f32 %v6264_v13, %v20598_v26  ;;  %v16759_v13 = vpop.f32.mrb[134].mxu1  ;;  %vm20629_vm7 = vmmov %vm20504_vm0 }
 0xaa7   : > { %7317 = vst [vmem:[#allocation9 + $0xe0] sm:$0xff] %v7148_v40  ;;  %v6987_v55 = vmax.f32 %v6923_v50, 0.0  ;;  %v6924_v9 = vadd.f32 %v12925_v48, %v16448_v28  ;;  %v8374_v16 = vrot.slane %v16537_v19, 2  ;;  %v8376_v41 = vrot.slane %v16545_v32, 2  ;;  %v16779_v61 = vpop.f32.mrb[135].mxu1 }
 0xaa8   : > { %v7150_v14 = vsel %vm20599_vm1, %v7145_v12, %v7149_v20  ;;  %v9894_v53 = vadd.f32 %v9831_v60, %v9830_v49  ;;  %v12928_v22 = vadd.f32 %v6266_v58, %v20600_v59  ;;  %v12927_v33 = vadd.f32 %v12926_v30, %v6714_v6  ;;  %v10023_v6 = vld [vmem:[#allocation9 + $0x48] sm:$0xfe]  ;;  %v16789_v49 = vpop.f32.mrb[188].mxu0  ;;  %v20609_v59 = vld [vmem:[#allocation23_spill] sm:$0xff]  ;;  %vm20633_vm1 = vmmov %vm20504_vm0 }
 0xaa9   : > { %v20602_v11 = vand.u32 15, %v20601_v47  ;;  %v20603_v63 = vmov 0  ;;  %7318 = vst [vmem:[#allocation9 + $0xe8] sm:$0xff] %v7150_v14  ;;  %v7151_v18 = vrot.slane %v6987_v55, 7  ;;  %v6988_v45 = vmax.f32 %v6924_v9, 0.0  ;;  %v16794_v30 = vpop.f32.mrb[189].mxu0 }
 0xaaa   : > { %v16771_v12 = vsel %vm8359_vm3, %v16626_v15, %v8374_v16  ;;  %v16777_v58 = vsel %vm8359_vm3, %v16657_v37, %v8376_v41  ;;  %9895 = vadd.xlane.f32.xlu1 %v9894_v53  ;;  %v6925_v15 = vadd.f32 %v12927_v33, %v16444_v35  ;;  %v12929_v7 = vadd.f32 %v12928_v22, %v16714_v21  ;;  %v20608_v14 = vld [vmem:[#allocation22_spill] sm:$0xff]  ;;  %v16799_v21 = vpop.f32.mrb[136].mxu1 }
 0xaab   : > { %vm16763_vm9 = vcmp.le.s32.totalorder %v20602_v11, 14  ;;  %v9482_v50 = vsel %vm16528_vm8, %v16771_v12, 0.0  ;;  %v9483_v48 = vsel %vm16528_vm8, %v16777_v58, 0.0  ;;  %v7152_v37 = vsel %vm20607_vm10, %v7147_v42, %v7151_v18  ;;  %v20611_v47 = vld [vmem:[#allocation30_spill] sm:$0xff]  ;;  %vm20634_vm10 = vmmov %vm20504_vm0 }
 0xaac   : > { %v20604_v63 = vsel %vm16763_vm9, 4294967295, %v20603_v63  ;;  %v7153_v40 = vrot.slane %v6988_v45, 7  ;;  %v9559_v60 = vmul.f32 %v16493_v0, %v9482_v50  ;;  %v9560_v26 = vmul.f32 %v16498_v17, %v9483_v48  ;;  %7319 = vst [vmem:[#allocation9 + $0xf0] sm:$0xff] %v7152_v37  ;;  %v16806_v50 = vpop.f32.mrb[137].mxu1 }
 0xaad   : > { %20605 = vst [vmem:[#allocation24_spill] sm:$0xff] %v20604_v63  ;;  %v6989_v55 = vmax.f32 %v6925_v15, 0.0  ;;  %v6926_v9 = vadd.f32 %v12929_v7, %v16448_v28  ;;  %v10039_v53 = vmul.f32 %v20608_v14, %v10022_v46  ;;  %v10040_v33 = vmul.f32 %v20609_v59, %v10023_v6  ;;  %v16810_v7 = vpop.f32.mrb[190].mxu0 }
 0xaae   : > { %v7154_v22 = vsel %vm20610_vm11, %v7149_v20, %v7153_v40  ;;  %v9624_v42 = vadd.f32 %v9560_v26, %v9559_v60  ;;  %v12930_v11 = vadd.f32 %v16717_v23, %v20611_v47  ;;  %v9832_v45 = vmul.f32 %v20595_v4, %v16558_v54  ;;  %v20612_v23 = vld [vmem:[#allocation31_spill] sm:$0xff]  ;;  %v16817_v47 = vpop.f32.mrb[191].mxu0 }
 0xaaf   : > { %7320 = vst [vmem:[#allocation9 + $0xf8] sm:$0xff] %v7154_v22  ;;  %v7155_v48 = vrot.slane %v6989_v55, 7  ;;  %v6990_v15 = vmax.f32 %v6926_v9, 0.0  ;;  %v10105_v46 = vsel %vm7926_vm2, %v10039_v53, 0.0  ;;  %v10106_v6 = vsel %vm7926_vm2, %v10040_v33, 0.0  ;;  %v16824_v22 = vpop.f32.mrb[138].mxu1  ;;  %vm20615_vm2 = vmmov %vm20504_vm0 }
 0xab0   : > { %9625 = vadd.xlane.f32.xlu0 %v9624_v42  ;;  %v10107_v20 = vadd.f32 %v10106_v6, %v10105_v46  ;;  %v9833_v37 = vmul.f32 %v20597_v52, %v20592_v24  ;;  %v12932_v60 = vadd.f32 %v16723_v25, %v20612_v23  ;;  %v12931_v26 = vadd.f32 %v12930_v11, %v16729_v43  ;;  %v20614_v11 = vld [vmem:[#allocation32_spill] sm:$0xff] }
 0xab1   : > { %v7156_v55 = vsel %vm20613_vm13, %v7151_v18, %v7155_v48  ;;  %v7157_v9 = vrot.slane %v6990_v15, 7  ;;  %v7661_v53 = vmul.f32 %v16108_v36, %v16558_v54  ;;  %v7662_v33 = vmul.f32 %v16111_v10, %v20592_v24  ;;  %v16830_v18 = vpop.f32.mrb[139].mxu1  ;;  %vm20643_vm13 = vmmov %vm20504_vm0 }
 0xab2   : > { %7321 = vst [vmem:[#allocation9 + $0x100] sm:$0xff] %v7156_v55  ;;  %10108 = vadd.xlane.f32.xlu1 %v10107_v20  ;;  %v9897_v42 = vadd.f32 %v9833_v37, %v9832_v45  ;;  %v6927_v25 = vadd.f32 %v12931_v26, %v16444_v35  ;;  %v12933_v43 = vadd.f32 %v12932_v60, %v16733_v56  ;;  %v16837_v20 = vpop.f32.mrb[192].mxu0  ;;  %v20616_v37 = vld [vmem:[#allocation33_spill] sm:$0xff] }
 0xab3   : > { %v12934_v46 = vadd.f32 %v16738_v51, %v20614_v11  ;;  %v7158_v15 = vsel %vm20615_vm2, %v7153_v40, %v7157_v9  ;;  %v7730_v6 = vadd.f32 %v7662_v33, %v7661_v53  ;;  %v10041_v23 = vmul.f32 %v20608_v14, %v16558_v54  ;;  %v16843_v40 = vpop.f32.mrb[193].mxu0  ;;  %vm20645_vm2 = vmmov %vm20504_vm0 }
 0xab4   : > { %v10042_v55 = vmul.f32 %v20609_v59, %v20592_v24  ;;  %7322 = vst [vmem:[#allocation9 + $0x108] sm:$0xff] %v7158_v15  ;;  %9898 = vadd.xlane.f32.xlu0 %v9897_v42  ;;  %v6991_v45 = vmax.f32 %v6927_v25, 0.0  ;;  %v6928_v56 = vadd.f32 %v12933_v43, %v16448_v28  ;;  %v12936_v51 = vadd.f32 %v16745_v29, %v20616_v37  ;;  %v20617_v42 = vld [vmem:[#allocation34_spill] sm:$0xff]  ;;  %v16853_v43 = vpop.f32.mrb[140].mxu1 }
 0xab5   : > { %v12935_v60 = vadd.f32 %v12934_v46, %v16750_v3  ;;  %v8560_v53 = vsel %vm16763_vm9, %v16771_v12, 0.0  ;;  %v8561_v33 = vsel %vm16763_vm9, %v16777_v58, 0.0  ;;  %v12938_v25 = vadd.f32 %v16759_v13, %v20617_v42  ;;  %v16857_v15 = vpop.f32.mrb[141].mxu1 }
 0xab6   : > { %v10110_v26 = vadd.f32 %v10042_v55, %v10041_v23  ;;  %v7159_v11 = vrot.slane %v6991_v45, 7  ;;  %v6992_v29 = vmax.f32 %v6928_v56, 0.0  ;;  %7731 = vadd.xlane.f32.xlu1 %v7730_v6  ;;  %v12937_v46 = vadd.f32 %v12936_v51, %v16755_v34  ;;  %v16867_v55 = vpop.f32.mrb[194].mxu0 }
 0xab7   : > { %v6929_v3 = vadd.f32 %v12935_v60, %v16444_v35  ;;  %v8637_v12 = vmul.f32 %v16187_v27, %v8560_v53  ;;  %v8638_v23 = vmul.f32 %v16190_v5, %v8561_v33  ;;  %v16862_v58 = vrot.slane %v16558_v54, 2  ;;  %v16871_v37 = vpop.f32.mrb[195].mxu0  ;;  %v16887_v33 = vpop.f32.mrb[142].mxu1 }
 0xab8   : > { %v16865_v13 = vrot.slane %v20592_v24, 2  ;;  %v7160_v6 = vsel %vm20618_vm14, %v7155_v48, %v7159_v11  ;;  %v7161_v45 = vrot.slane %v6992_v29, 7  ;;  %10111 = vadd.xlane.f32.xlu0 %v10110_v26  ;;  %v6930_v34 = vadd.f32 %v12937_v46, %v16448_v28  ;;  %v20619_v26 = vld [vmem:[#allocation35_spill] sm:$0xff]  ;;  %v16892_v46 = vpop.f32.mrb[143].mxu1  ;;  %vm20647_vm14 = vmmov %vm20504_vm0 }
 0xab9   : > { %v6993_v56 = vmax.f32 %v6929_v3, 0.0  ;;  %7323 = vst [vmem:[#allocation9 + $0x110] sm:$0xff] %v7160_v6  ;;  %v8704_v51 = vadd.f32 %v8638_v23, %v8637_v12  ;;  %v16877_v60 = vsel %vm8359_vm3, %v8374_v16, %v16862_v58  ;;  %v12940_v53 = vadd.f32 %v16779_v61, %v20619_v26  ;;  %v10370_v16 = vld [vmem:[#allocation9 + $0x40] sm:$0xfc]  ;;  %v10371_v12 = vld [vmem:[#allocation9 + $0x48] sm:$0xfc] }
 0xaba   : > { %v16883_v48 = vsel %vm8359_vm3, %v8376_v41, %v16865_v13  ;;  %v7162_v42 = vsel %vm20620_vm15, %v7157_v9, %v7161_v45  ;;  %v6994_v3 = vmax.f32 %v6930_v34, 0.0  ;;  %v8639_v19 = vmul.f32 %v16187_v27, %v16877_v60  ;;  %v16900_v23 = vpop.f32.mrb[196].mxu0  ;;  %v16911_v8 = vpop.f32.mrb[144].mxu1  ;;  %v20623_v27 = vld [vmem:[#allocation37_spill] sm:$0xff]  ;;  %vm20649_vm15 = vmmov %vm20504_vm0 }
 0xabb   : > { %v7163_v29 = vrot.slane %v6993_v56, 7  ;;  %7324 = vst [vmem:[#allocation9 + $0x118] sm:$0xff] %v7162_v42  ;;  %8705 = vadd.xlane.f32.xlu1 %v8704_v51  ;;  %v8640_v32 = vmul.f32 %v16190_v5, %v16883_v48  ;;  %v12939_v41 = vadd.f32 %v12938_v25, %v16789_v49  ;;  %v12941_v61 = vadd.f32 %v12940_v53, %v16794_v30  ;;  %v20621_v51 = vld [vmem:[#allocation36_spill] sm:$0xff]  ;;  %v16907_v42 = vpop.f32.mrb[197].mxu0  ;;  %v16916_v52 = vpop.f32.mrb[145].mxu1 }
 0xabc   : > { %v8910_v9 = vmul.f32 %v16478_v39, %v16558_v54  ;;  %v7165_v56 = vrot.slane %v6994_v3, 7  ;;  %v8911_v34 = vmul.f32 %v16481_v62, %v20592_v24  ;;  %v12942_v26 = vadd.f32 %v16799_v21, %v20621_v51  ;;  %v20625_v51 = vld [vmem:[#allocation71_spill] sm:$0xff] }
 0xabd   : > { %v7164_v6 = vsel %vm20504_vm0, %v7159_v11, %v7163_v29  ;;  %v8707_v49 = vadd.f32 %v8640_v32, %v8639_v19  ;;  %v6931_v30 = vadd.f32 %v12939_v41, %v16444_v35  ;;  %v6932_v25 = vadd.f32 %v12941_v61, %v16448_v28  ;;  %v16921_v41 = vpop.f32.mrb[198].mxu0  ;;  %v20624_v61 = vld [vmem:[#allocation70_spill] sm:$0xff] }
 0xabe   : > { %7325 = vst [vmem:[#allocation9 + $0x120] sm:$0xff] %v7164_v6  ;;  %v10382_v53 = vrot.slane %v10370_v16, 2  ;;  %v7166_v11 = vsel %vm20622_vm5, %v7161_v45, %v7165_v56  ;;  %v8977_v3 = vadd.f32 %v8911_v34, %v8910_v9  ;;  %v10384_v5 = vrot.slane %v10371_v12, 2  ;;  %v16929_v12 = vpop.f32.mrb[199].mxu0  ;;  %vm20650_vm5 = vmmov %vm20504_vm0 }
 0xabf   : > { %v12944_v38 = vadd.f32 %v16806_v50, %v20623_v27  ;;  %7326 = vst [vmem:[#allocation9 + $0x128] sm:$0xff] %v7166_v11  ;;  %8708 = vadd.xlane.f32.xlu0 %v8707_v49  ;;  %v6995_v21 = vmax.f32 %v6931_v30, 0.0  ;;  %v6996_v19 = vmax.f32 %v6932_v25, 0.0  ;;  %v12943_v16 = vadd.f32 %v12942_v26, %v16810_v7  ;;  %v16933_v26 = vpop.f32.mrb[146].mxu1  ;;  %v20626_v25 = vld [vmem:[#allocation38_spill] sm:$0xff] }
 0xac0   : > { %v10383_v32 = vsel %vm8359_vm3, %v10382_v53, %v16862_v58  ;;  %8978 = vadd.xlane.f32.xlu1 %v8977_v3  ;;  %v10385_v45 = vsel %vm8359_vm3, %v10384_v5, %v16865_v13  ;;  %v9119_v50 = vmul.f32 %v16484_v1, %v16558_v54  ;;  %v9120_v5 = vmul.f32 %v16490_v57, %v20592_v24  ;;  %v16942_v53 = vpop.f32.mrb[147].mxu1 }
 0xac1   : > { %v10483_v9 = vmul.f32 %v20624_v61, %v10383_v32  ;;  %v12945_v27 = vadd.f32 %v12944_v38, %v16817_v47  ;;  %v7167_v6 = vrot.slane %v6995_v21, 7  ;;  %v7169_v34 = vrot.slane %v6996_v19, 7  ;;  %v20627_v47 = vld [vmem:[#allocation74_spill] sm:$0xff]  ;;  %v16946_v32 = vpop.f32.mrb[200].mxu0 }
 0xac2   : > { %v10484_v49 = vmul.f32 %v20625_v51, %v10385_v45  ;;  %v6933_v7 = vadd.f32 %v12943_v16, %v16444_v35  ;;  %v12946_v38 = vadd.f32 %v16824_v22, %v20626_v25  ;;  %v9121_v54 = vmul.f32 %v16484_v1, %v20627_v47  ;;  %v20630_v45 = vld [vmem:[#allocation75_spill] sm:$0xff]  ;;  %v16952_v1 = vpop.f32.mrb[201].mxu0 }
 0xac3   : > { %v6934_v30 = vadd.f32 %v12945_v27, %v16448_v28  ;;  %v7168_v11 = vsel %vm20628_vm6, %v7163_v29, %v7167_v6  ;;  %v7170_v3 = vsel %vm20629_vm7, %v7165_v56, %v7169_v34  ;;  %v9190_v24 = vadd.f32 %v9120_v5, %v9119_v50  ;;  %v20631_v27 = vld [vmem:[#allocation39_spill] sm:$0xff]  ;;  %vm20659_vm7 = vmmov %vm20504_vm0 }
 0xac4   : > { %v10547_v21 = vadd.f32 %v10484_v49, %v10483_v9  ;;  %v6997_v19 = vmax.f32 %v6933_v7, 0.0  ;;  %7327 = vst [vmem:[#allocation9 + $0x130] sm:$0xff] %v7168_v11  ;;  %7328 = vst [vmem:[#allocation9 + $0x138] sm:$0xff] %v7170_v3  ;;  %v9122_v22 = vmul.f32 %v16490_v57, %v20630_v45  ;;  %v12948_v25 = vadd.f32 %v16830_v18, %v20631_v27  ;;  %v16959_v7 = vpop.f32.mrb[148].mxu1  ;;  %v20632_v18 = vld [vmem:[#allocation40_spill] sm:$0xff] }
 0xac5   : > { %v6998_v16 = vmax.f32 %v6934_v30, 0.0  ;;  %v12947_v56 = vadd.f32 %v12946_v38, %v16837_v20  ;;  %v9561_v9 = vmul.f32 %v16493_v0, %v16877_v60  ;;  %v9562_v49 = vmul.f32 %v16498_v17, %v16883_v48  ;;  %9191 = vadd.xlane.f32.xlu1 %v9190_v24  ;;  %v16964_v3 = vpop.f32.mrb[149].mxu1 }
 0xac6   : > { %10548 = vadd.xlane.f32.xlu0 %v10547_v21  ;;  %v7171_v29 = vrot.slane %v6997_v19, 7  ;;  %v9193_v30 = vadd.f32 %v9122_v22, %v9121_v54  ;;  %v12949_v5 = vadd.f32 %v12948_v25, %v16843_v40  ;;  %v12950_v11 = vadd.f32 %v16853_v43, %v20632_v18  ;;  %v16971_v21 = vpop.f32.mrb[202].mxu0  ;;  %v20635_v22 = vld [vmem:[#allocation41_spill] sm:$0xff]  ;;  %v16985_v25 = vpop.f32.mrb[150].mxu1 }
 0xac7   : > { %v7173_v50 = vrot.slane %v6998_v16, 7  ;;  %v6935_v38 = vadd.f32 %v12947_v56, %v16444_v35  ;;  %v9627_v60 = vadd.f32 %v9562_v49, %v9561_v9  ;;  %v8835_v48 = vsel %vm16664_vm12, %v20627_v47, 0.0  ;;  %v16979_v19 = vpop.f32.mrb[203].mxu0  ;;  %v20636_v56 = vld [vmem:[#allocation14_spill] sm:$0xff] }
 0xac8   : > { %v7172_v20 = vsel %vm20633_vm1, %v7167_v6, %v7171_v29  ;;  %v6936_v40 = vadd.f32 %v12949_v5, %v16448_v28  ;;  %v8836_v43 = vsel %vm16664_vm12, %v20630_v45, 0.0  ;;  %v8912_v6 = vmul.f32 %v16478_v39, %v8835_v48  ;;  %vm20664_vm1 = vmmov %vm20504_vm0 }
 0xac9   : > { %7329 = vst [vmem:[#allocation9 + $0x140] sm:$0xff] %v7172_v20  ;;  %v7174_v54 = vsel %vm20634_vm10, %v7169_v34, %v7173_v50  ;;  %v6999_v16 = vmax.f32 %v6935_v38, 0.0  ;;  %v8913_v24 = vmul.f32 %v16481_v62, %v8836_v43  ;;  %v12952_v27 = vadd.f32 %v16857_v15, %v20635_v22  ;;  %9628 = vadd.xlane.f32.xlu1 %v9627_v60  ;;  %v20640_v20 = vld [vmem:[#allocation42_spill] sm:$0xff]  ;;  %v17003_v43 = vpop.f32.mrb[204].mxu0  ;;  %v20641_v22 = vld [vmem:[#allocation76_spill] sm:$0xff]  ;;  %vm20666_vm10 = vmmov %vm20504_vm0 }
 0xaca   : > { %7330 = vst [vmem:[#allocation9 + $0x148] sm:$0xff] %v7174_v54  ;;  %9194 = vadd.xlane.f32.xlu0 %v9193_v30  ;;  %v12951_v34 = vadd.f32 %v12950_v11, %v16867_v55  ;;  %v20637_v9 = vand.u32 15, %v20636_v56  ;;  %v7000_v5 = vmax.f32 %v6936_v40, 0.0  ;;  %v7872_v30 = vmul.f32 %v16144_v2, %v20627_v47  ;;  %v16999_v55 = vpop.f32.mrb[151].mxu1  ;;  %v17009_v57 = vpop.f32.mrb[205].mxu0 }
 0xacb   : > { %v7873_v18 = vmul.f32 %v16147_v44, %v20630_v45  ;;  %v12954_v15 = vadd.f32 %v16887_v33, %v20640_v20  ;;  %v7175_v11 = vrot.slane %v6999_v16, 7  ;;  %v8980_v38 = vadd.f32 %v8913_v24, %v8912_v6  ;;  %v20644_v24 = vld [vmem:[#allocation43_spill] sm:$0xff] }
 0xacc   : > { %vm16989_vm11 = vcmp.ge.s32.totalorder %v20637_v9, 1  ;;  %v6937_v48 = vadd.f32 %v12951_v34, %v16444_v35  ;;  %v12953_v54 = vadd.f32 %v12952_v27, %v16871_v37  ;;  %v7177_v60 = vrot.slane %v7000_v5, 7  ;;  %v20642_v9 = vld [vmem:[#allocation77_spill] sm:$0xff]  ;;  %v17015_v27 = vpop.f32.mrb[152].mxu1 }
 0xacd   : > { %v7947_v40 = vadd.f32 %v7873_v18, %v7872_v30  ;;  %v7874_v56 = vmul.f32 %v16144_v2, %v20641_v22  ;;  %v7875_v31 = vmul.f32 %v16147_v44, %v20642_v9  ;;  %v7176_v33 = vsel %vm20643_vm13, %v7171_v29, %v7175_v11  ;;  %v17021_v29 = vpop.f32.mrb[153].mxu1  ;;  %v13252_v44 = vld [vmem:[#allocation9 + $0x68] sm:$0xff]  ;;  %vm20671_vm13 = vmmov %vm20504_vm0 }
 0xace   : > { %8981 = vadd.xlane.f32.xlu0 %v8980_v38  ;;  %v7001_v6 = vmax.f32 %v6937_v48, 0.0  ;;  %v6938_v16 = vadd.f32 %v12953_v54, %v16448_v28  ;;  %v12956_v37 = vadd.f32 %v16892_v46, %v20644_v24  ;;  %7331 = vst [vmem:[#allocation9 + $0x150] sm:$0xff] %v7176_v33  ;;  %v7178_v34 = vsel %vm20645_vm2, %v7173_v50, %v7177_v60  ;;  %v17026_v54 = vpop.f32.mrb[206].mxu0  ;;  %v17037_v24 = vpop.f32.mrb[154].mxu1  ;;  %vm20673_vm2 = vmmov %vm20504_vm0 }
 0xacf   : > { %7948 = vadd.xlane.f32.xlu1 %v7947_v40  ;;  %v7950_v5 = vadd.f32 %v7875_v31, %v7874_v56  ;;  %v12955_v30 = vadd.f32 %v12954_v15, %v16900_v23  ;;  %v10043_v18 = vmul.f32 %v20608_v14, %v20627_v47  ;;  %7332 = vst [vmem:[#allocation9 + $0x158] sm:$0xff] %v7178_v34  ;;  %v20646_v31 = vld [vmem:[#allocation44_spill] sm:$0xff]  ;;  %v20311_v15 = vrot.slane %v20627_v47, 2  ;;  %v17033_v56 = vpop.f32.mrb[207].mxu0  ;;  %v20648_v34 = vld [vmem:[#allocation45_spill] sm:$0xff] }
 0xad0   : > { %v7179_v20 = vrot.slane %v7001_v6, 7  ;;  %v7002_v38 = vmax.f32 %v6938_v16, 0.0  ;;  %v12957_v48 = vadd.f32 %v12956_v37, %v16907_v42  ;;  %v10044_v46 = vmul.f32 %v20609_v59, %v20630_v45 }
 0xad1   : > { %v6939_v50 = vadd.f32 %v12955_v30, %v16444_v35  ;;  %v12958_v23 = vadd.f32 %v16911_v8, %v20646_v31  ;;  %v20310_v40 = vrot.slane %v20630_v45, 2  ;;  %v17043_v8 = vsel %vm8359_vm3, %v16862_v58, %v20311_v15  ;;  %v17053_v30 = vpop.f32.mrb[155].mxu1 }
 0xad2   : > { %v7180_v33 = vsel %vm20647_vm14, %v7175_v11, %v7179_v20  ;;  %v7181_v6 = vrot.slane %v7002_v38, 7  ;;  %7951 = vadd.xlane.f32.xlu0 %v7950_v5  ;;  %v6940_v42 = vadd.f32 %v12957_v48, %v16448_v28  ;;  %v10113_v16 = vadd.f32 %v10044_v46, %v10043_v18  ;;  %v17062_v46 = vpop.f32.mrb[208].mxu0  ;;  %vm20676_vm14 = vmmov %vm20504_vm0 }
 0xad3   : > { %7333 = vst [vmem:[#allocation9 + $0x160] sm:$0xff] %v7180_v33  ;;  %v7003_v37 = vmax.f32 %v6939_v50, 0.0  ;;  %v17049_v11 = vsel %vm8359_vm3, %v16865_v13, %v20310_v40  ;;  %v12960_v5 = vadd.f32 %v16916_v52, %v20648_v34  ;;  %v9486_v58 = vsel %vm16763_vm9, %v17043_v8, 0.0  ;;  %v17067_v31 = vpop.f32.mrb[209].mxu0  ;;  %v20651_v40 = vld [vmem:[#allocation46_spill] sm:$0xff] }
 0xad4   : > { %v7182_v18 = vsel %vm20649_vm15, %v7177_v60, %v7181_v6  ;;  %v7004_v38 = vmax.f32 %v6940_v42, 0.0  ;;  %10114 = vadd.xlane.f32.xlu1 %v10113_v16  ;;  %v9487_v48 = vsel %vm16763_vm9, %v17049_v11, 0.0  ;;  %v9563_v52 = vmul.f32 %v16493_v0, %v9486_v58  ;;  %v17088_v63 = vpop.f32.mrb[210].mxu0  ;;  %vm20677_vm15 = vmmov %vm20504_vm0 }
 0xad5   : > { %7334 = vst [vmem:[#allocation9 + $0x168] sm:$0xff] %v7182_v18  ;;  %v7183_v13 = vrot.slane %v7003_v37, 7  ;;  %v9564_v50 = vmul.f32 %v16498_v17, %v9487_v48  ;;  %v12959_v60 = vadd.f32 %v12958_v23, %v16921_v41  ;;  %v12961_v42 = vadd.f32 %v12960_v5, %v16929_v12  ;;  %v17076_v37 = vpop.f32.mrb[156].mxu1 }
 0xad6   : > { %v7185_v33 = vrot.slane %v7004_v38, 7  ;;  %v7587_v16 = vsel %vm16989_vm11, %v20627_v47, 0.0  ;;  %v7588_v34 = vsel %vm16989_vm11, %v20630_v45, 0.0  ;;  %v17081_v38 = vpop.f32.mrb[157].mxu1  ;;  %v12962_v15 = vadd.f32 %v16933_v26, %v20651_v40 }
 0xad7   : > { %v7184_v18 = vsel %vm20504_vm0, %v7179_v20, %v7183_v13  ;;  %v9630_v58 = vadd.f32 %v9564_v50, %v9563_v52  ;;  %v6941_v41 = vadd.f32 %v12959_v60, %v16444_v35  ;;  %v7663_v23 = vmul.f32 %v16108_v36, %v7587_v16  ;;  %v20652_v50 = vld [vmem:[#allocation21_spill] sm:$0xff]  ;;  %v20653_v16 = vld [vmem:[#allocation47_spill] sm:$0xff] }
 0xad8   : > { %7335 = vst [vmem:[#allocation9 + $0x170] sm:$0xff] %v7184_v18  ;;  %v7186_v12 = vsel %vm20650_vm5, %v7181_v6, %v7185_v33  ;;  %v6942_v5 = vadd.f32 %v12961_v42, %v16448_v28  ;;  %v7664_v48 = vmul.f32 %v16111_v10, %v7588_v34  ;;  %v9836_v52 = vmul.f32 %v20595_v4, %v20641_v22  ;;  %v17096_v42 = vpop.f32.mrb[211].mxu0  ;;  %v20654_v34 = vld [vmem:[#allocation13_spill] sm:$0xff]  ;;  %vm20683_vm5 = vmmov %vm20504_vm0 }
 0xad9   : > { %7336 = vst [vmem:[#allocation9 + $0x178] sm:$0xff] %v7186_v12  ;;  %9631 = vadd.xlane.f32.xlu0 %v9630_v58  ;;  %v7005_v20 = vmax.f32 %v6941_v41, 0.0  ;;  %v9837_v60 = vmul.f32 %v20652_v50, %v20642_v9  ;;  %v12964_v6 = vadd.f32 %v16942_v53, %v20653_v16  ;;  %v20655_v18 = vand.u32 15, %v20654_v34  ;;  %v13251_v12 = vld [vmem:[#allocation9 + $0x60] sm:$0xff]  ;;  %v17107_v9 = vpop.f32.mrb[158].mxu1 }
 0xada   : > { %v7006_v40 = vmax.f32 %v6942_v5, 0.0  ;;  %v7733_v58 = vadd.f32 %v7664_v48, %v7663_v23  ;;  %v12963_v41 = vadd.f32 %v12962_v15, %v16946_v32  ;;  %v9757_v17 = vsel %vm16471_vm4, %v13251_v12, 0.0  ;;  %v17117_v48 = vpop.f32.mrb[212].mxu0  ;;  %v17130_v12 = vld [vmem:[#allocation9 + $0x78] sm:$0xff] }
 0xadb   : > { %vm17100_vm6 = vcmp.le.s32.totalorder %v20655_v18, 14  ;;  %v7187_v0 = vrot.slane %v7005_v20, 7  ;;  %v9903_v53 = vadd.f32 %v9837_v60, %v9836_v52  ;;  %v12965_v16 = vadd.f32 %v12964_v6, %v16952_v1  ;;  %v17112_v18 = vpop.f32.mrb[159].mxu1  ;;  %v20660_v52 = vld [vmem:[#allocation48_spill] sm:$0xff]  ;;  %v17123_v60 = vld [vmem:[#allocation9 + $0x70] sm:$0xff] }
 0xadc   : > { %v9758_v34 = vsel %vm16471_vm4, %v13252_v44, 0.0  ;;  %v7189_v5 = vrot.slane %v7006_v40, 7  ;;  %7734 = vadd.xlane.f32.xlu1 %v7733_v58  ;;  %v6943_v32 = vadd.f32 %v12963_v41, %v16444_v35  ;;  %v9834_v15 = vmul.f32 %v20595_v4, %v9757_v17  ;;  %v17127_v40 = vpop.f32.mrb[213].mxu0  ;;  %vm20661_vm4 = vmmov %vm20504_vm0  ;;  %v17134_v22 = vpop.f32.mrb[160].mxu1 }
 0xadd   : > { %v9835_v23 = vmul.f32 %v20652_v50, %v9758_v34  ;;  %v7188_v20 = vsel %vm20659_vm7, %v7183_v13, %v7187_v0  ;;  %9904 = vadd.xlane.f32.xlu0 %v9903_v53  ;;  %v6944_v1 = vadd.f32 %v12965_v16, %v16448_v28  ;;  %v12966_v44 = vadd.f32 %v16959_v7, %v20660_v52  ;;  %v20662_v53 = vld [vmem:[#allocation49_spill] sm:$0xff]  ;;  %v20663_v52 = vld [vmem:[#allocation50_spill] sm:$0xff]  ;;  %vm20685_vm7 = vmmov %vm20504_vm0 }
 0xade   : > { %v10045_v6 = vmul.f32 %v17123_v60, %v20608_v14  ;;  %7337 = vst [vmem:[#allocation9 + $0x180] sm:$0xff] %v7188_v20  ;;  %v7190_v17 = vsel %vm20661_vm4, %v7185_v33, %v7189_v5  ;;  %v7007_v58 = vmax.f32 %v6943_v32, 0.0  ;;  %v10046_v13 = vmul.f32 %v17130_v12, %v20609_v59  ;;  %v17141_v33 = vpop.f32.mrb[161].mxu1  ;;  %vm20693_vm4 = vmmov %vm20504_vm0 }
 0xadf   : > { %v9900_v41 = vadd.f32 %v9835_v23, %v9834_v15  ;;  %7338 = vst [vmem:[#allocation9 + $0x188] sm:$0xff] %v7190_v17  ;;  %v7008_v7 = vmax.f32 %v6944_v1, 0.0  ;;  %v12968_v16 = vadd.f32 %v16964_v3, %v20662_v53  ;;  %v12967_v34 = vadd.f32 %v12966_v44, %v16971_v21  ;;  %v17147_v1 = vpop.f32.mrb[214].mxu0 }
 0xae0   : > { %v7665_v20 = vmul.f32 %v17123_v60, %v16108_v36  ;;  %v7191_v32 = vrot.slane %v7007_v58, 7  ;;  %v10116_v15 = vadd.f32 %v10046_v13, %v10045_v6  ;;  %v7666_v23 = vmul.f32 %v17130_v12, %v16111_v10  ;;  %v17152_v53 = vpop.f32.mrb[215].mxu0  ;;  %v20665_v13 = vld [vmem:[#allocation51_spill] sm:$0xff] }
 0xae1   : > { %9901 = vadd.xlane.f32.xlu1 %v9900_v41  ;;  %v12970_v17 = vadd.f32 %v16985_v25, %v20663_v52  ;;  %v7193_v59 = vrot.slane %v7008_v7, 7  ;;  %v6945_v3 = vadd.f32 %v12967_v34, %v16444_v35  ;;  %v12969_v21 = vadd.f32 %v12968_v16, %v16979_v19 }
 0xae2   : > { %v20322_v44 = vrot.slane %v17123_v60, 2  ;;  %v7192_v58 = vsel %vm20664_vm1, %v7187_v0, %v7191_v32  ;;  %10117 = vadd.xlane.f32.xlu0 %v10116_v15  ;;  %v7736_v6 = vadd.f32 %v7666_v23, %v7665_v20  ;;  %v20321_v41 = vrot.slane %v17130_v12, 2  ;;  %vm20695_vm1 = vmmov %vm20504_vm0 }
 0xae3   : > { %v12972_v25 = vadd.f32 %v16999_v55, %v20665_v13  ;;  %7339 = vst [vmem:[#allocation9 + $0x190] sm:$0xff] %v7192_v58  ;;  %v7194_v7 = vsel %vm20666_vm10, %v7189_v5, %v7193_v59  ;;  %v7009_v52 = vmax.f32 %v6945_v3, 0.0  ;;  %v6946_v34 = vadd.f32 %v12969_v21, %v16448_v28  ;;  %v20669_v5 = vld [vmem:[#allocation18_spill] sm:$0xff]  ;;  %v20670_v21 = vld [vmem:[#allocation19_spill] sm:$0xff]  ;;  %vm20698_vm10 = vmmov %vm20504_vm0 }
 0xae4   : > { %v20667_v19 = vrot.slane %v20627_v47, 2  ;;  %7340 = vst [vmem:[#allocation9 + $0x198] sm:$0xff] %v7194_v7  ;;  %v20668_v0 = vrot.slane %v20630_v45, 2  ;;  %v12971_v15 = vadd.f32 %v12970_v17, %v17003_v43  ;;  %v8565_v7 = vsel %vm17100_vm6, %v17049_v11, 0.0 }
 0xae5   : > { %7737 = vadd.xlane.f32.xlu1 %v7736_v6  ;;  %v12973_v23 = vadd.f32 %v12972_v25, %v17009_v57  ;;  %v7195_v47 = vrot.slane %v7009_v52, 7  ;;  %v7010_v3 = vmax.f32 %v6946_v34, 0.0  ;;  %v8564_v6 = vsel %vm17100_vm6, %v17043_v8, 0.0 }
 0xae6   : > { %v17165_v16 = vsel %vm8359_vm3, %v20667_v19, %v20322_v44  ;;  %v17172_v55 = vsel %vm8359_vm3, %v20668_v0, %v20321_v41  ;;  %v6947_v45 = vadd.f32 %v12971_v15, %v16444_v35  ;;  %v8641_v43 = vmul.f32 %v20669_v5, %v8564_v6  ;;  %v20672_v0 = vld [vmem:[#allocation52_spill] sm:$0xff] }
 0xae7   : > { %v8643_v20 = vmul.f32 %v20669_v5, %v17165_v16  ;;  %v8644_v58 = vmul.f32 %v20670_v21, %v17172_v55  ;;  %v6948_v13 = vadd.f32 %v12973_v23, %v16448_v28  ;;  %v7196_v57 = vsel %vm20671_vm13, %v7191_v32, %v7195_v47  ;;  %vm20699_vm13 = vmmov %vm20504_vm0 }
 0xae8   : > { %v7197_v17 = vrot.slane %v7010_v3, 7  ;;  %v8642_v52 = vmul.f32 %v20670_v21, %v8565_v7  ;;  %7341 = vst [vmem:[#allocation9 + $0x1a0] sm:$0xff] %v7196_v57  ;;  %v7011_v34 = vmax.f32 %v6947_v45, 0.0  ;;  %v12974_v15 = vadd.f32 %v17015_v27, %v20672_v0  ;;  %v20674_v3 = vld [vmem:[#allocation53_spill] sm:$0xff]  ;;  %v20678_v0 = vld [vmem:[#allocation66_spill] sm:$0xff] }
 0xae9   : > { %v8713_v25 = vadd.f32 %v8644_v58, %v8643_v20  ;;  %v7012_v19 = vmax.f32 %v6948_v13, 0.0  ;;  %v10487_v23 = vmul.f32 %v20624_v61, %v17165_v16  ;;  %v10488_v32 = vmul.f32 %v20625_v51, %v17172_v55  ;;  %v17200_v58 = vld [vmem:[#allocation9 + $0x80] sm:$0xff]  ;;  %v17205_v7 = vld [vmem:[#allocation9 + $0x88] sm:$0xff] }
 0xaea   : > { %v7198_v41 = vsel %vm20673_vm2, %v7193_v59, %v7197_v17  ;;  %v8710_v44 = vadd.f32 %v8642_v52, %v8641_v43  ;;  %v12976_v20 = vadd.f32 %v17021_v29, %v20674_v3  ;;  %v7199_v6 = vrot.slane %v7011_v34, 7  ;;  %v17207_v59 = vpop.f32.mrb[162].mxu1  ;;  %vm20704_vm2 = vmmov %vm20504_vm0 }
 0xaeb   : > { %8714 = vadd.xlane.f32.xlu0 %v8713_v25  ;;  %7342 = vst [vmem:[#allocation9 + $0x1a8] sm:$0xff] %v7198_v41  ;;  %v7201_v45 = vrot.slane %v7012_v19, 7  ;;  %v12975_v27 = vadd.f32 %v12974_v15, %v17026_v54  ;;  %v8914_v13 = vmul.f32 %v17123_v60, %v16478_v39  ;;  %v10553_v43 = vadd.f32 %v10488_v32, %v10487_v23  ;;  %v20675_v25 = vld [vmem:[#allocation54_spill] sm:$0xff]  ;;  %v17214_v52 = vpop.f32.mrb[163].mxu1  ;;  %v20679_v23 = vld [vmem:[#allocation67_spill] sm:$0xff] }
 0xaec   : > { %8711 = vadd.xlane.f32.xlu1 %v8710_v44  ;;  %v12977_v57 = vadd.f32 %v12976_v20, %v17033_v56  ;;  %v8915_v29 = vmul.f32 %v17130_v12, %v16481_v62  ;;  %v12978_v41 = vadd.f32 %v17037_v24, %v20675_v25  ;;  %v7200_v54 = vsel %vm20676_vm14, %v7195_v47, %v7199_v6  ;;  %v20680_v32 = vld [vmem:[#allocation55_spill] sm:$0xff]  ;;  %vm20705_vm14 = vmmov %vm20504_vm0 }
 0xaed   : > { %v7202_v34 = vsel %vm20677_vm15, %v7197_v17, %v7201_v45  ;;  %v6949_v19 = vadd.f32 %v12975_v27, %v16444_v35  ;;  %v9125_v44 = vmul.f32 %v20678_v0, %v17200_v58  ;;  %7343 = vst [vmem:[#allocation9 + $0x1b0] sm:$0xff] %v7200_v54  ;;  %v9126_v24 = vmul.f32 %v20679_v23, %v17205_v7 }
 0xaee   : > { %7344 = vst [vmem:[#allocation9 + $0x1b8] sm:$0xff] %v7202_v34  ;;  %v6950_v56 = vadd.f32 %v12977_v57, %v16448_v28  ;;  %v8983_v15 = vadd.f32 %v8915_v29, %v8914_v13  ;;  %v12980_v3 = vadd.f32 %v17053_v30, %v20680_v32  ;;  %v12979_v17 = vadd.f32 %v12978_v41, %v17062_v46  ;;  %v20681_v57 = vld [vmem:[#allocation56_spill] sm:$0xff] }
 0xaef   : > { %10554 = vadd.xlane.f32.xlu0 %v10553_v43  ;;  %v7013_v47 = vmax.f32 %v6949_v19, 0.0  ;;  %v9123_v20 = vmul.f32 %v17123_v60, %v20678_v0  ;;  %v9124_v27 = vmul.f32 %v17130_v12, %v20679_v23  ;;  %v9199_v43 = vadd.f32 %v9126_v24, %v9125_v44  ;;  %v20682_v24 = vld [vmem:[#allocation57_spill] sm:$0xff] }
 0xaf0   : > { %v7014_v25 = vmax.f32 %v6950_v56, 0.0  ;;  %8984 = vadd.xlane.f32.xlu1 %v8983_v15  ;;  %v12981_v13 = vadd.f32 %v12980_v3, %v17067_v31  ;;  %v12982_v29 = vadd.f32 %v17076_v37, %v20681_v57  ;;  %v6951_v30 = vadd.f32 %v12979_v17, %v16444_v35 }
 0xaf1   : > { %v7203_v54 = vrot.slane %v7013_v47, 7  ;;  %v9196_v34 = vadd.f32 %v9124_v27, %v9123_v20  ;;  %v8839_v46 = vsel %vm16989_vm11, %v17200_v58, 0.0  ;;  %v8840_v44 = vsel %vm16989_vm11, %v17205_v7, 0.0 }
 0xaf2   : > { %v7205_v41 = vrot.slane %v7014_v25, 7  ;;  %v6952_v19 = vadd.f32 %v12981_v13, %v16448_v28  ;;  %v8916_v31 = vmul.f32 %v16478_v39, %v8839_v46  ;;  %v7015_v56 = vmax.f32 %v6951_v30, 0.0  ;;  %v17252_v25 = vld [vmem:[#allocation9 + $0x90] sm:$0xff] }
 0xaf3   : > { %9200 = vadd.xlane.f32.xlu0 %v9199_v43  ;;  %v7204_v37 = vsel %vm20504_vm0, %v7199_v6, %v7203_v54  ;;  %v8917_v15 = vmul.f32 %v16481_v62, %v8840_v44  ;;  %v12984_v32 = vadd.f32 %v17081_v38, %v20682_v24  ;;  %v12983_v17 = vadd.f32 %v12982_v29, %v17088_v63  ;;  %v20686_v46 = vld [vmem:[#allocation58_spill] sm:$0xff] }
 0xaf4   : > { %7345 = vst [vmem:[#allocation9 + $0x1c0] sm:$0xff] %v7204_v37  ;;  %v7206_v3 = vsel %vm20683_vm5, %v7201_v45, %v7205_v41  ;;  %v7016_v47 = vmax.f32 %v6952_v19, 0.0  ;;  %9197 = vadd.xlane.f32.xlu1 %v9196_v34  ;;  %v10408_v27 = vsel %vm16528_vm8, %v17043_v8, 0.0  ;;  %v7207_v6 = vrot.slane %v7015_v56, 7  ;;  %v17258_v45 = vld [vmem:[#allocation9 + $0x98] sm:$0xff]  ;;  %vm20717_vm5 = vmmov %vm20695_vm1 }
 0xaf5   : > { %7346 = vst [vmem:[#allocation9 + $0x1c8] sm:$0xff] %v7206_v3  ;;  %v8986_v43 = vadd.f32 %v8917_v15, %v8916_v31  ;;  %v12985_v13 = vadd.f32 %v12984_v32, %v17096_v42  ;;  %v10409_v38 = vsel %vm16528_vm8, %v17049_v11, 0.0  ;;  %v6953_v63 = vadd.f32 %v12983_v17, %v16444_v35  ;;  %vm20687_vm8 = vmmov %vm20504_vm0  ;;  %v20688_v37 = vld [vmem:[#allocation16_spill] sm:$0xff] }
 0xaf6   : > { %v7209_v57 = vrot.slane %v7016_v47, 7  ;;  %v10485_v29 = vmul.f32 %v20624_v61, %v10408_v27  ;;  %v10486_v8 = vmul.f32 %v20625_v51, %v10409_v38  ;;  %v7208_v30 = vsel %vm20685_vm7, %v7203_v54, %v7207_v6  ;;  %v20689_v54 = vld [vmem:[#allocation59_spill] sm:$0xff]  ;;  %v20692_v27 = vld [vmem:[#allocation60_spill] sm:$0xff] }
 0xaf7   : > { %8987 = vadd.xlane.f32.xlu0 %v8986_v43  ;;  %v6954_v34 = vadd.f32 %v12985_v13, %v16448_v28  ;;  %v12986_v42 = vadd.f32 %v17107_v9, %v20686_v46  ;;  %v7878_v11 = vmul.f32 %v16144_v2, %v17252_v25  ;;  %7347 = vst [vmem:[#allocation9 + $0x1d0] sm:$0xff] %v7208_v30  ;;  %v7017_v44 = vmax.f32 %v6953_v63, 0.0  ;;  %v20690_v9 = vld [vmem:[#allocation68_spill] sm:$0xff] }
 0xaf8   : > { %v7210_v19 = vsel %vm20687_vm8, %v7205_v41, %v7209_v57  ;;  %v10550_v31 = vadd.f32 %v10486_v8, %v10485_v29  ;;  %v7879_v56 = vmul.f32 %v20688_v37, %v17258_v45  ;;  %v12988_v24 = vadd.f32 %v17112_v18, %v20689_v54  ;;  %v20691_v41 = vld [vmem:[#allocation69_spill] sm:$0xff] }
 0xaf9   : > { %7348 = vst [vmem:[#allocation9 + $0x1d8] sm:$0xff] %v7210_v19  ;;  %v7018_v15 = vmax.f32 %v6954_v34, 0.0  ;;  %v12987_v32 = vadd.f32 %v12986_v42, %v17117_v48  ;;  %v9565_v3 = vmul.f32 %v20690_v9, %v17165_v16  ;;  %v7211_v47 = vrot.slane %v7017_v44, 7  ;;  %v20694_v8 = vld [vmem:[#allocation61_spill] sm:$0xff]  ;;  %v17299_v42 = vpop.xlane.xlu0 %7933 }
 0xafa   : > { %10551 = vadd.xlane.f32.xlu1 %v10550_v31  ;;  %v7956_v17 = vadd.f32 %v7879_v56, %v7878_v11  ;;  %v9566_v20 = vmul.f32 %v20691_v41, %v17172_v55  ;;  %v12990_v43 = vadd.f32 %v17134_v22, %v20692_v27  ;;  %v12989_v63 = vadd.f32 %v12988_v24, %v17127_v40 }
 0xafb   : > { %v7213_v13 = vrot.slane %v7018_v15, 7  ;;  %v6955_v38 = vadd.f32 %v12987_v32, %v16444_v35  ;;  %v8390_v18 = vrot.slane %v17200_v58, 2  ;;  %v7212_v48 = vsel %vm20693_vm4, %v7207_v6, %v7211_v47  ;;  %v17297_v6 = vpop.xlane.xlu1 %7716 }
 0xafc   : > { %7957 = vadd.xlane.f32.xlu0 %v7956_v17  ;;  %v9633_v16 = vadd.f32 %v9566_v20, %v9565_v3  ;;  %v8392_v29 = vrot.slane %v17205_v7, 2  ;;  %v12992_v30 = vadd.f32 %v17141_v33, %v20694_v8  ;;  %7349 = vst [vmem:[#allocation9 + $0x1e0] sm:$0xff] %v7212_v48  ;;  %v6956_v34 = vadd.f32 %v12989_v63, %v16448_v28 }
 0xafd   : > { %v7214_v55 = vsel %vm20695_vm1, %v7209_v57, %v7213_v13  ;;  %v7019_v22 = vmax.f32 %v6955_v38, 0.0  ;;  %v20696_v40 = vrot.slane %v17123_v60, 2  ;;  %v20697_v33 = vrot.slane %v17130_v12, 2 }
 0xafe   : > { %7350 = vst [vmem:[#allocation9 + $0x1e8] sm:$0xff] %v7214_v55  ;;  %9634 = vadd.xlane.f32.xlu1 %v9633_v16  ;;  %v12991_v11 = vadd.f32 %v12990_v43, %v17147_v1  ;;  %v12993_v19 = vadd.f32 %v12992_v30, %v17152_v53  ;;  %v7020_v31 = vmax.f32 %v6956_v34, 0.0  ;;  %v7876_v32 = vmul.f32 %v16144_v2, %v17200_v58  ;;  %v20700_v16 = vld [vmem:[#allocation23_spill] sm:$0xff]  ;;  %v17336_v55 = vpop.xlane.xlu0 %8696 }
 0xaff   : > { %v17295_v46 = vsel %vm8359_vm3, %v20696_v40, %v8390_v18  ;;  %v17306_v57 = vsel %vm8359_vm3, %v20697_v33, %v8392_v29  ;;  %v7215_v44 = vrot.slane %v7019_v22, 7  ;;  %v7877_v3 = vmul.f32 %v20688_v37, %v17205_v7  ;;  %v17334_v30 = vpop.xlane.xlu1 %7719 }
 0xb00   : > { %v9490_v60 = vsel %vm17100_vm6, %v17295_v46, 0.0  ;;  %v9491_v56 = vsel %vm17100_vm6, %v17306_v57, 0.0  ;;  %v6957_v54 = vadd.f32 %v12991_v11, %v16444_v35  ;;  %v6958_v24 = vadd.f32 %v12993_v19, %v16448_v28  ;;  %20701 = vst [vmem:[#allocation25_spill] sm:$0xff] %v17334_v30  ;;  %v20703_v19 = vld [vmem:[#allocation62_spill] sm:$0xff] }
 0xb01   : > { %v9567_v15 = vmul.f32 %v20690_v9, %v9490_v60  ;;  %v9568_v12 = vmul.f32 %v20691_v41, %v9491_v56  ;;  %v7216_v1 = vsel %vm20698_vm10, %v7211_v47, %v7215_v44  ;;  %v7217_v53 = vrot.slane %v7020_v31, 7  ;;  %v20702_v60 = vld [vmem:[#allocation11_spill] sm:$0xff] }
 0xb02   : > { %v9840_v17 = vmul.f32 %v20595_v4, %v17252_v25  ;;  %7351 = vst [vmem:[#allocation9 + $0x1f0] sm:$0xff] %v7216_v1  ;;  %v7021_v27 = vmax.f32 %v6957_v54, 0.0  ;;  %v7022_v43 = vmax.f32 %v6958_v24, 0.0  ;;  %v9841_v38 = vmul.f32 %v20652_v50, %v17258_v45 }
 0xb03   : > { %v9636_v20 = vadd.f32 %v9568_v12, %v9567_v15  ;;  %v7218_v63 = vsel %vm20699_vm13, %v7213_v13, %v7217_v53  ;;  %v7953_v48 = vadd.f32 %v7877_v3, %v7876_v32  ;;  %v10047_v47 = vmul.f32 %v20608_v14, %v17200_v58  ;;  %v20706_v3 = vld [vmem:[#allocation63_spill] sm:$0xff] }
 0xb04   : > { %v10048_v8 = vmul.f32 %v20700_v16, %v17205_v7  ;;  %7352 = vst [vmem:[#allocation9 + $0x1f8] sm:$0xff] %v7218_v63  ;;  %v7219_v22 = vrot.slane %v7021_v27, 7  ;;  %v7221_v34 = vrot.slane %v7022_v43, 7  ;;  %v10049_v40 = vmul.f32 %v20608_v14, %v17252_v25  ;;  %v17380_v63 = vpop.xlane.xlu1 %7930 }
 0xb05   : > { %9637 = vadd.xlane.f32.xlu0 %v9636_v20  ;;  %7954 = vadd.xlane.f32.xlu1 %v7953_v48  ;;  %v9909_v13 = vadd.f32 %v9841_v38, %v9840_v17  ;;  %v10050_v33 = vmul.f32 %v20700_v16, %v17258_v45  ;;  %v7359_v11 = vadd.s32 64, %v20702_v60  ;;  %v12994_v31 = vadd.f32 %v17207_v59, %v20703_v19  ;;  %v17352_v20 = vpop.xlane.xlu0 %9988 }
 0xb06   : > { %v7220_v56 = vsel %vm20704_vm2, %v7215_v44, %v7219_v22  ;;  %v7222_v15 = vsel %vm20705_vm14, %v7217_v53, %v7221_v34  ;;  %v8394_v12 = vrot.slane %v17252_v25, 2  ;;  %v8396_v54 = vrot.slane %v17258_v45, 2  ;;  %20707 = vst [vmem:[#allocation26_spill] sm:$0xff] %v17352_v20 }
 0xb07   : > { %7353 = vst [vmem:[#allocation9 + $0x200] sm:$0xff] %v7220_v56  ;;  %7354 = vst [vmem:[#allocation9 + $0x208] sm:$0xff] %v7222_v15  ;;  %v10119_v24 = vadd.f32 %v10048_v8, %v10047_v47  ;;  %v7391_v32 = vand.u32 15, %v7359_v11  ;;  %v6959_v1 = vadd.f32 %v12994_v31, %v16444_v35  ;;  %v12995_v17 = vadd.f32 %v17214_v52, %v20706_v3  ;;  %v17411_v52 = vld [vmem:[#allocation9 + $0xa8] sm:$0xff] }
 0xb08   : > { %v10122_v59 = vadd.f32 %v10050_v33, %v10049_v40  ;;  %v17359_v44 = vsel %vm8359_vm3, %v8390_v18, %v8394_v12  ;;  %v17366_v35 = vsel %vm8359_vm3, %v8392_v29, %v8396_v54  ;;  %v9761_v53 = vsel %vm16664_vm12, %v17200_v58, 0.0  ;;  %v20711_v40 = vld [vmem:[#allocation15_spill] sm:$0xff] }
 0xb09   : > { %9910 = vadd.xlane.f32.xlu0 %v9909_v13  ;;  %10120 = vadd.xlane.f32.xlu1 %v10119_v24  ;;  %vm17371_vm15 = vcmp.ge.s32.totalorder %v7391_v32, 1  ;;  %v7023_v43 = vmax.f32 %v6959_v1, 0.0  ;;  %v8647_v18 = vmul.f32 %v20669_v5, %v17359_v44  ;;  %v9762_v38 = vsel %vm16664_vm12, %v17205_v7, 0.0  ;;  %vm20712_vm12 = vmmov %vm20504_vm0  ;;  %v17401_v32 = vpop.xlane.xlu1 %10206  ;;  %v17403_v1 = vpop.xlane.xlu0 %10201 }
 0xb0a   : > { %v7591_v29 = vsel %vm17371_vm15, %v17200_v58, 0.0  ;;  %v7592_v48 = vsel %vm17371_vm15, %v17205_v7, 0.0  ;;  %v8648_v47 = vmul.f32 %v20670_v21, %v17366_v35  ;;  %v6960_v8 = vadd.f32 %v12995_v17, %v16448_v28  ;;  %20713 = vst [vmem:[#allocation73_spill] sm:$0xff] %v17401_v32  ;;  %20714 = vst [vmem:[#allocation27_spill] sm:$0xff] %v17403_v1 }
 0xb0b   : > { %v7390_v13 = vand.u32 15, %v20711_v40  ;;  %v7667_v33 = vmul.f32 %v16108_v36, %v7591_v29  ;;  %v7668_v11 = vmul.f32 %v16111_v10, %v7592_v48  ;;  %v7223_v19 = vrot.slane %v7023_v43, 7 }
 0xb0c   : > { %v7024_v31 = vmax.f32 %v6960_v8, 0.0  ;;  %v9838_v58 = vmul.f32 %v20595_v4, %v9761_v53  ;;  %v9839_v56 = vmul.f32 %v20652_v50, %v9762_v38  ;;  %v10491_v28 = vmul.f32 %v20624_v61, %v17359_v44 }
 0xb0d   : > { %10123 = vadd.xlane.f32.xlu0 %v10122_v59  ;;  %v7739_v15 = vadd.f32 %v7668_v11, %v7667_v33  ;;  %v7224_v7 = vsel %vm20712_vm12, %v7219_v22, %v7223_v19  ;;  %7357 = vst [vmem:[#allocation9 + $0x220] sm:$0x1] %v7223_v19  ;;  %v10492_v24 = vmul.f32 %v20625_v51, %v17366_v35  ;;  %vm17405_vm0 = vcmp.le.s32.totalorder %v7390_v13, 14  ;;  %v17409_v22 = vld [vmem:[#allocation9 + $0xa0] sm:$0xff]  ;;  %v17434_v33 = vpop.xlane.xlu1 %7936  ;;  %v17436_v11 = vpop.xlane.xlu0 %7722 }
 0xb0e   : > { %7355 = vst [vmem:[#allocation9 + $0x210] sm:$0xff] %v7224_v7  ;;  %v8719_v3 = vadd.f32 %v8648_v47, %v8647_v18  ;;  %v7225_v17 = vrot.slane %v7024_v31, 7  ;;  %v9906_v43 = vadd.f32 %v9839_v56, %v9838_v58  ;;  %v7669_v18 = vmul.f32 %v16108_v36, %v17252_v25 }
 0xb0f   : > { %7740 = vadd.xlane.f32.xlu1 %v7739_v15  ;;  %v10559_v38 = vadd.f32 %v10492_v24, %v10491_v28  ;;  %v7670_v29 = vmul.f32 %v16111_v10, %v17258_v45  ;;  %v9129_v48 = vmul.f32 %v20678_v0, %v17409_v22  ;;  %v9130_v47 = vmul.f32 %v20679_v23, %v17411_v52  ;;  %v17442_v28 = vld [vmem:[#allocation9 + $0xb0] sm:$0xff]  ;;  %v17444_v24 = vld [vmem:[#allocation9 + $0xb8] sm:$0xff] }
 0xb10   : > { %v7226_v53 = vsel %vm20717_vm5, %v7221_v34, %v7225_v17  ;;  %7358 = vst [vmem:[#allocation9 + $0x228] sm:$0x1] %v7225_v17  ;;  %v8568_v34 = vsel %vm17405_vm0, %v17295_v46, 0.0  ;;  %v8569_v8 = vsel %vm17405_vm0, %v17306_v57, 0.0  ;;  %v8843_v40 = vsel %vm17371_vm15, %v17409_v22, 0.0 }
 0xb11   : > { %8720 = vadd.xlane.f32.xlu0 %v8719_v3  ;;  %7356 = vst [vmem:[#allocation9 + $0x218] sm:$0xff] %v7226_v53  ;;  %v8844_v13 = vsel %vm17371_vm15, %v17411_v52, 0.0  ;;  %v7742_v19 = vadd.f32 %v7670_v29, %v7669_v18  ;;  %v8645_v31 = vmul.f32 %v20669_v5, %v8568_v34  ;;  %v8646_v58 = vmul.f32 %v20670_v21, %v8569_v8 }
 0xb12   : > { %v9205_v56 = vadd.f32 %v9130_v47, %v9129_v48  ;;  %v8920_v15 = vmul.f32 %v16478_v39, %v8843_v40  ;;  %v8921_v7 = vmul.f32 %v16481_v62, %v8844_v13  ;;  %v8398_v3 = vrot.slane %v17409_v22, 2 }
 0xb13   : > { %9907 = vadd.xlane.f32.xlu1 %v9906_v43  ;;  %v8400_v17 = vrot.slane %v17411_v52, 2  ;;  %v8716_v53 = vadd.f32 %v8646_v58, %v8645_v31  ;;  %v8918_v43 = vmul.f32 %v16478_v39, %v17252_v25  ;;  %v7673_v47 = vmul.f32 %v16108_v36, %v17442_v28 }
 0xb14   : > { %v8992_v48 = vadd.f32 %v8921_v7, %v8920_v15  ;;  %v7674_v34 = vmul.f32 %v16111_v10, %v17444_v24  ;;  %v17463_v8 = vsel %vm8359_vm3, %v8394_v12, %v8398_v3  ;;  %v9128_v31 = vmul.f32 %v20679_v23, %v17258_v45 }
 0xb15   : > { %10560 = vadd.xlane.f32.xlu0 %v10559_v38  ;;  %v8919_v38 = vmul.f32 %v16481_v62, %v17258_v45  ;;  %v17452_v18 = vpop.xlane.xlu1 %8699  ;;  %v17454_v29 = vpop.xlane.xlu0 %8969  ;;  %v17468_v40 = vsel %vm8359_vm3, %v8396_v54, %v8400_v17  ;;  %v7882_v58 = vmul.f32 %v16144_v2, %v17442_v28  ;;  %v7883_v12 = vmul.f32 %v20688_v37, %v17444_v24 }
 0xb16   : > { %20718 = vst [vmem:[#allocation20_spill] sm:$0xff] %v17452_v18  ;;  %v7748_v15 = vadd.f32 %v7674_v34, %v7673_v47  ;;  %v10412_v54 = vsel %vm16763_vm9, %v17295_v46, 0.0  ;;  %v9494_v45 = vsel %vm17405_vm0, %v17463_v8, 0.0  ;;  %v7361_v7 = vadd.s32 80, %v20702_v60 }
 0xb17   : > { %7743 = vadd.xlane.f32.xlu1 %v7742_v19  ;;  %v8989_v13 = vadd.f32 %v8919_v38, %v8918_v43  ;;  %v9127_v19 = vmul.f32 %v20678_v0, %v17252_v25  ;;  %v10413_v25 = vsel %vm16763_vm9, %v17306_v57, 0.0  ;;  %v9495_v43 = vsel %vm17405_vm0, %v17468_v40, 0.0 }
 0xb18   : > { %v10490_v46 = vmul.f32 %v20625_v51, %v10413_v25  ;;  %v7962_v57 = vadd.f32 %v7883_v12, %v7882_v58  ;;  %v9571_v34 = vmul.f32 %v20690_v9, %v9494_v45  ;;  %v9844_v58 = vmul.f32 %v20595_v4, %v17442_v28 }
 0xb19   : > { %9206 = vadd.xlane.f32.xlu0 %v9205_v56  ;;  %v17476_v56 = vpop.xlane.xlu1 %7725  ;;  %v9202_v38 = vadd.f32 %v9128_v31, %v9127_v19  ;;  %v9569_v19 = vmul.f32 %v20690_v9, %v17359_v44  ;;  %v9570_v31 = vmul.f32 %v20691_v41, %v17366_v35  ;;  %v9845_v12 = vmul.f32 %v20652_v50, %v17444_v24 }
 0xb1a   : > { %v20323_v45 = vrot.slane %v17442_v28, 2  ;;  %v7880_v35 = vmul.f32 %v16144_v2, %v17409_v22  ;;  %vm10906_vm4 = vcmask 7168  }
 0xb1b   : > { %8717 = vadd.xlane.f32.xlu1 %v8716_v53  ;;  %v17486_v53 = vpop.xlane.xlu0 %9182  ;;  %v9639_v44 = vadd.f32 %v9570_v31, %v9569_v19  ;;  %v20721_v31 = vmov 0 }
 0xb1d   : > { %8993 = vadd.xlane.f32.xlu0 %v8992_v48  ;;  %v10489_v48 = vmul.f32 %v20624_v61, %v10412_v54  ;;  %v17496_v47 = vpop.xlane.xlu1 %8972 }
 0xb1e   : > { %20720 = vst [vmem:[#allocation28_spill] sm:$0xff] %v17496_v47 }
 0xb1f   : > { %8990 = vadd.xlane.f32.xlu1 %v8989_v13  ;;  %v9572_v13 = vmul.f32 %v20691_v41, %v9495_v43  ;;  %v17501_v20 = vpop.xlane.xlu0 %7939  ;;  %v20324_v43 = vrot.slane %v17444_v24, 2 }
 0xb21   : > { %7749 = vadd.xlane.f32.xlu0 %v7748_v15  ;;  %v10556_v15 = vadd.f32 %v10490_v46, %v10489_v48  ;;  %v9642_v54 = vadd.f32 %v9572_v13, %v9571_v34  ;;  %v17511_v25 = vpop.xlane.xlu1 %9185  ;;  %v7881_v48 = vmul.f32 %v20688_v37, %v17411_v52  ;;  %v10053_v46 = vmul.f32 %v20608_v14, %v17442_v28 }
 0xb22   : > { %v9915_v13 = vadd.f32 %v9845_v12, %v9844_v58  ;;  %v17533_v19 = vsel %vm8359_vm3, %v8400_v17, %v20324_v43 }
 0xb23   : > { %9203 = vadd.xlane.f32.xlu1 %v9202_v38  ;;  %v7393_v38 = vand.u32 15, %v7361_v7  ;;  %v17528_v7 = vsel %vm8359_vm3, %v8398_v3, %v20323_v45  ;;  %v7959_v58 = vadd.f32 %v7881_v48, %v7880_v35  ;;  %v10051_v3 = vmul.f32 %v20608_v14, %v17409_v22 }
 0xb24   : > { %v8651_v17 = vmul.f32 %v20669_v5, %v17528_v7  ;;  %v10495_v32 = vmul.f32 %v20624_v61, %v17528_v7  ;;  %v10496_v18 = vmul.f32 %v20625_v51, %v17533_v19 }
 0xb25   : > { %7963 = vadd.xlane.f32.xlu0 %v7962_v57  ;;  %v10054_v57 = vmul.f32 %v20700_v16, %v17444_v24  ;;  %vm17535_vm9 = vcmp.ge.s32.totalorder %v7393_v38, 1  ;;  %v8652_v38 = vmul.f32 %v20670_v21, %v17533_v19 }
 0xb26   : > { %v20722_v31 = vsel %vm17535_vm9, 4294967295, %v20721_v31  ;;  %v7596_v35 = vsel %vm17535_vm9, %v17411_v52, 0.0 }
 0xb27   : > { %10557 = vadd.xlane.f32.xlu1 %v10556_v15  ;;  %v17523_v34 = vpop.xlane.xlu0 %8702  ;;  %20723 = vst [vmem:[#allocation29_spill] sm:$0xff] %v20722_v31  ;;  %v7360_v15 = vadd.s32 72, %v20702_v60  ;;  %v10128_v12 = vadd.f32 %v10054_v57, %v10053_v46  ;;  %v7672_v1 = vmul.f32 %v16111_v10, %v7596_v35  ;;  %v8725_v47 = vadd.f32 %v8652_v38, %v8651_v17  ;;  %v17610_v31 = vld [vmem:[#allocation9 + $0xd0] sm:$0xff] }
 0xb28   : > { %v10565_v35 = vadd.f32 %v10496_v18, %v10495_v32  ;;  %v17612_v18 = vld [vmem:[#allocation9 + $0xd8] sm:$0xff] }
 0xb29   : > { %9643 = vadd.xlane.f32.xlu0 %v9642_v54  ;;  %v17540_v54 = vpop.xlane.xlu1 %9622  ;;  %v7392_v48 = vand.u32 15, %v7360_v15  ;;  %v9766_v15 = vsel %vm16989_vm11, %v17411_v52, 0.0 }
 0xb2b   : > { %9640 = vadd.xlane.f32.xlu1 %v9639_v44  ;;  %v10052_v44 = vmul.f32 %v20700_v16, %v17411_v52  ;;  %v17546_v45 = vpop.xlane.xlu0 %9188  ;;  %vm17576_vm7 = vcmp.le.s32.totalorder %v7392_v48, 14 }
 0xb2c   : > { %20724 = vst [vmem:[#allocation12_spill] sm:$0xff] %v17546_v45 }
 0xb2d   : > { %9916 = vadd.xlane.f32.xlu0 %v9915_v13  ;;  %v7595_v13 = vsel %vm17535_vm9, %v17409_v22, 0.0  ;;  %v17558_v46 = vpop.xlane.xlu1 %7942  ;;  %v10125_v57 = vadd.f32 %v10052_v44, %v10051_v3  ;;  %v17574_v3 = vld [vmem:[#allocation9 + $0xc8] sm:$0xff]  ;;  %v20726_v44 = vmov 0 }
 0xb2e   : > { %20725 = vst [vmem:[#allocation22_spill] sm:$0xff] %v17558_v46  ;;  %v7671_v43 = vmul.f32 %v16108_v36, %v7595_v13  ;;  %v20727_v44 = vsel %vm17576_vm7, 4294967295, %v20726_v44  ;;  %v9134_v48 = vmul.f32 %v20679_v23, %v17574_v3  ;;  %v8848_v32 = vsel %vm17535_vm9, %v17574_v3, 0.0 }
 0xb2f   : > { %7960 = vadd.xlane.f32.xlu1 %v7959_v58  ;;  %v9765_v58 = vsel %vm16989_vm11, %v17409_v22, 0.0  ;;  %20728 = vst [vmem:[#allocation30_spill] sm:$0xff] %v20727_v44  ;;  %v17580_v17 = vpop.xlane.xlu0 %8975  ;;  %v9843_v22 = vmul.f32 %v20652_v50, %v9766_v15  ;;  %vm8063_vm11 = vcmask 1046528   ;;  %v8925_v45 = vmul.f32 %v16481_v62, %v8848_v32 }
 0xb30   : > { %20729 = vst [vmem:[#allocation31_spill] sm:$0xff] %v17580_v17  ;;  %v7745_v38 = vadd.f32 %v7672_v1, %v7671_v43  ;;  %v9842_v13 = vmul.f32 %v20595_v4, %v9765_v58  ;;  %v8573_v1 = vsel %vm17576_vm7, %v17468_v40, 0.0  ;;  %v8064_v43 = vrot.slane %v17380_v63, 1 }
 0xb31   : > { %10129 = vadd.xlane.f32.xlu0 %v10128_v12  ;;  %v17572_v12 = vld [vmem:[#allocation9 + $0xc0] sm:$0xff]  ;;  %v7677_v32 = vmul.f32 %v16108_v36, %v17610_v31 }
 0xb32   : > { %v9133_v49 = vmul.f32 %v20678_v0, %v17572_v12  ;;  %v17586_v52 = vpop.xlane.xlu1 %7728  ;;  %v9912_v58 = vadd.f32 %v9843_v22, %v9842_v13  ;;  %v20328_v63 = vrot.slane %v17572_v12, 2  ;;  %v20732_v22 = vrot.slane %v17299_v42, 1 }
 0xb33   : > { %10126 = vadd.xlane.f32.xlu1 %v10125_v57  ;;  %20730 = vst [vmem:[#allocation32_spill] sm:$0xff] %v17586_v52  ;;  %v8572_v57 = vsel %vm17576_vm7, %v17463_v8, 0.0  ;;  %v8650_v52 = vmul.f32 %v20670_v21, %v8573_v1  ;;  %v17606_v30 = vpop.xlane.xlu0 %7945  ;;  %v8923_v1 = vmul.f32 %v16481_v62, %v17444_v24 }
 0xb34   : > { %v8649_v15 = vmul.f32 %v20669_v5, %v8572_v57  ;;  %20731 = vst [vmem:[#allocation33_spill] sm:$0xff] %v17606_v30  ;;  %v8922_v57 = vmul.f32 %v16478_v39, %v17442_v28  ;;  %v20738_v30 = vrot.slane %v17511_v25, 1 }
 0xb35   : > { %8726 = vadd.xlane.f32.xlu0 %v8725_v47  ;;  %v8847_v47 = vsel %vm17535_vm9, %v17572_v12, 0.0 }
 0xb36   : > { %v8924_v17 = vmul.f32 %v16478_v39, %v8847_v47 }
 0xb37   : > { %7746 = vadd.xlane.f32.xlu1 %v7745_v38  ;;  %v9211_v38 = vadd.f32 %v9134_v48, %v9133_v49  ;;  %v8066_v49 = vsel %vm8063_vm11, %v8064_v43, %v20732_v22  ;;  %v8722_v48 = vadd.f32 %v8650_v52, %v8649_v15  ;;  %v20734_v52 = vrot.slane %v17442_v28, 2 }
 0xb38   : > { %v8998_v47 = vadd.f32 %v8925_v45, %v8924_v17  ;;  %v8161_v13 = vadd.f32 %v8066_v49, %v17297_v6  ;;  %v20735_v45 = vrot.slane %v17574_v3, 2  ;;  %v20736_v17 = vrot.slane %v17444_v24, 2 }
 0xb39   : > { %10566 = vadd.xlane.f32.xlu0 %v10565_v35  ;;  %v17614_v35 = vpop.xlane.xlu1 %9895  ;;  %v17637_v43 = vsel %vm8359_vm3, %v20734_v52, %v20328_v63  ;;  %v8995_v22 = vadd.f32 %v8923_v1, %v8922_v57  ;;  %v9132_v6 = vmul.f32 %v20679_v23, %v17444_v24  ;;  %v7886_v49 = vmul.f32 %v16144_v2, %v17610_v31 }
 0xb3a   : > { %v17644_v15 = vsel %vm8359_vm3, %v20736_v17, %v20735_v45  ;;  %v7887_v63 = vmul.f32 %v20688_v37, %v17612_v18  ;;  %v10416_v45 = vsel %vm17100_vm6, %v17463_v8, 0.0  ;;  %v10417_v57 = vsel %vm17100_vm6, %v17468_v40, 0.0 }
 0xb3b   : > { %9913 = vadd.xlane.f32.xlu1 %v9912_v58  ;;  %v7678_v58 = vmul.f32 %v16111_v10, %v17612_v18  ;;  %v9498_v24 = vsel %vm17576_vm7, %v17637_v43, 0.0  ;;  %v9499_v1 = vsel %vm17576_vm7, %v17644_v15, 0.0  ;;  %v9315_v8 = vrot.slane %v17486_v53, 1 }
 0xb3c   : > { %v10493_v26 = vmul.f32 %v20624_v61, %v10416_v45  ;;  %v10494_v40 = vmul.f32 %v20625_v51, %v10417_v57  ;;  %v9576_v44 = vmul.f32 %v20691_v41, %v9499_v1  ;;  %v7363_v53 = vadd.s32 96, %v20702_v60 }
 0xb3d   : > { %9212 = vadd.xlane.f32.xlu0 %v9211_v38  ;;  %v17629_v38 = vpop.xlane.xlu0 %9625  ;;  %v7754_v52 = vadd.f32 %v7678_v58, %v7677_v32  ;;  %v9849_v57 = vmul.f32 %v20652_v50, %v17612_v18 }
 0xb3e   : > { %20733 = vst [vmem:[#allocation34_spill] sm:$0xff] %v17629_v38  ;;  %v9575_v38 = vmul.f32 %v20690_v9, %v9498_v24 }
 0xb3f   : > { %8723 = vadd.xlane.f32.xlu1 %v8722_v48  ;;  %v9131_v48 = vmul.f32 %v20678_v0, %v17442_v28  ;;  %v7968_v28 = vadd.f32 %v7887_v63, %v7886_v49 }
 0xb40   : > { %v9648_v45 = vadd.f32 %v9576_v44, %v9575_v38  ;;  %v7884_v44 = vmul.f32 %v16144_v2, %v17572_v12  ;;  %v7885_v38 = vmul.f32 %v20688_v37, %v17574_v3 }
 0xb41   : > { %8999 = vadd.xlane.f32.xlu0 %v8998_v47  ;;  %v10109_v47 = vpop.xlane.xlu1 %10108  ;;  %v17667_v32 = vpop.xlane.xlu0 %9898  ;;  %v9208_v58 = vadd.f32 %v9132_v6, %v9131_v48  ;;  %v9573_v6 = vmul.f32 %v20690_v9, %v17528_v7  ;;  %v20332_v7 = vrot.slane %v17612_v18, 2 }
 0xb42   : > { %20737 = vst [vmem:[#allocation35_spill] sm:$0xff] %v17667_v32  ;;  %v17804_v32 = vld [vmem:[#allocation9 + $0xf8] sm:$0xff] }
 0xb43   : > { %8996 = vadd.xlane.f32.xlu1 %v8995_v22  ;;  %v8791_v22 = vadd.f32 %v17336_v55, %v8161_v13  ;;  %v9574_v55 = vmul.f32 %v20691_v41, %v17533_v19  ;;  %v10562_v13 = vadd.f32 %v10494_v40, %v10493_v26 }
 0xb45   : > { %7755 = vadd.xlane.f32.xlu0 %v7754_v52  ;;  %v17672_v17 = vpop.xlane.xlu1 %7731  ;;  %v9317_v52 = vsel %vm8063_vm11, %v9315_v8, %v20738_v30  ;;  %v9064_v48 = vadd.f32 %v17454_v29, %v8791_v22  ;;  %v17686_v63 = vpop.xlane.xlu0 %10111  ;;  %v9848_v30 = vmul.f32 %v20595_v4, %v17610_v31  ;;  %v20334_v29 = vrot.slane %v17610_v31, 2 }
 0xb46   : > { %20739 = vst [vmem:[#allocation36_spill] sm:$0xff] %v17686_v63  ;;  %v9645_v19 = vadd.f32 %v9574_v55, %v9573_v6  ;;  %v20333_v1 = vrot.slane %v17686_v63, 1  ;;  %v10057_v8 = vmul.f32 %v20608_v14, %v17610_v31  ;;  %v10241_v22 = vrot.slane %v10109_v47, 1 }
 0xb47   : > { %9209 = vadd.xlane.f32.xlu1 %v9208_v58  ;;  %v9412_v49 = vadd.f32 %v9317_v52, %v9064_v48  ;;  %v10058_v58 = vmul.f32 %v20700_v16, %v17612_v18  ;;  %v9921_v40 = vadd.f32 %v9849_v57, %v9848_v30  ;;  %v20742_v6 = vrot.slane %v17574_v3, 2 }
 0xb48   : > { %v10243_v30 = vsel %vm8063_vm11, %v10241_v22, %v20333_v1 }
 0xb49   : > { %7969 = vadd.xlane.f32.xlu0 %v7968_v28  ;;  %v17692_v24 = vpop.xlane.xlu1 %8705  ;;  %v7395_v28 = vand.u32 15, %v7363_v53  ;;  %v9717_v26 = vadd.f32 %v17540_v54, %v9412_v49  ;;  %v20741_v53 = vrot.slane %v17572_v12, 2  ;;  %v17720_v55 = vsel %vm8359_vm3, %v20742_v6, %v20332_v7 }
 0xb4a   : > { %v20743_v54 = vmov 0  ;;  %v10055_v49 = vmul.f32 %v20608_v14, %v17572_v12 }
 0xb4b   : > { %10563 = vadd.xlane.f32.xlu1 %v10562_v13  ;;  %v17713_v48 = vsel %vm8359_vm3, %v20741_v53, %v20334_v29  ;;  %vm17722_vm6 = vcmp.ge.s32.totalorder %v7395_v28, 1  ;;  %v7362_v13 = vadd.s32 88, %v20702_v60  ;;  %v9990_v57 = vadd.f32 %v17614_v35, %v9717_v26 }
 0xb4c   : > { %v17706_v52 = vpop.xlane.xlu0 %8708  ;;  %v20744_v54 = vsel %vm17722_vm6, 4294967295, %v20743_v54  ;;  %v7965_v28 = vadd.f32 %v7885_v38, %v7884_v44  ;;  %v8655_v53 = vmul.f32 %v20669_v5, %v17713_v48  ;;  %v7599_v6 = vsel %vm17722_vm6, %v17572_v12, 0.0  ;;  %v17747_v44 = vld [vmem:[#allocation10] ss:$0 sm:$0xff] }
 0xb4d   : > { %9649 = vadd.xlane.f32.xlu0 %v9648_v45  ;;  %20740 = vst [vmem:[#allocation37_spill] sm:$0xff] %v17706_v52  ;;  %20745 = vst [vmem:[#allocation70_spill] sm:$0xff] %v20744_v54  ;;  %v17726_v47 = vpop.xlane.xlu1 %8978  ;;  %v10056_v45 = vmul.f32 %v20700_v16, %v17574_v3  ;;  %v7600_v7 = vsel %vm17722_vm6, %v17574_v3, 0.0  ;;  %v10338_v22 = vadd.f32 %v10243_v30, %v9990_v57  ;;  %v7394_v1 = vand.u32 15, %v7362_v13  ;;  %v17763_v30 = vld [vmem:[#allocation9 + $0xe0] sm:$0xff] }
 0xb4e   : > { %v9769_v26 = vsel %vm17371_vm15, %v17572_v12, 0.0  ;;  %v10499_v13 = vmul.f32 %v20624_v61, %v17713_v48  ;;  %v20746_v57 = vmov 0 }
 0xb4f   : > { %9646 = vadd.xlane.f32.xlu1 %v9645_v19  ;;  %v10134_v19 = vadd.f32 %v10058_v58, %v10057_v8  ;;  %v10131_v35 = vadd.f32 %v10056_v45, %v10055_v49  ;;  %v7675_v8 = vmul.f32 %v16108_v36, %v7599_v6  ;;  %v7676_v58 = vmul.f32 %v16111_v10, %v7600_v7  ;;  %v17765_v7 = vld [vmem:[#allocation9 + $0xe8] sm:$0xff] }
 0xb50   : > { %v10500_v49 = vmul.f32 %v20625_v51, %v17720_v55  ;;  %v9770_v45 = vsel %vm17371_vm15, %v17574_v3, 0.0  ;;  %vm17768_vm8 = vcmp.le.s32.totalorder %v7394_v1, 14  ;;  %v9137_v3 = vmul.f32 %v20678_v0, %v17763_v30 }
 0xb51   : > { %9922 = vadd.xlane.f32.xlu0 %v9921_v40  ;;  %v8656_v40 = vmul.f32 %v20670_v21, %v17720_v55  ;;  %v20747_v57 = vsel %vm17768_vm8, 4294967295, %v20746_v57  ;;  %v9847_v27 = vmul.f32 %v20652_v50, %v9770_v45  ;;  %v8577_v1 = vsel %vm17768_vm8, %v17644_v15, 0.0 }
 0xb52   : > { %v17754_v52 = vpop.xlane.xlu1 %9191  ;;  %20748 = vst [vmem:[#allocation71_spill] sm:$0xff] %v20747_v57  ;;  %v8654_v45 = vmul.f32 %v20670_v21, %v8577_v1  ;;  %v20752_v1 = vrot.slane %v17763_v30, 2 }
 0xb53   : > { %7966 = vadd.xlane.f32.xlu1 %v7965_v28  ;;  %v10549_v38 = vpop.xlane.xlu0 %10548  ;;  %v8731_v63 = vadd.f32 %v8656_v40, %v8655_v53  ;;  %v9846_v28 = vmul.f32 %v20595_v4, %v9769_v26  ;;  %v7751_v53 = vadd.f32 %v7676_v58, %v7675_v8  ;;  %v8852_v8 = vsel %vm17722_vm6, %v17765_v7, 0.0 }
 0xb54   : > { %v10643_v29 = vadd.f32 %v10549_v38, %v10338_v22  ;;  %v10571_v22 = vadd.f32 %v10500_v49, %v10499_v13  ;;  %v8851_v38 = vsel %vm17722_vm6, %v17763_v30, 0.0  ;;  %v8069_v26 = vrot.slane %v17501_v20, 1 }
 0xb55   : > { %10135 = vadd.xlane.f32.xlu0 %v10134_v19  ;;  %v9918_v13 = vadd.f32 %v9847_v27, %v9846_v28  ;;  %v20751_v20 = vrot.slane %v17558_v46, 1  ;;  %v8926_v27 = vmul.f32 %v16478_v39, %v17610_v31 }
 0xb56   : > { %v10682_v12 = vadd.f32 %v17747_v44, %v10643_v29  ;;  %v17778_v6 = vpop.xlane.xlu1 %9628  ;;  %v9138_v29 = vmul.f32 %v20679_v23, %v17765_v7 }
 0xb57   : > { %10132 = vadd.xlane.f32.xlu1 %v10131_v35  ;;  %v17773_v19 = vpop.xlane.xlu0 %9194  ;;  %v8929_v35 = vmul.f32 %v16481_v62, %v8852_v8  ;;  %v8072_v28 = vsel %vm8063_vm11, %v8069_v26, %v20751_v20 }
 0xb58   : > { %20749 = vst [vmem:[#allocation38_spill] sm:$0xff] %v17773_v19  ;;  %v11445_v40 = vmul.f32 -1.442695, %v10682_v12  ;;  %v17800_v12 = vld [vmem:[#allocation9 + $0xf0] sm:$0xff] }
 0xb59   : > { %8732 = vadd.xlane.f32.xlu0 %v8731_v63  ;;  %v8576_v63 = vsel %vm17768_vm8, %v17637_v43, 0.0 }
 0xb5a   : > { %13119 = vpow2.f32 %v11445_v40  ;;  %v8653_v49 = vmul.f32 %v20669_v5, %v8576_v63  ;;  %v8928_v40 = vmul.f32 %v16478_v39, %v8851_v38  ;;  %v9320_v38 = vrot.slane %v17754_v52, 1 }
 0xb5b   : > { %7752 = vadd.xlane.f32.xlu1 %v7751_v53  ;;  %v17795_v58 = vpop.xlane.xlu0 %8981  ;;  %v9217_v53 = vadd.f32 %v9138_v29, %v9137_v3  ;;  %v8927_v3 = vmul.f32 %v16481_v62, %v17612_v18  ;;  %v7681_v29 = vmul.f32 %v16108_v36, %v17800_v12  ;;  %v9135_v63 = vmul.f32 %v20678_v0, %v17610_v31 }
 0xb5c   : > { %20750 = vst [vmem:[#allocation74_spill] sm:$0xff] %v17795_v58  ;;  %v17806_v54 = vpop.xlane.xlu1 %7948  ;;  %v9004_v58 = vadd.f32 %v8929_v35, %v8928_v40  ;;  %v20755_v40 = vrot.slane %v17612_v18, 2  ;;  %v7365_v62 = vadd.s32 112, %v20702_v60 }
 0xb5d   : > { %10572 = vadd.xlane.f32.xlu0 %v10571_v22  ;;  %v8067_v22 = vrot.slane %v17434_v33, 1  ;;  %v8728_v33 = vadd.f32 %v8654_v45, %v8653_v49  ;;  %v9136_v49 = vmul.f32 %v20679_v23, %v17612_v18  ;;  %v9001_v45 = vadd.f32 %v8927_v3, %v8926_v27 }
 0xb5e   : > { %v7891_v27 = vmul.f32 %v20688_v37, %v17804_v32  ;;  %v10420_v18 = vsel %vm17405_vm0, %v17637_v43, 0.0 }
 0xb5f   : > { %9919 = vadd.xlane.f32.xlu1 %v9918_v13  ;;  %v7682_v13 = vmul.f32 %v16111_v10, %v17804_v32  ;;  %v17824_v20 = vpop.xlane.xlu0 %7951  ;;  %v8070_v46 = vsel %vm8063_vm11, %v8067_v22, %v8069_v26  ;;  %v20754_v26 = vrot.slane %v17765_v7, 2  ;;  %v9214_v43 = vadd.f32 %v9136_v49, %v9135_v63  ;;  %v20758_v49 = vld [vmem:[#allocation12_spill] sm:$0xff] }
 0xb61   : > { %9218 = vadd.xlane.f32.xlu0 %v9217_v53  ;;  %v8164_v53 = vadd.f32 %v8072_v28, %v17476_v56  ;;  %v17833_v8 = vpop.xlane.xlu1 %10114  ;;  %v20753_v56 = vrot.slane %v17610_v31, 2  ;;  %v17847_v28 = vsel %vm8359_vm3, %v20755_v40, %v20754_v26  ;;  %v20756_v31 = vrot.slane %v17773_v19, 1 }
 0xb62   : > { %v10497_v40 = vmul.f32 %v20624_v61, %v10420_v18  ;;  %v20346_v18 = vrot.slane %v17800_v12, 2 }
 0xb63   : > { %8729 = vadd.xlane.f32.xlu1 %v8728_v33  ;;  %v8794_v52 = vadd.f32 %v17692_v24, %v8164_v53  ;;  %v17840_v35 = vsel %vm8359_vm3, %v20753_v56, %v20752_v1  ;;  %v7760_v24 = vadd.f32 %v7682_v13, %v7681_v29  ;;  %v9323_v3 = vsel %vm8063_vm11, %v9320_v38, %v20756_v31 }
 0xb64   : > { %v13120_v33 = vpop.eup %13119  ;;  %v10421_v29 = vsel %vm17405_vm0, %v17644_v15, 0.0  ;;  %v9502_v13 = vsel %vm17768_vm8, %v17840_v35, 0.0  ;;  %v9503_v56 = vsel %vm17768_vm8, %v17847_v28, 0.0 }
 0xb65   : > { %9005 = vadd.xlane.f32.xlu0 %v9004_v58  ;;  %v7890_v58 = vmul.f32 %v16144_v2, %v17800_v12  ;;  %v9067_v1 = vadd.f32 %v17726_v47, %v8794_v52  ;;  %v10810_v53 = vadd.f32 1.0, %v13120_v33  ;;  %v8163_v47 = vadd.f32 %v8070_v46, %v17436_v11 }
 0xb66   : > { %v9632_v26 = vpop.xlane.xlu0 %9631  ;;  %v10498_v59 = vmul.f32 %v20625_v51, %v10421_v29  ;;  %v9580_v33 = vmul.f32 %v20691_v41, %v9503_v56  ;;  %v20757_v11 = vrot.slane %v17299_v42, 1  ;;  %v9852_v42 = vmul.f32 %v20595_v4, %v17800_v12  ;;  %v20759_v29 = vld [vmem:[#allocation31_spill] sm:$0xff] }
 0xb67   : > { %9002 = vadd.xlane.f32.xlu1 %v9001_v45  ;;  %13121 = vrcp.f32 %v10810_v53  ;;  %v9415_v52 = vadd.f32 %v9323_v3, %v9067_v1  ;;  %v7974_v15 = vadd.f32 %v7891_v27, %v7890_v58  ;;  %v9579_v45 = vmul.f32 %v20690_v9, %v9502_v13 }
 0xb68   : > { %v8068_v46 = vsel %vm8063_vm11, %v20757_v11, %v8067_v22  ;;  %v8793_v63 = vadd.f32 %v17523_v34, %v8163_v47  ;;  %v10568_v27 = vadd.f32 %v10498_v59, %v10497_v40  ;;  %v9577_v3 = vmul.f32 %v20690_v9, %v17713_v48 }
 0xb69   : > { %7761 = vadd.xlane.f32.xlu0 %v7760_v24  ;;  %v9720_v31 = vadd.f32 %v9632_v26, %v9415_v52  ;;  %v7735_v19 = vpop.xlane.xlu1 %7734  ;;  %v20348_v24 = vrot.slane %v20758_v49, 1  ;;  %v9578_v1 = vmul.f32 %v20691_v41, %v17720_v55  ;;  %v9654_v53 = vadd.f32 %v9580_v33, %v9579_v45  ;;  %v20761_v52 = vld [vmem:[#allocation25_spill] sm:$0xff] }
 0xb6a   : > { %v9905_v57 = vpop.xlane.xlu0 %9904  ;;  %v9853_v34 = vmul.f32 %v20652_v50, %v17804_v32  ;;  %v9066_v13 = vadd.f32 %v20759_v29, %v8793_v63  ;;  %v7397_v55 = vand.u32 15, %v7365_v62  ;;  %v7888_v56 = vmul.f32 %v16144_v2, %v17763_v30 }
 0xb6b   : > { %9215 = vadd.xlane.f32.xlu1 %v9214_v43  ;;  %v17880_v58 = vadd.f32 %v9905_v57, %v9720_v31  ;;  %v20345_v57 = vrot.slane %v17804_v32, 2  ;;  %v9321_v48 = vsel %vm8063_vm11, %v20348_v24, %v9320_v38  ;;  %v7889_v26 = vmul.f32 %v20688_v37, %v17765_v7 }
 0xb6c   : > { %v10061_v47 = vmul.f32 %v20608_v14, %v17800_v12  ;;  %v10062_v62 = vmul.f32 %v20700_v16, %v17804_v32  ;;  %v8162_v43 = vadd.f32 %v8068_v46, %v20761_v52  ;;  %v8075_v40 = vrot.slane %v17806_v54, 1  ;;  %v20764_v54 = vld [vmem:[#allocation33_spill] sm:$0xff] }
 0xb6d   : > { %7975 = vadd.xlane.f32.xlu0 %v7974_v15  ;;  %v20344_v59 = vrot.slane %v17824_v20, 1  ;;  %v9651_v15 = vadd.f32 %v9578_v1, %v9577_v3  ;;  %v9414_v33 = vadd.f32 %v9321_v48, %v9066_v13  ;;  %v9927_v31 = vadd.f32 %v9853_v34, %v9852_v42 }
 0xb6e   : > { %v9902_v22 = vpop.xlane.xlu1 %9901  ;;  %v20762_v11 = vrot.slane %v17763_v30, 2  ;;  %vm17936_vm1 = vcmp.ge.s32.totalorder %v7397_v55, 1  ;;  %v7364_v34 = vadd.s32 104, %v20702_v60  ;;  %v7971_v29 = vadd.f32 %v7889_v26, %v7888_v56 }
 0xb6f   : > { %10569 = vadd.xlane.f32.xlu1 %v10568_v27  ;;  %v17911_v38 = vpop.xlane.xlu0 %10117  ;;  %v20763_v27 = vrot.slane %v17765_v7, 2  ;;  %v10140_v13 = vadd.f32 %v10062_v62, %v10061_v47  ;;  %v10059_v48 = vmul.f32 %v20608_v14, %v17763_v30  ;;  %v10060_v52 = vmul.f32 %v20700_v16, %v17765_v7 }
 0xb70   : > { %v17921_v63 = vsel %vm8359_vm3, %v20762_v11, %v20346_v18  ;;  %v20349_v3 = vrot.slane %v17911_v38, 1  ;;  %v8078_v55 = vsel %vm8063_vm11, %v8075_v40, %v20344_v59  ;;  %v9719_v56 = vadd.f32 %v17778_v6, %v9414_v33  ;;  %v20767_v11 = vld [vmem:[#allocation20_spill] sm:$0xff] }
 0xb71   : > { %9655 = vadd.xlane.f32.xlu0 %v9654_v53  ;;  %v13122_v45 = vpop.eup %13121  ;;  %v17928_v46 = vsel %vm8359_vm3, %v20763_v27, %v20345_v57  ;;  %v20347_v53 = vrot.slane %v20764_v54, 1  ;;  %v8167_v26 = vadd.f32 %v8078_v55, %v7735_v19  ;;  %v7603_v47 = vsel %vm17936_vm1, %v17763_v30, 0.0 }
 0xb72   : > { %10907 = vst.msk [vmem:[%s17901_s2] sm:$0xff] %vm10906_vm4, %v13122_v45  ;;  %v17934_v1 = vpop.xlane.xlu1 %7737  ;;  %v8659_v45 = vmul.f32 %v20669_v5, %v17921_v63  ;;  %v7604_v62 = vsel %vm17936_vm1, %v17765_v7, 0.0  ;;  %v8792_v27 = vadd.f32 %v20767_v11, %v8162_v43  ;;  %v7396_v6 = vand.u32 15, %v7364_v34 }
 0xb73   : > { %9652 = vadd.xlane.f32.xlu1 %v9651_v15  ;;  %v20350_v15 = vrot.slane %v17833_v8, 1  ;;  %v8076_v57 = vsel %vm8063_vm11, %v20347_v53, %v8075_v40  ;;  %v9992_v33 = vadd.f32 %v9902_v22, %v9719_v56  ;;  %v10137_v55 = vadd.f32 %v10060_v52, %v10059_v48  ;;  %v17980_v22 = vld [vmem:[#allocation9 + $0x100] sm:$0xff]  ;;  %v17986_v56 = vld [vmem:[#allocation9 + $0x108] sm:$0xff] }
 0xb74   : > { %v10503_v43 = vmul.f32 %v20624_v61, %v17921_v63  ;;  %v7680_v11 = vmul.f32 %v16111_v10, %v7604_v62  ;;  %v10504_v53 = vmul.f32 %v20625_v51, %v17928_v46  ;;  %v9773_v34 = vsel %vm17535_vm9, %v17763_v30, 0.0 }
 0xb75   : > { %9928 = vadd.xlane.f32.xlu0 %v9927_v31  ;;  %v8660_v31 = vmul.f32 %v20670_v21, %v17928_v46  ;;  %v10247_v19 = vsel %vm8063_vm11, %v20350_v15, %v20349_v3  ;;  %v9774_v52 = vsel %vm17535_vm9, %v17765_v7, 0.0  ;;  %v20770_v62 = vrot.slane %v20758_v49, 1 }
 0xb76   : > { %v10340_v48 = vadd.f32 %v10247_v19, %v9992_v33  ;;  %v20771_v3 = vrot.slane %v17511_v25, 1  ;;  %vm17994_vm10 = vcmp.le.s32.totalorder %v7396_v6, 14  ;;  %v9850_v7 = vmul.f32 %v20595_v4, %v9773_v34 }
 0xb77   : > { %7972 = vadd.xlane.f32.xlu1 %v7971_v29  ;;  %v7679_v29 = vmul.f32 %v16108_v36, %v7603_v47  ;;  %v10577_v49 = vadd.f32 %v10504_v53, %v10503_v43  ;;  %v9851_v25 = vmul.f32 %v20652_v50, %v9774_v52  ;;  %v8581_v33 = vsel %vm17994_vm10, %v17847_v28, 0.0 }
 0xb78   : > { %v8715_v59 = vpop.xlane.xlu0 %8714  ;;  %v9319_v30 = vsel %vm8063_vm11, %v20771_v3, %v20770_v62  ;;  %v9142_v3 = vmul.f32 %v20679_v23, %v17986_v56  ;;  %v8855_v43 = vsel %vm17936_vm1, %v17980_v22, 0.0  ;;  %v20778_v62 = vld [vmem:[#allocation65_spill] sm:$0xff] }
 0xb79   : > { %10141 = vadd.xlane.f32.xlu0 %v10140_v13  ;;  %v17969_v18 = vadd.f32 %v8715_v59, %v8167_v26  ;;  %v8712_v40 = vpop.xlane.xlu1 %8711  ;;  %v8737_v13 = vadd.f32 %v8660_v31, %v8659_v45  ;;  %v8166_v59 = vadd.f32 %v8076_v57, %v17672_v17  ;;  %v20769_v26 = vld [vmem:[#allocation28_spill] sm:$0xff]  ;;  %v20772_v45 = vmov 0 }
 0xb7a   : > { %v9065_v47 = vadd.f32 %v20769_v26, %v8792_v27  ;;  %v20773_v45 = vsel %vm17994_vm10, 4294967295, %v20772_v45  ;;  %v9141_v57 = vmul.f32 %v20678_v0, %v17980_v22  ;;  %v7757_v31 = vadd.f32 %v7680_v11, %v7679_v29 }
 0xb7b   : > { %10138 = vadd.xlane.f32.xlu1 %v10137_v55  ;;  %20774 = vst [vmem:[#allocation75_spill] sm:$0xff] %v20773_v45  ;;  %v8796_v17 = vadd.f32 %v8712_v40, %v8166_v59  ;;  %v8856_v29 = vsel %vm17936_vm1, %v17986_v56, 0.0  ;;  %v20776_v40 = vld [vmem:[#allocation34_spill] sm:$0xff]  ;;  %v9778_v45 = vsel %vm17722_vm6, %v17986_v56, 0.0 }
 0xb7c   : > { %v10555_v15 = vpop.xlane.xlu0 %10554  ;;  %v9413_v55 = vadd.f32 %v9319_v30, %v9065_v47  ;;  %v9223_v26 = vadd.f32 %v9142_v3, %v9141_v57  ;;  %v8932_v47 = vmul.f32 %v16478_v39, %v8855_v43  ;;  %v8933_v30 = vmul.f32 %v20778_v62, %v8856_v29 }
 0xb7d   : > { %8738 = vadd.xlane.f32.xlu0 %v8737_v13  ;;  %v10645_v24 = vadd.f32 %v10555_v15, %v10340_v48  ;;  %v8985_v27 = vpop.xlane.xlu1 %8984  ;;  %v8580_v15 = vsel %vm17994_vm10, %v17840_v35, 0.0  ;;  %v9924_v13 = vadd.f32 %v9851_v25, %v9850_v7  ;;  %v8658_v48 = vmul.f32 %v20670_v21, %v8581_v33  ;;  %v20781_v25 = vld [vmem:[#allocation36_spill] sm:$0xff] }
 0xb7e   : > { %v18005_v6 = vadd.f32 %v8985_v27, %v8796_v17  ;;  %v9718_v34 = vadd.f32 %v20776_v40, %v9413_v55  ;;  %v8657_v59 = vmul.f32 %v20669_v5, %v8580_v15  ;;  %v18028_v17 = vld [vmem:[#allocation9 + $0x110] sm:$0xff]  ;;  %v20780_v7 = vrot.slane %v17833_v8, 1 }
 0xb7f   : > { %v10684_v19 = vadd.f32 %v17747_v44, %v10645_v24  ;;  %7758 = vadd.xlane.f32.xlu1 %v7757_v31  ;;  %v18030_v24 = vld [vmem:[#allocation9 + $0x118] sm:$0xff]  ;;  %v20782_v27 = vrot.slane %v20781_v25, 1  ;;  %v8930_v57 = vmul.f32 %v16478_v39, %v17800_v12  ;;  %v8931_v3 = vmul.f32 %v20778_v62, %v17804_v32 }
 0xb80   : > { %20775 = vst [vmem:[#allocation39_spill] sm:$0xff] %v18005_v6  ;;  %v18013_v53 = vpop.xlane.xlu0 %9200  ;;  %v20779_v31 = vld [vmem:[#allocation35_spill] sm:$0xff]  ;;  %v8422_v15 = vrot.slane %v17980_v22, 2  ;;  %v8424_v33 = vrot.slane %v17986_v56, 2  ;;  %v8734_v55 = vadd.f32 %v8658_v48, %v8657_v59  ;;  %v7685_v8 = vmul.f32 %v16108_v36, %v18028_v17 }
 0xb81   : > { %10578 = vadd.xlane.f32.xlu0 %v10577_v49  ;;  %v11447_v11 = vmul.f32 -1.442695, %v10684_v19  ;;  %v18024_v52 = vpop.xlane.xlu1 %9197  ;;  %v9991_v49 = vadd.f32 %v20779_v31, %v9718_v34  ;;  %v10245_v19 = vsel %vm8063_vm11, %v20782_v27, %v20780_v7  ;;  %v7686_v29 = vmul.f32 %v16111_v10, %v18030_v24 }
 0xb82   : > { %20777 = vst [vmem:[#allocation40_spill] sm:$0xff] %v18024_v52  ;;  %v20783_v31 = vrot.slane %v17800_v12, 2  ;;  %v20784_v48 = vrot.slane %v17804_v32, 2  ;;  %v7894_v25 = vmul.f32 %v16144_v2, %v18028_v17 }
 0xb83   : > { %13123 = vpow2.f32 %v11447_v11  ;;  %9925 = vadd.xlane.f32.xlu1 %v9924_v13  ;;  %v9010_v11 = vadd.f32 %v8933_v30, %v8932_v47  ;;  %v10339_v40 = vadd.f32 %v10245_v19, %v9991_v49  ;;  %v9007_v13 = vadd.f32 %v8931_v3, %v8930_v57 }
 0xb84   : > { %v18044_v43 = vpop.xlane.xlu0 %8987  ;;  %v18055_v59 = vsel %vm8359_vm3, %v20783_v31, %v8422_v15  ;;  %v18062_v7 = vsel %vm8359_vm3, %v20784_v48, %v8424_v33  ;;  %v7766_v47 = vadd.f32 %v7686_v29, %v7685_v8  ;;  %v9139_v30 = vmul.f32 %v20678_v0, %v17800_v12 }
 0xb85   : > { %9224 = vadd.xlane.f32.xlu0 %v9223_v26  ;;  %v9140_v49 = vmul.f32 %v20679_v23, %v17804_v32  ;;  %v7895_v19 = vmul.f32 %v20688_v37, %v18030_v24  ;;  %v10424_v3 = vsel %vm17576_vm7, %v17840_v35, 0.0  ;;  %v9506_v32 = vsel %vm17994_vm10, %v18055_v59, 0.0 }
 0xb86   : > { %v9507_v8 = vsel %vm17994_vm10, %v18062_v7, 0.0  ;;  %v9583_v31 = vmul.f32 %v20690_v9, %v9506_v32  ;;  %v7367_v57 = vadd.s32 128, %v20702_v60 }
 0xb87   : > { %8735 = vadd.xlane.f32.xlu1 %v8734_v55  ;;  %v10552_v34 = vpop.xlane.xlu1 %10551  ;;  %v10425_v55 = vsel %vm17576_vm7, %v17847_v28, 0.0  ;;  %v10501_v28 = vmul.f32 %v20624_v61, %v10424_v3  ;;  %v9584_v48 = vmul.f32 %v20691_v41, %v9507_v8 }
 0xb88   : > { %v10644_v26 = vadd.f32 %v10552_v34, %v10339_v40  ;;  %v9220_v34 = vadd.f32 %v9140_v49, %v9139_v30  ;;  %v9582_v30 = vmul.f32 %v20691_v41, %v17928_v46  ;;  %v20786_v49 = vrot.slane %v20764_v54, 1 }
 0xb89   : > { %9011 = vadd.xlane.f32.xlu0 %v9010_v11  ;;  %v18079_v12 = vpop.xlane.xlu0 %7957  ;;  %v9660_v8 = vadd.f32 %v9584_v48, %v9583_v31  ;;  %v7893_v31 = vmul.f32 %v20688_v37, %v17986_v56 }
 0xb8a   : > { %v10683_v27 = vadd.f32 %v17747_v44, %v10644_v26  ;;  %v7980_v26 = vadd.f32 %v7895_v19, %v7894_v25  ;;  %v20351_v46 = vrot.slane %v18079_v12, 1 }
 0xb8b   : > { %9008 = vadd.xlane.f32.xlu1 %v9007_v13  ;;  %v18087_v40 = vpop.xlane.xlu1 %9634  ;;  %v10502_v13 = vmul.f32 %v20625_v51, %v10425_v55 }
 0xb8c   : > { %v11446_v11 = vmul.f32 -1.442695, %v10683_v27  ;;  %v20787_v27 = vld [vmem:[#allocation22_spill] sm:$0xff] }
 0xb8d   : > { %v13124_v29 = vpop.eup %13123  ;;  %7767 = vadd.xlane.f32.xlu0 %v7766_v47  ;;  %v9581_v47 = vmul.f32 %v20690_v9, %v17921_v63  ;;  %v20788_v3 = vrot.slane %v20787_v27, 1  ;;  %v10574_v55 = vadd.f32 %v10502_v13, %v10501_v28  ;;  %v9857_v63 = vmul.f32 %v20652_v50, %v18030_v24 }
 0xb8e   : > { %v10812_v35 = vadd.f32 1.0, %v13124_v29  ;;  %13125 = vpow2.f32 %v11446_v11  ;;  %v9856_v29 = vmul.f32 %v20595_v4, %v18028_v17  ;;  %v20353_v11 = vrot.slane %v18028_v17, 2 }
 0xb8f   : > { %9221 = vadd.xlane.f32.xlu1 %v9220_v34  ;;  %v8074_v25 = vsel %vm8063_vm11, %v20788_v3, %v20786_v49  ;;  %v7399_v34 = vand.u32 15, %v7367_v57  ;;  %v9657_v28 = vadd.f32 %v9582_v30, %v9581_v47  ;;  %v7892_v13 = vmul.f32 %v16144_v2, %v17980_v22 }
 0xb90   : > { %13127 = vrcp.f32 %v10812_v35  ;;  %v20352_v35 = vrot.slane %v18030_v24, 2  ;;  %v10065_v3 = vmul.f32 %v20608_v14, %v18028_v17  ;;  %v10066_v57 = vmul.f32 %v20700_v16, %v18030_v24 }
 0xb91   : > { %7981 = vadd.xlane.f32.xlu0 %v7980_v26  ;;  %v20790_v26 = vld [vmem:[#allocation32_spill] sm:$0xff]  ;;  %v20792_v47 = vrot.slane %v17824_v20, 1  ;;  %vm18149_vm13 = vcmp.ge.s32.totalorder %v7399_v34, 1  ;;  %v7977_v34 = vadd.f32 %v7893_v31, %v7892_v13  ;;  %v20798_v31 = vld [vmem:[#allocation74_spill] sm:$0xff] }
 0xb92   : > { %v18103_v19 = vpop.xlane.xlu0 %9637  ;;  %v7955_v32 = vpop.xlane.xlu1 %7954  ;;  %v8165_v49 = vadd.f32 %v8074_v25, %v20790_v26  ;;  %v20354_v25 = vrot.slane %v18024_v52, 1  ;;  %v18147_v20 = vsel %vm8359_vm3, %v8424_v33, %v20352_v35  ;;  %v10146_v35 = vadd.f32 %v10066_v57, %v10065_v3 }
 0xb93   : > { %20789 = vst [vmem:[#allocation41_spill] sm:$0xff] %v18103_v19  ;;  %10575 = vadd.xlane.f32.xlu1 %v10574_v55  ;;  %v8079_v54 = vrot.slane %v7955_v32, 1  ;;  %v9933_v32 = vadd.f32 %v9857_v63, %v9856_v29  ;;  %v7366_v63 = vadd.s32 120, %v20702_v60  ;;  %v7608_v13 = vsel %vm18149_vm13, %v17986_v56, 0.0 }
 0xb94   : > { %v9777_v19 = vsel %vm17722_vm6, %v17980_v22, 0.0 }
 0xb95   : > { %9661 = vadd.xlane.f32.xlu0 %v9660_v8  ;;  %v8082_v27 = vsel %vm8063_vm11, %v8079_v54, %v20351_v46  ;;  %v8080_v30 = vsel %vm8063_vm11, %v20792_v47, %v8079_v54  ;;  %v18137_v8 = vsel %vm8359_vm3, %v8422_v15, %v20353_v11  ;;  %v20795_v54 = vld [vmem:[#allocation37_spill] sm:$0xff]  ;;  %v7398_v57 = vand.u32 15, %v7366_v63 }
 0xb96   : > { %v18117_v48 = vpop.xlane.xlu0 %9910  ;;  %v18130_v55 = vpop.xlane.xlu1 %10120  ;;  %v18140_v26 = vadd.f32 %v8080_v30, %v17934_v1  ;;  %v8795_v47 = vadd.f32 %v20795_v54, %v8165_v49  ;;  %v10063_v1 = vmul.f32 %v20608_v14, %v17980_v22  ;;  %v8663_v11 = vmul.f32 %v20669_v5, %v18137_v8  ;;  %v20796_v49 = vld [vmem:[#allocation38_spill] sm:$0xff] }
 0xb97   : > { %20791 = vst [vmem:[#allocation14_spill] sm:$0xff] %v18117_v48  ;;  %9658 = vadd.xlane.f32.xlu1 %v9657_v28  ;;  %v10064_v28 = vmul.f32 %v20700_v16, %v17986_v56  ;;  %v8664_v48 = vmul.f32 %v20670_v21, %v18147_v20  ;;  %v7684_v63 = vmul.f32 %v16111_v10, %v7608_v13  ;;  %vm18200_vm2 = vcmp.le.s32.totalorder %v7398_v57, 14 }
 0xb98   : > { %v13126_v15 = vpop.eup %13125  ;;  %v9068_v3 = vadd.f32 %v20798_v31, %v8795_v47  ;;  %v18195_v31 = vld [vmem:[#allocation9 + $0x128] sm:$0xff]  ;;  %v8585_v57 = vsel %vm18200_vm2, %v18062_v7, 0.0 }
 0xb99   : > { %9934 = vadd.xlane.f32.xlu0 %v9933_v32  ;;  %v10811_v46 = vadd.f32 1.0, %v13126_v15  ;;  %v20797_v32 = vrot.slane %v20796_v49, 1  ;;  %v7607_v15 = vsel %vm18149_vm13, %v17980_v22, 0.0  ;;  %v10143_v49 = vadd.f32 %v10064_v28, %v10063_v1 }
 0xb9a   : > { %v13128_v30 = vpop.eup %13127  ;;  %v18159_v33 = vpop.xlane.xlu0 %10123  ;;  %v20359_v1 = vrot.slane %v18130_v55, 1  ;;  %v10508_v22 = vmul.f32 %v20625_v51, %v18147_v20 }
 0xb9b   : > { %10909 = vst.msk [vmem:[%s17901_s2 + $0x10] sm:$0xff] %vm10906_vm4, %v13128_v30  ;;  %v9325_v54 = vsel %vm8063_vm11, %v20797_v32, %v20354_v25  ;;  %13129 = vrcp.f32 %v10811_v46  ;;  %7978 = vadd.xlane.f32.xlu1 %v7977_v34  ;;  %v10507_v32 = vmul.f32 %v20624_v61, %v18137_v8  ;;  %v7683_v46 = vmul.f32 %v16108_v36, %v7607_v15 }
 0xb9c   : > { %v7741_v30 = vpop.xlane.xlu1 %7740  ;;  %v9416_v6 = vadd.f32 %v9325_v54, %v9068_v3  ;;  %v20358_v28 = vrot.slane %v18159_v33, 1  ;;  %v8743_v34 = vadd.f32 %v8664_v48, %v8663_v11  ;;  %v20800_v25 = vmov 0 }
 0xb9d   : > { %10147 = vadd.xlane.f32.xlu0 %v10146_v35  ;;  %v8169_v52 = vadd.f32 %v8082_v27, %v7741_v30  ;;  %v18189_v35 = vld [vmem:[#allocation9 + $0x120] sm:$0xff]  ;;  %v20801_v25 = vsel %vm18200_vm2, 4294967295, %v20800_v25  ;;  %v9854_v15 = vmul.f32 %v20595_v4, %v9777_v19  ;;  %v7763_v3 = vadd.f32 %v7684_v63, %v7683_v46 }
 0xb9e   : > { %v8721_v47 = vpop.xlane.xlu0 %8720  ;;  %v9721_v56 = vadd.f32 %v18087_v40, %v9416_v6  ;;  %20802 = vst [vmem:[#allocation42_spill] sm:$0xff] %v20801_v25  ;;  %v9145_v11 = vmul.f32 %v20678_v0, %v18189_v35  ;;  %v9855_v30 = vmul.f32 %v20652_v50, %v9778_v45  ;;  %v9146_v6 = vmul.f32 %v20679_v23, %v18195_v31 }
 0xb9f   : > { %v18198_v27 = vadd.f32 %v8721_v47, %v8169_v52  ;;  %10144 = vadd.xlane.f32.xlu1 %v10143_v49  ;;  %v10251_v52 = vsel %vm8063_vm11, %v20359_v1, %v20358_v28  ;;  %v10583_v40 = vadd.f32 %v10508_v22, %v10507_v32  ;;  %v8584_v19 = vsel %vm18200_vm2, %v18055_v59, 0.0  ;;  %v18239_v1 = vld [vmem:[#allocation9 + $0x138] sm:$0xff] }
 0xba0   : > { %v9908_v54 = vpop.xlane.xlu1 %9907  ;;  %v8859_v49 = vsel %vm18149_vm13, %v18189_v35, 0.0  ;;  %v8860_v47 = vsel %vm18149_vm13, %v18195_v31, 0.0  ;;  %v9930_v22 = vadd.f32 %v9855_v30, %v9854_v15  ;;  %v8934_v15 = vmul.f32 %v16478_v39, %v18028_v17 }
 0xba1   : > { %8744 = vadd.xlane.f32.xlu0 %v8743_v34  ;;  %v9994_v48 = vadd.f32 %v9908_v54, %v9721_v56  ;;  %v8661_v56 = vmul.f32 %v20669_v5, %v8584_v19  ;;  %v8662_v54 = vmul.f32 %v20670_v21, %v8585_v57  ;;  %v8937_v28 = vmul.f32 %v20778_v62, %v8860_v47 }
 0xba2   : > { %v10561_v13 = vpop.xlane.xlu0 %10560  ;;  %v20360_v19 = vrot.slane %v18195_v31, 2 }
 0xba3   : > { %v10342_v45 = vadd.f32 %v10251_v52, %v9994_v48  ;;  %7764 = vadd.xlane.f32.xlu1 %v7763_v3  ;;  %v18233_v48 = vld [vmem:[#allocation9 + $0x130] sm:$0xff]  ;;  %v9229_v3 = vadd.f32 %v9146_v6, %v9145_v11  ;;  %v8936_v52 = vmul.f32 %v16478_v39, %v8859_v49  ;;  %v20361_v6 = vrot.slane %v18189_v35, 2 }
 0xba4   : > { %v18227_v32 = vpop.xlane.xlu1 %7743  ;;  %v7689_v11 = vmul.f32 %v16108_v36, %v18233_v48  ;;  %v8740_v47 = vadd.f32 %v8662_v54, %v8661_v56  ;;  %v20805_v56 = vrot.slane %v18030_v24, 2 }
 0xba5   : > { %10584 = vadd.xlane.f32.xlu0 %v10583_v40  ;;  %v13130_v46 = vpop.eup %13129  ;;  %v10647_v63 = vadd.f32 %v10561_v13, %v10342_v45  ;;  %v8935_v40 = vmul.f32 %v20778_v62, %v18030_v24 }
 0xba6   : > { %v18229_v34 = vpop.xlane.xlu0 %9206  ;;  %10908 = vst.msk [vmem:[%s17901_s2 + $0x8] sm:$0xff] %vm10906_vm4, %v13130_v46  ;;  %v7690_v46 = vmul.f32 %v16111_v10, %v18239_v1 }
 0xba7   : > { %v10686_v13 = vadd.f32 %v17747_v44, %v10647_v63  ;;  %9931 = vadd.xlane.f32.xlu1 %v9930_v22  ;;  %v9016_v63 = vadd.f32 %v8937_v28, %v8936_v52  ;;  %v18269_v28 = vsel %vm8359_vm3, %v20805_v56, %v20360_v19  ;;  %v10428_v56 = vsel %vm17768_vm8, %v18055_v59, 0.0 }
 0xba8   : > { %v8718_v30 = vpop.xlane.xlu1 %8717  ;;  %v20810_v59 = vrot.slane %v17911_v38, 1 }
 0xba9   : > { %9230 = vadd.xlane.f32.xlu0 %v9229_v3  ;;  %v11449_v57 = vmul.f32 -1.442695, %v10686_v13  ;;  %v8798_v45 = vadd.f32 %v8718_v30, %v18140_v26  ;;  %v9143_v3 = vmul.f32 %v20678_v0, %v18028_v17  ;;  %v20804_v13 = vrot.slane %v18028_v17, 2 }
 0xbaa   : > { %v18251_v49 = vpop.xlane.xlu0 %8993  ;;  %v9013_v30 = vadd.f32 %v8935_v40, %v8934_v15  ;;  %v7898_v17 = vmul.f32 %v16144_v2, %v18233_v48 }
 0xbab   : > { %20803 = vst [vmem:[#allocation76_spill] sm:$0xff] %v18251_v49  ;;  %13131 = vpow2.f32 %v11449_v57  ;;  %8741 = vadd.xlane.f32.xlu1 %v8740_v47  ;;  %v18262_v26 = vsel %vm8359_vm3, %v20804_v13, %v20361_v6  ;;  %v7772_v57 = vadd.f32 %v7690_v46, %v7689_v11  ;;  %v9144_v47 = vmul.f32 %v20679_v23, %v18030_v24 }
 0xbac   : > { %v8991_v22 = vpop.xlane.xlu1 %8990  ;;  %v9510_v15 = vsel %vm18200_vm2, %v18262_v26, 0.0  ;;  %v9511_v24 = vsel %vm18200_vm2, %v18269_v28, 0.0  ;;  %v20809_v11 = vrot.slane %v18130_v55, 1  ;;  %v7369_v55 = vadd.s32 144, %v20702_v60 }
 0xbad   : > { %9017 = vadd.xlane.f32.xlu0 %v9016_v63  ;;  %v18271_v54 = vadd.f32 %v8991_v22, %v8798_v45  ;;  %v7899_v63 = vmul.f32 %v20688_v37, %v18239_v1  ;;  %v10429_v45 = vsel %vm17768_vm8, %v18062_v7, 0.0  ;;  %v9226_v7 = vadd.f32 %v9144_v47, %v9143_v3 }
 0xbae   : > { %v18273_v52 = vpop.xlane.xlu0 %7749  ;;  %v10249_v46 = vsel %vm8063_vm11, %v20810_v59, %v20809_v11  ;;  %v10506_v13 = vmul.f32 %v20625_v51, %v10429_v45  ;;  %v9587_v6 = vmul.f32 %v20690_v9, %v9510_v15  ;;  %v9588_v25 = vmul.f32 %v20691_v41, %v9511_v24 }
 0xbaf   : > { %20806 = vst [vmem:[#allocation77_spill] sm:$0xff] %v18271_v54  ;;  %9014 = vadd.xlane.f32.xlu1 %v9013_v30  ;;  %v10505_v30 = vmul.f32 %v20624_v61, %v10428_v56  ;;  %v7986_v19 = vadd.f32 %v7899_v63, %v7898_v17  ;;  %v9585_v11 = vmul.f32 %v20690_v9, %v18137_v8  ;;  %v20364_v59 = vrot.slane %v18239_v1, 2 }
 0xbb0   : > { %v18293_v40 = vpop.xlane.xlu1 %9203  ;;  %v9586_v17 = vmul.f32 %v20691_v41, %v18147_v20  ;;  %v9860_v63 = vmul.f32 %v20595_v4, %v18233_v48  ;;  %v9861_v24 = vmul.f32 %v20652_v50, %v18239_v1  ;;  %v7896_v20 = vmul.f32 %v16144_v2, %v18189_v35 }
 0xbb1   : > { %20808 = vst [vmem:[#allocation43_spill] sm:$0xff] %v18293_v40  ;;  %7773 = vadd.xlane.f32.xlu0 %v7772_v57  ;;  %v10341_v57 = vadd.f32 %v10249_v46, %v17880_v58  ;;  %v10580_v45 = vadd.f32 %v10506_v13, %v10505_v30  ;;  %v9666_v58 = vadd.f32 %v9588_v25, %v9587_v6  ;;  %v7401_v46 = vand.u32 15, %v7369_v55 }
 0xbb2   : > { %v18300_v22 = vpop.xlane.xlu0 %7963  ;;  %v7897_v25 = vmul.f32 %v20688_v37, %v18195_v31  ;;  %v9663_v13 = vadd.f32 %v9586_v17, %v9585_v11  ;;  %v9939_v55 = vadd.f32 %v9861_v24, %v9860_v63  ;;  %v20814_v11 = vrot.slane %v18195_v31, 2 }
 0xbb3   : > { %9227 = vadd.xlane.f32.xlu1 %v9226_v7  ;;  %vm18347_vm14 = vcmp.ge.s32.totalorder %v7401_v46, 1  ;;  %v7368_v17 = vadd.s32 136, %v20702_v60  ;;  %v10068_v24 = vmul.f32 %v20700_v16, %v18195_v31 }
 0xbb4   : > { %v10558_v38 = vpop.xlane.xlu1 %10557 }
 0xbb5   : > { %7987 = vadd.xlane.f32.xlu0 %v7986_v19  ;;  %v13132_v3 = vpop.eup %13131  ;;  %v10646_v47 = vadd.f32 %v10558_v38, %v10341_v57  ;;  %v20365_v19 = vrot.slane %v18233_v48, 2  ;;  %v10070_v57 = vmul.f32 %v20700_v16, %v18239_v1  ;;  %v20813_v38 = vrot.slane %v18189_v35, 2 }
 0xbb6   : > { %v18310_v56 = vpop.xlane.xlu0 %9643  ;;  %v10814_v15 = vadd.f32 1.0, %v13132_v3 }
 0xbb7   : > { %20811 = vst [vmem:[#allocation44_spill] sm:$0xff] %v18310_v56  ;;  %v10685_v8 = vadd.f32 %v17747_v44, %v10646_v47  ;;  %10581 = vadd.xlane.f32.xlu1 %v10580_v45  ;;  %v10069_v44 = vmul.f32 %v20608_v14, %v18233_v48  ;;  %v18338_v3 = vsel %vm8359_vm3, %v20813_v38, %v20365_v19  ;;  %v20815_v45 = vmov 0 }
 0xbb8   : > { %13133 = vrcp.f32 %v10814_v15  ;;  %v18321_v7 = vpop.xlane.xlu1 %9640  ;;  %v18345_v47 = vsel %vm8359_vm3, %v20814_v11, %v20364_v59  ;;  %v20816_v45 = vsel %vm18347_vm14, 4294967295, %v20815_v45  ;;  %v7983_v15 = vadd.f32 %v7897_v25, %v7896_v20 }
 0xbb9   : > { %9667 = vadd.xlane.f32.xlu0 %v9666_v58  ;;  %v11448_v6 = vmul.f32 -1.442695, %v10685_v8  ;;  %20817 = vst [vmem:[#allocation46_spill] sm:$0xff] %v20816_v45  ;;  %v10067_v58 = vmul.f32 %v20608_v14, %v18189_v35  ;;  %v20366_v8 = vrot.slane %v18300_v22, 1  ;;  %v10152_v46 = vadd.f32 %v10070_v57, %v10069_v44 }
 0xbba   : > { %v18327_v30 = vpop.xlane.xlu0 %9916  ;;  %v8667_v38 = vmul.f32 %v20669_v5, %v18338_v3  ;;  %v8668_v20 = vmul.f32 %v20670_v21, %v18345_v47  ;;  %v7611_v25 = vsel %vm18347_vm14, %v18189_v35, 0.0  ;;  %v20818_v57 = vrot.slane %v18079_v12, 1 }
 0xbbb   : > { %20812 = vst [vmem:[#allocation45_spill] sm:$0xff] %v18327_v30  ;;  %13135 = vpow2.f32 %v11448_v6  ;;  %9664 = vadd.xlane.f32.xlu1 %v9663_v13  ;;  %v7400_v19 = vand.u32 15, %v7368_v17  ;;  %v10149_v30 = vadd.f32 %v10068_v24, %v10067_v58  ;;  %v10511_v56 = vmul.f32 %v20624_v61, %v18338_v3  ;;  %v18392_v24 = vld [vmem:[#allocation9 + $0x140] sm:$0xff] }
 0xbbc   : > { %v7961_v63 = vpop.xlane.xlu1 %7960  ;;  %v9781_v17 = vsel %vm17936_vm1, %v18189_v35, 0.0  ;;  %v9782_v58 = vsel %vm17936_vm1, %v18195_v31, 0.0  ;;  %v20820_v35 = vmov 0 }
 0xbbd   : > { %9940 = vadd.xlane.f32.xlu0 %v9939_v55  ;;  %v8083_v6 = vrot.slane %v7961_v63, 1  ;;  %v7612_v55 = vsel %vm18347_vm14, %v18195_v31, 0.0  ;;  %v9326_v63 = vrot.slane %v18013_v53, 1  ;;  %v10512_v53 = vmul.f32 %v20625_v51, %v18345_v47 }
 0xbbe   : > { %v18357_v13 = vpop.xlane.xlu0 %10129  ;;  %v7688_v12 = vmul.f32 %v16111_v10, %v7612_v55  ;;  %vm18403_vm15 = vcmp.le.s32.totalorder %v7400_v19, 14  ;;  %v9858_v55 = vmul.f32 %v20595_v4, %v9781_v17 }
 0xbbf   : > { %7984 = vadd.xlane.f32.xlu1 %v7983_v15  ;;  %v8086_v44 = vsel %vm8063_vm11, %v8083_v6, %v20366_v8  ;;  %v8084_v59 = vsel %vm8063_vm11, %v20818_v57, %v8083_v6  ;;  %v7687_v8 = vmul.f32 %v16108_v36, %v7611_v25  ;;  %v18397_v57 = vld [vmem:[#allocation9 + $0x148] sm:$0xff]  ;;  %v9070_v25 = vadd.f32 %v18044_v43, %v17969_v18 }
 0xbc0   : > { %v18377_v11 = vpop.xlane.xlu1 %10126  ;;  %v8170_v15 = vadd.f32 %v8084_v59, %v18227_v32  ;;  %v8749_v59 = vadd.f32 %v8668_v20, %v8667_v38  ;;  %v20821_v35 = vsel %vm18403_vm15, 4294967295, %v20820_v35  ;;  %v10589_v31 = vadd.f32 %v10512_v53, %v10511_v56 }
 0xbc1   : > { %10153 = vadd.xlane.f32.xlu0 %v10152_v46  ;;  %v20819_v46 = vrot.slane %v18293_v40, 1  ;;  %20822 = vst [vmem:[#allocation21_spill] sm:$0xff] %v20821_v35  ;;  %v9149_v38 = vmul.f32 %v20678_v0, %v18392_v24  ;;  %v9150_v19 = vmul.f32 %v20679_v23, %v18397_v57  ;;  %v20369_v49 = vrot.slane %v18377_v11, 1 }
 0xbc2   : > { %v8727_v54 = vpop.xlane.xlu0 %8726  ;;  %v13134_v6 = vpop.eup %13133  ;;  %v8588_v56 = vsel %vm18403_vm15, %v18262_v26, 0.0  ;;  %v8589_v53 = vsel %vm18403_vm15, %v18269_v28, 0.0 }
 0xbc3   : > { %v9329_v32 = vsel %vm8063_vm11, %v9326_v63, %v20819_v46  ;;  %10911 = vst.msk [vmem:[%s17901_s2 + $0x20] sm:$0xff] %vm10906_vm4, %v13134_v6  ;;  %10150 = vadd.xlane.f32.xlu1 %v10149_v30  ;;  %v9859_v46 = vmul.f32 %v20652_v50, %v9782_v58  ;;  %v7769_v6 = vadd.f32 %v7688_v12, %v7687_v8  ;;  %v8863_v8 = vsel %vm18347_vm14, %v18392_v24, 0.0 }
 0xbc4   : > { %v7747_v42 = vpop.xlane.xlu1 %7746  ;;  %v9418_v40 = vadd.f32 %v9329_v32, %v9070_v25  ;;  %v8864_v12 = vsel %vm18347_vm14, %v18397_v57, 0.0  ;;  %v20368_v58 = vrot.slane %v18357_v13, 1 }
 0xbc5   : > { %8750 = vadd.xlane.f32.xlu0 %v8749_v59  ;;  %v13136_v20 = vpop.eup %13135  ;;  %v8171_v18 = vadd.f32 %v8086_v44, %v7747_v42  ;;  %v18434_v42 = vld [vmem:[#allocation9 + $0x150] sm:$0xff] }
 0xbc6   : > { %v10567_v43 = vpop.xlane.xlu0 %10566  ;;  %v10813_v30 = vadd.f32 1.0, %v13136_v20  ;;  %v9723_v17 = vadd.f32 %v18321_v7, %v9418_v40  ;;  %v9936_v40 = vadd.f32 %v9859_v46, %v9858_v55  ;;  %v8666_v7 = vmul.f32 %v20670_v21, %v8589_v53  ;;  %v20824_v55 = vld [vmem:[#allocation40_spill] sm:$0xff] }
 0xbc7   : > { %7770 = vadd.xlane.f32.xlu1 %v7769_v6  ;;  %v18421_v44 = vadd.f32 %v8727_v54, %v8171_v18  ;;  %v8665_v54 = vmul.f32 %v20669_v5, %v8588_v56  ;;  %v10255_v20 = vsel %vm8063_vm11, %v20369_v49, %v20368_v58  ;;  %v9235_v18 = vadd.f32 %v9150_v19, %v9149_v38  ;;  %v18461_v49 = vld [vmem:[#allocation10] ss:$0 sm:$0xff] }
 0xbc8   : > { %13137 = vrcp.f32 %v10813_v30  ;;  %v9914_v32 = vpop.xlane.xlu1 %9913  ;;  %v8940_v6 = vmul.f32 %v16478_v39, %v8863_v8  ;;  %v18443_v30 = vld [vmem:[#allocation9 + $0x158] sm:$0xff]  ;;  %v20825_v46 = vrot.slane %v20824_v55, 1  ;;  %v8939_v38 = vmul.f32 %v20778_v62, %v18239_v1 }
 0xbc9   : > { %20823 = vst [vmem:[#allocation47_spill] sm:$0xff] %v18421_v44  ;;  %10590 = vadd.xlane.f32.xlu0 %v10589_v31  ;;  %v9996_v59 = vadd.f32 %v9914_v32, %v9723_v17  ;;  %v8941_v31 = vmul.f32 %v20778_v62, %v8864_v12  ;;  %v8938_v17 = vmul.f32 %v16478_v39, %v18233_v48  ;;  %v20372_v8 = vrot.slane %v18392_v24, 2 }
 0xbca   : > { %v18430_v25 = vpop.xlane.xlu0 %9212  ;;  %v9327_v56 = vsel %vm8063_vm11, %v20825_v46, %v9326_v63  ;;  %v7693_v19 = vmul.f32 %v16108_v36, %v18434_v42 }
 0xbcb   : > { %v10344_v53 = vadd.f32 %v10255_v20, %v9996_v59  ;;  %9937 = vadd.xlane.f32.xlu1 %v9936_v40  ;;  %v8746_v59 = vadd.f32 %v8666_v7, %v8665_v54  ;;  %v7694_v40 = vmul.f32 %v16111_v10, %v18443_v30  ;;  %v9022_v20 = vadd.f32 %v8941_v31, %v8940_v6 }
 0xbcc   : > { %v8724_v32 = vpop.xlane.xlu1 %8723  ;;  %v9019_v12 = vadd.f32 %v8939_v38, %v8938_v17  ;;  %v20828_v7 = vrot.slane %v18397_v57, 2  ;;  %v20829_v6 = vrot.slane %v18239_v1, 2  ;;  %v9148_v38 = vmul.f32 %v20679_v23, %v18239_v1 }
 0xbcd   : > { %9236 = vadd.xlane.f32.xlu0 %v9235_v18  ;;  %v10649_v55 = vadd.f32 %v10567_v43, %v10344_v53  ;;  %v8800_v58 = vadd.f32 %v8724_v32, %v8170_v15  ;;  %v20826_v18 = vld [vmem:[#allocation39_spill] sm:$0xff]  ;;  %v9147_v15 = vmul.f32 %v20678_v0, %v18233_v48  ;;  %v20827_v43 = vrot.slane %v18233_v48, 2 }
 0xbce   : > { %v18456_v63 = vpop.xlane.xlu0 %8999  ;;  %v9417_v46 = vadd.f32 %v9327_v56, %v20826_v18  ;;  %v18478_v31 = vsel %vm8359_vm3, %v20829_v6, %v20828_v7  ;;  %v7778_v32 = vadd.f32 %v7694_v40, %v7693_v19  ;;  %v10432_v18 = vsel %vm17994_vm10, %v18262_v26, 0.0 }
 0xbcf   : > { %v10688_v44 = vadd.f32 %v18461_v49, %v10649_v55  ;;  %8747 = vadd.xlane.f32.xlu1 %v8746_v59  ;;  %v18471_v54 = vsel %vm8359_vm3, %v20827_v43, %v20372_v8  ;;  %v7902_v55 = vmul.f32 %v16144_v2, %v18434_v42  ;;  %v7903_v59 = vmul.f32 %v20688_v37, %v18443_v30  ;;  %v20836_v43 = vld [vmem:[#allocation14_spill] sm:$0xff] }
 0xbd0   : > { %v8997_v45 = vpop.xlane.xlu1 %8996  ;;  %v9514_v1 = vsel %vm18403_vm15, %v18471_v54, 0.0  ;;  %v9515_v19 = vsel %vm18403_vm15, %v18478_v31, 0.0  ;;  %v20834_v26 = vrot.slane %v18377_v11, 1  ;;  %v9232_v6 = vadd.f32 %v9148_v38, %v9147_v15 }
 0xbd1   : > { %9023 = vadd.xlane.f32.xlu0 %v9022_v20  ;;  %v11451_v56 = vmul.f32 -1.442695, %v10688_v44  ;;  %v18480_v53 = vadd.f32 %v8997_v45, %v8800_v58  ;;  %v10433_v45 = vsel %vm17994_vm10, %v18269_v28, 0.0  ;;  %v20832_v44 = vld [vmem:[#allocation41_spill] sm:$0xff]  ;;  %v20835_v28 = vrot.slane %v18159_v33, 1 }
 0xbd2   : > { %v18482_v17 = vpop.xlane.xlu0 %7755  ;;  %v13138_v48 = vpop.eup %13137  ;;  %v9722_v58 = vadd.f32 %v20832_v44, %v9417_v46  ;;  %v7992_v20 = vadd.f32 %v7903_v59, %v7902_v55  ;;  %v9591_v44 = vmul.f32 %v20690_v9, %v9514_v1  ;;  %v7371_v33 = vadd.s32 160, %v20702_v60 }
 0xbd3   : > { %20830 = vst [vmem:[#allocation13_spill] sm:$0xff] %v18480_v53  ;;  %10910 = vst.msk [vmem:[%s17901_s2 + $0x18] sm:$0xff] %vm10906_vm4, %v13138_v48  ;;  %13139 = vpow2.f32 %v11451_v56  ;;  %9020 = vadd.xlane.f32.xlu1 %v9019_v12  ;;  %v10253_v46 = vsel %vm8063_vm11, %v20835_v28, %v20834_v26  ;;  %v10509_v56 = vmul.f32 %v20624_v61, %v10432_v18 }
 0xbd4   : > { %v18505_v40 = vpop.xlane.xlu1 %9209  ;;  %v9995_v7 = vadd.f32 %v20836_v43, %v9722_v58  ;;  %v10510_v48 = vmul.f32 %v20625_v51, %v10433_v45  ;;  %v9589_v58 = vmul.f32 %v20690_v9, %v18338_v3  ;;  %v9590_v15 = vmul.f32 %v20691_v41, %v18345_v47 }
 0xbd5   : > { %20833 = vst [vmem:[#allocation64_spill] sm:$0xff] %v18505_v40  ;;  %7779 = vadd.xlane.f32.xlu0 %v7778_v32  ;;  %v9592_v32 = vmul.f32 %v20691_v41, %v9515_v19  ;;  %v9864_v45 = vmul.f32 %v20595_v4, %v18434_v42  ;;  %v9865_v1 = vmul.f32 %v20652_v50, %v18443_v30  ;;  %v20374_v19 = vrot.slane %v18434_v42, 2 }
 0xbd6   : > { %v18513_v12 = vpop.xlane.xlu0 %7969  ;;  %v10343_v11 = vadd.f32 %v10253_v46, %v9995_v7  ;;  %v10586_v55 = vadd.f32 %v10510_v48, %v10509_v56  ;;  %v20373_v3 = vrot.slane %v18443_v30, 2  ;;  %v7403_v28 = vand.u32 15, %v7371_v33 }
 0xbd7   : > { %9233 = vadd.xlane.f32.xlu1 %v9232_v6  ;;  %v9672_v59 = vadd.f32 %v9592_v32, %v9591_v44  ;;  %v7900_v46 = vmul.f32 %v16144_v2, %v18392_v24  ;;  %v7901_v43 = vmul.f32 %v20688_v37, %v18397_v57  ;;  %v10073_v48 = vmul.f32 %v20608_v14, %v18434_v42 }
 0xbd8   : > { %v10564_v8 = vpop.xlane.xlu1 %10563  ;;  %v10071_v44 = vmul.f32 %v20608_v14, %v18392_v24  ;;  %v10072_v33 = vmul.f32 %v20700_v16, %v18397_v57  ;;  %vm18563_vm12 = vcmp.ge.s32.totalorder %v7403_v28, 1 }
 0xbd9   : > { %7993 = vadd.xlane.f32.xlu0 %v7992_v20  ;;  %v10648_v38 = vadd.f32 %v10564_v8, %v10343_v11  ;;  %v9669_v8 = vadd.f32 %v9590_v15, %v9589_v58  ;;  %v10074_v20 = vmul.f32 %v20700_v16, %v18443_v30  ;;  %v9945_v11 = vadd.f32 %v9865_v1, %v9864_v45 }
 0xbda   : > { %v18524_v18 = vpop.xlane.xlu0 %9649  ;;  %v20839_v58 = vrot.slane %v18392_v24, 2  ;;  %v7370_v45 = vadd.s32 152, %v20702_v60 }
 0xbdb   : > { %20837 = vst [vmem:[#allocation48_spill] sm:$0xff] %v18524_v18  ;;  %v10687_v26 = vadd.f32 %v18461_v49, %v10648_v38  ;;  %10587 = vadd.xlane.f32.xlu1 %v10586_v55  ;;  %v20840_v38 = vrot.slane %v18397_v57, 2  ;;  %v20846_v18 = vmov 0 }
 0xbdc   : > { %v18533_v47 = vpop.xlane.xlu1 %9646  ;;  %v18554_v15 = vsel %vm8359_vm3, %v20839_v58, %v20374_v19  ;;  %v10158_v58 = vadd.f32 %v10074_v20, %v10073_v48  ;;  %v20843_v20 = vrot.slane %v18300_v22, 1  ;;  %v9330_v19 = vrot.slane %v18229_v34, 1 }
 0xbdd   : > { %9673 = vadd.xlane.f32.xlu0 %v9672_v59  ;;  %v13140_v7 = vpop.eup %13139  ;;  %v11450_v6 = vmul.f32 -1.442695, %v10687_v26  ;;  %v18561_v55 = vsel %vm8359_vm3, %v20840_v38, %v20373_v3  ;;  %v7989_v26 = vadd.f32 %v7901_v43, %v7900_v46  ;;  %v8671_v38 = vmul.f32 %v20669_v5, %v18554_v15 }
 0xbde   : > { %v18539_v56 = vpop.xlane.xlu0 %9922  ;;  %v10816_v32 = vadd.f32 1.0, %v13140_v7  ;;  %v20375_v7 = vrot.slane %v18513_v12, 1  ;;  %v8672_v3 = vmul.f32 %v20670_v21, %v18561_v55  ;;  %v7616_v46 = vsel %vm18563_vm12, %v18397_v57, 0.0 }
 0xbdf   : > { %20838 = vst [vmem:[#allocation49_spill] sm:$0xff] %v18539_v56  ;;  %13141 = vpow2.f32 %v11450_v6  ;;  %9670 = vadd.xlane.f32.xlu1 %v9669_v8  ;;  %v10155_v43 = vadd.f32 %v10072_v33, %v10071_v44  ;;  %v10515_v56 = vmul.f32 %v20624_v61, %v18554_v15  ;;  %v10516_v44 = vmul.f32 %v20625_v51, %v18561_v55 }
 0xbe0   : > { %13143 = vrcp.f32 %v10816_v32  ;;  %v7967_v1 = vpop.xlane.xlu1 %7966  ;;  %v7615_v32 = vsel %vm18563_vm12, %v18392_v24, 0.0  ;;  %v7692_v22 = vmul.f32 %v16111_v10, %v7616_v46  ;;  %v9785_v34 = vsel %vm18149_vm13, %v18392_v24, 0.0 }
 0xbe1   : > { %9946 = vadd.xlane.f32.xlu0 %v9945_v11  ;;  %v8087_v8 = vrot.slane %v7967_v1, 1  ;;  %v7402_v1 = vand.u32 15, %v7370_v45  ;;  %v9786_v45 = vsel %vm18149_vm13, %v18397_v57, 0.0  ;;  %v10595_v29 = vadd.f32 %v10516_v44, %v10515_v56 }
 0xbe2   : > { %v18569_v6 = vpop.xlane.xlu0 %10135  ;;  %v9862_v57 = vmul.f32 %v20595_v4, %v9785_v34  ;;  %v9863_v35 = vmul.f32 %v20652_v50, %v9786_v45 }
 0xbe3   : > { %7990 = vadd.xlane.f32.xlu1 %v7989_v26  ;;  %v8090_v48 = vsel %vm8063_vm11, %v8087_v8, %v20375_v7  ;;  %v8088_v11 = vsel %vm8063_vm11, %v20843_v20, %v8087_v8  ;;  %v7691_v7 = vmul.f32 %v16108_v36, %v7615_v32  ;;  %v18604_v8 = vld [vmem:[#allocation9 + $0x160] sm:$0xff]  ;;  %vm18613_vm0 = vcmp.le.s32.totalorder %v7402_v1, 14 }
 0xbe4   : > { %v18589_v28 = vpop.xlane.xlu1 %10132  ;;  %v8172_v33 = vadd.f32 %v8088_v11, %v18273_v52  ;;  %v8755_v52 = vadd.f32 %v8672_v3, %v8671_v38  ;;  %v18609_v11 = vld [vmem:[#allocation9 + $0x168] sm:$0xff]  ;;  %v20845_v32 = vld [vmem:[#allocation76_spill] sm:$0xff]  ;;  %v20847_v18 = vsel %vm18613_vm0, 4294967295, %v20846_v18  ;;  %v9153_v3 = vmul.f32 %v20678_v0, %v18604_v8 }
 0xbe5   : > { %10159 = vadd.xlane.f32.xlu0 %v10158_v58  ;;  %v20844_v58 = vrot.slane %v18505_v40, 1  ;;  %v9072_v46 = vadd.f32 %v20845_v32, %v18198_v27  ;;  %20848 = vst [vmem:[#allocation50_spill] sm:$0xff] %v20847_v18  ;;  %v9154_v1 = vmul.f32 %v20679_v23, %v18609_v11  ;;  %v8592_v56 = vsel %vm18613_vm0, %v18471_v54, 0.0 }
 0xbe6   : > { %v8733_v26 = vpop.xlane.xlu0 %8732  ;;  %v8593_v44 = vsel %vm18613_vm0, %v18478_v31, 0.0  ;;  %v8868_v34 = vsel %vm18563_vm12, %v18609_v11, 0.0  ;;  %v20379_v45 = vrot.slane %v18569_v6, 1  ;;  %v20874_v18 = vmov 0 }
 0xbe7   : > { %v9333_v20 = vsel %vm8063_vm11, %v9330_v19, %v20844_v58  ;;  %10156 = vadd.xlane.f32.xlu1 %v10155_v43  ;;  %v7775_v43 = vadd.f32 %v7692_v22, %v7691_v7  ;;  %v8867_v22 = vsel %vm18563_vm12, %v18604_v8, 0.0 }
 0xbe8   : > { %v7753_v24 = vpop.xlane.xlu1 %7752  ;;  %v9420_v58 = vadd.f32 %v9333_v20, %v9072_v46 }
 0xbe9   : > { %8756 = vadd.xlane.f32.xlu0 %v8755_v52  ;;  %v13142_v38 = vpop.eup %13141  ;;  %v8173_v53 = vadd.f32 %v8090_v48, %v7753_v24  ;;  %v20380_v52 = vrot.slane %v18589_v28, 1 }
 0xbea   : > { %v10573_v27 = vpop.xlane.xlu0 %10572  ;;  %v13144_v32 = vpop.eup %13143  ;;  %v10815_v40 = vadd.f32 1.0, %v13142_v38  ;;  %v9725_v48 = vadd.f32 %v18533_v47, %v9420_v58  ;;  %v9942_v47 = vadd.f32 %v9863_v35, %v9862_v57  ;;  %v18646_v38 = vld [vmem:[#allocation9 + $0x170] sm:$0xff]  ;;  %v9241_v58 = vadd.f32 %v9154_v1, %v9153_v3 }
 0xbeb   : > { %10913 = vst.msk [vmem:[%s17901_s2 + $0x30] sm:$0xff] %vm10906_vm4, %v13144_v32  ;;  %7776 = vadd.xlane.f32.xlu1 %v7775_v43  ;;  %v18633_v7 = vadd.f32 %v8733_v26, %v8173_v53  ;;  %v8669_v53 = vmul.f32 %v20669_v5, %v8592_v56  ;;  %v8670_v26 = vmul.f32 %v20670_v21, %v8593_v44  ;;  %v18655_v32 = vld [vmem:[#allocation9 + $0x178] sm:$0xff] }
 0xbec   : > { %13145 = vrcp.f32 %v10815_v40  ;;  %v9920_v20 = vpop.xlane.xlu1 %9919  ;;  %v10259_v40 = vsel %vm8063_vm11, %v20380_v52, %v20379_v45  ;;  %v8944_v43 = vmul.f32 %v16478_v39, %v8867_v22  ;;  %v8942_v57 = vmul.f32 %v16478_v39, %v18434_v42  ;;  %v20850_v44 = vld [vmem:[#allocation43_spill] sm:$0xff] }
 0xbed   : > { %20849 = vst [vmem:[#allocation51_spill] sm:$0xff] %v18633_v7  ;;  %10596 = vadd.xlane.f32.xlu0 %v10595_v29  ;;  %v9998_v46 = vadd.f32 %v9920_v20, %v9725_v48  ;;  %v8945_v29 = vmul.f32 %v20778_v62, %v8868_v34  ;;  %v8943_v56 = vmul.f32 %v20778_v62, %v18443_v30  ;;  %v20851_v48 = vrot.slane %v20850_v44, 1  ;;  %v20853_v7 = vld [vmem:[#allocation77_spill] sm:$0xff] }
 0xbee   : > { %v18642_v24 = vpop.xlane.xlu0 %9218  ;;  %v7697_v3 = vmul.f32 %v16108_v36, %v18646_v38  ;;  %v20381_v22 = vrot.slane %v18609_v11, 2  ;;  %v7698_v52 = vmul.f32 %v16111_v10, %v18655_v32 }
 0xbef   : > { %v10346_v35 = vadd.f32 %v10259_v40, %v9998_v46  ;;  %9943 = vadd.xlane.f32.xlu1 %v9942_v47  ;;  %v9331_v20 = vsel %vm8063_vm11, %v20851_v48, %v9330_v19  ;;  %v8752_v40 = vadd.f32 %v8670_v26, %v8669_v53  ;;  %v9028_v44 = vadd.f32 %v8945_v29, %v8944_v43 }
 0xbf0   : > { %v8730_v45 = vpop.xlane.xlu1 %8729  ;;  %v9419_v19 = vadd.f32 %v9331_v20, %v20853_v7  ;;  %v9025_v1 = vadd.f32 %v8943_v56, %v8942_v57  ;;  %v20856_v7 = vrot.slane %v18443_v30, 2  ;;  %v7784_v57 = vadd.f32 %v7698_v52, %v7697_v3 }
 0xbf1   : > { %9242 = vadd.xlane.f32.xlu0 %v9241_v58  ;;  %v10651_v34 = vadd.f32 %v10573_v27, %v10346_v35  ;;  %v8802_v46 = vadd.f32 %v8730_v45, %v8172_v33  ;;  %v9151_v27 = vmul.f32 %v20678_v0, %v18434_v42  ;;  %v20854_v33 = vrot.slane %v18604_v8, 2 }
 0xbf2   : > { %v18668_v47 = vpop.xlane.xlu0 %9005  ;;  %v20855_v45 = vrot.slane %v18434_v42, 2  ;;  %v18688_v26 = vsel %vm8359_vm3, %v20856_v7, %v20381_v22  ;;  %v9152_v56 = vmul.f32 %v20679_v23, %v18443_v30  ;;  %v7906_v20 = vmul.f32 %v16144_v2, %v18646_v38 }
 0xbf3   : > { %20852 = vst [vmem:[#allocation18_spill] sm:$0xff] %v18668_v47  ;;  %v10690_v58 = vadd.f32 %v18461_v49, %v10651_v34  ;;  %8753 = vadd.xlane.f32.xlu1 %v8752_v40  ;;  %v7907_v34 = vmul.f32 %v20688_v37, %v18655_v32  ;;  %v9519_v3 = vsel %vm18613_vm0, %v18688_v26, 0.0 }
 0xbf4   : > { %v9003_v48 = vpop.xlane.xlu1 %9002  ;;  %v18681_v53 = vsel %vm8359_vm3, %v20855_v45, %v20854_v33  ;;  %v20863_v33 = vld [vmem:[#allocation45_spill] sm:$0xff]  ;;  %v9238_v7 = vadd.f32 %v9152_v56, %v9151_v27  ;;  %v9594_v27 = vmul.f32 %v20691_v41, %v18561_v55 }
 0xbf5   : > { %9029 = vadd.xlane.f32.xlu0 %v9028_v44  ;;  %v11453_v43 = vmul.f32 -1.442695, %v10690_v58  ;;  %v18690_v29 = vadd.f32 %v9003_v48, %v8802_v46  ;;  %v10436_v44 = vsel %vm18200_vm2, %v18471_v54, 0.0  ;;  %v10437_v46 = vsel %vm18200_vm2, %v18478_v31, 0.0  ;;  %v20859_v58 = vld [vmem:[#allocation44_spill] sm:$0xff] }
 0xbf6   : > { %v18692_v35 = vpop.xlane.xlu0 %7761  ;;  %v13146_v42 = vpop.eup %13145  ;;  %v9724_v52 = vadd.f32 %v20859_v58, %v9419_v19  ;;  %v9518_v30 = vsel %vm18613_vm0, %v18681_v53, 0.0  ;;  %v20861_v54 = vrot.slane %v18589_v28, 1  ;;  %v20862_v31 = vrot.slane %v18357_v13, 1 }
 0xbf7   : > { %20857 = vst [vmem:[#allocation19_spill] sm:$0xff] %v18690_v29  ;;  %10912 = vst.msk [vmem:[%s17901_s2 + $0x28] sm:$0xff] %vm10906_vm4, %v13146_v42  ;;  %13147 = vpow2.f32 %v11453_v43  ;;  %9026 = vadd.xlane.f32.xlu1 %v9025_v1  ;;  %v10513_v43 = vmul.f32 %v20624_v61, %v10436_v44  ;;  %v10514_v42 = vmul.f32 %v20625_v51, %v10437_v46  ;;  %v7373_v13 = vadd.s32 176, %v20702_v60 }
 0xbf8   : > { %v18715_v48 = vpop.xlane.xlu1 %9215  ;;  %v10257_v19 = vsel %vm8063_vm11, %v20862_v31, %v20861_v54  ;;  %v9997_v45 = vadd.f32 %v20863_v33, %v9724_v52  ;;  %v7998_v40 = vadd.f32 %v7907_v34, %v7906_v20  ;;  %v9595_v58 = vmul.f32 %v20690_v9, %v9518_v30 }
 0xbf9   : > { %20860 = vst [vmem:[#allocation52_spill] sm:$0xff] %v18715_v48  ;;  %7785 = vadd.xlane.f32.xlu0 %v7784_v57  ;;  %v9596_v57 = vmul.f32 %v20691_v41, %v9519_v3  ;;  %v9593_v52 = vmul.f32 %v20690_v9, %v18554_v15  ;;  %v10592_v20 = vadd.f32 %v10514_v42, %v10513_v43  ;;  %v20383_v3 = vrot.slane %v18646_v38, 2 }
 0xbfa   : > { %v18723_v1 = vpop.xlane.xlu0 %7975  ;;  %v10345_v28 = vadd.f32 %v10257_v19, %v9997_v45  ;;  %v9868_v34 = vmul.f32 %v20595_v4, %v18646_v38  ;;  %v9869_v46 = vmul.f32 %v20652_v50, %v18655_v32  ;;  %v20382_v15 = vrot.slane %v18655_v32, 2 }
 0xbfb   : > { %9239 = vadd.xlane.f32.xlu1 %v9238_v7  ;;  %v9678_v30 = vadd.f32 %v9596_v57, %v9595_v58  ;;  %v7405_v31 = vand.u32 15, %v7373_v13  ;;  %v7904_v19 = vmul.f32 %v16144_v2, %v18604_v8  ;;  %v7905_v33 = vmul.f32 %v20688_v37, %v18609_v11 }
 0xbfc   : > { %v10570_v22 = vpop.xlane.xlu1 %10569  ;;  %v9951_v42 = vadd.f32 %v9869_v46, %v9868_v34  ;;  %v10078_v58 = vmul.f32 %v20700_v16, %v18655_v32  ;;  %v10076_v13 = vmul.f32 %v20700_v16, %v18609_v11  ;;  %v7372_v46 = vadd.s32 168, %v20702_v60 }
 0xbfd   : > { %7999 = vadd.xlane.f32.xlu0 %v7998_v40  ;;  %v10650_v56 = vadd.f32 %v10570_v22, %v10345_v28  ;;  %v9675_v22 = vadd.f32 %v9594_v27, %v9593_v52  ;;  %v10077_v40 = vmul.f32 %v20608_v14, %v18646_v38  ;;  %v10075_v28 = vmul.f32 %v20608_v14, %v18604_v8 }
 0xbfe   : > { %v18734_v44 = vpop.xlane.xlu0 %9655  ;;  %v20866_v52 = vrot.slane %v18604_v8, 2  ;;  %vm18773_vm5 = vcmp.ge.s32.totalorder %v7405_v31, 1 }
 0xbff   : > { %20864 = vst [vmem:[#allocation53_spill] sm:$0xff] %v18734_v44  ;;  %v10689_v54 = vadd.f32 %v18461_v49, %v10650_v56  ;;  %10593 = vadd.xlane.f32.xlu1 %v10592_v20  ;;  %v20867_v56 = vrot.slane %v18609_v11, 2 }
 0xc00   : > { %v18743_v55 = vpop.xlane.xlu1 %9652  ;;  %v18764_v27 = vsel %vm8359_vm3, %v20866_v52, %v20383_v3  ;;  %v10164_v52 = vadd.f32 %v10078_v58, %v10077_v40  ;;  %v20870_v40 = vrot.slane %v18513_v12, 1  ;;  %v9334_v3 = vrot.slane %v18430_v25, 1 }
 0xc01   : > { %9679 = vadd.xlane.f32.xlu0 %v9678_v30  ;;  %v13148_v45 = vpop.eup %13147  ;;  %v11452_v7 = vmul.f32 -1.442695, %v10689_v54  ;;  %v18771_v20 = vsel %vm8359_vm3, %v20867_v56, %v20382_v15  ;;  %v7995_v54 = vadd.f32 %v7905_v33, %v7904_v19  ;;  %v8675_v56 = vmul.f32 %v20669_v5, %v18764_v27 }
 0xc02   : > { %v18749_v43 = vpop.xlane.xlu0 %9928  ;;  %v10818_v57 = vadd.f32 1.0, %v13148_v45  ;;  %v20384_v45 = vrot.slane %v18723_v1, 1  ;;  %v8676_v15 = vmul.f32 %v20670_v21, %v18771_v20  ;;  %v7620_v19 = vsel %vm18773_vm5, %v18609_v11, 0.0 }
 0xc03   : > { %20865 = vst [vmem:[#allocation54_spill] sm:$0xff] %v18749_v43  ;;  %13149 = vpow2.f32 %v11452_v7  ;;  %9676 = vadd.xlane.f32.xlu1 %v9675_v22  ;;  %v10161_v33 = vadd.f32 %v10076_v13, %v10075_v28  ;;  %v10519_v43 = vmul.f32 %v20624_v61, %v18764_v27  ;;  %v10520_v28 = vmul.f32 %v20625_v51, %v18771_v20 }
 0xc04   : > { %13151 = vrcp.f32 %v10818_v57  ;;  %v7973_v30 = vpop.xlane.xlu1 %7972  ;;  %v7619_v57 = vsel %vm18773_vm5, %v18604_v8, 0.0  ;;  %v7696_v12 = vmul.f32 %v16111_v10, %v7620_v19  ;;  %v9789_v25 = vsel %vm18347_vm14, %v18604_v8, 0.0 }
 0xc05   : > { %9952 = vadd.xlane.f32.xlu0 %v9951_v42  ;;  %v8091_v22 = vrot.slane %v7973_v30, 1  ;;  %v7404_v30 = vand.u32 15, %v7372_v46  ;;  %v9866_v46 = vmul.f32 %v20595_v4, %v9789_v25 }
 0xc06   : > { %v18779_v7 = vpop.xlane.xlu0 %10141 }
 0xc07   : > { %7996 = vadd.xlane.f32.xlu1 %v7995_v54  ;;  %v8094_v42 = vsel %vm8063_vm11, %v8091_v22, %v20384_v45  ;;  %v8092_v58 = vsel %vm8063_vm11, %v20870_v40, %v8091_v22  ;;  %v7695_v45 = vmul.f32 %v16108_v36, %v7619_v57  ;;  %v9790_v22 = vsel %vm18347_vm14, %v18609_v11, 0.0  ;;  %v20873_v57 = vld [vmem:[#allocation47_spill] sm:$0xff] }
 0xc08   : > { %v18799_v31 = vpop.xlane.xlu1 %10138  ;;  %v8174_v13 = vadd.f32 %v8092_v58, %v18482_v17  ;;  %v20872_v40 = vrot.slane %v18715_v48, 1  ;;  %v8761_v17 = vadd.f32 %v8676_v15, %v8675_v56  ;;  %v18819_v58 = vld [vmem:[#allocation9 + $0x188] sm:$0xff]  ;;  %v9074_v19 = vadd.f32 %v18456_v63, %v20873_v57 }
 0xc09   : > { %10165 = vadd.xlane.f32.xlu0 %v10164_v52  ;;  %v18814_v52 = vld [vmem:[#allocation9 + $0x180] sm:$0xff]  ;;  %vm18823_vm9 = vcmp.le.s32.totalorder %v7404_v30, 14  ;;  %v10601_v11 = vadd.f32 %v10520_v28, %v10519_v43  ;;  %v9867_v29 = vmul.f32 %v20652_v50, %v9790_v22  ;;  %v9158_v30 = vmul.f32 %v20679_v23, %v18819_v58 }
 0xc0a   : > { %v8739_v54 = vpop.xlane.xlu0 %8738  ;;  %v9337_v44 = vsel %vm8063_vm11, %v9334_v3, %v20872_v40  ;;  %v20875_v18 = vsel %vm18823_vm9, 4294967295, %v20874_v18  ;;  %v9157_v15 = vmul.f32 %v20678_v0, %v18814_v52  ;;  %v8596_v43 = vsel %vm18823_vm9, %v18681_v53, 0.0 }
 0xc0b   : > { %10162 = vadd.xlane.f32.xlu1 %v10161_v33  ;;  %20876 = vst [vmem:[#allocation66_spill] sm:$0xff] %v20875_v18  ;;  %v9422_v40 = vadd.f32 %v9337_v44, %v9074_v19  ;;  %v7781_v33 = vadd.f32 %v7696_v12, %v7695_v45  ;;  %v8597_v28 = vsel %vm18823_vm9, %v18688_v26, 0.0  ;;  %v8872_v12 = vsel %vm18773_vm5, %v18819_v58, 0.0 }
 0xc0c   : > { %v7759_v8 = vpop.xlane.xlu1 %7758  ;;  %v20388_v25 = vrot.slane %v18779_v7, 1 }
 0xc0d   : > { %8762 = vadd.xlane.f32.xlu0 %v8761_v17  ;;  %v13150_v56 = vpop.eup %13149  ;;  %v8175_v48 = vadd.f32 %v8094_v42, %v7759_v8  ;;  %v20389_v17 = vrot.slane %v18799_v31, 1  ;;  %v9727_v44 = vadd.f32 %v18743_v55, %v9422_v40  ;;  %v8871_v42 = vsel %vm18773_vm5, %v18814_v52, 0.0 }
 0xc0e   : > { %v10579_v63 = vpop.xlane.xlu0 %10578  ;;  %v13152_v57 = vpop.eup %13151  ;;  %v10817_v47 = vadd.f32 1.0, %v13150_v56  ;;  %v9948_v55 = vadd.f32 %v9867_v29, %v9866_v46  ;;  %v9247_v40 = vadd.f32 %v9158_v30, %v9157_v15  ;;  %v8946_v29 = vmul.f32 %v16478_v39, %v18646_v38  ;;  %v18865_v46 = vld [vmem:[#allocation9 + $0x190] sm:$0xff] }
 0xc0f   : > { %10915 = vst.msk [vmem:[%s17901_s2 + $0x40] sm:$0xff] %vm10906_vm4, %v13152_v57  ;;  %7782 = vadd.xlane.f32.xlu1 %v7781_v33  ;;  %v18843_v45 = vadd.f32 %v8739_v54, %v8175_v48  ;;  %v8673_v48 = vmul.f32 %v20669_v5, %v8596_v43  ;;  %v8674_v54 = vmul.f32 %v20670_v21, %v8597_v28  ;;  %v18867_v57 = vld [vmem:[#allocation9 + $0x198] sm:$0xff] }
 0xc10   : > { %13153 = vrcp.f32 %v10817_v47  ;;  %v9926_v22 = vpop.xlane.xlu1 %9925  ;;  %v10263_v56 = vsel %vm8063_vm11, %v20389_v17, %v20388_v25  ;;  %v8948_v47 = vmul.f32 %v16478_v39, %v8871_v42  ;;  %v8949_v33 = vmul.f32 %v20778_v62, %v8872_v12  ;;  %v20878_v43 = vld [vmem:[#allocation64_spill] sm:$0xff] }
 0xc11   : > { %20877 = vst [vmem:[#allocation67_spill] sm:$0xff] %v18843_v45  ;;  %10602 = vadd.xlane.f32.xlu0 %v10601_v11  ;;  %v10000_v19 = vadd.f32 %v9926_v22, %v9727_v44  ;;  %v20879_v28 = vrot.slane %v20878_v43, 1  ;;  %v8947_v15 = vmul.f32 %v20778_v62, %v18655_v32  ;;  %v20390_v42 = vrot.slane %v18819_v58, 2 }
 0xc12   : > { %v18852_v8 = vpop.xlane.xlu0 %9224  ;;  %v9034_v25 = vadd.f32 %v8949_v33, %v8948_v47  ;;  %v7701_v43 = vmul.f32 %v16108_v36, %v18865_v46  ;;  %v20884_v33 = vrot.slane %v18655_v32, 2 }
 0xc13   : > { %v10348_v11 = vadd.f32 %v10263_v56, %v10000_v19  ;;  %9949 = vadd.xlane.f32.xlu1 %v9948_v55  ;;  %v9335_v44 = vsel %vm8063_vm11, %v20879_v28, %v9334_v3  ;;  %v8758_v56 = vadd.f32 %v8674_v54, %v8673_v48  ;;  %v7702_v3 = vmul.f32 %v16111_v10, %v18867_v57 }
 0xc14   : > { %v8736_v22 = vpop.xlane.xlu1 %8735  ;;  %v20882_v48 = vrot.slane %v18814_v52, 2  ;;  %v20883_v54 = vrot.slane %v18646_v38, 2 }
 0xc15   : > { %9248 = vadd.xlane.f32.xlu0 %v9247_v40  ;;  %v10653_v12 = vadd.f32 %v10579_v63, %v10348_v11  ;;  %v8804_v19 = vadd.f32 %v8736_v22, %v8174_v13  ;;  %v20881_v40 = vld [vmem:[#allocation13_spill] sm:$0xff]  ;;  %v9031_v63 = vadd.f32 %v8947_v15, %v8946_v29  ;;  %v9155_v13 = vmul.f32 %v20678_v0, %v18646_v38 }
 0xc16   : > { %v18876_v55 = vpop.xlane.xlu0 %9011  ;;  %v9421_v28 = vadd.f32 %v9335_v44, %v20881_v40  ;;  %v18891_v47 = vsel %vm8359_vm3, %v20883_v54, %v20882_v48  ;;  %v18898_v11 = vsel %vm8359_vm3, %v20884_v33, %v20390_v42  ;;  %v9156_v22 = vmul.f32 %v20679_v23, %v18655_v32  ;;  %v20891_v54 = vld [vmem:[#allocation49_spill] sm:$0xff] }
 0xc17   : > { %20880 = vst [vmem:[#allocation55_spill] sm:$0xff] %v18876_v55  ;;  %v10692_v17 = vadd.f32 %v18461_v49, %v10653_v12  ;;  %8759 = vadd.xlane.f32.xlu1 %v8758_v56  ;;  %v7910_v38 = vmul.f32 %v16144_v2, %v18865_v46  ;;  %v7790_v12 = vadd.f32 %v7702_v3, %v7701_v43  ;;  %v10440_v48 = vsel %vm18403_vm15, %v18681_v53, 0.0 }
 0xc18   : > { %v9009_v30 = vpop.xlane.xlu1 %9008  ;;  %v7911_v56 = vmul.f32 %v20688_v37, %v18867_v57  ;;  %v9522_v32 = vsel %vm18823_vm9, %v18891_v47, 0.0  ;;  %v9523_v43 = vsel %vm18823_vm9, %v18898_v11, 0.0  ;;  %v20889_v53 = vrot.slane %v18799_v31, 1 }
 0xc19   : > { %9035 = vadd.xlane.f32.xlu0 %v9034_v25  ;;  %v11455_v25 = vmul.f32 -1.442695, %v10692_v17  ;;  %v18900_v44 = vadd.f32 %v9009_v30, %v8804_v19  ;;  %v10441_v17 = vsel %vm18403_vm15, %v18688_v26, 0.0  ;;  %v20887_v30 = vld [vmem:[#allocation48_spill] sm:$0xff]  ;;  %v20890_v26 = vrot.slane %v18569_v6, 1 }
 0xc1a   : > { %v18902_v29 = vpop.xlane.xlu0 %7767  ;;  %v13154_v15 = vpop.eup %13153  ;;  %v9726_v19 = vadd.f32 %v20887_v30, %v9421_v28  ;;  %v10518_v40 = vmul.f32 %v20625_v51, %v10441_v17  ;;  %v8004_v30 = vadd.f32 %v7911_v56, %v7910_v38  ;;  %v9599_v42 = vmul.f32 %v20690_v9, %v9522_v32 }
 0xc1b   : > { %20885 = vst [vmem:[#allocation56_spill] sm:$0xff] %v18900_v44  ;;  %10914 = vst.msk [vmem:[%s17901_s2 + $0x38] sm:$0xff] %vm10906_vm4, %v13154_v15  ;;  %13155 = vpow2.f32 %v11455_v25  ;;  %9032 = vadd.xlane.f32.xlu1 %v9031_v63  ;;  %v10261_v28 = vsel %vm8063_vm11, %v20890_v26, %v20889_v53  ;;  %v9244_v25 = vadd.f32 %v9156_v22, %v9155_v13  ;;  %v7375_v6 = vadd.s32 192, %v20702_v60 }
 0xc1c   : > { %v18925_v3 = vpop.xlane.xlu1 %9221  ;;  %v9999_v33 = vadd.f32 %v20891_v54, %v9726_v19  ;;  %v10517_v15 = vmul.f32 %v20624_v61, %v10440_v48  ;;  %v9597_v19 = vmul.f32 %v20690_v9, %v18764_v27  ;;  %v9598_v13 = vmul.f32 %v20691_v41, %v18771_v20 }
 0xc1d   : > { %20888 = vst [vmem:[#allocation57_spill] sm:$0xff] %v18925_v3  ;;  %7791 = vadd.xlane.f32.xlu0 %v7790_v12  ;;  %v9600_v12 = vmul.f32 %v20691_v41, %v9523_v43  ;;  %v9872_v56 = vmul.f32 %v20595_v4, %v18865_v46  ;;  %v9873_v17 = vmul.f32 %v20652_v50, %v18867_v57  ;;  %v20394_v43 = vrot.slane %v18865_v46, 2 }
 0xc1e   : > { %v18933_v63 = vpop.xlane.xlu0 %7981  ;;  %v10347_v31 = vadd.f32 %v10261_v28, %v9999_v33  ;;  %v10598_v38 = vadd.f32 %v10518_v40, %v10517_v15  ;;  %v20393_v27 = vrot.slane %v18867_v57, 2  ;;  %v7407_v26 = vand.u32 15, %v7375_v6 }
 0xc1f   : > { %9245 = vadd.xlane.f32.xlu1 %v9244_v25  ;;  %v9684_v32 = vadd.f32 %v9600_v12, %v9599_v42  ;;  %v7908_v28 = vmul.f32 %v16144_v2, %v18814_v52  ;;  %v7909_v54 = vmul.f32 %v20688_v37, %v18819_v58  ;;  %v9957_v15 = vadd.f32 %v9873_v17, %v9872_v56 }
 0xc20   : > { %v10576_v18 = vpop.xlane.xlu1 %10575  ;;  %v10081_v40 = vmul.f32 %v20608_v14, %v18865_v46  ;;  %v10080_v6 = vmul.f32 %v20700_v16, %v18819_v58  ;;  %vm18983_vm7 = vcmp.ge.s32.totalorder %v7407_v26, 1  ;;  %v7374_v17 = vadd.s32 184, %v20702_v60 }
 0xc21   : > { %8005 = vadd.xlane.f32.xlu0 %v8004_v30  ;;  %v10652_v22 = vadd.f32 %v10576_v18, %v10347_v31  ;;  %v9681_v18 = vadd.f32 %v9598_v13, %v9597_v19  ;;  %v10082_v30 = vmul.f32 %v20700_v16, %v18867_v57  ;;  %v10079_v31 = vmul.f32 %v20608_v14, %v18814_v52 }
 0xc22   : > { %v18944_v48 = vpop.xlane.xlu0 %9661  ;;  %v20894_v19 = vrot.slane %v18814_v52, 2  ;;  %v20899_v59 = vrot.slane %v18925_v3, 1  ;;  %vm20993_vm15 = vcmask 1040384  }
 0xc23   : > { %20892 = vst [vmem:[#allocation72_spill] sm:$0xff] %v18944_v48  ;;  %v10691_v53 = vadd.f32 %v18461_v49, %v10652_v22  ;;  %10599 = vadd.xlane.f32.xlu1 %v10598_v38  ;;  %v20895_v22 = vrot.slane %v18819_v58, 2 }
 0xc24   : > { %v18953_v20 = vpop.xlane.xlu1 %9658  ;;  %v18974_v13 = vsel %vm8359_vm3, %v20894_v19, %v20394_v43  ;;  %v10170_v19 = vadd.f32 %v10082_v30, %v10081_v40  ;;  %v20898_v40 = vrot.slane %v18723_v1, 1  ;;  %v9338_v43 = vrot.slane %v18642_v24, 1 }
 0xc25   : > { %9685 = vadd.xlane.f32.xlu0 %v9684_v32  ;;  %v13156_v33 = vpop.eup %13155  ;;  %v11454_v42 = vmul.f32 -1.442695, %v10691_v53  ;;  %v18981_v38 = vsel %vm8359_vm3, %v20895_v22, %v20393_v27  ;;  %v8001_v53 = vadd.f32 %v7909_v54, %v7908_v28  ;;  %v8679_v22 = vmul.f32 %v20669_v5, %v18974_v13 }
 0xc26   : > { %v18959_v25 = vpop.xlane.xlu0 %9934  ;;  %v10820_v12 = vadd.f32 1.0, %v13156_v33  ;;  %v20395_v33 = vrot.slane %v18933_v63, 1  ;;  %v8680_v27 = vmul.f32 %v20670_v21, %v18981_v38  ;;  %v7624_v28 = vsel %vm18983_vm7, %v18819_v58, 0.0 }
 0xc27   : > { %20893 = vst [vmem:[#allocation58_spill] sm:$0xff] %v18959_v25  ;;  %13157 = vpow2.f32 %v11454_v42  ;;  %9682 = vadd.xlane.f32.xlu1 %v9681_v18  ;;  %v10167_v54 = vadd.f32 %v10080_v6, %v10079_v31  ;;  %v9793_v25 = vsel %vm18563_vm12, %v18814_v52, 0.0  ;;  %v9794_v31 = vsel %vm18563_vm12, %v18819_v58, 0.0  ;;  %vm20994_vm12 = vmmov %vm20993_vm15 }
 0xc28   : > { %13159 = vrcp.f32 %v10820_v12  ;;  %v7979_v32 = vpop.xlane.xlu1 %7978  ;;  %v7623_v12 = vsel %vm18983_vm7, %v18814_v52, 0.0  ;;  %v10523_v24 = vmul.f32 %v20624_v61, %v18974_v13  ;;  %v19026_v52 = vld [vmem:[#allocation9 + $0x1a8] sm:$0xff]  ;;  %v9341_v58 = vsel %vm8063_vm11, %v9338_v43, %v20899_v59 }
 0xc29   : > { %9958 = vadd.xlane.f32.xlu0 %v9957_v15  ;;  %v8095_v18 = vrot.slane %v7979_v32, 1  ;;  %v7406_v32 = vand.u32 15, %v7374_v17  ;;  %v7699_v1 = vmul.f32 %v16108_v36, %v7623_v12  ;;  %v7700_v17 = vmul.f32 %v16111_v10, %v7624_v28 }
 0xc2a   : > { %v18989_v42 = vpop.xlane.xlu0 %10147  ;;  %v20902_v28 = vmov 0  ;;  %v9870_v48 = vmul.f32 %v20595_v4, %v9793_v25  ;;  %v9871_v44 = vmul.f32 %v20652_v50, %v9794_v31 }
 0xc2b   : > { %8002 = vadd.xlane.f32.xlu1 %v8001_v53  ;;  %v8098_v15 = vsel %vm8063_vm11, %v8095_v18, %v20395_v33  ;;  %v8096_v30 = vsel %vm8063_vm11, %v20898_v40, %v8095_v18  ;;  %v10524_v18 = vmul.f32 %v20625_v51, %v18981_v38  ;;  %v20900_v40 = vld [vmem:[#allocation51_spill] sm:$0xff]  ;;  %vm19033_vm6 = vcmp.le.s32.totalorder %v7406_v32, 14 }
 0xc2c   : > { %v19009_v26 = vpop.xlane.xlu1 %10144  ;;  %v8176_v6 = vadd.f32 %v8096_v30, %v18692_v35  ;;  %v8767_v35 = vadd.f32 %v8680_v27, %v8679_v22  ;;  %v20901_v30 = vld [vmem:[#allocation18_spill] sm:$0xff]  ;;  %v20903_v28 = vsel %vm19033_vm6, 4294967295, %v20902_v28  ;;  %v9162_v27 = vmul.f32 %v20679_v23, %v19026_v52 }
 0xc2d   : > { %10171 = vadd.xlane.f32.xlu0 %v10170_v19  ;;  %v19024_v19 = vld [vmem:[#allocation9 + $0x1a0] sm:$0xff]  ;;  %v9076_v12 = vadd.f32 %v20901_v30, %v20900_v40  ;;  %20904 = vst [vmem:[#allocation16_spill] sm:$0xff] %v20903_v28  ;;  %v7787_v40 = vadd.f32 %v7700_v17, %v7699_v1  ;;  %v10607_v30 = vadd.f32 %v10524_v18, %v10523_v24  ;;  %v8600_v25 = vsel %vm19033_vm6, %v18891_v47, 0.0 }
 0xc2e   : > { %v8745_v53 = vpop.xlane.xlu0 %8744  ;;  %v9161_v3 = vmul.f32 %v20678_v0, %v19024_v19  ;;  %v8601_v31 = vsel %vm19033_vm6, %v18898_v11, 0.0  ;;  %v8876_v1 = vsel %vm18983_vm7, %v19026_v52, 0.0  ;;  %v20397_v17 = vrot.slane %v18989_v42, 1 }
 0xc2f   : > { %10168 = vadd.xlane.f32.xlu1 %v10167_v54  ;;  %v9424_v59 = vadd.f32 %v9341_v58, %v9076_v12  ;;  %v8678_v12 = vmul.f32 %v20670_v21, %v8601_v31  ;;  %v20906_v31 = vld [vmem:[#allocation52_spill] sm:$0xff]  ;;  %v20930_v28 = vmov 0 }
 0xc30   : > { %v7765_v33 = vpop.xlane.xlu1 %7764 }
 0xc31   : > { %8768 = vadd.xlane.f32.xlu0 %v8767_v35  ;;  %v13158_v22 = vpop.eup %13157  ;;  %v8177_v54 = vadd.f32 %v8098_v15, %v7765_v33  ;;  %v20398_v35 = vrot.slane %v19009_v26, 1  ;;  %v9729_v58 = vadd.f32 %v18953_v20, %v9424_v59  ;;  %v8875_v15 = vsel %vm18983_vm7, %v19024_v19, 0.0 }
 0xc32   : > { %v10585_v32 = vpop.xlane.xlu0 %10584  ;;  %v13160_v55 = vpop.eup %13159  ;;  %v10819_v45 = vadd.f32 1.0, %v13158_v22  ;;  %v9954_v20 = vadd.f32 %v9871_v44, %v9870_v48  ;;  %v19066_v22 = vld [vmem:[#allocation9 + $0x1b0] sm:$0xff]  ;;  %v9253_v59 = vadd.f32 %v9162_v27, %v9161_v3  ;;  %v8950_v48 = vmul.f32 %v16478_v39, %v18865_v46 }
 0xc33   : > { %10917 = vst.msk [vmem:[%s17901_s2 + $0x50] sm:$0xff] %vm10906_vm4, %v13160_v55  ;;  %7788 = vadd.xlane.f32.xlu1 %v7787_v40  ;;  %v19053_v33 = vadd.f32 %v8745_v53, %v8177_v54  ;;  %v8677_v53 = vmul.f32 %v20669_v5, %v8600_v25  ;;  %v8952_v54 = vmul.f32 %v16478_v39, %v8875_v15  ;;  %v8464_v15 = vrot.slane %v19026_v52, 2 }
 0xc34   : > { %13161 = vrcp.f32 %v10819_v45  ;;  %v9932_v24 = vpop.xlane.xlu1 %9931  ;;  %v10267_v45 = vsel %vm8063_vm11, %v20398_v35, %v20397_v17  ;;  %v8953_v40 = vmul.f32 %v20778_v62, %v8876_v1  ;;  %v8951_v25 = vmul.f32 %v20778_v62, %v18867_v57 }
 0xc35   : > { %20905 = vst [vmem:[#allocation59_spill] sm:$0xff] %v19053_v33  ;;  %10608 = vadd.xlane.f32.xlu0 %v10607_v30  ;;  %v10002_v18 = vadd.f32 %v9932_v24, %v9729_v58  ;;  %v19075_v30 = vld [vmem:[#allocation9 + $0x1b8] sm:$0xff]  ;;  %v20907_v58 = vrot.slane %v20906_v31, 1  ;;  %v7705_v3 = vmul.f32 %v16108_v36, %v19066_v22 }
 0xc36   : > { %v19062_v55 = vpop.xlane.xlu0 %9230  ;;  %v7706_v35 = vmul.f32 %v16111_v10, %v19075_v30  ;;  %v9040_v31 = vadd.f32 %v8953_v40, %v8952_v54  ;;  %v20909_v33 = vld [vmem:[#allocation19_spill] sm:$0xff]  ;;  %v9037_v27 = vadd.f32 %v8951_v25, %v8950_v48  ;;  %v9160_v48 = vmul.f32 %v20679_v23, %v18867_v57 }
 0xc37   : > { %v10350_v44 = vadd.f32 %v10267_v45, %v10002_v18  ;;  %9955 = vadd.xlane.f32.xlu1 %v9954_v20  ;;  %v9339_v24 = vsel %vm8063_vm11, %v20907_v58, %v9338_v43  ;;  %v8764_v45 = vadd.f32 %v8678_v12, %v8677_v53  ;;  %v7914_v25 = vmul.f32 %v16144_v2, %v19066_v22 }
 0xc38   : > { %v8742_v17 = vpop.xlane.xlu1 %8741  ;;  %v9423_v43 = vadd.f32 %v9339_v24, %v20909_v33  ;;  %v20912_v33 = vrot.slane %v18867_v57, 2  ;;  %v7915_v24 = vmul.f32 %v20688_v37, %v19075_v30 }
 0xc39   : > { %9254 = vadd.xlane.f32.xlu0 %v9253_v59  ;;  %v10655_v1 = vadd.f32 %v10585_v32, %v10350_v44  ;;  %v8806_v18 = vadd.f32 %v8742_v17, %v8176_v6  ;;  %v9159_v32 = vmul.f32 %v20678_v0, %v18865_v46  ;;  %v20910_v6 = vrot.slane %v19024_v19, 2 }
 0xc3a   : > { %v19088_v20 = vpop.xlane.xlu0 %9017  ;;  %v20911_v17 = vrot.slane %v18865_v46, 2  ;;  %v7796_v44 = vadd.f32 %v7706_v35, %v7705_v3 }
 0xc3b   : > { %20908 = vst [vmem:[#allocation68_spill] sm:$0xff] %v19088_v20  ;;  %v10694_v59 = vadd.f32 %v18461_v49, %v10655_v1  ;;  %8765 = vadd.xlane.f32.xlu1 %v8764_v45  ;;  %v19108_v49 = vsel %vm8359_vm3, %v20912_v33, %v8464_v15  ;;  %v10444_v45 = vsel %vm18613_vm0, %v18891_v47, 0.0  ;;  %v20917_v47 = vrot.slane %v19009_v26, 1 }
 0xc3c   : > { %v9015_v58 = vpop.xlane.xlu1 %9014  ;;  %v19101_v53 = vsel %vm8359_vm3, %v20911_v17, %v20910_v6  ;;  %v9527_v3 = vsel %vm19033_vm6, %v19108_v49, 0.0  ;;  %v9250_v17 = vadd.f32 %v9160_v48, %v9159_v32  ;;  %v10521_v33 = vmul.f32 %v20624_v61, %v10444_v45 }
 0xc3d   : > { %9041 = vadd.xlane.f32.xlu0 %v9040_v31  ;;  %v11457_v12 = vmul.f32 -1.442695, %v10694_v59  ;;  %v19110_v54 = vadd.f32 %v9015_v58, %v8806_v18  ;;  %v10445_v18 = vsel %vm18613_vm0, %v18898_v11, 0.0  ;;  %v20915_v31 = vld [vmem:[#allocation53_spill] sm:$0xff]  ;;  %v9526_v57 = vsel %vm19033_vm6, %v19101_v53, 0.0  ;;  %v20919_v58 = vld [vmem:[#allocation54_spill] sm:$0xff] }
 0xc3e   : > { %v19112_v40 = vpop.xlane.xlu0 %7773  ;;  %v13162_v46 = vpop.eup %13161  ;;  %v9728_v35 = vadd.f32 %v20915_v31, %v9423_v43  ;;  %v20918_v11 = vrot.slane %v18779_v7, 1  ;;  %v9603_v1 = vmul.f32 %v20690_v9, %v9526_v57  ;;  %v7377_v7 = vadd.s32 208, %v20702_v60 }
 0xc3f   : > { %20913 = vst [vmem:[#allocation69_spill] sm:$0xff] %v19110_v54  ;;  %10916 = vst.msk [vmem:[%s17901_s2 + $0x48] sm:$0xff] %vm10906_vm4, %v13162_v46  ;;  %13163 = vpow2.f32 %v11457_v12  ;;  %9038 = vadd.xlane.f32.xlu1 %v9037_v27  ;;  %v10522_v12 = vmul.f32 %v20625_v51, %v10445_v18  ;;  %v8010_v46 = vadd.f32 %v7915_v24, %v7914_v25 }
 0xc40   : > { %v19135_v59 = vpop.xlane.xlu1 %9227  ;;  %v10265_v43 = vsel %vm8063_vm11, %v20918_v11, %v20917_v47  ;;  %v10001_v6 = vadd.f32 %v20919_v58, %v9728_v35  ;;  %v9601_v35 = vmul.f32 %v20690_v9, %v18974_v13  ;;  %v9602_v32 = vmul.f32 %v20691_v41, %v18981_v38  ;;  %v19161_v47 = vld [vmem:[#allocation10] ss:$0 sm:$0xff] }
 0xc41   : > { %20916 = vst [vmem:[#allocation60_spill] sm:$0xff] %v19135_v59  ;;  %7797 = vadd.xlane.f32.xlu0 %v7796_v44  ;;  %v9604_v44 = vmul.f32 %v20691_v41, %v9527_v3  ;;  %v10604_v25 = vadd.f32 %v10522_v12, %v10521_v33  ;;  %v9876_v24 = vmul.f32 %v20595_v4, %v19066_v22  ;;  %v20400_v3 = vrot.slane %v19066_v22, 2 }
 0xc42   : > { %v19143_v27 = vpop.xlane.xlu0 %7987  ;;  %v10349_v26 = vadd.f32 %v10265_v43, %v10001_v6  ;;  %v9877_v18 = vmul.f32 %v20652_v50, %v19075_v30  ;;  %v20399_v38 = vrot.slane %v19075_v30, 2  ;;  %v7409_v11 = vand.u32 15, %v7377_v7 }
 0xc43   : > { %9251 = vadd.xlane.f32.xlu1 %v9250_v17  ;;  %v9690_v57 = vadd.f32 %v9604_v44, %v9603_v1  ;;  %v9687_v58 = vadd.f32 %v9602_v32, %v9601_v35  ;;  %v7912_v6 = vmul.f32 %v16144_v2, %v19024_v19  ;;  %v7913_v17 = vmul.f32 %v20688_v37, %v19026_v52 }
 0xc44   : > { %v10582_v31 = vpop.xlane.xlu1 %10581  ;;  %v9963_v1 = vadd.f32 %v9877_v18, %v9876_v24  ;;  %v10085_v44 = vmul.f32 %v20608_v14, %v19066_v22  ;;  %v10084_v35 = vmul.f32 %v20700_v16, %v19026_v52  ;;  %v20922_v32 = vrot.slane %v19024_v19, 2 }
 0xc45   : > { %8011 = vadd.xlane.f32.xlu0 %v8010_v46  ;;  %v10654_v48 = vadd.f32 %v10582_v31, %v10349_v26  ;;  %v10086_v26 = vmul.f32 %v20700_v16, %v19075_v30  ;;  %v10083_v31 = vmul.f32 %v20608_v14, %v19024_v19  ;;  %vm19195_vm8 = vcmp.ge.s32.totalorder %v7409_v11, 1 }
 0xc46   : > { %v19154_v45 = vpop.xlane.xlu0 %9667  ;;  %v20923_v24 = vmov 0  ;;  %v7376_v18 = vadd.s32 200, %v20702_v60 }
 0xc47   : > { %20920 = vst [vmem:[#allocation61_spill] sm:$0xff] %v19154_v45  ;;  %v10693_v13 = vadd.f32 %v19161_v47, %v10654_v48  ;;  %10605 = vadd.xlane.f32.xlu1 %v10604_v25  ;;  %v19186_v48 = vsel %vm8359_vm3, %v20922_v32, %v20400_v3  ;;  %v19193_v25 = vsel %vm8359_vm3, %v8464_v15, %v20399_v38  ;;  %v20924_v24 = vsel %vm19195_vm8, 4294967295, %v20923_v24  ;;  %v20929_v45 = vld [vmem:[#allocation55_spill] sm:$0xff] }
 0xc48   : > { %v19165_v43 = vpop.xlane.xlu1 %9664  ;;  %20925 = vst [vmem:[#allocation11_spill] sm:$0xff] %v20924_v24  ;;  %v10176_v32 = vadd.f32 %v10086_v26, %v10085_v44  ;;  %v8683_v15 = vmul.f32 %v20669_v5, %v19186_v48  ;;  %v8684_v38 = vmul.f32 %v20670_v21, %v19193_v25  ;;  %v20926_v44 = vrot.slane %v18933_v63, 1 }
 0xc49   : > { %9691 = vadd.xlane.f32.xlu0 %v9690_v57  ;;  %v13164_v33 = vpop.eup %13163  ;;  %v11456_v12 = vmul.f32 -1.442695, %v10693_v13  ;;  %v8007_v13 = vadd.f32 %v7913_v17, %v7912_v6  ;;  %v7628_v6 = vsel %vm19195_vm8, %v19026_v52, 0.0  ;;  %v10173_v17 = vadd.f32 %v10084_v35, %v10083_v31 }
 0xc4a   : > { %v19171_v46 = vpop.xlane.xlu0 %9940  ;;  %v10822_v7 = vadd.f32 1.0, %v13164_v33  ;;  %v20401_v33 = vrot.slane %v19143_v27, 1  ;;  %v9342_v3 = vrot.slane %v18852_v8, 1  ;;  %v10528_v31 = vmul.f32 %v20625_v51, %v19193_v25 }
 0xc4b   : > { %20921 = vst [vmem:[#allocation23_spill] sm:$0xff] %v19171_v46  ;;  %13165 = vpow2.f32 %v11456_v12  ;;  %9688 = vadd.xlane.f32.xlu1 %v9687_v58  ;;  %v10527_v46 = vmul.f32 %v20624_v61, %v19186_v48  ;;  %v9797_v8 = vsel %vm18773_vm5, %v19024_v19, 0.0 }
 0xc4c   : > { %13167 = vrcp.f32 %v10822_v7  ;;  %v7985_v57 = vpop.xlane.xlu1 %7984  ;;  %v7627_v7 = vsel %vm19195_vm8, %v19024_v19, 0.0 }
 0xc4d   : > { %9964 = vadd.xlane.f32.xlu0 %v9963_v1  ;;  %v8099_v58 = vrot.slane %v7985_v57, 1  ;;  %v7408_v57 = vand.u32 15, %v7376_v18  ;;  %v7703_v63 = vmul.f32 %v16108_v36, %v7627_v7  ;;  %v9798_v18 = vsel %vm18773_vm5, %v19026_v52, 0.0  ;;  %v20928_v7 = vld [vmem:[#allocation67_spill] sm:$0xff]  ;;  %vm21006_vm5 = vmmov %vm20994_vm12 }
 0xc4e   : > { %v19201_v12 = vpop.xlane.xlu0 %10153  ;;  %v10613_v34 = vadd.f32 %v10528_v31, %v10527_v46  ;;  %v9874_v52 = vmul.f32 %v20595_v4, %v9797_v8  ;;  %v9875_v54 = vmul.f32 %v20652_v50, %v9798_v18 }
 0xc4f   : > { %8008 = vadd.xlane.f32.xlu1 %v8007_v13  ;;  %v8102_v1 = vsel %vm8063_vm11, %v8099_v58, %v20401_v33  ;;  %v8100_v26 = vsel %vm8063_vm11, %v20926_v44, %v8099_v58  ;;  %v7704_v58 = vmul.f32 %v16111_v10, %v7628_v6  ;;  %v20927_v44 = vrot.slane %v19135_v59, 1  ;;  %v19243_v33 = vld [vmem:[#allocation9 + $0x1c8] sm:$0xff] }
 0xc50   : > { %v19221_v11 = vpop.xlane.xlu1 %10150  ;;  %v19228_v35 = vadd.f32 %v8100_v26, %v18902_v29  ;;  %v8773_v26 = vadd.f32 %v8684_v38, %v8683_v15  ;;  %v9078_v6 = vadd.f32 %v20929_v45, %v20928_v7  ;;  %vm19247_vm1 = vcmp.le.s32.totalorder %v7408_v57, 14 }
 0xc51   : > { %10177 = vadd.xlane.f32.xlu0 %v10176_v32  ;;  %v19238_v32 = vld [vmem:[#allocation9 + $0x1c0] sm:$0xff]  ;;  %v9345_v29 = vsel %vm8063_vm11, %v9342_v3, %v20927_v44  ;;  %v20931_v28 = vsel %vm19247_vm1, 4294967295, %v20930_v28  ;;  %v9166_v57 = vmul.f32 %v20679_v23, %v19243_v33  ;;  %v8604_v46 = vsel %vm19247_vm1, %v19101_v53, 0.0 }
 0xc52   : > { %v8751_v13 = vpop.xlane.xlu0 %8750  ;;  %20932 = vst [vmem:[#allocation62_spill] sm:$0xff] %v20931_v28  ;;  %v9165_v38 = vmul.f32 %v20678_v0, %v19238_v32  ;;  %v9426_v44 = vadd.f32 %v9345_v29, %v9078_v6  ;;  %v8605_v31 = vsel %vm19247_vm1, %v19108_v49, 0.0  ;;  %v8880_v8 = vsel %vm19195_vm8, %v19243_v33, 0.0  ;;  %v19276_v6 = vld [vmem:[#allocation9 + $0x1d0] sm:$0xff] }
 0xc53   : > { %10174 = vadd.xlane.f32.xlu1 %v10173_v17  ;;  %v7793_v17 = vadd.f32 %v7704_v58, %v7703_v63  ;;  %v8879_v58 = vsel %vm19195_vm8, %v19238_v32, 0.0  ;;  %v20405_v18 = vrot.slane %v19201_v12, 1 }
 0xc54   : > { %v7771_v19 = vpop.xlane.xlu1 %7770 }
 0xc55   : > { %8774 = vadd.xlane.f32.xlu0 %v8773_v26  ;;  %v13166_v15 = vpop.eup %13165  ;;  %v8179_v59 = vadd.f32 %v8102_v1, %v7771_v19  ;;  %v20406_v26 = vrot.slane %v19221_v11, 1  ;;  %v9731_v1 = vadd.f32 %v19165_v43, %v9426_v44  ;;  %v19282_v44 = vld [vmem:[#allocation9 + $0x1d8] sm:$0xff] }
 0xc56   : > { %v10591_v45 = vpop.xlane.xlu0 %10590  ;;  %v13168_v7 = vpop.eup %13167  ;;  %v10821_v20 = vadd.f32 1.0, %v13166_v15  ;;  %v8682_v15 = vmul.f32 %v20670_v21, %v8605_v31  ;;  %v20935_v31 = vld [vmem:[#allocation57_spill] sm:$0xff] }
 0xc57   : > { %10919 = vst.msk [vmem:[%s17901_s2 + $0x60] sm:$0xff] %vm10906_vm4, %v13168_v7  ;;  %7794 = vadd.xlane.f32.xlu1 %v7793_v17  ;;  %v19267_v63 = vadd.f32 %v8751_v13, %v8179_v59  ;;  %v9960_v59 = vadd.f32 %v9875_v54, %v9874_v52  ;;  %v8681_v13 = vmul.f32 %v20669_v5, %v8604_v46 }
 0xc58   : > { %13169 = vrcp.f32 %v10821_v20  ;;  %v9938_v29 = vpop.xlane.xlu1 %9937  ;;  %v10271_v20 = vsel %vm8063_vm11, %v20406_v26, %v20405_v18  ;;  %v9259_v17 = vadd.f32 %v9166_v57, %v9165_v38  ;;  %v8957_v7 = vmul.f32 %v20778_v62, %v8880_v8 }
 0xc59   : > { %20933 = vst [vmem:[#allocation63_spill] sm:$0xff] %v19267_v63  ;;  %10614 = vadd.xlane.f32.xlu0 %v10613_v34  ;;  %v10004_v19 = vadd.f32 %v9938_v29, %v9731_v1  ;;  %v8956_v34 = vmul.f32 %v16478_v39, %v8879_v58  ;;  %v8954_v54 = vmul.f32 %v16478_v39, %v19066_v22  ;;  %v20936_v29 = vrot.slane %v20935_v31, 1 }
 0xc5a   : > { %v19278_v43 = vpop.xlane.xlu0 %9236  ;;  %v8955_v52 = vmul.f32 %v20778_v62, %v19075_v30  ;;  %v7709_v46 = vmul.f32 %v16108_v36, %v19276_v6  ;;  %v7710_v57 = vmul.f32 %v16111_v10, %v19282_v44  ;;  %v8470_v58 = vrot.slane %v19238_v32, 2 }
 0xc5b   : > { %20934 = vst [vmem:[#allocation78_spill] sm:$0xff] %v19278_v43  ;;  %v10352_v1 = vadd.f32 %v10271_v20, %v10004_v19  ;;  %9961 = vadd.xlane.f32.xlu1 %v9960_v59  ;;  %v9343_v18 = vsel %vm8063_vm11, %v20936_v29, %v9342_v3  ;;  %v8472_v8 = vrot.slane %v19243_v33, 2  ;;  %v8770_v26 = vadd.f32 %v8682_v15, %v8681_v13  ;;  %v20937_v43 = vld [vmem:[#allocation56_spill] sm:$0xff] }
 0xc5c   : > { %v8748_v38 = vpop.xlane.xlu1 %8747  ;;  %v9046_v63 = vadd.f32 %v8957_v7, %v8956_v34  ;;  %v9425_v31 = vadd.f32 %v9343_v18, %v20937_v43  ;;  %v9043_v29 = vadd.f32 %v8955_v52, %v8954_v54  ;;  %v7802_v24 = vadd.f32 %v7710_v57, %v7709_v46  ;;  %v20942_v57 = vld [vmem:[#allocation72_spill] sm:$0xff] }
 0xc5d   : > { %9260 = vadd.xlane.f32.xlu0 %v9259_v17  ;;  %v10657_v19 = vadd.f32 %v10591_v45, %v10352_v1  ;;  %v8808_v59 = vadd.f32 %v8748_v38, %v19228_v35  ;;  %v20938_v45 = vrot.slane %v19066_v22, 2  ;;  %v20939_v13 = vrot.slane %v19075_v30, 2 }
 0xc5e   : > { %v19305_v20 = vpop.xlane.xlu0 %9023  ;;  %v9163_v15 = vmul.f32 %v20678_v0, %v19066_v22  ;;  %v9164_v34 = vmul.f32 %v20679_v23, %v19075_v30  ;;  %v7918_v1 = vmul.f32 %v16144_v2, %v19276_v6  ;;  %v7919_v54 = vmul.f32 %v20688_v37, %v19282_v44 }
 0xc5f   : > { %v10696_v3 = vadd.f32 %v19161_v47, %v10657_v19  ;;  %8771 = vadd.xlane.f32.xlu1 %v8770_v26  ;;  %v19314_v35 = vsel %vm8359_vm3, %v20938_v45, %v8470_v58  ;;  %v19321_v18 = vsel %vm8359_vm3, %v20939_v13, %v8472_v8  ;;  %v10448_v46 = vsel %vm18823_vm9, %v19101_v53, 0.0 }
 0xc60   : > { %v9021_v17 = vpop.xlane.xlu1 %9020  ;;  %v10449_v38 = vsel %vm18823_vm9, %v19108_v49, 0.0  ;;  %v9730_v22 = vadd.f32 %v20942_v57, %v9425_v31  ;;  %v9530_v30 = vsel %vm19247_vm1, %v19314_v35, 0.0  ;;  %v9531_v19 = vsel %vm19247_vm1, %v19321_v18, 0.0  ;;  %vm21007_vm9 = vmmov %vm21006_vm5 }
 0xc61   : > { %9047 = vadd.xlane.f32.xlu0 %v9046_v63  ;;  %v11459_v26 = vmul.f32 -1.442695, %v10696_v3  ;;  %v19323_v43 = vadd.f32 %v9021_v17, %v8808_v59  ;;  %v20943_v53 = vrot.slane %v19221_v11, 1  ;;  %v20944_v49 = vrot.slane %v18989_v42, 1  ;;  %v20945_v3 = vld [vmem:[#allocation58_spill] sm:$0xff] }
 0xc62   : > { %v19325_v63 = vpop.xlane.xlu0 %7779  ;;  %v13170_v7 = vpop.eup %13169  ;;  %v10003_v17 = vadd.f32 %v20945_v3, %v9730_v22  ;;  %v9256_v45 = vadd.f32 %v9164_v34, %v9163_v15  ;;  %v10525_v13 = vmul.f32 %v20624_v61, %v10448_v46  ;;  %v9607_v52 = vmul.f32 %v20690_v9, %v9530_v30 }
 0xc63   : > { %20940 = vst [vmem:[#allocation15_spill] sm:$0xff] %v19323_v43  ;;  %10918 = vst.msk [vmem:[%s17901_s2 + $0x58] sm:$0xff] %vm10906_vm4, %v13170_v7  ;;  %13171 = vpow2.f32 %v11459_v26  ;;  %9044 = vadd.xlane.f32.xlu1 %v9043_v29  ;;  %v10269_v31 = vsel %vm8063_vm11, %v20944_v49, %v20943_v53  ;;  %v10526_v26 = vmul.f32 %v20625_v51, %v10449_v38  ;;  %v7379_v42 = vadd.s32 224, %v20702_v60 }
 0xc64   : > { %v19350_v59 = vpop.xlane.xlu1 %9233  ;;  %v8016_v7 = vadd.f32 %v7919_v54, %v7918_v1  ;;  %v10351_v11 = vadd.f32 %v10269_v31, %v10003_v17  ;;  %v9605_v22 = vmul.f32 %v20690_v9, %v19186_v48  ;;  %v9606_v15 = vmul.f32 %v20691_v41, %v19193_v25 }
 0xc65   : > { %7803 = vadd.xlane.f32.xlu0 %v7802_v24  ;;  %v9608_v24 = vmul.f32 %v20691_v41, %v9531_v19  ;;  %v10610_v1 = vadd.f32 %v10526_v26, %v10525_v13  ;;  %v9880_v54 = vmul.f32 %v20595_v4, %v19276_v6  ;;  %v9881_v38 = vmul.f32 %v20652_v50, %v19282_v44 }
 0xc66   : > { %v19358_v29 = vpop.xlane.xlu0 %7993  ;;  %v20410_v19 = vrot.slane %v19276_v6, 2  ;;  %v20409_v48 = vrot.slane %v19282_v44, 2  ;;  %v7411_v49 = vand.u32 15, %v7379_v42  ;;  %v9693_v31 = vadd.f32 %v9606_v15, %v9605_v22 }
 0xc67   : > { %9257 = vadd.xlane.f32.xlu1 %v9256_v45  ;;  %v9696_v30 = vadd.f32 %v9608_v24, %v9607_v52  ;;  %v7916_v3 = vmul.f32 %v16144_v2, %v19238_v32  ;;  %v7917_v17 = vmul.f32 %v20688_v37, %v19243_v33  ;;  %v10089_v52 = vmul.f32 %v20608_v14, %v19276_v6 }
 0xc68   : > { %v10588_v57 = vpop.xlane.xlu1 %10587  ;;  %v10090_v24 = vmul.f32 %v20700_v16, %v19282_v44  ;;  %v10087_v42 = vmul.f32 %v20608_v14, %v19238_v32  ;;  %v19399_v22 = vsel %vm8359_vm3, %v8470_v58, %v20410_v19  ;;  %v19406_v15 = vsel %vm8359_vm3, %v8472_v8, %v20409_v48 }
 0xc69   : > { %8017 = vadd.xlane.f32.xlu0 %v8016_v7  ;;  %v10656_v34 = vadd.f32 %v10588_v57, %v10351_v11  ;;  %v9969_v7 = vadd.f32 %v9881_v38, %v9880_v54  ;;  %v10088_v57 = vmul.f32 %v20700_v16, %v19243_v33  ;;  %vm19408_vm10 = vcmp.ge.s32.totalorder %v7411_v49, 1 }
 0xc6a   : > { %v19369_v46 = vpop.xlane.xlu0 %9673  ;;  %v8013_v58 = vadd.f32 %v7917_v17, %v7916_v3  ;;  %v20411_v38 = vrot.slane %v19358_v29, 1  ;;  %v8687_v8 = vmul.f32 %v20669_v5, %v19399_v22  ;;  %v20412_v49 = vrot.slane %v19350_v59, 1 }
 0xc6b   : > { %20946 = vst [vmem:[#allocation24_spill] sm:$0xff] %v19369_v46  ;;  %v10695_v53 = vadd.f32 %v19161_v47, %v10656_v34  ;;  %10611 = vadd.xlane.f32.xlu1 %v10610_v1  ;;  %v7378_v1 = vadd.s32 216, %v20702_v60  ;;  %v7632_v3 = vsel %vm19408_vm10, %v19243_v33, 0.0  ;;  %v10179_v17 = vadd.f32 %v10088_v57, %v10087_v42 }
 0xc6c   : > { %v19378_v25 = vpop.xlane.xlu1 %9670  ;;  %v10531_v19 = vmul.f32 %v20624_v61, %v19399_v22  ;;  %v10532_v42 = vmul.f32 %v20625_v51, %v19406_v15 }
 0xc6d   : > { %9697 = vadd.xlane.f32.xlu0 %v9696_v30  ;;  %v13172_v45 = vpop.eup %13171  ;;  %v11458_v13 = vmul.f32 -1.442695, %v10695_v53 }
 0xc6e   : > { %v19384_v26 = vpop.xlane.xlu0 %9946  ;;  %v10824_v11 = vadd.f32 1.0, %v13172_v45  ;;  %v8688_v45 = vmul.f32 %v20670_v21, %v19406_v15  ;;  %v10619_v56 = vadd.f32 %v10532_v42, %v10531_v19 }
 0xc6f   : > { %20947 = vst [vmem:[#allocation12_spill] sm:$0xff] %v19384_v26  ;;  %13173 = vpow2.f32 %v11458_v13  ;;  %9694 = vadd.xlane.f32.xlu1 %v9693_v31  ;;  %v10182_v31 = vadd.f32 %v10090_v24, %v10089_v52  ;;  %v7631_v13 = vsel %vm19408_vm10, %v19238_v32, 0.0  ;;  %v20950_v52 = vrot.slane %v19143_v27, 1 }
 0xc70   : > { %13175 = vrcp.f32 %v10824_v11  ;;  %v7991_v54 = vpop.xlane.xlu1 %7990  ;;  %v7410_v11 = vand.u32 15, %v7378_v1  ;;  %v7708_v27 = vmul.f32 %v16111_v10, %v7632_v3  ;;  %v9802_v1 = vsel %vm18983_vm7, %v19243_v33, 0.0 }
 0xc71   : > { %9970 = vadd.xlane.f32.xlu0 %v9969_v7  ;;  %v8103_v30 = vrot.slane %v7991_v54, 1  ;;  %v9346_v54 = vrot.slane %v19062_v55, 1  ;;  %v9801_v55 = vsel %vm18983_vm7, %v19238_v32, 0.0  ;;  %v20953_v26 = vmov 0 }
 0xc72   : > { %v19414_v53 = vpop.xlane.xlu0 %10159  ;;  %vm19458_vm13 = vcmp.le.s32.totalorder %v7410_v11, 14  ;;  %v9878_v33 = vmul.f32 %v20595_v4, %v9801_v55  ;;  %v9879_v46 = vmul.f32 %v20652_v50, %v9802_v1 }
 0xc73   : > { %8014 = vadd.xlane.f32.xlu1 %v8013_v58  ;;  %v8106_v7 = vsel %vm8063_vm11, %v8103_v30, %v20411_v38  ;;  %v8104_v24 = vsel %vm8063_vm11, %v20950_v52, %v8103_v30  ;;  %v7707_v38 = vmul.f32 %v16108_v36, %v7631_v13  ;;  %v19449_v30 = vld [vmem:[#allocation9 + $0x1e0] sm:$0xff]  ;;  %v19454_v52 = vld [vmem:[#allocation9 + $0x1e8] sm:$0xff]  ;;  %v20951_v13 = vld [vmem:[#allocation59_spill] sm:$0xff]  ;;  %v20954_v26 = vsel %vm19458_vm13, 4294967295, %v20953_v26 }
 0xc74   : > { %v19434_v48 = vpop.xlane.xlu1 %10156  ;;  %v8180_v57 = vadd.f32 %v8104_v24, %v19112_v40  ;;  %v8779_v40 = vadd.f32 %v8688_v45, %v8687_v8  ;;  %v20952_v24 = vld [vmem:[#allocation68_spill] sm:$0xff]  ;;  %20955 = vst [vmem:[#allocation31_spill] sm:$0xff] %v20954_v26  ;;  %v9169_v8 = vmul.f32 %v20678_v0, %v19449_v30  ;;  %v9170_v11 = vmul.f32 %v20679_v23, %v19454_v52 }
 0xc75   : > { %10183 = vadd.xlane.f32.xlu0 %v10182_v31  ;;  %v9349_v31 = vsel %vm8063_vm11, %v9346_v54, %v20412_v49  ;;  %v9080_v3 = vadd.f32 %v20952_v24, %v20951_v13  ;;  %v8608_v19 = vsel %vm19458_vm13, %v19314_v35, 0.0  ;;  %v8609_v42 = vsel %vm19458_vm13, %v19321_v18, 0.0 }
 0xc76   : > { %v8757_v58 = vpop.xlane.xlu0 %8756  ;;  %v8884_v55 = vsel %vm19408_vm10, %v19454_v52, 0.0  ;;  %v20415_v1 = vrot.slane %v19414_v53, 1 }
 0xc77   : > { %10180 = vadd.xlane.f32.xlu1 %v10179_v17  ;;  %v9428_v49 = vadd.f32 %v9349_v31, %v9080_v3  ;;  %v7799_v17 = vadd.f32 %v7708_v27, %v7707_v38  ;;  %v8883_v27 = vsel %vm19408_vm10, %v19449_v30, 0.0 }
 0xc78   : > { %v7777_v32 = vpop.xlane.xlu1 %7776 }
 0xc79   : > { %8780 = vadd.xlane.f32.xlu0 %v8779_v40  ;;  %v13174_v45 = vpop.eup %13173  ;;  %v8181_v28 = vadd.f32 %v8106_v7, %v7777_v32  ;;  %v20416_v40 = vrot.slane %v19434_v48, 1  ;;  %v9733_v7 = vadd.f32 %v19378_v25, %v9428_v49  ;;  %v9966_v25 = vadd.f32 %v9879_v46, %v9878_v33 }
 0xc7a   : > { %v10597_v13 = vpop.xlane.xlu0 %10596  ;;  %v13176_v24 = vpop.eup %13175  ;;  %v10823_v43 = vadd.f32 1.0, %v13174_v45  ;;  %v8686_v49 = vmul.f32 %v20670_v21, %v8609_v42  ;;  %v9265_v45 = vadd.f32 %v9170_v11, %v9169_v8  ;;  %v8958_v33 = vmul.f32 %v16478_v39, %v19276_v6  ;;  %v20958_v42 = vld [vmem:[#allocation60_spill] sm:$0xff] }
 0xc7b   : > { %10921 = vst.msk [vmem:[%s17901_s2 + $0x70] sm:$0xff] %vm10906_vm4, %v13176_v24  ;;  %7800 = vadd.xlane.f32.xlu1 %v7799_v17  ;;  %v19478_v38 = vadd.f32 %v8757_v58, %v8181_v28  ;;  %v8685_v28 = vmul.f32 %v20669_v5, %v8608_v19  ;;  %v19491_v58 = vld [vmem:[#allocation9 + $0x1f0] sm:$0xff]  ;;  %v8960_v17 = vmul.f32 %v16478_v39, %v8883_v27  ;;  %v19500_v24 = vld [vmem:[#allocation9 + $0x1f8] sm:$0xff]  ;;  %v20417_v27 = vrot.slane %v19454_v52, 2 }
 0xc7c   : > { %13177 = vrcp.f32 %v10823_v43  ;;  %v9944_v31 = vpop.xlane.xlu1 %9943  ;;  %v10275_v43 = vsel %vm8063_vm11, %v20416_v40, %v20415_v1  ;;  %v8959_v19 = vmul.f32 %v20778_v62, %v19282_v44  ;;  %v7713_v8 = vmul.f32 %v16108_v36, %v19491_v58 }
 0xc7d   : > { %20956 = vst [vmem:[#allocation25_spill] sm:$0xff] %v19478_v38  ;;  %10620 = vadd.xlane.f32.xlu0 %v10619_v56  ;;  %v10006_v3 = vadd.f32 %v9944_v31, %v9733_v7  ;;  %v8961_v56 = vmul.f32 %v20778_v62, %v8884_v55  ;;  %v20959_v7 = vrot.slane %v20958_v42, 1  ;;  %v7714_v40 = vmul.f32 %v16111_v10, %v19500_v24  ;;  %v20961_v38 = vld [vmem:[#allocation69_spill] sm:$0xff] }
 0xc7e   : > { %v19487_v32 = vpop.xlane.xlu0 %9242  ;;  %v9049_v11 = vadd.f32 %v8959_v19, %v8958_v33  ;;  %v9168_v19 = vmul.f32 %v20679_v23, %v19282_v44 }
 0xc7f   : > { %20957 = vst [vmem:[#allocation33_spill] sm:$0xff] %v19487_v32  ;;  %v10354_v46 = vadd.f32 %v10275_v43, %v10006_v3  ;;  %9967 = vadd.xlane.f32.xlu1 %v9966_v25  ;;  %v9347_v31 = vsel %vm8063_vm11, %v20959_v7, %v9346_v54  ;;  %v8776_v43 = vadd.f32 %v8686_v49, %v8685_v28 }
 0xc80   : > { %v8754_v1 = vpop.xlane.xlu1 %8753  ;;  %v9052_v42 = vadd.f32 %v8961_v56, %v8960_v17  ;;  %v9427_v54 = vadd.f32 %v9347_v31, %v20961_v38  ;;  %v20964_v38 = vrot.slane %v19282_v44, 2  ;;  %v7808_v33 = vadd.f32 %v7714_v40, %v7713_v8 }
 0xc81   : > { %9266 = vadd.xlane.f32.xlu0 %v9265_v45  ;;  %v10659_v55 = vadd.f32 %v10597_v13, %v10354_v46  ;;  %v8810_v3 = vadd.f32 %v8754_v1, %v8180_v57  ;;  %v9167_v13 = vmul.f32 %v20678_v0, %v19276_v6  ;;  %v20962_v57 = vrot.slane %v19449_v30, 2 }
 0xc82   : > { %v19513_v25 = vpop.xlane.xlu0 %9029  ;;  %v20963_v1 = vrot.slane %v19276_v6, 2  ;;  %v19533_v49 = vsel %vm8359_vm3, %v20964_v38, %v20417_v27  ;;  %v7922_v31 = vmul.f32 %v16144_v2, %v19491_v58 }
 0xc83   : > { %20960 = vst [vmem:[#allocation20_spill] sm:$0xff] %v19513_v25  ;;  %v10698_v45 = vadd.f32 %v19161_v47, %v10659_v55  ;;  %8777 = vadd.xlane.f32.xlu1 %v8776_v43  ;;  %v7923_v55 = vmul.f32 %v20688_v37, %v19500_v24  ;;  %v9535_v8 = vsel %vm19458_vm13, %v19533_v49, 0.0  ;;  %v9262_v38 = vadd.f32 %v9168_v19, %v9167_v13 }
 0xc84   : > { %v9027_v7 = vpop.xlane.xlu1 %9026  ;;  %v19526_v28 = vsel %vm8359_vm3, %v20963_v1, %v20962_v57  ;;  %v20971_v57 = vld [vmem:[#allocation23_spill] sm:$0xff]  ;;  %v9610_v13 = vmul.f32 %v20691_v41, %v19406_v15  ;;  %v7920_v15 = vmul.f32 %v16144_v2, %v19449_v30 }
 0xc85   : > { %9053 = vadd.xlane.f32.xlu0 %v9052_v42  ;;  %v11461_v17 = vmul.f32 -1.442695, %v10698_v45  ;;  %v19535_v56 = vadd.f32 %v9027_v7, %v8810_v3  ;;  %v10452_v42 = vsel %vm19033_vm6, %v19314_v35, 0.0  ;;  %v10453_v3 = vsel %vm19033_vm6, %v19321_v18, 0.0  ;;  %v20968_v45 = vld [vmem:[#allocation61_spill] sm:$0xff] }
 0xc86   : > { %v19537_v46 = vpop.xlane.xlu0 %7785  ;;  %v13178_v6 = vpop.eup %13177  ;;  %v9732_v40 = vadd.f32 %v20968_v45, %v9427_v54  ;;  %v9534_v44 = vsel %vm19458_vm13, %v19526_v28, 0.0  ;;  %v20969_v35 = vrot.slane %v19434_v48, 1  ;;  %v20970_v18 = vrot.slane %v19201_v12, 1 }
 0xc87   : > { %20965 = vst [vmem:[#allocation29_spill] sm:$0xff] %v19535_v56  ;;  %20966 = vst [vmem:[#allocation28_spill] sm:$0xff] %v19537_v46  ;;  %13179 = vpow2.f32 %v11461_v17  ;;  %9050 = vadd.xlane.f32.xlu1 %v9049_v11  ;;  %v10529_v17 = vmul.f32 %v20624_v61, %v10452_v42  ;;  %v8022_v43 = vadd.f32 %v7923_v55, %v7922_v31  ;;  %v7381_v12 = vadd.s32 240, %v20702_v60  ;;  %v20981_v56 = vld [vmem:[#allocation78_spill] sm:$0xff] }
 0xc88   : > { %10920 = vst.msk [vmem:[%s17901_s2 + $0x68] sm:$0xff] %vm10906_vm4, %v13178_v6  ;;  %v19560_v7 = vpop.xlane.xlu1 %9239  ;;  %v10273_v54 = vsel %vm8063_vm11, %v20970_v18, %v20969_v35  ;;  %v10005_v1 = vadd.f32 %v20971_v57, %v9732_v40  ;;  %v10530_v6 = vmul.f32 %v20625_v51, %v10453_v3  ;;  %v9611_v45 = vmul.f32 %v20690_v9, %v9534_v44 }
 0xc89   : > { %7809 = vadd.xlane.f32.xlu0 %v7808_v33  ;;  %v9612_v33 = vmul.f32 %v20691_v41, %v9535_v8  ;;  %v9609_v40 = vmul.f32 %v20690_v9, %v19399_v22  ;;  %v9884_v55 = vmul.f32 %v20595_v4, %v19491_v58  ;;  %v9885_v3 = vmul.f32 %v20652_v50, %v19500_v24 }
 0xc8a   : > { %v19568_v11 = vpop.xlane.xlu0 %7999  ;;  %v10353_v48 = vadd.f32 %v10273_v54, %v10005_v1  ;;  %v10616_v31 = vadd.f32 %v10530_v6, %v10529_v17  ;;  %v19586_v8 = vrot.slane %v19491_v58, 2  ;;  %v19589_v35 = vrot.slane %v19500_v24, 2 }
 0xc8b   : > { %20972 = vst [vmem:[#allocation34_spill] sm:$0xff] %v19568_v11  ;;  %9263 = vadd.xlane.f32.xlu1 %v9262_v38  ;;  %v9702_v44 = vadd.f32 %v9612_v33, %v9611_v45  ;;  %v7413_v18 = vand.u32 15, %v7381_v12  ;;  %v10093_v57 = vmul.f32 %v20608_v14, %v19491_v58  ;;  %v10094_v1 = vmul.f32 %v20700_v16, %v19500_v24 }
 0xc8c   : > { %v10594_v27 = vpop.xlane.xlu1 %10593  ;;  %v9975_v45 = vadd.f32 %v9885_v3, %v9884_v55  ;;  %v10091_v33 = vmul.f32 %v20608_v14, %v19449_v30  ;;  %v10092_v12 = vmul.f32 %v20700_v16, %v19454_v52  ;;  %v7380_v55 = vadd.s32 232, %v20702_v60 }
 0xc8d   : > { %8023 = vadd.xlane.f32.xlu0 %v8022_v43  ;;  %v10658_v19 = vadd.f32 %v10594_v27, %v10353_v48  ;;  %v7921_v27 = vmul.f32 %v20688_v37, %v19454_v52  ;;  %v9699_v43 = vadd.f32 %v9610_v13, %v9609_v40  ;;  %vm19620_vm2 = vcmp.ge.s32.totalorder %v7413_v18, 1 }
 0xc8e   : > { %v19579_v42 = vpop.xlane.xlu0 %9679  ;;  %v9350_v26 = vrot.slane %v20981_v56, 1 }
 0xc8f   : > { %20973 = vst [vmem:[#allocation65_spill] sm:$0xff] %v19579_v42  ;;  %v10697_v22 = vadd.f32 %v19161_v47, %v10658_v19  ;;  %10617 = vadd.xlane.f32.xlu1 %v10616_v31  ;;  %v20975_v19 = vrot.slane %v19449_v30, 2  ;;  %v8019_v40 = vadd.f32 %v7921_v27, %v7920_v15  ;;  %v20420_v15 = vrot.slane %v19568_v11, 1 }
 0xc90   : > { %v19596_v54 = vpop.xlane.xlu1 %9676 }
 0xc91   : > { %9703 = vadd.xlane.f32.xlu0 %v9702_v44  ;;  %v13180_v38 = vpop.eup %13179  ;;  %v11460_v17 = vmul.f32 -1.442695, %v10697_v22  ;;  %v19612_v31 = vsel %vm8359_vm3, %v20975_v19, %v19586_v8  ;;  %v20976_v44 = vrot.slane %v19454_v52, 2 }
 0xc92   : > { %v19602_v6 = vpop.xlane.xlu0 %9952  ;;  %v10826_v48 = vadd.f32 1.0, %v13180_v38  ;;  %v10188_v38 = vadd.f32 %v10094_v1, %v10093_v57  ;;  %v7635_v1 = vsel %vm19620_vm2, %v19449_v30, 0.0  ;;  %v20980_v57 = vrot.slane %v19358_v29, 1  ;;  %v19665_v29 = vld [vmem:[#allocation9 + $0x208] sm:$0xff] }
 0xc93   : > { %20974 = vst [vmem:[#allocation35_spill] sm:$0xff] %v19602_v6  ;;  %v19618_v22 = vsel %vm8359_vm3, %v20976_v44, %v19589_v35  ;;  %13181 = vpow2.f32 %v11460_v17  ;;  %9700 = vadd.xlane.f32.xlu1 %v9699_v43  ;;  %v9805_v6 = vsel %vm19195_vm8, %v19449_v30, 0.0  ;;  %v9806_v17 = vsel %vm19195_vm8, %v19454_v52, 0.0 }
 0xc94   : > { %13183 = vrcp.f32 %v10826_v48  ;;  %v7997_v3 = vpop.xlane.xlu1 %7996  ;;  %v8691_v43 = vmul.f32 %v20669_v5, %v19612_v31  ;;  %v7636_v48 = vsel %vm19620_vm2, %v19454_v52, 0.0  ;;  %v10535_v44 = vmul.f32 %v20624_v61, %v19612_v31 }
 0xc95   : > { %9976 = vadd.xlane.f32.xlu0 %v9975_v45  ;;  %v8107_v27 = vrot.slane %v7997_v3, 1  ;;  %v8692_v45 = vmul.f32 %v20670_v21, %v19618_v22  ;;  %v10536_v19 = vmul.f32 %v20625_v51, %v19618_v22  ;;  %v7412_v30 = vand.u32 15, %v7380_v55 }
 0xc96   : > { %v19632_v18 = vpop.xlane.xlu0 %10165  ;;  %v7711_v32 = vmul.f32 %v16108_v36, %v7635_v1  ;;  %v7712_v11 = vmul.f32 %v16111_v10, %v7636_v48  ;;  %v20982_v55 = vrot.slane %v19560_v7, 1 }
 0xc97   : > { %8020 = vadd.xlane.f32.xlu1 %v8019_v40  ;;  %v8110_v3 = vsel %vm8063_vm11, %v8107_v27, %v20420_v15  ;;  %v8108_v42 = vsel %vm8063_vm11, %v20980_v57, %v8107_v27  ;;  %v19661_v40 = vld [vmem:[#allocation9 + $0x200] sm:$0xff]  ;;  %v10185_v15 = vadd.f32 %v10092_v12, %v10091_v33  ;;  %v8785_v27 = vadd.f32 %v8692_v45, %v8691_v43 }
 0xc98   : > { %v19656_v25 = vpop.xlane.xlu1 %10162  ;;  %v19659_v52 = vadd.f32 %v8108_v42, %v19325_v63  ;;  %v9353_v56 = vsel %vm8063_vm11, %v9350_v26, %v20982_v55  ;;  %v9883_v63 = vmul.f32 %v20652_v50, %v9806_v17  ;;  %v20983_v42 = vld [vmem:[#allocation63_spill] sm:$0xff]  ;;  %v10625_v33 = vadd.f32 %v10536_v19, %v10535_v44 }
 0xc99   : > { %10189 = vadd.xlane.f32.xlu0 %v10188_v38  ;;  %v9882_v38 = vmul.f32 %v20595_v4, %v9805_v6  ;;  %v9082_v57 = vadd.f32 %v19305_v20, %v20983_v42  ;;  %v9173_v36 = vmul.f32 %v20678_v0, %v19661_v40  ;;  %vm19676_vm14 = vcmp.le.s32.totalorder %v7412_v30, 14 }
 0xc9a   : > { %v8763_v46 = vpop.xlane.xlu0 %8762  ;;  %v9174_v6 = vmul.f32 %v20679_v23, %v19665_v29  ;;  %v8887_v17 = vsel %vm19620_vm2, %v19661_v40, 0.0  ;;  %v20423_v20 = vrot.slane %v19661_v40, 2  ;;  %v7805_v44 = vadd.f32 %v7712_v11, %v7711_v32 }
 0xc9b   : > { %10186 = vadd.xlane.f32.xlu1 %v10185_v15  ;;  %v9430_v45 = vadd.f32 %v9353_v56, %v9082_v57  ;;  %v8888_v19 = vsel %vm19620_vm2, %v19665_v29, 0.0  ;;  %v8612_v42 = vsel %vm19676_vm14, %v19526_v28, 0.0  ;;  %v8613_v15 = vsel %vm19676_vm14, %v19533_v49, 0.0 }
 0xc9c   : > { %v7783_v12 = vpop.xlane.xlu1 %7782  ;;  %v9972_v11 = vadd.f32 %v9883_v63, %v9882_v38  ;;  %v8964_v56 = vmul.f32 %v16478_v39, %v8887_v17  ;;  %v20422_v57 = vrot.slane %v19632_v18, 1  ;;  %v8689_v63 = vmul.f32 %v20669_v5, %v8612_v42 }
 0xc9d   : > { %8786 = vadd.xlane.f32.xlu0 %v8785_v27  ;;  %v13182_v43 = vpop.eup %13181  ;;  %v8183_v1 = vadd.f32 %v8110_v3, %v7783_v12  ;;  %v20424_v27 = vrot.slane %v19656_v25, 1  ;;  %v9735_v32 = vadd.f32 %v19596_v54, %v9430_v45  ;;  %v8690_v17 = vmul.f32 %v20670_v21, %v8613_v15  ;;  %v9098_v15 = vld [vmem:[#allocation9 + $0x220] sm:$0x1] }
 0xc9e   : > { %v10603_v48 = vpop.xlane.xlu0 %10602  ;;  %v13184_v30 = vpop.eup %13183  ;;  %v10825_v55 = vadd.f32 1.0, %v13182_v43  ;;  %v19708_v43 = vsel %vm8359_vm3, %v19586_v8, %v20423_v20 }
 0xc9f   : > { %10923 = vst.msk [vmem:[%s17901_s2 + $0x80] sm:$0xff] %vm10906_vm4, %v13184_v30  ;;  %7806 = vadd.xlane.f32.xlu1 %v7805_v44  ;;  %v19700_v3 = vadd.f32 %v8763_v46, %v8183_v1  ;;  %v20987_v30 = vrot.slane %v19665_v29, 2  ;;  %v10279_v45 = vsel %vm8063_vm11, %v20424_v27, %v20422_v57  ;;  %v9271_v1 = vadd.f32 %v9174_v6, %v9173_v36 }
 0xca0   : > { %13185 = vrcp.f32 %v10825_v55  ;;  %v9950_v12 = vpop.xlane.xlu1 %9949  ;;  %v9538_v55 = vsel %vm19676_vm14, %v19708_v43, 0.0  ;;  %v8962_v36 = vmul.f32 %v16478_v39, %v19491_v58  ;;  %v8963_v6 = vmul.f32 %v20778_v62, %v19500_v24 }
 0xca1   : > { %20986 = vst [vmem:[#allocation36_spill] sm:$0xff] %v19700_v3  ;;  %10626 = vadd.xlane.f32.xlu0 %v10625_v33  ;;  %v19714_v54 = vsel %vm8359_vm3, %v19589_v35, %v20987_v30  ;;  %v10008_v46 = vadd.f32 %v9950_v12, %v9735_v32  ;;  %v8965_v33 = vmul.f32 %v20778_v62, %v8888_v19  ;;  %v9099_v32 = vld [vmem:[#allocation9 + $0x228] sm:$0x1]  ;;  %v20989_v19 = vrot.slane %v19350_v59, 1 }
 0xca2   : > { %v19716_v38 = vpop.xlane.xlu0 %9248  ;;  %v9539_v42 = vsel %vm19676_vm14, %v19714_v54, 0.0  ;;  %v8782_v57 = vadd.f32 %v8690_v17, %v8689_v63  ;;  %v9615_v27 = vmul.f32 %v20690_v9, %v9538_v55  ;;  %v9171_v63 = vmul.f32 %v20678_v0, %v19491_v58  ;;  %v19752_v17 = vld [vmem:[#allocation9 + $0x210] sm:$0xff] }
 0xca3   : > { %20988 = vst [vmem:[#allocation30_spill] sm:$0xff] %v19716_v38  ;;  %v10356_v44 = vadd.f32 %v10279_v45, %v10008_v46  ;;  %9973 = vadd.xlane.f32.xlu1 %v9972_v11  ;;  %v9351_v12 = vsel %vm8063_vm11, %v20989_v19, %v9350_v26  ;;  %v9058_v20 = vadd.f32 %v8965_v33, %v8964_v56  ;;  %v20990_v19 = vld [vmem:[#allocation15_spill] sm:$0xff]  ;;  %v7382_v58 = vadd.s32 248, %v20702_v60 }
 0xca4   : > { %v8760_v30 = vpop.xlane.xlu1 %8759  ;;  %v9616_v59 = vmul.f32 %v20691_v41, %v9539_v42  ;;  %v9177_v26 = vmul.f32 %v20678_v0, %v9098_v15  ;;  %v9429_v3 = vadd.f32 %v9351_v12, %v20990_v19  ;;  %v9172_v56 = vmul.f32 %v20679_v23, %v19500_v24  ;;  %v19754_v33 = vld [vmem:[#allocation9 + $0x218] sm:$0xff] }
 0xca5   : > { %9272 = vadd.xlane.f32.xlu0 %v9271_v1  ;;  %v10661_v11 = vadd.f32 %v10603_v48, %v10356_v44  ;;  %v8812_v46 = vadd.f32 %v8760_v30, %v19659_v52  ;;  %v9178_v1 = vmul.f32 %v20679_v23, %v9099_v32  ;;  %v9055_v52 = vadd.f32 %v8963_v6, %v8962_v36  ;;  %v9446_v44 = vld [vmem:[#allocation9 + $0x220] sm:$0x3]  ;;  %v9447_v32 = vld [vmem:[#allocation9 + $0x228] sm:$0x3] }
 0xca6   : > { %v19740_v45 = vpop.xlane.xlu0 %9035  ;;  %v9708_v24 = vadd.f32 %v9616_v59, %v9615_v27  ;;  %v9277_v30 = vsel %vm20993_vm15, %v9177_v26, 0.0  ;;  %v20995_v6 = vld [vmem:[#allocation24_spill] sm:$0xff]  ;;  %v9468_v60 = vrot.slane %v9446_v44, 2  ;;  %v9268_v27 = vadd.f32 %v9172_v56, %v9171_v63 }
 0xca7   : > { %v10700_v38 = vadd.f32 %v19161_v47, %v10661_v11  ;;  %8783 = vadd.xlane.f32.xlu1 %v8782_v57  ;;  %v10456_v57 = vsel %vm19247_vm1, %v19526_v28, 0.0  ;;  %v9278_v36 = vsel %vm20994_vm12, %v9178_v1, 0.0  ;;  %v9734_v11 = vadd.f32 %v20995_v6, %v9429_v3  ;;  %v20999_v19 = vld [vmem:[#allocation12_spill] sm:$0xff] }
 0xca8   : > { %v9033_v48 = vpop.xlane.xlu1 %9032  ;;  %v19773_v28 = vrot.slane %v19752_v17, 2  ;;  %v20997_v59 = vrot.slane %v19656_v25, 1  ;;  %v20998_v26 = vrot.slane %v19414_v53, 1  ;;  %v19783_v3 = vrot.slane %v19754_v33, 2 }
 0xca9   : > { %9059 = vadd.xlane.f32.xlu0 %v9058_v20  ;;  %v11463_v55 = vmul.f32 -1.442695, %v10700_v38  ;;  %v19756_v42 = vadd.f32 %v9033_v48, %v8812_v46  ;;  %v10457_v38 = vsel %vm19247_vm1, %v19533_v49, 0.0  ;;  %v9470_v1 = vrot.slane %v9447_v32, 2 }
 0xcaa   : > { %v19758_v15 = vpop.xlane.xlu0 %7791  ;;  %v13186_v12 = vpop.eup %13185  ;;  %v10277_v49 = vsel %vm8063_vm11, %v20998_v26, %v20997_v59  ;;  %v10007_v48 = vadd.f32 %v20999_v19, %v9734_v11  ;;  %v10533_v44 = vmul.f32 %v20624_v61, %v10456_v57  ;;  %v7414_v20 = vand.u32 15, %v7382_v58  ;;  %v7846_v59 = vld [vmem:[#allocation9 + $0x208] sm:$0x1] }
 0xcab   : > { %20991 = vst [vmem:[#allocation22_spill] sm:$0xff] %v19756_v42  ;;  %10922 = vst.msk [vmem:[%s17901_s2 + $0x78] sm:$0xff] %vm10906_vm4, %v13186_v12  ;;  %13187 = vpow2.f32 %v11463_v55  ;;  %9056 = vadd.xlane.f32.xlu1 %v9055_v52  ;;  %v10534_v55 = vmul.f32 %v20625_v51, %v10457_v38  ;;  %v9279_v63 = vadd.f32 %v9278_v36, %v9277_v30  ;;  %v7845_v38 = vld [vmem:[#allocation9 + $0x200] sm:$0x1] }
 0xcac   : > { %v19775_v46 = vpop.xlane.xlu1 %9245  ;;  %v9888_v25 = vmul.f32 %v20595_v4, %v19752_v17  ;;  %v9889_v53 = vmul.f32 %v20652_v50, %v19754_v33  ;;  %v9613_v56 = vmul.f32 %v20690_v9, %v19612_v31  ;;  %v10355_v32 = vadd.f32 %v10277_v49, %v10007_v48 }
 0xcad   : > { %20996 = vst [vmem:[#allocation32_spill] sm:$0xff] %v19775_v46  ;;  %9709 = vadd.xlane.f32.xlu0 %v9708_v24  ;;  %v9614_v12 = vmul.f32 %v20691_v41, %v19618_v22  ;;  %v10097_v57 = vmul.f32 %v20608_v14, %v19752_v17  ;;  %v9469_v58 = vsel %vm8359_vm3, %v19773_v28, %v9468_v60  ;;  %vm19812_vm0 = vcmp.le.s32.totalorder %v7414_v20, 14 }
 0xcae   : > { %v19786_v52 = vpop.xlane.xlu0 %8005  ;;  %v10098_v30 = vmul.f32 %v20700_v16, %v19754_v33  ;;  %v10095_v36 = vmul.f32 %v20608_v14, %v19661_v40  ;;  %v10096_v31 = vmul.f32 %v20700_v16, %v19665_v29  ;;  %v9471_v22 = vsel %vm8359_vm3, %v19783_v3, %v9470_v1 }
 0xcaf   : > { %9269 = vadd.xlane.f32.xlu1 %v9268_v27  ;;  %v10622_v27 = vadd.f32 %v10534_v55, %v10533_v44  ;;  %v9981_v26 = vadd.f32 %v9889_v53, %v9888_v25  ;;  %v9542_v49 = vsel %vm19812_vm0, %v9469_v58, 0.0  ;;  %v9543_v1 = vsel %vm19812_vm0, %v9471_v22, 0.0  ;;  %v19824_v44 = vld [vmem:[#allocation9 + $0x228] sm:$0xff]  ;;  %v8195_v58 = vld [vmem:[#allocation9 + $0x200] sm:$0x3] }
 0xcb0   : > { %v10600_v24 = vpop.xlane.xlu1 %10599  ;;  %v7924_v48 = vmul.f32 %v16144_v2, %v7845_v38  ;;  %v9705_v20 = vadd.f32 %v9614_v12, %v9613_v56  ;;  %v10194_v25 = vadd.f32 %v10098_v30, %v10097_v57  ;;  %v10191_v53 = vadd.f32 %v10096_v31, %v10095_v36 }
 0xcb1   : > { %9280 = vadd.xlane.f32.xlu0 %v9279_v63  ;;  %v10660_v6 = vadd.f32 %v10600_v24, %v10355_v32  ;;  %v19822_v63 = vld [vmem:[#allocation9 + $0x220] sm:$0xff]  ;;  %v7925_v32 = vmul.f32 %v20688_v37, %v7846_v59  ;;  %v9619_v2 = vmul.f32 %v20690_v9, %v9542_v49  ;;  %v21004_v22 = vrot.slane %v19661_v40, 2 }
 0xcb2   : > { %v19810_v11 = vpop.xlane.xlu0 %9685  ;;  %v21005_v56 = vrot.slane %v19665_v29, 2  ;;  %v9620_v57 = vmul.f32 %v20691_v41, %v9543_v1  ;;  %v20425_v30 = vrot.slane %v19822_v63, 2  ;;  %v20426_v36 = vrot.slane %v19824_v44, 2 }
 0xcb3   : > { %21000 = vst [vmem:[#allocation37_spill] sm:$0xff] %v19810_v11  ;;  %v10699_v19 = vadd.f32 %v19161_v47, %v10660_v6  ;;  %10623 = vadd.xlane.f32.xlu1 %v10622_v27  ;;  %v8196_v47 = vld [vmem:[#allocation9 + $0x208] sm:$0x3]  ;;  %v19836_v38 = vsel %vm8359_vm3, %v21004_v22, %v19773_v28  ;;  %v8025_v31 = vsel %vm21006_vm5, %v7924_v48, 0.0  ;;  %v8486_v59 = vrot.slane %v8195_v58, 2 }
 0xcb4   : > { %v19826_v55 = vpop.xlane.xlu1 %9682  ;;  %v19842_v12 = vsel %vm8359_vm3, %v21005_v56, %v19783_v3  ;;  %v20427_v22 = vrot.slane %v19786_v52, 1  ;;  %v9809_v48 = vsel %vm19408_vm10, %v19661_v40, 0.0  ;;  %v21008_v58 = vld [vmem:[#allocation17_spill] sm:$0xff]  ;;  %v21022_v13 = vrot.slane %v19822_v63, 2 }
 0xcb5   : > { %9982 = vadd.xlane.f32.xlu0 %v9981_v26  ;;  %v13188_v24 = vpop.eup %13187  ;;  %v11462_v6 = vmul.f32 -1.442695, %v10699_v19  ;;  %v8488_v26 = vrot.slane %v8196_v47, 2  ;;  %v8026_v19 = vsel %vm21007_vm9, %v7925_v32, 0.0  ;;  %v10540_v1 = vmul.f32 %v20625_v51, %v19842_v12 }
 0xcb6   : > { %v19829_v27 = vpop.xlane.xlu0 %9958  ;;  %v10828_v37 = vadd.f32 1.0, %v13188_v24  ;;  %v10539_v24 = vmul.f32 %v20624_v61, %v19836_v38  ;;  %v9714_v32 = vadd.f32 %v9620_v57, %v9619_v2  ;;  %v10391_v47 = vsel %vm8359_vm3, %v20425_v30, %v21008_v58  ;;  %v21009_v2 = vld [vmem:[#allocation34_spill] sm:$0xff]  ;;  %v21011_v30 = vld [vmem:[#allocation33_spill] sm:$0xff] }
 0xcb7   : > { %21003 = vst [vmem:[#allocation38_spill] sm:$0xff] %v19829_v27  ;;  %13189 = vpow2.f32 %v11462_v6  ;;  %9706 = vadd.xlane.f32.xlu1 %v9705_v20  ;;  %v9810_v20 = vsel %vm19408_vm10, %v19665_v29, 0.0  ;;  %v8487_v34 = vsel %vm8359_vm3, %v19586_v8, %v8486_v59  ;;  %v8489_v29 = vsel %vm8359_vm3, %v19589_v35, %v8488_v26 }
 0xcb8   : > { %13191 = vrcp.f32 %v10828_v37  ;;  %v8003_v49 = vpop.xlane.xlu1 %8002  ;;  %v10393_v37 = vsel %vm8359_vm3, %v20426_v36, %v21008_v58  ;;  %v21010_v57 = vrot.slane %v21009_v2, 1  ;;  %v9887_v36 = vmul.f32 %v20652_v50, %v9810_v20  ;;  %v21014_v20 = vld [vmem:[#allocation25_spill] sm:$0xff]  ;;  %v21015_v2 = vld [vmem:[#allocation20_spill] sm:$0xff] }
 0xcb9   : > { %10195 = vadd.xlane.f32.xlu0 %v10194_v25  ;;  %v8111_v56 = vrot.slane %v8003_v49, 1  ;;  %v9354_v25 = vrot.slane %v21011_v30, 1  ;;  %v8027_v8 = vadd.f32 %v8026_v19, %v8025_v31  ;;  %v10631_v59 = vadd.f32 %v10540_v1, %v10539_v24  ;;  %v21018_v24 = vld [vmem:[#allocation29_spill] sm:$0xff] }
 0xcba   : > { %v19854_v6 = vpop.xlane.xlu0 %10171  ;;  %v10543_v35 = vmul.f32 %v20624_v61, %v10391_v47  ;;  %v21013_v26 = vrot.slane %v19775_v46, 1  ;;  %v10544_v30 = vmul.f32 %v20625_v51, %v10393_v37  ;;  %v10460_v1 = vsel %vm19458_vm13, %v19708_v43, 0.0 }
 0xcbb   : > { %10192 = vadd.xlane.f32.xlu1 %v10191_v53  ;;  %v8114_v40 = vsel %vm8063_vm11, %v8111_v56, %v20427_v22  ;;  %v8112_v49 = vsel %vm8063_vm11, %v21010_v57, %v8111_v56  ;;  %v9886_v53 = vmul.f32 %v20595_v4, %v9809_v48  ;;  %v21012_v22 = vld [vmem:[#allocation28_spill] sm:$0xff]  ;;  %v8617_v48 = vsel %vm19812_vm0, %v8489_v29, 0.0 }
 0xcbc   : > { %v19882_v27 = vpop.xlane.xlu1 %10168  ;;  %v8184_v11 = vadd.f32 %v8112_v49, %v21012_v22  ;;  %v9357_v56 = vsel %vm8063_vm11, %v9354_v25, %v21013_v26  ;;  %v9084_v22 = vadd.f32 %v21015_v2, %v21014_v20  ;;  %v8694_v29 = vmul.f32 %v20670_v21, %v8617_v48 }
 0xcbd   : > { %9715 = vadd.xlane.f32.xlu0 %v9714_v32  ;;  %v8616_v32 = vsel %vm19812_vm0, %v8487_v34, 0.0  ;;  %v9978_v19 = vadd.f32 %v9887_v36, %v9886_v53  ;;  %v10637_v20 = vadd.f32 %v10544_v30, %v10543_v35  ;;  %v10461_v36 = vsel %vm19458_vm13, %v19714_v54, 0.0 }
 0xcbe   : > { %v8769_v42 = vpop.xlane.xlu0 %8768  ;;  %v9432_v37 = vadd.f32 %v9357_v56, %v9084_v22  ;;  %v8693_v34 = vmul.f32 %v20669_v5, %v8616_v32  ;;  %v10282_v5 = vrot.slane %v19854_v6, 1  ;;  %v10537_v35 = vmul.f32 %v20624_v61, %v10460_v1 }
 0xcbf   : > { %8028 = vadd.xlane.f32.xlu1 %v8027_v8  ;;  %v10280_v8 = vrot.slane %v19882_v27, 1  ;;  %v10538_v54 = vmul.f32 %v20625_v51, %v10461_v36  ;;  %v10099_v32 = vmul.f32 %v20608_v14, %v19822_v63  ;;  %v8966_v14 = vmul.f32 %v16478_v39, %v19752_v17 }
 0xcc0   : > { %v7789_v31 = vpop.xlane.xlu1 %7788  ;;  %v9737_v43 = vadd.f32 %v19826_v55, %v9432_v37  ;;  %v8788_v27 = vadd.f32 %v8694_v29, %v8693_v34  ;;  %v21019_v29 = vld [vmem:[#allocation65_spill] sm:$0xff]  ;;  %v21020_v39 = vrot.slane %v19632_v18, 1  ;;  %v9814_v18 = vsel %vm19620_vm2, %v19824_v44, 0.0 }
 0xcc1   : > { %10632 = vadd.xlane.f32.xlu0 %v10631_v59  ;;  %v13190_v47 = vpop.eup %13189  ;;  %v8185_v57 = vadd.f32 %v8114_v40, %v7789_v31  ;;  %v10283_v55 = vsel %vm8063_vm11, %v10280_v8, %v10282_v5  ;;  %v10628_v31 = vadd.f32 %v10538_v54, %v10537_v35  ;;  %v9813_v54 = vsel %vm19620_vm2, %v19822_v63, 0.0 }
 0xcc2   : > { %v10609_v49 = vpop.xlane.xlu0 %10608  ;;  %v13192_v26 = vpop.eup %13191  ;;  %v10827_v46 = vadd.f32 1.0, %v13190_v47  ;;  %v19930_v47 = vld [vmem:[#allocation10] ss:$0 sm:$0xff]  ;;  %v10281_v36 = vsel %vm8063_vm11, %v21020_v39, %v10280_v8  ;;  %v10372_v8 = vld [vmem:[#allocation9 + $0x240] sm:$0x3] }
 0xcc3   : > { %10925 = vst.msk [vmem:[%s17901_s2 + $0x90] sm:$0xff] %vm10906_vm4, %v13192_v26  ;;  %9979 = vadd.xlane.f32.xlu1 %v9978_v19  ;;  %v19910_v40 = vadd.f32 %v8769_v42, %v8185_v57  ;;  %v21017_v42 = vrot.slane %v19560_v7, 1  ;;  %v10100_v19 = vmul.f32 %v20700_v16, %v19824_v44  ;;  %v8967_v16 = vmul.f32 %v20778_v62, %v19754_v33  ;;  %v21021_v62 = vld [vmem:[#allocation35_spill] sm:$0xff] }
 0xcc4   : > { %13193 = vrcp.f32 %v10827_v46  ;;  %v9956_v21 = vpop.xlane.xlu1 %9955 }
 0xcc5   : > { %10638 = vadd.xlane.f32.xlu0 %v10637_v20  ;;  %v10010_v53 = vadd.f32 %v9956_v21, %v9737_v43  ;;  %v9355_v46 = vsel %vm8063_vm11, %v21017_v42, %v9354_v25  ;;  %v9175_v43 = vmul.f32 %v20678_v0, %v19752_v17  ;;  %v9176_v21 = vmul.f32 %v20679_v23, %v19754_v33 }
 0xcc6   : > { %v19913_v59 = vpop.xlane.xlu0 %9254  ;;  %v9431_v1 = vadd.f32 %v9355_v46, %v21018_v24  ;;  %v9061_v35 = vadd.f32 %v8967_v16, %v8966_v14  ;;  %v9890_v23 = vmul.f32 %v20595_v4, %v9813_v54  ;;  %v9891_v46 = vmul.f32 %v20652_v50, %v9814_v18 }
 0xcc7   : > { %v10358_v56 = vadd.f32 %v10283_v55, %v10010_v53  ;;  %8789 = vadd.xlane.f32.xlu1 %v8788_v27  ;;  %v10373_v55 = vld [vmem:[#allocation9 + $0x248] sm:$0x3]  ;;  %v9617_v24 = vmul.f32 %v20690_v9, %v19836_v38  ;;  %v9618_v50 = vmul.f32 %v20691_v41, %v19842_v12 }
 0xcc8   : > { %v8766_v30 = vpop.xlane.xlu1 %8765  ;;  %v9736_v26 = vadd.f32 %v21019_v29, %v9431_v1  ;;  %v9984_v63 = vadd.f32 %v9891_v46, %v9890_v23 }
 0xcc9   : > { %v10663_v48 = vadd.f32 %v10609_v49, %v10358_v56  ;;  %v8814_v2 = vadd.f32 %v8766_v30, %v8184_v11  ;;  %v10197_v49 = vadd.f32 %v10100_v19, %v10099_v32  ;;  %v9274_v56 = vadd.f32 %v9176_v21, %v9175_v43  ;;  %v21025_v21 = vld [vmem:[#allocation30_spill] sm:$0xff] }
 0xcca   : > { %v19925_v22 = vpop.xlane.xlu0 %9041  ;;  %v10009_v53 = vadd.f32 %v21021_v62, %v9736_v26  ;;  %v10394_v30 = vrot.slane %v10372_v8, 2  ;;  %v10396_v32 = vrot.slane %v10373_v55, 2  ;;  %v9711_v38 = vadd.f32 %v9618_v50, %v9617_v24  ;;  %v21026_v55 = vld [vmem:[#allocation36_spill] sm:$0xff] }
 0xccb   : > { %v10702_v7 = vadd.f32 %v19930_v47, %v10663_v48  ;;  %10629 = vadd.xlane.f32.xlu1 %v10628_v31  ;;  %v21023_v31 = vrot.slane %v19824_v44, 2  ;;  %v9358_v62 = vrot.slane %v21025_v21, 1  ;;  %v21027_v24 = vld [vmem:[#allocation32_spill] sm:$0xff] }
 0xccc   : > { %v9039_v25 = vpop.xlane.xlu1 %9038  ;;  %v10357_v0 = vadd.f32 %v10281_v36, %v10009_v53  ;;  %v10397_v44 = vsel %vm8359_vm3, %v21008_v58, %v10396_v32  ;;  %v21024_v36 = vrot.slane %v19786_v52, 1  ;;  %v21028_v50 = vrot.slane %v21027_v24, 1 }
 0xccd   : > { %v11465_v37 = vmul.f32 -1.442695, %v10702_v7  ;;  %v19935_v11 = vadd.f32 %v9039_v25, %v8814_v2  ;;  %v10387_v2 = vsel %vm8359_vm3, %v19773_v28, %v21022_v13  ;;  %v10389_v4 = vsel %vm8359_vm3, %v19783_v3, %v21023_v31 }
 0xcce   : > { %v19937_v57 = vpop.xlane.xlu0 %7797  ;;  %v13194_v34 = vpop.eup %13193  ;;  %v10395_v28 = vsel %vm8359_vm3, %v21008_v58, %v10394_v30  ;;  %v10464_v3 = vsel %vm19676_vm14, %v10387_v2, 0.0  ;;  %v10465_v9 = vsel %vm19676_vm14, %v10389_v4, 0.0 }
 0xccf   : > { %10924 = vst.msk [vmem:[%s17901_s2 + $0x88] sm:$0xff] %vm10906_vm4, %v13194_v34  ;;  %13195 = vpow2.f32 %v11465_v37  ;;  %10198 = vadd.xlane.f32.xlu1 %v10197_v49  ;;  %v10468_v12 = vsel %vm19812_vm0, %v10395_v28, 0.0  ;;  %v10469_v37 = vsel %vm19812_vm0, %v10397_v44, 0.0  ;;  %v10541_v34 = vmul.f32 %v20624_v61, %v10464_v3  ;;  %v21029_v44 = vld [vmem:[#allocation22_spill] sm:$0xff] }
 0xcd0   : > { %v19944_v20 = vpop.xlane.xlu1 %9251  ;;  %v10542_v10 = vmul.f32 %v20625_v51, %v10465_v9  ;;  %v10545_v39 = vmul.f32 %v20624_v61, %v10468_v12  ;;  %v10546_v60 = vmul.f32 %v20625_v51, %v10469_v37  ;;  %v9086_v61 = vadd.f32 %v19740_v45, %v21026_v55 }
 0xcd1   : > { %v9360_v29 = vrot.slane %v19944_v20, 1 }
 0xcd2   : > { %v19954_v27 = vpop.xlane.xlu0 %8011  ;;  %v10634_v18 = vadd.f32 %v10542_v10, %v10541_v34  ;;  %v10640_v51 = vadd.f32 %v10546_v60, %v10545_v39  ;;  %v21031_v39 = vld [vmem:[#allocation38_spill] sm:$0xff] }
 0xcd3   : > { %9062 = vadd.xlane.f32.xlu1 %v9061_v35  ;;  %v8117_v58 = vrot.slane %v19954_v27, 1  ;;  %v9361_v8 = vsel %vm8063_vm11, %v9358_v62, %v9360_v29 }
 0xcd4   : > { %v10606_v17 = vpop.xlane.xlu1 %10605 }
 0xcd5   : > { %v10662_v33 = vadd.f32 %v10606_v17, %v10357_v0  ;;  %v9434_v17 = vadd.f32 %v9361_v8, %v9086_v61 }
 0xcd6   : > { %v19963_v42 = vpop.xlane.xlu0 %9691 }
 0xcd7   : > { %v10701_v48 = vadd.f32 %v19930_v47, %v10662_v33  ;;  %9275 = vadd.xlane.f32.xlu1 %v9274_v56 }
 0xcd8   : > { %v9689_v19 = vpop.xlane.xlu1 %9688 }
 0xcd9   : > { %v13196_v1 = vpop.eup %13195  ;;  %v11464_v7 = vmul.f32 -1.442695, %v10701_v48 }
 0xcda   : > { %v19979_v25 = vpop.xlane.xlu0 %9964  ;;  %v10830_v14 = vadd.f32 1.0, %v13196_v1 }
 0xcdb   : > { %13197 = vpow2.f32 %v11464_v7  ;;  %9985 = vadd.xlane.f32.xlu1 %v9984_v63 }
 0xcdc   : > { %13199 = vrcp.f32 %v10830_v14  ;;  %v8009_v41 = vpop.xlane.xlu1 %8008 }
 0xcdd   : > { %v8115_v49 = vrot.slane %v8009_v41, 1 }
 0xcde   : > { %v19994_v16 = vpop.xlane.xlu0 %10177 }
 0xcdf   : > { %9712 = vadd.xlane.f32.xlu1 %v9711_v38  ;;  %v8118_v26 = vsel %vm8063_vm11, %v8115_v49, %v8117_v58  ;;  %v8116_v43 = vsel %vm8063_vm11, %v21024_v36, %v8115_v49  ;;  %v10286_v48 = vrot.slane %v19994_v16, 1  ;;  %v21030_v49 = vld [vmem:[#allocation37_spill] sm:$0xff] }
 0xce0   : > { %v10175_v53 = vpop.xlane.xlu1 %10174  ;;  %v8186_v35 = vadd.f32 %v8116_v43, %v19758_v15  ;;  %v9739_v15 = vadd.f32 %v9689_v19, %v9434_v17  ;;  %v9359_v19 = vsel %vm8063_vm11, %v21028_v50, %v9358_v62 }
 0xce1   : > { %v10284_v30 = vrot.slane %v10175_v53, 1  ;;  %v9433_v14 = vadd.f32 %v9359_v19, %v21029_v44 }
 0xce2   : > { %v8775_v54 = vpop.xlane.xlu0 %8774 }
 0xce3   : > { %10635 = vadd.xlane.f32.xlu1 %v10634_v18  ;;  %v10287_v31 = vsel %vm8063_vm11, %v10284_v30, %v10286_v48  ;;  %v9738_v34 = vadd.f32 %v21030_v49, %v9433_v14 }
 0xce4   : > { %v7795_v52 = vpop.xlane.xlu1 %7794 }
 0xce5   : > { %v13198_v0 = vpop.eup %13197  ;;  %v8187_v56 = vadd.f32 %v8118_v26, %v7795_v52  ;;  %v10285_v26 = vsel %vm8063_vm11, %v10282_v5, %v10284_v30  ;;  %v10011_v60 = vadd.f32 %v21031_v39, %v9738_v34 }
 0xce6   : > { %v10615_v23 = vpop.xlane.xlu0 %10614  ;;  %v13200_v33 = vpop.eup %13199  ;;  %v10829_v46 = vadd.f32 1.0, %v13198_v0 }
 0xce7   : > { %10927 = vst.msk [vmem:[%s17901_s2 + $0xa0] sm:$0xff] %vm10906_vm4, %v13200_v33  ;;  %10641 = vadd.xlane.f32.xlu1 %v10640_v51  ;;  %v20016_v32 = vadd.f32 %v8775_v54, %v8187_v56  ;;  %v10359_v43 = vadd.f32 %v10285_v26, %v10011_v60 }
 0xce8   : > { %13201 = vrcp.f32 %v10829_v46  ;;  %v9962_v45 = vpop.xlane.xlu1 %9961 }
 0xce9   : > { %v10012_v13 = vadd.f32 %v9962_v45, %v9739_v15  ;;  %v9088_v45 = vadd.f32 %v19925_v22, %v19910_v40 }
 0xcea   : > { %v20019_v2 = vpop.xlane.xlu0 %9260 }
 0xceb   : > { %v10360_v4 = vadd.f32 %v10287_v31, %v10012_v13 }
 0xcec   : > { %v8772_v1 = vpop.xlane.xlu1 %8771 }
 0xced   : > { %v10665_v7 = vadd.f32 %v10615_v23, %v10360_v4  ;;  %v8816_v63 = vadd.f32 %v8772_v1, %v8186_v35  ;;  %v9362_v23 = vrot.slane %v19913_v59, 1 }
 0xcee   : > { %v20027_v28 = vpop.xlane.xlu0 %9047 }
 0xcef   : > { %v10704_v3 = vadd.f32 %v19930_v47, %v10665_v7 }
 0xcf0   : > { %v9045_v9 = vpop.xlane.xlu1 %9044 }
 0xcf1   : > { %v11467_v41 = vmul.f32 -1.442695, %v10704_v3  ;;  %v20031_v38 = vadd.f32 %v9045_v9, %v8816_v63  ;;  %v9363_v63 = vsel %vm8063_vm11, %v9360_v29, %v9362_v23 }
 0xcf2   : > { %v20033_v12 = vpop.xlane.xlu0 %7803  ;;  %v13202_v37 = vpop.eup %13201  ;;  %v9435_v9 = vadd.f32 %v9363_v63, %v19935_v11 }
 0xcf3   : > { %10926 = vst.msk [vmem:[%s17901_s2 + $0x98] sm:$0xff] %vm10906_vm4, %v13202_v37  ;;  %13203 = vpow2.f32 %v11467_v41 }
 0xcf4   : > { %v20038_v10 = vpop.xlane.xlu1 %9257  ;;  %v9740_v39 = vadd.f32 %v19963_v42, %v9435_v9 }
 0xcf5   : > { %v9364_v0 = vrot.slane %v20038_v10, 1 }
 0xcf6   : > { %v20044_v36 = vpop.xlane.xlu0 %8017  ;;  %v10013_v11 = vadd.f32 %v19979_v25, %v9740_v39 }
 0xcf7   : > { %v8121_v5 = vrot.slane %v20044_v36, 1  ;;  %v9365_v15 = vsel %vm8063_vm11, %v9362_v23, %v9364_v0 }
 0xcf8   : > { %v10612_v21 = vpop.xlane.xlu1 %10611  ;;  %v9436_v31 = vadd.f32 %v9365_v15, %v9088_v45 }
 0xcf9   : > { %v10664_v62 = vadd.f32 %v10612_v21, %v10359_v43 }
 0xcfa   : > { %v20046_v53 = vpop.xlane.xlu0 %9697 }
 0xcfb   : > { %v10703_v35 = vadd.f32 %v19930_v47, %v10664_v62 }
 0xcfc   : > { %v9695_v54 = vpop.xlane.xlu1 %9694 }
 0xcfd   : > { %v13204_v18 = vpop.eup %13203  ;;  %v11466_v8 = vmul.f32 -1.442695, %v10703_v35 }
 0xcfe   : > { %v20049_v55 = vpop.xlane.xlu0 %9970  ;;  %v10832_v61 = vadd.f32 1.0, %v13204_v18 }
 0xcff   : > { %13205 = vpow2.f32 %v11466_v8 }
 0xd00   : > { %13207 = vrcp.f32 %v10832_v61  ;;  %v8015_v6 = vpop.xlane.xlu1 %8014 }
 0xd01   : > { %v8119_v51 = vrot.slane %v8015_v6, 1 }
 0xd02   : > { %v20052_v52 = vpop.xlane.xlu0 %10183 }
 0xd03   : > { %v20056_v17 = vsel %vm8063_vm11, %v8119_v51, %v8121_v5  ;;  %v8120_v56 = vsel %vm8063_vm11, %v8117_v58, %v8119_v51  ;;  %v10290_v50 = vrot.slane %v20052_v52, 1 }
 0xd04   : > { %v10181_v33 = vpop.xlane.xlu1 %10180  ;;  %v20063_v46 = vadd.f32 %v8120_v56, %v19937_v57  ;;  %v9741_v57 = vadd.f32 %v9695_v54, %v9436_v31  ;;  %v9366_v56 = vrot.slane %v20019_v2, 1 }
 0xd05   : > { %v10288_v24 = vrot.slane %v10181_v33, 1 }
 0xd06   : > { %v20065_v30 = vpop.xlane.xlu0 %8780 }
 0xd07   : > { %v10291_v40 = vsel %vm8063_vm11, %v10288_v24, %v10290_v50  ;;  %v10289_v29 = vsel %vm8063_vm11, %v10286_v48, %v10288_v24 }
 0xd08   : > { %v20072_v13 = vpop.xlane.xlu1 %7800  ;;  %v10361_v36 = vadd.f32 %v10289_v29, %v10013_v11 }
 0xd09   : > { %v13206_v27 = vpop.eup %13205 }
 0xd0a   : > { %v10621_v58 = vpop.xlane.xlu0 %10620  ;;  %v13208_v4 = vpop.eup %13207  ;;  %v10831_v59 = vadd.f32 1.0, %v13206_v27  ;;  %v9090_v27 = vadd.f32 %v20027_v28, %v20016_v32 }
 0xd0b   : > { %10929 = vst.msk [vmem:[%s17901_s2 + $0xb0] sm:$0xff] %vm10906_vm4, %v13208_v4 }
 0xd0c   : > { %13209 = vrcp.f32 %v10831_v59  ;;  %v9968_v19 = vpop.xlane.xlu1 %9967 }
 0xd0d   : > { %v10014_v1 = vadd.f32 %v9968_v19, %v9741_v57 }
 0xd0e   : > { %v20077_v7 = vpop.xlane.xlu0 %9266 }
 0xd0f   : > { %v10362_v22 = vadd.f32 %v10291_v40, %v10014_v1 }
 0xd10   : > { %v20085_v44 = vpop.xlane.xlu1 %8777 }
 0xd11   : > { %v10667_v14 = vadd.f32 %v10621_v58, %v10362_v22  ;;  %v9367_v22 = vsel %vm8063_vm11, %v9364_v0, %v9366_v56 }
 0xd12   : > { %v20087_v3 = vpop.xlane.xlu0 %9053 }
 0xd13   : > { %v10706_v41 = vadd.f32 %v19930_v47, %v10667_v14 }
 0xd14   : > { %v20091_v37 = vpop.xlane.xlu1 %9050 }
 0xd15   : > { %v11469_v49 = vmul.f32 -1.442695, %v10706_v41  ;;  %v9437_v41 = vadd.f32 %v9367_v22, %v20031_v38 }
 0xd16   : > { %v20093_v34 = vpop.xlane.xlu0 %7809  ;;  %v13210_v26 = vpop.eup %13209 }
 0xd17   : > { %10928 = vst.msk [vmem:[%s17901_s2 + $0xa8] sm:$0xff] %vm10906_vm4, %v13210_v26  ;;  %13211 = vpow2.f32 %v11469_v49  ;;  %v9742_v11 = vadd.f32 %v20046_v53, %v9437_v41 }
 0xd18   : > { %v20098_v20 = vpop.xlane.xlu1 %9263 }
 0xd19   : > { %v9368_v6 = vrot.slane %v20098_v20, 1  ;;  %v10015_v38 = vadd.f32 %v20049_v55, %v9742_v11  ;;  %v9370_v55 = vrot.slane %v20077_v7, 1 }
 0xd1a   : > { %v20104_v60 = vpop.xlane.xlu0 %8023 }
 0xd1b   : > { %v9369_v45 = vsel %vm8063_vm11, %v9366_v56, %v9368_v6  ;;  %v8125_v7 = vrot.slane %v20104_v60, 1 }
 0xd1c   : > { %v10618_v43 = vpop.xlane.xlu1 %10617  ;;  %v9438_v4 = vadd.f32 %v9369_v45, %v9090_v27 }
 0xd1d   : > { %v10666_v21 = vadd.f32 %v10618_v43, %v10361_v36 }
 0xd1e   : > { %v20106_v62 = vpop.xlane.xlu0 %9703 }
 0xd1f   : > { %v10705_v42 = vadd.f32 %v19930_v47, %v10666_v21 }
 0xd20   : > { %v9701_v35 = vpop.xlane.xlu1 %9700 }
 0xd21   : > { %v13212_v54 = vpop.eup %13211  ;;  %v11468_v18 = vmul.f32 -1.442695, %v10705_v42  ;;  %v9743_v2 = vadd.f32 %v9701_v35, %v9438_v4 }
 0xd22   : > { %v20109_v8 = vpop.xlane.xlu0 %9976  ;;  %v10834_v61 = vadd.f32 1.0, %v13212_v54 }
 0xd23   : > { %13213 = vpow2.f32 %v11468_v18 }
 0xd24   : > { %13215 = vrcp.f32 %v10834_v61  ;;  %v20111_v16 = vpop.xlane.xlu1 %8020  ;;  %v8189_v61 = vadd.f32 %v20056_v17, %v20072_v13  ;;  %v9371_v13 = vsel %vm8063_vm11, %v9368_v6, %v9370_v55 }
 0xd25   : > { %v8123_v25 = vrot.slane %v20111_v16, 1 }
 0xd26   : > { %v20114_v48 = vpop.xlane.xlu0 %10189  ;;  %v8819_v45 = vadd.f32 %v20065_v30, %v8189_v61 }
 0xd27   : > { %v8124_v51 = vsel %vm8063_vm11, %v8121_v5, %v8123_v25 }
 0xd28   : > { %v10187_v23 = vpop.xlane.xlu1 %10186  ;;  %v20122_v33 = vadd.f32 %v8124_v51, %v20033_v12  ;;  %v10294_v12 = vrot.slane %v20114_v48, 1  ;;  %v9092_v17 = vadd.f32 %v20087_v3, %v8819_v45 }
 0xd29   : > { %v10292_v57 = vrot.slane %v10187_v23, 1 }
 0xd2a   : > { %v20124_v15 = vpop.xlane.xlu0 %8786 }
 0xd2b   : > { %v10295_v32 = vsel %vm8063_vm11, %v10292_v57, %v10294_v12  ;;  %v10293_v0 = vsel %vm8063_vm11, %v10290_v50, %v10292_v57 }
 0xd2c   : > { %v20129_v31 = vpop.xlane.xlu1 %7806  ;;  %v10363_v43 = vadd.f32 %v10293_v0, %v10015_v38 }
 0xd2d   : > { %v13214_v58 = vpop.eup %13213 }
 0xd2e   : > { %v10627_v59 = vpop.xlane.xlu0 %10626  ;;  %v13216_v24 = vpop.eup %13215  ;;  %v10833_v5 = vadd.f32 1.0, %v13214_v58  ;;  %v8818_v58 = vadd.f32 %v20085_v44, %v20063_v46 }
 0xd2f   : > { %10931 = vst.msk [vmem:[%s17901_s2 + $0xc0] sm:$0xff] %vm10906_vm4, %v13216_v24 }
 0xd30   : > { %13217 = vrcp.f32 %v10833_v5  ;;  %v9974_v19 = vpop.xlane.xlu1 %9973 }
 0xd31   : > { %v10016_v1 = vadd.f32 %v9974_v19, %v9743_v2 }
 0xd32   : > { %v20134_v40 = vpop.xlane.xlu0 %9272 }
 0xd33   : > { %v10364_v28 = vadd.f32 %v10295_v32, %v10016_v1  ;;  %v9374_v48 = vrot.slane %v20134_v40, 1 }
 0xd34   : > { %v20142_v63 = vpop.xlane.xlu1 %8783 }
 0xd35   : > { %v10669_v14 = vadd.f32 %v10627_v59, %v10364_v28  ;;  %v9091_v59 = vadd.f32 %v20091_v37, %v8818_v58 }
 0xd36   : > { %v20144_v9 = vpop.xlane.xlu0 %9059 }
 0xd37   : > { %v10708_v49 = vadd.f32 %v19930_v47, %v10669_v14  ;;  %v9439_v30 = vadd.f32 %v9371_v13, %v9091_v59 }
 0xd38   : > { %v20148_v26 = vpop.xlane.xlu1 %9056 }
 0xd39   : > { %v11471_v39 = vmul.f32 -1.442695, %v10708_v49  ;;  %v9744_v22 = vadd.f32 %v20106_v62, %v9439_v30 }
 0xd3a   : > { %v20150_v20 = vpop.xlane.xlu0 %9709  ;;  %v13218_v29 = vpop.eup %13217 }
 0xd3b   : > { %10930 = vst.msk [vmem:[%s17901_s2 + $0xb8] sm:$0xff] %vm10906_vm4, %v13218_v29  ;;  %13219 = vpow2.f32 %v11471_v39 }
 0xd3c   : > { %v20155_v10 = vpop.xlane.xlu1 %9269 }
 0xd3d   : > { %v9372_v50 = vrot.slane %v20155_v10, 1 }
 0xd3e   : > { %v20161_v36 = vpop.xlane.xlu0 %9280 }
 0xd3f   : > { %v9373_v27 = vsel %vm8063_vm11, %v9370_v55, %v9372_v50 }
 0xd40   : > { %v10624_v21 = vpop.xlane.xlu1 %10623  ;;  %v9440_v24 = vadd.f32 %v9373_v27, %v9092_v17 }
 0xd41   : > { %v10668_v42 = vadd.f32 %v10624_v21, %v10363_v43 }
 0xd42   : > { %v20163_v35 = vpop.xlane.xlu0 %9982 }
 0xd43   : > { %v10707_v53 = vadd.f32 %v19930_v47, %v10668_v42 }
 0xd44   : > { %v9707_v54 = vpop.xlane.xlu1 %9706 }
 0xd45   : > { %v13220_v18 = vpop.eup %13219  ;;  %v11470_v51 = vmul.f32 -1.442695, %v10707_v53  ;;  %v9745_v19 = vadd.f32 %v9707_v54, %v9440_v24  ;;  %v8126_v54 = vsel %vm8063_vm11, %v8123_v25, %v8125_v7 }
 0xd46   : > { %v10836_v52 = vadd.f32 1.0, %v13220_v18  ;;  %v20170_v56 = vpop.xlane.xlu0 %10195  ;;  %v9375_v18 = vsel %vm8063_vm11, %v9372_v50, %v9374_v48  ;;  %v8191_v61 = vadd.f32 %v8126_v54, %v20129_v31 }
 0xd47   : > { %13221 = vpow2.f32 %v11470_v51  ;;  %v10298_v46 = vrot.slane %v20170_v56, 1 }
 0xd48   : > { %13223 = vrcp.f32 %v10836_v52  ;;  %v10193_v23 = vpop.xlane.xlu1 %10192 }
 0xd49   : > { %v10296_v57 = vrot.slane %v10193_v23, 1  ;;  %v9378_v23 = vrot.slane %v20161_v36, 1 }
 0xd4a   : > { %v9716_v2 = vpop.xlane.xlu0 %9715 }
 0xd4b   : > { %v10299_v60 = vsel %vm8063_vm11, %v10296_v57, %v10298_v46  ;;  %v10297_v39 = vsel %vm8063_vm11, %v10294_v12, %v10296_v57  ;;  %v21032_v57 = vld [vmem:[#allocation73_spill] sm:$0xff] }
 0xd4c   : > { %v8029_v4 = vpop.xlane.xlu1 %8028  ;;  %v10304_v30 = vrot.slane %v21032_v57, 1 }
 0xd4d   : > { %v8127_v5 = vrot.slane %v8029_v4, 1 }
 0xd4e   : > { %v10633_v41 = vpop.xlane.xlu0 %10632 }
 0xd4f   : > { %v8128_v1 = vsel %vm8063_vm11, %v8125_v7, %v8127_v5 }
 0xd50   : > { %v9980_v44 = vpop.xlane.xlu1 %9979  ;;  %v8192_v3 = vadd.f32 %v8128_v1, %v20093_v34  ;;  %v10017_v34 = vadd.f32 %v20109_v8, %v9744_v22  ;;  %v8820_v8 = vadd.f32 %v20142_v63, %v20122_v33  ;;  %v8821_v33 = vadd.f32 %v20124_v15, %v8191_v61 }
 0xd51   : > { %v13222_v6 = vpop.eup %13221  ;;  %v10018_v32 = vadd.f32 %v9980_v44, %v9745_v19  ;;  %v21033_v19 = vld [vmem:[#allocation27_spill] sm:$0xff] }
 0xd52   : > { %v13224_v28 = vpop.eup %13223  ;;  %v10835_v37 = vadd.f32 1.0, %v13222_v6  ;;  %v10365_v10 = vadd.f32 %v10297_v39, %v10017_v34  ;;  %v9093_v51 = vadd.f32 %v20148_v26, %v8820_v8  ;;  %v9094_v17 = vadd.f32 %v20144_v9, %v8821_v33  ;;  %v21034_v9 = vld [vmem:[#allocation26_spill] sm:$0xff] }
 0xd53   : > { %10933 = vst.msk [vmem:[%s17901_s2 + $0xd0] sm:$0xff] %vm10906_vm4, %v13224_v28  ;;  %v10366_v14 = vadd.f32 %v10299_v60, %v10018_v32  ;;  %v10302_v1 = vrot.slane %v21033_v19, 1  ;;  %v10639_v60 = vpop.xlane.xlu0 %10638 }
 0xd54   : > { %13225 = vrcp.f32 %v10835_v37  ;;  %v8790_v49 = vpop.xlane.xlu1 %8789  ;;  %v9441_v40 = vadd.f32 %v9375_v18, %v9093_v51 }
 0xd55   : > { %v10671_v29 = vadd.f32 %v10633_v41, %v10366_v14  ;;  %v8822_v52 = vadd.f32 %v8790_v49, %v8192_v3 }
 0xd56   : > { %v9746_v13 = vadd.f32 %v20150_v20, %v9441_v40 }
 0xd57   : > { %v10710_v11 = vadd.f32 %v19930_v47, %v10671_v29 }
 0xd58   : > { %v10630_v0 = vpop.xlane.xlu1 %10629  ;;  %v10019_v24 = vadd.f32 %v20163_v35, %v9746_v13 }
 0xd59   : > { %v11473_v38 = vmul.f32 -1.442695, %v10710_v11  ;;  %v10670_v62 = vadd.f32 %v10630_v0, %v10365_v10 }
 0xd5b   : > { %13227 = vpow2.f32 %v11473_v38  ;;  %v10709_v43 = vadd.f32 %v19930_v47, %v10670_v62 }
 0xd5c   : > { %v10199_v21 = vpop.xlane.xlu1 %10198 }
 0xd5d   : > { %v11472_v42 = vmul.f32 -1.442695, %v10709_v43  ;;  %v10300_v25 = vrot.slane %v10199_v21, 1 }
 0xd5e   : > { %v13226_v53 = vpop.eup %13225 }
 0xd5f   : > { %10932 = vst.msk [vmem:[%s17901_s2 + $0xc8] sm:$0xff] %vm10906_vm4, %v13226_v53  ;;  %13229 = vpow2.f32 %v11472_v42  ;;  %v10301_v15 = vsel %vm8063_vm11, %v10298_v46, %v10300_v25  ;;  %v10303_v20 = vsel %vm8063_vm11, %v10300_v25, %v10302_v1  ;;  %v10305_v46 = vsel %vm8063_vm11, %v10302_v1, %v10304_v30 }
 0xd60   : > { %v9063_v12 = vpop.xlane.xlu1 %9062  ;;  %v10367_v3 = vadd.f32 %v10301_v15, %v10019_v24 }
 0xd61   : > { %v9095_v58 = vadd.f32 %v9063_v12, %v8822_v52 }
 0xd64   : > { %v9276_v55 = vpop.xlane.xlu1 %9275 }
 0xd65   : > { %v13228_v56 = vpop.eup %13227  ;;  %v9376_v45 = vrot.slane %v9276_v55, 1 }
 0xd66   : > { %v10838_v27 = vadd.f32 1.0, %v13228_v56 }
 0xd67   : > { %v9379_v16 = vsel %vm8063_vm11, %v9376_v45, %v9378_v23  ;;  %v9377_v31 = vsel %vm8063_vm11, %v9374_v48, %v9376_v45 }
 0xd68   : > { %13231 = vrcp.f32 %v10838_v27  ;;  %v9443_v63 = vadd.f32 %v9379_v16, %v9095_v58  ;;  %v9986_v50 = vpop.xlane.xlu1 %9985  ;;  %v9442_v4 = vadd.f32 %v9377_v31, %v9094_v17 }
 0xd69   : > { %v13230_v26 = vpop.eup %13229 }
 0xd6a   : > { %v10837_v36 = vadd.f32 1.0, %v13230_v26  ;;  %v9748_v59 = vadd.f32 %v9716_v2, %v9443_v63 }
 0xd6c   : > { %13233 = vrcp.f32 %v10837_v36  ;;  %v9713_v7 = vpop.xlane.xlu1 %9712  ;;  %v10021_v6 = vadd.f32 %v21034_v9, %v9748_v59 }
 0xd6d   : > { %v9747_v5 = vadd.f32 %v9713_v7, %v9442_v4 }
 0xd6e   : > { %v10369_v14 = vadd.f32 %v10305_v46, %v10021_v6 }
 0xd6f   : > { %v10020_v44 = vadd.f32 %v9986_v50, %v9747_v5 }
 0xd70   : > { %v10636_v2 = vpop.xlane.xlu1 %10635 }
 0xd71   : > { %v10368_v32 = vadd.f32 %v10303_v20, %v10020_v44  ;;  %v10672_v28 = vadd.f32 %v10636_v2, %v10367_v3 }
 0xd72   : > { %v13232_v37 = vpop.eup %13231 }
 0xd73   : > { %10935 = vst.msk [vmem:[%s17901_s2 + $0xe0] sm:$0xff] %vm10906_vm4, %v13232_v37  ;;  %v10673_v35 = vadd.f32 %v10639_v60, %v10368_v32  ;;  %v10711_v22 = vadd.f32 %v19930_v47, %v10672_v28 }
 0xd74   : > { %v10642_v41 = vpop.xlane.xlu1 %10641 }
 0xd75   : > { %v10712_v49 = vadd.f32 %v19930_v47, %v10673_v35  ;;  %v11474_v39 = vmul.f32 -1.442695, %v10711_v22  ;;  %v10674_v34 = vadd.f32 %v10642_v41, %v10369_v14 }
 0xd76   : > { %v13234_v29 = vpop.eup %13233 }
 0xd77   : > { %10934 = vst.msk [vmem:[%s17901_s2 + $0xd8] sm:$0xff] %vm10906_vm4, %v13234_v29  ;;  %v11475_v11 = vmul.f32 -1.442695, %v10712_v49  ;;  %13235 = vpow2.f32 %v11474_v39  ;;  %v10713_v10 = vadd.f32 %v19930_v47, %v10674_v34 }
 0xd79   : > { %13237 = vpow2.f32 %v11475_v11  ;;  %v11476_v0 = vmul.f32 -1.442695, %v10713_v10 }
 0xd7b   : > { %13239 = vpow2.f32 %v11476_v0 }
 0xd81   : > { %v13236_v38 = vpop.eup %13235 }
 0xd82   : > { %v10839_v62 = vadd.f32 1.0, %v13236_v38 }
 0xd83   : > { %v13238_v43 = vpop.eup %13237 }
 0xd84   : > { %v10840_v21 = vadd.f32 1.0, %v13238_v43  ;;  %13241 = vrcp.f32 %v10839_v62 }
 0xd85   : > { %v13240_v42 = vpop.eup %13239 }
 0xd86   : > { %13243 = vrcp.f32 %v10840_v21  ;;  %v10841_v53 = vadd.f32 1.0, %v13240_v42 }
 0xd88   : > { %13245 = vrcp.f32 %v10841_v53 }
 0xd8e   : > { %v13242_v48 = vpop.eup %13241 }
 0xd8f   : > { %10936 = vst.msk [vmem:[%s17901_s2 + $0xe8] sm:$0xff] %vm10906_vm4, %v13242_v48 }
 0xd90   : > { %v13244_v12 = vpop.eup %13243 }
 0xd91   : > { %10937 = vst.msk [vmem:[%s17901_s2 + $0xf0] sm:$0xff] %vm10906_vm4, %v13244_v12 }
 0xd92   : > { %v13246_v47 = vpop.eup %13245 }
 0xd93   : > { %10938 = vst.msk [vmem:[%s17901_s2 + $0xf8] sm:$0xff] %vm10906_vm4, %v13246_v47 }
 0xd94 PF: > { %s36_s27 = sadd.s32 1, %s13264_s27  }
 0xd95   : > { %p33_p4 = scmp.ge.s32.totalorder %s36_s27, 4  }
 0xd97   :  { %35 = sbr.rel (!%p33_p4) target bundleno = 11 (0xb), region = 210 }

</bundles_post_ra>
